<compile_context>
chip_gen: v7x
topology: tpu7x:2x2x1
jax: 0.10.0
libtpu: 0.0.40
codegen_flags: <defaults>
</compile_context>

<pallas_src>
import jax
import jax.numpy as jnp
from jax.experimental import pallas as pl
from jax.experimental.pallas import tpu as pltpu


# --------------------------------------------------------------- kernel 1
def _conv_stack_kernel(p1_ref, w1_ref, b1_ref, w2_ref, b2_ref, w3_ref, b3_ref,
                       o_ref, pad2_ref, pad3_ref):
    f32 = jnp.float32

    # ---- conv1 (Cin=1, 9 taps) on the VPU: out1[r, co] = sum_t p1[r, t]*w1[t, co]
    x1 = p1_ref[0].astype(f32)                       # (224, 9)   row = y*16 + x
    w1 = w1_ref[...].astype(f32)                     # (9, 16)
    acc1 = jnp.zeros((224, 16), f32)
    for t in range(9):
        acc1 = acc1 + x1[:, t:t + 1] * w1[t:t + 1, :]
    a1 = jnp.maximum(acc1 + b1_ref[...], 0.0)        # (224, 16)

    # rows with x in {14, 15} are junk; zero them so they become the padded
    # border when shifted by +17 into the 16x16 padded grid.
    rows16 = jax.lax.broadcasted_iota(jnp.int32, (224, 16), 0)
    a1 = jnp.where((rows16 % 16) < 14, a1, 0.0)
    pad2_ref[...] = jnp.zeros((272, 16), f32)        # zero borders + over-read slack
    pad2_ref[pl.ds(17, 224), :] = a1                 # (y+1)*16 + (x+1) = row + 17

    # ---- conv2 (stride 1): accumulate 9 tap matmuls on the MXU (bf16 x bf16 -> f32)
    acc2 = jnp.zeros((224, 32), f32)
    for t in range(9):
        i, j = divmod(t, 3)
        sl = pad2_ref[pl.ds(i * 16 + j, 224), :].astype(jnp.bfloat16)   # (224, 16)
        wt = w2_ref[pl.ds(t * 16, 16), :]                               # (16, 32)
        acc2 = acc2 + jnp.dot(sl, wt, preferred_element_type=f32)
    a2 = jnp.maximum(acc2 + b2_ref[...], 0.0)        # (224, 32)
    rows32 = jax.lax.broadcasted_iota(jnp.int32, (224, 32), 0)
    a2 = jnp.where((rows32 % 16) < 14, a2, 0.0)
    pad3_ref[...] = jnp.zeros((272, 32), f32)
    pad3_ref[pl.ds(17, 224), :] = a2

    # ---- conv3 evaluated at stride 1 over the padded grid; downsampled below.
    acc3 = jnp.zeros((224, 64), f32)
    for t in range(9):
        i, j = divmod(t, 3)
        sl = pad3_ref[pl.ds(i * 16 + j, 224), :].astype(jnp.bfloat16)   # (224, 32)
        wt = w3_ref[pl.ds(t * 32, 32), :]                               # (32, 64)
        acc3 = acc3 + jnp.dot(sl, wt, preferred_element_type=f32)
    a3 = jnp.maximum(acc3 + b3_ref[...], 0.0)        # (224, 64), row = y1*16 + x1

    # stride-2 downsample + compaction: output row y*7 + x <- stride-1 row 32y + 2x
    for y in range(7):
        for x in range(7):
            dst = y * 7 + x
            src = 32 * y + 2 * x
            o_ref[0, dst:dst + 1, :] = a3[src:src + 1, :]


def _conv_stack_call(patches1, prm):
    B = patches1.shape[0]
    flops = B * 2 * (224 * 9 * 16 + 224 * 144 * 32 + 224 * 288 * 64)
    bytes_acc = (patches1.size * 2
                 + (9 * 16 + 144 * 32 + 288 * 64) * 2
                 + (16 + 32 + 64) * 4
                 + B * 49 * 64 * 4)
    return pl.pallas_call(
        _conv_stack_kernel,
        out_shape=jax.ShapeDtypeStruct((B, 49, 64), jnp.float32),
        grid=(B,),
        in_specs=[
            pl.BlockSpec((1, 224, 9), lambda b: (b, 0, 0)),   # conv1 im2col patches
            pl.BlockSpec((9, 16), lambda b: (0, 0)),          # W1 (resident)
            pl.BlockSpec((1, 16), lambda b: (0, 0)),          # b1
            pl.BlockSpec((144, 32), lambda b: (0, 0)),        # W2 (resident)
            pl.BlockSpec((1, 32), lambda b: (0, 0)),          # b2
            pl.BlockSpec((288, 64), lambda b: (0, 0)),        # W3 (resident)
            pl.BlockSpec((1, 64), lambda b: (0, 0)),          # b3
        ],
        out_specs=pl.BlockSpec((1, 49, 64), lambda b: (b, 0, 0)),
        scratch_shapes=[pltpu.VMEM((272, 16), jnp.float32),   # padded conv1 output
                        pltpu.VMEM((272, 32), jnp.float32)],  # padded conv2 output
        compiler_params=pltpu.CompilerParams(
            dimension_semantics=("parallel",)),
        cost_estimate=pl.CostEstimate(flops=flops, transcendentals=0,
                                      bytes_accessed=bytes_acc),
    )(patches1, prm["W1"], prm["b1"], prm["W2"], prm["b2"],
      prm["W3"], prm["b3"])


# --------------------------------------------------------------- kernel 2
def _fc_kernel(x_ref, wf1_ref, bf1_ref, wf2_ref, bf2_ref, o_ref):
    x = x_ref[...].astype(jnp.bfloat16)                              # (B, 3136)
    h = jnp.dot(x, wf1_ref[...], preferred_element_type=jnp.float32)
    h = jnp.maximum(h + bf1_ref[...], 0.0).astype(jnp.bfloat16)      # (B, 512)
    o = jnp.dot(h, wf2_ref[...], preferred_element_type=jnp.float32)
    o_ref[...] = (o + bf2_ref[...]).astype(o_ref.dtype)              # (B, 10)


def _fc_call(feats, prm):
    B = feats.shape[0]
    vmem = pl.BlockSpec(memory_space=pltpu.MemorySpace.VMEM)
    flops = 2 * B * (3136 * 512 + 512 * 10)
    bytes_acc = (B * 3136 * 4 + 3136 * 512 * 2 + 512 * 10 * 2
                 + (512 + 10) * 4 + B * 10 * 4)
    return pl.pallas_call(
        _fc_kernel,
        out_shape=jax.ShapeDtypeStruct((B, 10), jnp.float32),
        in_specs=[vmem, vmem, vmem, vmem, vmem],
        out_specs=vmem,
        cost_estimate=pl.CostEstimate(flops=flops, transcendentals=0,
                                      bytes_accessed=bytes_acc),
    )(feats, prm["Wf1"], prm["bf1"], prm["Wf2"], prm["bf2"])


# ------------------------------------------------------------ host-side glue
def _conv1_patches(x_nchw):
    """conv1 im2col in the row-padded layout: (B, 224, 9), row = y*16 + x."""
    B = x_nchw.shape[0]
    xp = jnp.pad(x_nchw[:, 0], ((0, 0), (1, 1), (1, 1)))       # (B, 30, 30)
    taps = []
    for i in range(3):
        for j in range(3):
            taps.append(xp[:, i:i + 28:2, j:j + 28:2])          # (B, 14, 14) stride 2
    p = jnp.stack(taps, axis=-1)                                # (B, 14, 14, 9)
    p = jnp.pad(p, ((0, 0), (0, 0), (0, 2), (0, 0)))            # (B, 14, 16, 9)
    return p.reshape(B, 224, 9).astype(jnp.bfloat16)


def prepare_params(p):
    """One-time (offline) weight repacking: tap-major conv weights, fc1 row
    permutation to the kernel's (y, x, c) flatten order, bf16 storage."""
    def conv_w(w):  # OIHW -> ((i*3+j)*Cin + c, Cout)
        return jnp.transpose(w, (2, 3, 1, 0)).reshape(-1, w.shape[0]).astype(jnp.bfloat16)
    wf1 = (p["wf1"].reshape(64, 7, 7, 512)        # torch flatten index = c*49 + y*7 + x
           .transpose(1, 2, 0, 3)                 # -> (y, x, c, out)
           .reshape(3136, 512).astype(jnp.bfloat16))
    return {
        "W1": conv_w(p["w1"]), "b1": p["b1"].reshape(1, -1).astype(jnp.float32),
        "W2": conv_w(p["w2"]), "b2": p["b2"].reshape(1, -1).astype(jnp.float32),
        "W3": conv_w(p["w3"]), "b3": p["b3"].reshape(1, -1).astype(jnp.float32),
        "Wf1": wf1, "bf1": p["bf1"].reshape(1, -1).astype(jnp.float32),
        "Wf2": p["wf2"].astype(jnp.bfloat16),
        "bf2": p["bf2"].reshape(1, -1).astype(jnp.float32),
    }


def forward_pallas(x_nchw, prm):
    B = x_nchw.shape[0]
    patches1 = _conv1_patches(x_nchw)            # (B, 224, 9) bf16
    conv_out = _conv_stack_call(patches1, prm)   # (B, 49, 64) f32
    feats = conv_out.reshape(B, 49 * 64)         # flatten matches permuted Wf1
    return _fc_call(feats, prm)                  # (B, 10) f32


# ---------------------------------------------------------- pure-JAX reference
def forward_ref(x_nchw, p):
    def conv(x, w, b, s):
        y = jax.lax.conv_general_dilated(
            x, w, (s, s), ((1, 1), (1, 1)),
            dimension_numbers=("NCHW", "OIHW", "NCHW"))
        return jax.nn.relu(y + b[None, :, None, None])

    x = conv(x_nchw, p["w1"], p["b1"], 2)
    x = conv(x, p["w2"], p["b2"], 1)
    x = conv(x, p["w3"], p["b3"], 2)
    x = x.reshape(x.shape[0], -1)
    x = jax.nn.relu(x @ p["wf1"] + p["bf1"])
    return x @ p["wf2"] + p["bf2"]


def init_params(key):
    ks = jax.random.split(key, 5)
    f32 = jnp.float32
    return {
        "w1": 0.1 * jax.random.normal(ks[0], (16, 1, 3, 3), f32),
        "b1": jnp.linspace(-0.1, 0.1, 16, dtype=f32),
        "w2": 0.05 * jax.random.normal(ks[1], (32, 16, 3, 3), f32),
        "b2": jnp.linspace(-0.1, 0.1, 32, dtype=f32),
        "w3": 0.05 * jax.random.normal(ks[2], (64, 32, 3, 3), f32),
        "b3": jnp.linspace(-0.1, 0.1, 64, dtype=f32),
        "wf1": 0.02 * jax.random.normal(ks[3], (7 * 7 * 64, 512), f32),
        "bf1": jnp.linspace(-0.05, 0.05, 512, dtype=f32),
        "wf2": 0.05 * jax.random.normal(ks[4], (512, 10), f32),
        "bf2": jnp.linspace(-0.05, 0.05, 10, dtype=f32),
    }


if __name__ == "__main__":
    key = jax.random.PRNGKey(0)
    k_x, k_p = jax.random.split(key)
    params = init_params(k_p)
    prep = prepare_params(params)
    # MNIST-shaped input (the 7*7*64 linear_size requires 28x28 spatial)
    x = jax.random.normal(k_x, (2, 1, 28, 28), jnp.float32)

    fwd = jax.jit(forward_pallas)
    out = jax.block_until_ready(fwd(x, prep))
    assert out.shape == (2, 10), out.shape

    ref = jax.block_until_ready(forward_ref(x, params))
    max_err = float(jnp.max(jnp.abs(out - ref)))
    # bf16 matmul operands with f32 accumulation -> loosened tolerance.
    assert jnp.allclose(out, ref, atol=2e-2, rtol=2e-2), max_err

    print("KERNEL_OK")
</pallas_src>

<mosaic_0001>
module attributes {stable_mosaic.version = 11 : i64} {
  func.func @_conv_stack_kernel(%arg0: i32, %arg1: memref<1x224x9xbf16, #tpu.memory_space<vmem>>, %arg2: memref<9x16xbf16, #tpu.memory_space<vmem>>, %arg3: memref<1x16xf32, #tpu.memory_space<vmem>>, %arg4: memref<144x32xbf16, #tpu.memory_space<vmem>>, %arg5: memref<1x32xf32, #tpu.memory_space<vmem>>, %arg6: memref<288x64xbf16, #tpu.memory_space<vmem>>, %arg7: memref<1x64xf32, #tpu.memory_space<vmem>>, %arg8: memref<1x49x64xf32, #tpu.memory_space<vmem>>, %arg9: memref<272x16xf32, #tpu.memory_space<vmem>>, %arg10: memref<272x32xf32, #tpu.memory_space<vmem>>) attributes {dimension_semantics = [#tpu.dimension_semantics<parallel>], iteration_bounds = array<i64: 2>, scalar_prefetch = 0 : i64, scratch_operands = 2 : i64, tpu.core_type = #tpu.core_type<tc>, window_params = [{transform_indices = @transform_0, window_bounds = array<i64: 1, 224, 9>}, {pipeline_mode = #tpu.pipeline_mode<synchronous>, transform_indices = @transform_1, window_bounds = array<i64: 9, 16>}, {pipeline_mode = #tpu.pipeline_mode<synchronous>, transform_indices = @transform_2, window_bounds = array<i64: 1, 16>}, {pipeline_mode = #tpu.pipeline_mode<synchronous>, transform_indices = @transform_3, window_bounds = array<i64: 144, 32>}, {pipeline_mode = #tpu.pipeline_mode<synchronous>, transform_indices = @transform_4, window_bounds = array<i64: 1, 32>}, {pipeline_mode = #tpu.pipeline_mode<synchronous>, transform_indices = @transform_5, window_bounds = array<i64: 288, 64>}, {pipeline_mode = #tpu.pipeline_mode<synchronous>, transform_indices = @transform_6, window_bounds = array<i64: 1, 64>}, {transform_indices = @transform_7, window_bounds = array<i64: 1, 49, 64>}]} {
    %c0 = arith.constant 0 : index
    %c0_0 = arith.constant 0 : index
    %c0_1 = arith.constant 0 : index
    %0 = vector.load %arg1[%c0, %c0_0, %c0_1] : memref<1x224x9xbf16, #tpu.memory_space<vmem>>, vector<1x224x9xbf16>
    %1 = vector.shape_cast %0 : vector<1x224x9xbf16> to vector<224x9xbf16>
    %2 = arith.extf %1 : vector<224x9xbf16> to vector<224x9xf32>
    %c0_2 = arith.constant 0 : index
    %c0_3 = arith.constant 0 : index
    %3 = vector.load %arg2[%c0_2, %c0_3] : memref<9x16xbf16, #tpu.memory_space<vmem>>, vector<9x16xbf16>
    %4 = arith.extf %3 : vector<9x16xbf16> to vector<9x16xf32>
    %cst = arith.constant 0.000000e+00 : f32
    %5 = vector.broadcast %cst : f32 to vector<224x16xf32>
    %6 = vector.extract_strided_slice %2 {offsets = [0, 0], sizes = [224, 1], strides = [1, 1]} : vector<224x9xf32> to vector<224x1xf32>
    %7 = vector.extract_strided_slice %4 {offsets = [0, 0], sizes = [1, 16], strides = [1, 1]} : vector<9x16xf32> to vector<1x16xf32>
    %8 = vector.broadcast %6 : vector<224x1xf32> to vector<224x16xf32>
    %9 = vector.broadcast %7 : vector<1x16xf32> to vector<224x16xf32>
    %10 = arith.mulf %8, %9 : vector<224x16xf32>
    %11 = arith.addf %5, %10 : vector<224x16xf32>
    %12 = vector.extract_strided_slice %2 {offsets = [0, 1], sizes = [224, 1], strides = [1, 1]} : vector<224x9xf32> to vector<224x1xf32>
    %13 = vector.extract_strided_slice %4 {offsets = [1, 0], sizes = [1, 16], strides = [1, 1]} : vector<9x16xf32> to vector<1x16xf32>
    %14 = vector.broadcast %12 : vector<224x1xf32> to vector<224x16xf32>
    %15 = vector.broadcast %13 : vector<1x16xf32> to vector<224x16xf32>
    %16 = arith.mulf %14, %15 : vector<224x16xf32>
    %17 = arith.addf %11, %16 : vector<224x16xf32>
    %18 = vector.extract_strided_slice %2 {offsets = [0, 2], sizes = [224, 1], strides = [1, 1]} : vector<224x9xf32> to vector<224x1xf32>
    %19 = vector.extract_strided_slice %4 {offsets = [2, 0], sizes = [1, 16], strides = [1, 1]} : vector<9x16xf32> to vector<1x16xf32>
    %20 = vector.broadcast %18 : vector<224x1xf32> to vector<224x16xf32>
    %21 = vector.broadcast %19 : vector<1x16xf32> to vector<224x16xf32>
    %22 = arith.mulf %20, %21 : vector<224x16xf32>
    %23 = arith.addf %17, %22 : vector<224x16xf32>
    %24 = vector.extract_strided_slice %2 {offsets = [0, 3], sizes = [224, 1], strides = [1, 1]} : vector<224x9xf32> to vector<224x1xf32>
    %25 = vector.extract_strided_slice %4 {offsets = [3, 0], sizes = [1, 16], strides = [1, 1]} : vector<9x16xf32> to vector<1x16xf32>
    %26 = vector.broadcast %24 : vector<224x1xf32> to vector<224x16xf32>
    %27 = vector.broadcast %25 : vector<1x16xf32> to vector<224x16xf32>
    %28 = arith.mulf %26, %27 : vector<224x16xf32>
    %29 = arith.addf %23, %28 : vector<224x16xf32>
    %30 = vector.extract_strided_slice %2 {offsets = [0, 4], sizes = [224, 1], strides = [1, 1]} : vector<224x9xf32> to vector<224x1xf32>
    %31 = vector.extract_strided_slice %4 {offsets = [4, 0], sizes = [1, 16], strides = [1, 1]} : vector<9x16xf32> to vector<1x16xf32>
    %32 = vector.broadcast %30 : vector<224x1xf32> to vector<224x16xf32>
    %33 = vector.broadcast %31 : vector<1x16xf32> to vector<224x16xf32>
    %34 = arith.mulf %32, %33 : vector<224x16xf32>
    %35 = arith.addf %29, %34 : vector<224x16xf32>
    %36 = vector.extract_strided_slice %2 {offsets = [0, 5], sizes = [224, 1], strides = [1, 1]} : vector<224x9xf32> to vector<224x1xf32>
    %37 = vector.extract_strided_slice %4 {offsets = [5, 0], sizes = [1, 16], strides = [1, 1]} : vector<9x16xf32> to vector<1x16xf32>
    %38 = vector.broadcast %36 : vector<224x1xf32> to vector<224x16xf32>
    %39 = vector.broadcast %37 : vector<1x16xf32> to vector<224x16xf32>
    %40 = arith.mulf %38, %39 : vector<224x16xf32>
    %41 = arith.addf %35, %40 : vector<224x16xf32>
    %42 = vector.extract_strided_slice %2 {offsets = [0, 6], sizes = [224, 1], strides = [1, 1]} : vector<224x9xf32> to vector<224x1xf32>
    %43 = vector.extract_strided_slice %4 {offsets = [6, 0], sizes = [1, 16], strides = [1, 1]} : vector<9x16xf32> to vector<1x16xf32>
    %44 = vector.broadcast %42 : vector<224x1xf32> to vector<224x16xf32>
    %45 = vector.broadcast %43 : vector<1x16xf32> to vector<224x16xf32>
    %46 = arith.mulf %44, %45 : vector<224x16xf32>
    %47 = arith.addf %41, %46 : vector<224x16xf32>
    %48 = vector.extract_strided_slice %2 {offsets = [0, 7], sizes = [224, 1], strides = [1, 1]} : vector<224x9xf32> to vector<224x1xf32>
    %49 = vector.extract_strided_slice %4 {offsets = [7, 0], sizes = [1, 16], strides = [1, 1]} : vector<9x16xf32> to vector<1x16xf32>
    %50 = vector.broadcast %48 : vector<224x1xf32> to vector<224x16xf32>
    %51 = vector.broadcast %49 : vector<1x16xf32> to vector<224x16xf32>
    %52 = arith.mulf %50, %51 : vector<224x16xf32>
    %53 = arith.addf %47, %52 : vector<224x16xf32>
    %54 = vector.extract_strided_slice %2 {offsets = [0, 8], sizes = [224, 1], strides = [1, 1]} : vector<224x9xf32> to vector<224x1xf32>
    %55 = vector.extract_strided_slice %4 {offsets = [8, 0], sizes = [1, 16], strides = [1, 1]} : vector<9x16xf32> to vector<1x16xf32>
    %56 = vector.broadcast %54 : vector<224x1xf32> to vector<224x16xf32>
    %57 = vector.broadcast %55 : vector<1x16xf32> to vector<224x16xf32>
    %58 = arith.mulf %56, %57 : vector<224x16xf32>
    %59 = arith.addf %53, %58 : vector<224x16xf32>
    %c0_4 = arith.constant 0 : index
    %c0_5 = arith.constant 0 : index
    %60 = vector.load %arg3[%c0_4, %c0_5] : memref<1x16xf32, #tpu.memory_space<vmem>>, vector<1x16xf32>
    %61 = vector.broadcast %60 : vector<1x16xf32> to vector<224x16xf32>
    %62 = arith.addf %59, %61 : vector<224x16xf32>
    %cst_6 = arith.constant 0.000000e+00 : f32
    %63 = vector.broadcast %cst_6 : f32 to vector<224x16xf32>
    %64 = arith.maximumf %62, %63 : vector<224x16xf32>
    %65 = tpu.iota {dimensions = array<i32: 0>} : vector<224x16xi32>
    %c16_i32 = arith.constant 16 : i32
    %c0_i32 = arith.constant 0 : i32
    %66 = arith.cmpi eq, %c16_i32, %c0_i32 : i32
    %c1_i32 = arith.constant 1 : i32
    %67 = arith.select %66, %c1_i32, %c16_i32 : i32
    %68 = vector.broadcast %67 : i32 to vector<224x16xi32>
    %69 = arith.remsi %65, %68 : vector<224x16xi32>
    %c0_i32_7 = arith.constant 0 : i32
    %70 = vector.broadcast %c0_i32_7 : i32 to vector<224x16xi32>
    %71 = arith.cmpi ne, %69, %70 : vector<224x16xi32>
    %c0_i32_8 = arith.constant 0 : i32
    %72 = vector.broadcast %c0_i32_8 : i32 to vector<224x16xi32>
    %73 = arith.cmpi slt, %69, %72 : vector<224x16xi32>
    %c0_i32_9 = arith.constant 0 : i32
    %74 = arith.cmpi slt, %67, %c0_i32_9 : i32
    %75 = vector.broadcast %74 : i1 to vector<224x16xi1>
    %76 = vector.broadcast %75 : vector<224x16xi1> to vector<224x16xi1>
    %77 = arith.xori %73, %76 : vector<224x16xi1>
    %78 = arith.andi %77, %71 : vector<224x16xi1>
    %79 = vector.broadcast %67 : i32 to vector<224x16xi32>
    %80 = arith.addi %69, %79 : vector<224x16xi32>
    %81 = arith.select %78, %80, %69 : vector<224x16xi1>, vector<224x16xi32>
    %c14_i32 = arith.constant 14 : i32
    %82 = vector.broadcast %c14_i32 : i32 to vector<224x16xi32>
    %83 = arith.cmpi slt, %81, %82 : vector<224x16xi32>
    %cst_10 = arith.constant 0.000000e+00 : f32
    %84 = vector.broadcast %cst_10 : f32 to vector<224x16xf32>
    %85 = arith.select %83, %64, %84 : vector<224x16xi1>, vector<224x16xf32>
    %cst_11 = arith.constant 0.000000e+00 : f32
    %86 = vector.broadcast %cst_11 : f32 to vector<272x16xf32>
    %c0_12 = arith.constant 0 : index
    %c0_13 = arith.constant 0 : index
    %87 = vector.load %arg9[%c0_12, %c0_13] : memref<272x16xf32, #tpu.memory_space<vmem>>, vector<272x16xf32>
    tpu.vector_store %arg9[%c0_12, %c0_13], %86 {strides = array<i32>} : memref<272x16xf32, #tpu.memory_space<vmem>>, vector<272x16xf32>,
    %c17 = arith.constant 17 : index
    %c0_14 = arith.constant 0 : index
    %88 = vector.load %arg9[%c17, %c0_14] : memref<272x16xf32, #tpu.memory_space<vmem>>, vector<224x16xf32>
    tpu.vector_store %arg9[%c17, %c0_14], %85 {strides = array<i32>} : memref<272x16xf32, #tpu.memory_space<vmem>>, vector<224x16xf32>,
    %cst_15 = arith.constant 0.000000e+00 : f32
    %89 = vector.broadcast %cst_15 : f32 to vector<224x32xf32>
    %c0_16 = arith.constant 0 : index
    %c0_17 = arith.constant 0 : index
    %90 = vector.load %arg9[%c0_16, %c0_17] : memref<272x16xf32, #tpu.memory_space<vmem>>, vector<224x16xf32>
    %91 = arith.truncf %90 : vector<224x16xf32> to vector<224x16xbf16>
    %c0_18 = arith.constant 0 : index
    %c0_19 = arith.constant 0 : index
    %92 = vector.load %arg4[%c0_18, %c0_19] : memref<144x32xbf16, #tpu.memory_space<vmem>>, vector<16x32xbf16>
    %cst_20 = arith.constant dense<0.000000e+00> : vector<224x32xf32>
    %93 = tpu.matmul %91, %92, %cst_20 {dimension_numbers = #tpu.dot_dimension_numbers<[1], [0], [0], [1], [0, 0, 1, 1], [], []>} : vector<224x16xbf16>, vector<16x32xbf16>, vector<224x32xf32> -> vector<224x32xf32>
    %94 = arith.addf %89, %93 : vector<224x32xf32>
    %c1 = arith.constant 1 : index
    %c0_21 = arith.constant 0 : index
    %95 = vector.load %arg9[%c1, %c0_21] : memref<272x16xf32, #tpu.memory_space<vmem>>, vector<224x16xf32>
    %96 = arith.truncf %95 : vector<224x16xf32> to vector<224x16xbf16>
    %c16 = arith.constant 16 : index
    %c0_22 = arith.constant 0 : index
    %97 = vector.load %arg4[%c16, %c0_22] : memref<144x32xbf16, #tpu.memory_space<vmem>>, vector<16x32xbf16>
    %cst_23 = arith.constant dense<0.000000e+00> : vector<224x32xf32>
    %98 = tpu.matmul %96, %97, %cst_23 {dimension_numbers = #tpu.dot_dimension_numbers<[1], [0], [0], [1], [0, 0, 1, 1], [], []>} : vector<224x16xbf16>, vector<16x32xbf16>, vector<224x32xf32> -> vector<224x32xf32>
    %99 = arith.addf %94, %98 : vector<224x32xf32>
    %c2 = arith.constant 2 : index
    %c0_24 = arith.constant 0 : index
    %100 = vector.load %arg9[%c2, %c0_24] : memref<272x16xf32, #tpu.memory_space<vmem>>, vector<224x16xf32>
    %101 = arith.truncf %100 : vector<224x16xf32> to vector<224x16xbf16>
    %c32 = arith.constant 32 : index
    %c0_25 = arith.constant 0 : index
    %102 = vector.load %arg4[%c32, %c0_25] : memref<144x32xbf16, #tpu.memory_space<vmem>>, vector<16x32xbf16>
    %cst_26 = arith.constant dense<0.000000e+00> : vector<224x32xf32>
    %103 = tpu.matmul %101, %102, %cst_26 {dimension_numbers = #tpu.dot_dimension_numbers<[1], [0], [0], [1], [0, 0, 1, 1], [], []>} : vector<224x16xbf16>, vector<16x32xbf16>, vector<224x32xf32> -> vector<224x32xf32>
    %104 = arith.addf %99, %103 : vector<224x32xf32>
    %c16_27 = arith.constant 16 : index
    %c0_28 = arith.constant 0 : index
    %105 = vector.load %arg9[%c16_27, %c0_28] : memref<272x16xf32, #tpu.memory_space<vmem>>, vector<224x16xf32>
    %106 = arith.truncf %105 : vector<224x16xf32> to vector<224x16xbf16>
    %c48 = arith.constant 48 : index
    %c0_29 = arith.constant 0 : index
    %107 = vector.load %arg4[%c48, %c0_29] : memref<144x32xbf16, #tpu.memory_space<vmem>>, vector<16x32xbf16>
    %cst_30 = arith.constant dense<0.000000e+00> : vector<224x32xf32>
    %108 = tpu.matmul %106, %107, %cst_30 {dimension_numbers = #tpu.dot_dimension_numbers<[1], [0], [0], [1], [0, 0, 1, 1], [], []>} : vector<224x16xbf16>, vector<16x32xbf16>, vector<224x32xf32> -> vector<224x32xf32>
    %109 = arith.addf %104, %108 : vector<224x32xf32>
    %c17_31 = arith.constant 17 : index
    %c0_32 = arith.constant 0 : index
    %110 = vector.load %arg9[%c17_31, %c0_32] : memref<272x16xf32, #tpu.memory_space<vmem>>, vector<224x16xf32>
    %111 = arith.truncf %110 : vector<224x16xf32> to vector<224x16xbf16>
    %c64 = arith.constant 64 : index
    %c0_33 = arith.constant 0 : index
    %112 = vector.load %arg4[%c64, %c0_33] : memref<144x32xbf16, #tpu.memory_space<vmem>>, vector<16x32xbf16>
    %cst_34 = arith.constant dense<0.000000e+00> : vector<224x32xf32>
    %113 = tpu.matmul %111, %112, %cst_34 {dimension_numbers = #tpu.dot_dimension_numbers<[1], [0], [0], [1], [0, 0, 1, 1], [], []>} : vector<224x16xbf16>, vector<16x32xbf16>, vector<224x32xf32> -> vector<224x32xf32>
    %114 = arith.addf %109, %113 : vector<224x32xf32>
    %c18 = arith.constant 18 : index
    %c0_35 = arith.constant 0 : index
    %115 = vector.load %arg9[%c18, %c0_35] : memref<272x16xf32, #tpu.memory_space<vmem>>, vector<224x16xf32>
    %116 = arith.truncf %115 : vector<224x16xf32> to vector<224x16xbf16>
    %c80 = arith.constant 80 : index
    %c0_36 = arith.constant 0 : index
    %117 = vector.load %arg4[%c80, %c0_36] : memref<144x32xbf16, #tpu.memory_space<vmem>>, vector<16x32xbf16>
    %cst_37 = arith.constant dense<0.000000e+00> : vector<224x32xf32>
    %118 = tpu.matmul %116, %117, %cst_37 {dimension_numbers = #tpu.dot_dimension_numbers<[1], [0], [0], [1], [0, 0, 1, 1], [], []>} : vector<224x16xbf16>, vector<16x32xbf16>, vector<224x32xf32> -> vector<224x32xf32>
    %119 = arith.addf %114, %118 : vector<224x32xf32>
    %c32_38 = arith.constant 32 : index
    %c0_39 = arith.constant 0 : index
    %120 = vector.load %arg9[%c32_38, %c0_39] : memref<272x16xf32, #tpu.memory_space<vmem>>, vector<224x16xf32>
    %121 = arith.truncf %120 : vector<224x16xf32> to vector<224x16xbf16>
    %c96 = arith.constant 96 : index
    %c0_40 = arith.constant 0 : index
    %122 = vector.load %arg4[%c96, %c0_40] : memref<144x32xbf16, #tpu.memory_space<vmem>>, vector<16x32xbf16>
    %cst_41 = arith.constant dense<0.000000e+00> : vector<224x32xf32>
    %123 = tpu.matmul %121, %122, %cst_41 {dimension_numbers = #tpu.dot_dimension_numbers<[1], [0], [0], [1], [0, 0, 1, 1], [], []>} : vector<224x16xbf16>, vector<16x32xbf16>, vector<224x32xf32> -> vector<224x32xf32>
    %124 = arith.addf %119, %123 : vector<224x32xf32>
    %c33 = arith.constant 33 : index
    %c0_42 = arith.constant 0 : index
    %125 = vector.load %arg9[%c33, %c0_42] : memref<272x16xf32, #tpu.memory_space<vmem>>, vector<224x16xf32>
    %126 = arith.truncf %125 : vector<224x16xf32> to vector<224x16xbf16>
    %c112 = arith.constant 112 : index
    %c0_43 = arith.constant 0 : index
    %127 = vector.load %arg4[%c112, %c0_43] : memref<144x32xbf16, #tpu.memory_space<vmem>>, vector<16x32xbf16>
    %cst_44 = arith.constant dense<0.000000e+00> : vector<224x32xf32>
    %128 = tpu.matmul %126, %127, %cst_44 {dimension_numbers = #tpu.dot_dimension_numbers<[1], [0], [0], [1], [0, 0, 1, 1], [], []>} : vector<224x16xbf16>, vector<16x32xbf16>, vector<224x32xf32> -> vector<224x32xf32>
    %129 = arith.addf %124, %128 : vector<224x32xf32>
    %c34 = arith.constant 34 : index
    %c0_45 = arith.constant 0 : index
    %130 = vector.load %arg9[%c34, %c0_45] : memref<272x16xf32, #tpu.memory_space<vmem>>, vector<224x16xf32>
    %131 = arith.truncf %130 : vector<224x16xf32> to vector<224x16xbf16>
    %c128 = arith.constant 128 : index
    %c0_46 = arith.constant 0 : index
    %132 = vector.load %arg4[%c128, %c0_46] : memref<144x32xbf16, #tpu.memory_space<vmem>>, vector<16x32xbf16>
    %cst_47 = arith.constant dense<0.000000e+00> : vector<224x32xf32>
    %133 = tpu.matmul %131, %132, %cst_47 {dimension_numbers = #tpu.dot_dimension_numbers<[1], [0], [0], [1], [0, 0, 1, 1], [], []>} : vector<224x16xbf16>, vector<16x32xbf16>, vector<224x32xf32> -> vector<224x32xf32>
    %134 = arith.addf %129, %133 : vector<224x32xf32>
    %c0_48 = arith.constant 0 : index
    %c0_49 = arith.constant 0 : index
    %135 = vector.load %arg5[%c0_48, %c0_49] : memref<1x32xf32, #tpu.memory_space<vmem>>, vector<1x32xf32>
    %136 = vector.broadcast %135 : vector<1x32xf32> to vector<224x32xf32>
    %137 = arith.addf %134, %136 : vector<224x32xf32>
    %cst_50 = arith.constant 0.000000e+00 : f32
    %138 = vector.broadcast %cst_50 : f32 to vector<224x32xf32>
    %139 = arith.maximumf %137, %138 : vector<224x32xf32>
    %140 = tpu.iota {dimensions = array<i32: 0>} : vector<224x32xi32>
    %c16_i32_51 = arith.constant 16 : i32
    %c0_i32_52 = arith.constant 0 : i32
    %141 = arith.cmpi eq, %c16_i32_51, %c0_i32_52 : i32
    %c1_i32_53 = arith.constant 1 : i32
    %142 = arith.select %141, %c1_i32_53, %c16_i32_51 : i32
    %143 = vector.broadcast %142 : i32 to vector<224x32xi32>
    %144 = arith.remsi %140, %143 : vector<224x32xi32>
    %c0_i32_54 = arith.constant 0 : i32
    %145 = vector.broadcast %c0_i32_54 : i32 to vector<224x32xi32>
    %146 = arith.cmpi ne, %144, %145 : vector<224x32xi32>
    %c0_i32_55 = arith.constant 0 : i32
    %147 = vector.broadcast %c0_i32_55 : i32 to vector<224x32xi32>
    %148 = arith.cmpi slt, %144, %147 : vector<224x32xi32>
    %c0_i32_56 = arith.constant 0 : i32
    %149 = arith.cmpi slt, %142, %c0_i32_56 : i32
    %150 = vector.broadcast %149 : i1 to vector<224x32xi1>
    %151 = vector.broadcast %150 : vector<224x32xi1> to vector<224x32xi1>
    %152 = arith.xori %148, %151 : vector<224x32xi1>
    %153 = arith.andi %152, %146 : vector<224x32xi1>
    %154 = vector.broadcast %142 : i32 to vector<224x32xi32>
    %155 = arith.addi %144, %154 : vector<224x32xi32>
    %156 = arith.select %153, %155, %144 : vector<224x32xi1>, vector<224x32xi32>
    %c14_i32_57 = arith.constant 14 : i32
    %157 = vector.broadcast %c14_i32_57 : i32 to vector<224x32xi32>
    %158 = arith.cmpi slt, %156, %157 : vector<224x32xi32>
    %cst_58 = arith.constant 0.000000e+00 : f32
    %159 = vector.broadcast %cst_58 : f32 to vector<224x32xf32>
    %160 = arith.select %158, %139, %159 : vector<224x32xi1>, vector<224x32xf32>
    %cst_59 = arith.constant 0.000000e+00 : f32
    %161 = vector.broadcast %cst_59 : f32 to vector<272x32xf32>
    %c0_60 = arith.constant 0 : index
    %c0_61 = arith.constant 0 : index
    %162 = vector.load %arg10[%c0_60, %c0_61] : memref<272x32xf32, #tpu.memory_space<vmem>>, vector<272x32xf32>
    tpu.vector_store %arg10[%c0_60, %c0_61], %161 {strides = array<i32>} : memref<272x32xf32, #tpu.memory_space<vmem>>, vector<272x32xf32>,
    %c17_62 = arith.constant 17 : index
    %c0_63 = arith.constant 0 : index
    %163 = vector.load %arg10[%c17_62, %c0_63] : memref<272x32xf32, #tpu.memory_space<vmem>>, vector<224x32xf32>
    tpu.vector_store %arg10[%c17_62, %c0_63], %160 {strides = array<i32>} : memref<272x32xf32, #tpu.memory_space<vmem>>, vector<224x32xf32>,
    %cst_64 = arith.constant 0.000000e+00 : f32
    %164 = vector.broadcast %cst_64 : f32 to vector<224x64xf32>
    %c0_65 = arith.constant 0 : index
    %c0_66 = arith.constant 0 : index
    %165 = vector.load %arg10[%c0_65, %c0_66] : memref<272x32xf32, #tpu.memory_space<vmem>>, vector<224x32xf32>
    %166 = arith.truncf %165 : vector<224x32xf32> to vector<224x32xbf16>
    %c0_67 = arith.constant 0 : index
    %c0_68 = arith.constant 0 : index
    %167 = vector.load %arg6[%c0_67, %c0_68] : memref<288x64xbf16, #tpu.memory_space<vmem>>, vector<32x64xbf16>
    %cst_69 = arith.constant dense<0.000000e+00> : vector<224x64xf32>
    %168 = tpu.matmul %166, %167, %cst_69 {dimension_numbers = #tpu.dot_dimension_numbers<[1], [0], [0], [1], [0, 0, 1, 1], [], []>} : vector<224x32xbf16>, vector<32x64xbf16>, vector<224x64xf32> -> vector<224x64xf32>
    %169 = arith.addf %164, %168 : vector<224x64xf32>
    %c1_70 = arith.constant 1 : index
    %c0_71 = arith.constant 0 : index
    %170 = vector.load %arg10[%c1_70, %c0_71] : memref<272x32xf32, #tpu.memory_space<vmem>>, vector<224x32xf32>
    %171 = arith.truncf %170 : vector<224x32xf32> to vector<224x32xbf16>
    %c32_72 = arith.constant 32 : index
    %c0_73 = arith.constant 0 : index
    %172 = vector.load %arg6[%c32_72, %c0_73] : memref<288x64xbf16, #tpu.memory_space<vmem>>, vector<32x64xbf16>
    %cst_74 = arith.constant dense<0.000000e+00> : vector<224x64xf32>
    %173 = tpu.matmul %171, %172, %cst_74 {dimension_numbers = #tpu.dot_dimension_numbers<[1], [0], [0], [1], [0, 0, 1, 1], [], []>} : vector<224x32xbf16>, vector<32x64xbf16>, vector<224x64xf32> -> vector<224x64xf32>
    %174 = arith.addf %169, %173 : vector<224x64xf32>
    %c2_75 = arith.constant 2 : index
    %c0_76 = arith.constant 0 : index
    %175 = vector.load %arg10[%c2_75, %c0_76] : memref<272x32xf32, #tpu.memory_space<vmem>>, vector<224x32xf32>
    %176 = arith.truncf %175 : vector<224x32xf32> to vector<224x32xbf16>
    %c64_77 = arith.constant 64 : index
    %c0_78 = arith.constant 0 : index
    %177 = vector.load %arg6[%c64_77, %c0_78] : memref<288x64xbf16, #tpu.memory_space<vmem>>, vector<32x64xbf16>
    %cst_79 = arith.constant dense<0.000000e+00> : vector<224x64xf32>
    %178 = tpu.matmul %176, %177, %cst_79 {dimension_numbers = #tpu.dot_dimension_numbers<[1], [0], [0], [1], [0, 0, 1, 1], [], []>} : vector<224x32xbf16>, vector<32x64xbf16>, vector<224x64xf32> -> vector<224x64xf32>
    %179 = arith.addf %174, %178 : vector<224x64xf32>
    %c16_80 = arith.constant 16 : index
    %c0_81 = arith.constant 0 : index
    %180 = vector.load %arg10[%c16_80, %c0_81] : memref<272x32xf32, #tpu.memory_space<vmem>>, vector<224x32xf32>
    %181 = arith.truncf %180 : vector<224x32xf32> to vector<224x32xbf16>
    %c96_82 = arith.constant 96 : index
    %c0_83 = arith.constant 0 : index
    %182 = vector.load %arg6[%c96_82, %c0_83] : memref<288x64xbf16, #tpu.memory_space<vmem>>, vector<32x64xbf16>
    %cst_84 = arith.constant dense<0.000000e+00> : vector<224x64xf32>
    %183 = tpu.matmul %181, %182, %cst_84 {dimension_numbers = #tpu.dot_dimension_numbers<[1], [0], [0], [1], [0, 0, 1, 1], [], []>} : vector<224x32xbf16>, vector<32x64xbf16>, vector<224x64xf32> -> vector<224x64xf32>
    %184 = arith.addf %179, %183 : vector<224x64xf32>
    %c17_85 = arith.constant 17 : index
    %c0_86 = arith.constant 0 : index
    %185 = vector.load %arg10[%c17_85, %c0_86] : memref<272x32xf32, #tpu.memory_space<vmem>>, vector<224x32xf32>
    %186 = arith.truncf %185 : vector<224x32xf32> to vector<224x32xbf16>
    %c128_87 = arith.constant 128 : index
    %c0_88 = arith.constant 0 : index
    %187 = vector.load %arg6[%c128_87, %c0_88] : memref<288x64xbf16, #tpu.memory_space<vmem>>, vector<32x64xbf16>
    %cst_89 = arith.constant dense<0.000000e+00> : vector<224x64xf32>
    %188 = tpu.matmul %186, %187, %cst_89 {dimension_numbers = #tpu.dot_dimension_numbers<[1], [0], [0], [1], [0, 0, 1, 1], [], []>} : vector<224x32xbf16>, vector<32x64xbf16>, vector<224x64xf32> -> vector<224x64xf32>
    %189 = arith.addf %184, %188 : vector<224x64xf32>
    %c18_90 = arith.constant 18 : index
    %c0_91 = arith.constant 0 : index
    %190 = vector.load %arg10[%c18_90, %c0_91] : memref<272x32xf32, #tpu.memory_space<vmem>>, vector<224x32xf32>
    %191 = arith.truncf %190 : vector<224x32xf32> to vector<224x32xbf16>
    %c160 = arith.constant 160 : index
    %c0_92 = arith.constant 0 : index
    %192 = vector.load %arg6[%c160, %c0_92] : memref<288x64xbf16, #tpu.memory_space<vmem>>, vector<32x64xbf16>
    %cst_93 = arith.constant dense<0.000000e+00> : vector<224x64xf32>
    %193 = tpu.matmul %191, %192, %cst_93 {dimension_numbers = #tpu.dot_dimension_numbers<[1], [0], [0], [1], [0, 0, 1, 1], [], []>} : vector<224x32xbf16>, vector<32x64xbf16>, vector<224x64xf32> -> vector<224x64xf32>
    %194 = arith.addf %189, %193 : vector<224x64xf32>
    %c32_94 = arith.constant 32 : index
    %c0_95 = arith.constant 0 : index
    %195 = vector.load %arg10[%c32_94, %c0_95] : memref<272x32xf32, #tpu.memory_space<vmem>>, vector<224x32xf32>
    %196 = arith.truncf %195 : vector<224x32xf32> to vector<224x32xbf16>
    %c192 = arith.constant 192 : index
    %c0_96 = arith.constant 0 : index
    %197 = vector.load %arg6[%c192, %c0_96] : memref<288x64xbf16, #tpu.memory_space<vmem>>, vector<32x64xbf16>
    %cst_97 = arith.constant dense<0.000000e+00> : vector<224x64xf32>
    %198 = tpu.matmul %196, %197, %cst_97 {dimension_numbers = #tpu.dot_dimension_numbers<[1], [0], [0], [1], [0, 0, 1, 1], [], []>} : vector<224x32xbf16>, vector<32x64xbf16>, vector<224x64xf32> -> vector<224x64xf32>
    %199 = arith.addf %194, %198 : vector<224x64xf32>
    %c33_98 = arith.constant 33 : index
    %c0_99 = arith.constant 0 : index
    %200 = vector.load %arg10[%c33_98, %c0_99] : memref<272x32xf32, #tpu.memory_space<vmem>>, vector<224x32xf32>
    %201 = arith.truncf %200 : vector<224x32xf32> to vector<224x32xbf16>
    %c224 = arith.constant 224 : index
    %c0_100 = arith.constant 0 : index
    %202 = vector.load %arg6[%c224, %c0_100] : memref<288x64xbf16, #tpu.memory_space<vmem>>, vector<32x64xbf16>
    %cst_101 = arith.constant dense<0.000000e+00> : vector<224x64xf32>
    %203 = tpu.matmul %201, %202, %cst_101 {dimension_numbers = #tpu.dot_dimension_numbers<[1], [0], [0], [1], [0, 0, 1, 1], [], []>} : vector<224x32xbf16>, vector<32x64xbf16>, vector<224x64xf32> -> vector<224x64xf32>
    %204 = arith.addf %199, %203 : vector<224x64xf32>
    %c34_102 = arith.constant 34 : index
    %c0_103 = arith.constant 0 : index
    %205 = vector.load %arg10[%c34_102, %c0_103] : memref<272x32xf32, #tpu.memory_space<vmem>>, vector<224x32xf32>
    %206 = arith.truncf %205 : vector<224x32xf32> to vector<224x32xbf16>
    %c256 = arith.constant 256 : index
    %c0_104 = arith.constant 0 : index
    %207 = vector.load %arg6[%c256, %c0_104] : memref<288x64xbf16, #tpu.memory_space<vmem>>, vector<32x64xbf16>
    %cst_105 = arith.constant dense<0.000000e+00> : vector<224x64xf32>
    %208 = tpu.matmul %206, %207, %cst_105 {dimension_numbers = #tpu.dot_dimension_numbers<[1], [0], [0], [1], [0, 0, 1, 1], [], []>} : vector<224x32xbf16>, vector<32x64xbf16>, vector<224x64xf32> -> vector<224x64xf32>
    %209 = arith.addf %204, %208 : vector<224x64xf32>
    %c0_106 = arith.constant 0 : index
    %c0_107 = arith.constant 0 : index
    %210 = vector.load %arg7[%c0_106, %c0_107] : memref<1x64xf32, #tpu.memory_space<vmem>>, vector<1x64xf32>
    %211 = vector.broadcast %210 : vector<1x64xf32> to vector<224x64xf32>
    %212 = arith.addf %209, %211 : vector<224x64xf32>
    %cst_108 = arith.constant 0.000000e+00 : f32
    %213 = vector.broadcast %cst_108 : f32 to vector<224x64xf32>
    %214 = arith.maximumf %212, %213 : vector<224x64xf32>
    %215 = vector.extract_strided_slice %214 {offsets = [0, 0], sizes = [1, 64], strides = [1, 1]} : vector<224x64xf32> to vector<1x64xf32>
    %c0_109 = arith.constant 0 : index
    %c0_110 = arith.constant 0 : index
    %c0_111 = arith.constant 0 : index
    %216 = vector.load %arg8[%c0_109, %c0_110, %c0_111] : memref<1x49x64xf32, #tpu.memory_space<vmem>>, vector<1x1x64xf32>
    %217 = vector.shape_cast %216 : vector<1x1x64xf32> to vector<1x64xf32>
    %218 = vector.shape_cast %215 : vector<1x64xf32> to vector<1x1x64xf32>
    tpu.vector_store %arg8[%c0_109, %c0_110, %c0_111], %218 {strides = array<i32>} : memref<1x49x64xf32, #tpu.memory_space<vmem>>, vector<1x1x64xf32>,
    %219 = vector.extract_strided_slice %214 {offsets = [2, 0], sizes = [1, 64], strides = [1, 1]} : vector<224x64xf32> to vector<1x64xf32>
    %c0_112 = arith.constant 0 : index
    %c1_113 = arith.constant 1 : index
    %c0_114 = arith.constant 0 : index
    %220 = vector.load %arg8[%c0_112, %c1_113, %c0_114] : memref<1x49x64xf32, #tpu.memory_space<vmem>>, vector<1x1x64xf32>
    %221 = vector.shape_cast %220 : vector<1x1x64xf32> to vector<1x64xf32>
    %222 = vector.shape_cast %219 : vector<1x64xf32> to vector<1x1x64xf32>
    tpu.vector_store %arg8[%c0_112, %c1_113, %c0_114], %222 {strides = array<i32>} : memref<1x49x64xf32, #tpu.memory_space<vmem>>, vector<1x1x64xf32>,
    %223 = vector.extract_strided_slice %214 {offsets = [4, 0], sizes = [1, 64], strides = [1, 1]} : vector<224x64xf32> to vector<1x64xf32>
    %c0_115 = arith.constant 0 : index
    %c2_116 = arith.constant 2 : index
    %c0_117 = arith.constant 0 : index
    %224 = vector.load %arg8[%c0_115, %c2_116, %c0_117] : memref<1x49x64xf32, #tpu.memory_space<vmem>>, vector<1x1x64xf32>
    %225 = vector.shape_cast %224 : vector<1x1x64xf32> to vector<1x64xf32>
    %226 = vector.shape_cast %223 : vector<1x64xf32> to vector<1x1x64xf32>
    tpu.vector_store %arg8[%c0_115, %c2_116, %c0_117], %226 {strides = array<i32>} : memref<1x49x64xf32, #tpu.memory_space<vmem>>, vector<1x1x64xf32>,
    %227 = vector.extract_strided_slice %214 {offsets = [6, 0], sizes = [1, 64], strides = [1, 1]} : vector<224x64xf32> to vector<1x64xf32>
    %c0_118 = arith.constant 0 : index
    %c3 = arith.constant 3 : index
    %c0_119 = arith.constant 0 : index
    %228 = vector.load %arg8[%c0_118, %c3, %c0_119] : memref<1x49x64xf32, #tpu.memory_space<vmem>>, vector<1x1x64xf32>
    %229 = vector.shape_cast %228 : vector<1x1x64xf32> to vector<1x64xf32>
    %230 = vector.shape_cast %227 : vector<1x64xf32> to vector<1x1x64xf32>
    tpu.vector_store %arg8[%c0_118, %c3, %c0_119], %230 {strides = array<i32>} : memref<1x49x64xf32, #tpu.memory_space<vmem>>, vector<1x1x64xf32>,
    %231 = vector.extract_strided_slice %214 {offsets = [8, 0], sizes = [1, 64], strides = [1, 1]} : vector<224x64xf32> to vector<1x64xf32>
    %c0_120 = arith.constant 0 : index
    %c4 = arith.constant 4 : index
    %c0_121 = arith.constant 0 : index
    %232 = vector.load %arg8[%c0_120, %c4, %c0_121] : memref<1x49x64xf32, #tpu.memory_space<vmem>>, vector<1x1x64xf32>
    %233 = vector.shape_cast %232 : vector<1x1x64xf32> to vector<1x64xf32>
    %234 = vector.shape_cast %231 : vector<1x64xf32> to vector<1x1x64xf32>
    tpu.vector_store %arg8[%c0_120, %c4, %c0_121], %234 {strides = array<i32>} : memref<1x49x64xf32, #tpu.memory_space<vmem>>, vector<1x1x64xf32>,
    %235 = vector.extract_strided_slice %214 {offsets = [10, 0], sizes = [1, 64], strides = [1, 1]} : vector<224x64xf32> to vector<1x64xf32>
    %c0_122 = arith.constant 0 : index
    %c5 = arith.constant 5 : index
    %c0_123 = arith.constant 0 : index
    %236 = vector.load %arg8[%c0_122, %c5, %c0_123] : memref<1x49x64xf32, #tpu.memory_space<vmem>>, vector<1x1x64xf32>
    %237 = vector.shape_cast %236 : vector<1x1x64xf32> to vector<1x64xf32>
    %238 = vector.shape_cast %235 : vector<1x64xf32> to vector<1x1x64xf32>
    tpu.vector_store %arg8[%c0_122, %c5, %c0_123], %238 {strides = array<i32>} : memref<1x49x64xf32, #tpu.memory_space<vmem>>, vector<1x1x64xf32>,
    %239 = vector.extract_strided_slice %214 {offsets = [12, 0], sizes = [1, 64], strides = [1, 1]} : vector<224x64xf32> to vector<1x64xf32>
    %c0_124 = arith.constant 0 : index
    %c6 = arith.constant 6 : index
    %c0_125 = arith.constant 0 : index
    %240 = vector.load %arg8[%c0_124, %c6, %c0_125] : memref<1x49x64xf32, #tpu.memory_space<vmem>>, vector<1x1x64xf32>
    %241 = vector.shape_cast %240 : vector<1x1x64xf32> to vector<1x64xf32>
    %242 = vector.shape_cast %239 : vector<1x64xf32> to vector<1x1x64xf32>
    tpu.vector_store %arg8[%c0_124, %c6, %c0_125], %242 {strides = array<i32>} : memref<1x49x64xf32, #tpu.memory_space<vmem>>, vector<1x1x64xf32>,
    %243 = vector.extract_strided_slice %214 {offsets = [32, 0], sizes = [1, 64], strides = [1, 1]} : vector<224x64xf32> to vector<1x64xf32>
    %c0_126 = arith.constant 0 : index
    %c7 = arith.constant 7 : index
    %c0_127 = arith.constant 0 : index
    %244 = vector.load %arg8[%c0_126, %c7, %c0_127] : memref<1x49x64xf32, #tpu.memory_space<vmem>>, vector<1x1x64xf32>
    %245 = vector.shape_cast %244 : vector<1x1x64xf32> to vector<1x64xf32>
    %246 = vector.shape_cast %243 : vector<1x64xf32> to vector<1x1x64xf32>
    tpu.vector_store %arg8[%c0_126, %c7, %c0_127], %246 {strides = array<i32>} : memref<1x49x64xf32, #tpu.memory_space<vmem>>, vector<1x1x64xf32>,
    %247 = vector.extract_strided_slice %214 {offsets = [34, 0], sizes = [1, 64], strides = [1, 1]} : vector<224x64xf32> to vector<1x64xf32>
    %c0_128 = arith.constant 0 : index
    %c8 = arith.constant 8 : index
    %c0_129 = arith.constant 0 : index
    %248 = vector.load %arg8[%c0_128, %c8, %c0_129] : memref<1x49x64xf32, #tpu.memory_space<vmem>>, vector<1x1x64xf32>
    %249 = vector.shape_cast %248 : vector<1x1x64xf32> to vector<1x64xf32>
    %250 = vector.shape_cast %247 : vector<1x64xf32> to vector<1x1x64xf32>
    tpu.vector_store %arg8[%c0_128, %c8, %c0_129], %250 {strides = array<i32>} : memref<1x49x64xf32, #tpu.memory_space<vmem>>, vector<1x1x64xf32>,
    %251 = vector.extract_strided_slice %214 {offsets = [36, 0], sizes = [1, 64], strides = [1, 1]} : vector<224x64xf32> to vector<1x64xf32>
    %c0_130 = arith.constant 0 : index
    %c9 = arith.constant 9 : index
    %c0_131 = arith.constant 0 : index
    %252 = vector.load %arg8[%c0_130, %c9, %c0_131] : memref<1x49x64xf32, #tpu.memory_space<vmem>>, vector<1x1x64xf32>
    %253 = vector.shape_cast %252 : vector<1x1x64xf32> to vector<1x64xf32>
    %254 = vector.shape_cast %251 : vector<1x64xf32> to vector<1x1x64xf32>
    tpu.vector_store %arg8[%c0_130, %c9, %c0_131], %254 {strides = array<i32>} : memref<1x49x64xf32, #tpu.memory_space<vmem>>, vector<1x1x64xf32>,
    %255 = vector.extract_strided_slice %214 {offsets = [38, 0], sizes = [1, 64], strides = [1, 1]} : vector<224x64xf32> to vector<1x64xf32>
    %c0_132 = arith.constant 0 : index
    %c10 = arith.constant 10 : index
    %c0_133 = arith.constant 0 : index
    %256 = vector.load %arg8[%c0_132, %c10, %c0_133] : memref<1x49x64xf32, #tpu.memory_space<vmem>>, vector<1x1x64xf32>
    %257 = vector.shape_cast %256 : vector<1x1x64xf32> to vector<1x64xf32>
    %258 = vector.shape_cast %255 : vector<1x64xf32> to vector<1x1x64xf32>
    tpu.vector_store %arg8[%c0_132, %c10, %c0_133], %258 {strides = array<i32>} : memref<1x49x64xf32, #tpu.memory_space<vmem>>, vector<1x1x64xf32>,
    %259 = vector.extract_strided_slice %214 {offsets = [40, 0], sizes = [1, 64], strides = [1, 1]} : vector<224x64xf32> to vector<1x64xf32>
    %c0_134 = arith.constant 0 : index
    %c11 = arith.constant 11 : index
    %c0_135 = arith.constant 0 : index
    %260 = vector.load %arg8[%c0_134, %c11, %c0_135] : memref<1x49x64xf32, #tpu.memory_space<vmem>>, vector<1x1x64xf32>
    %261 = vector.shape_cast %260 : vector<1x1x64xf32> to vector<1x64xf32>
    %262 = vector.shape_cast %259 : vector<1x64xf32> to vector<1x1x64xf32>
    tpu.vector_store %arg8[%c0_134, %c11, %c0_135], %262 {strides = array<i32>} : memref<1x49x64xf32, #tpu.memory_space<vmem>>, vector<1x1x64xf32>,
    %263 = vector.extract_strided_slice %214 {offsets = [42, 0], sizes = [1, 64], strides = [1, 1]} : vector<224x64xf32> to vector<1x64xf32>
    %c0_136 = arith.constant 0 : index
    %c12 = arith.constant 12 : index
    %c0_137 = arith.constant 0 : index
    %264 = vector.load %arg8[%c0_136, %c12, %c0_137] : memref<1x49x64xf32, #tpu.memory_space<vmem>>, vector<1x1x64xf32>
    %265 = vector.shape_cast %264 : vector<1x1x64xf32> to vector<1x64xf32>
    %266 = vector.shape_cast %263 : vector<1x64xf32> to vector<1x1x64xf32>
    tpu.vector_store %arg8[%c0_136, %c12, %c0_137], %266 {strides = array<i32>} : memref<1x49x64xf32, #tpu.memory_space<vmem>>, vector<1x1x64xf32>,
    %267 = vector.extract_strided_slice %214 {offsets = [44, 0], sizes = [1, 64], strides = [1, 1]} : vector<224x64xf32> to vector<1x64xf32>
    %c0_138 = arith.constant 0 : index
    %c13 = arith.constant 13 : index
    %c0_139 = arith.constant 0 : index
    %268 = vector.load %arg8[%c0_138, %c13, %c0_139] : memref<1x49x64xf32, #tpu.memory_space<vmem>>, vector<1x1x64xf32>
    %269 = vector.shape_cast %268 : vector<1x1x64xf32> to vector<1x64xf32>
    %270 = vector.shape_cast %267 : vector<1x64xf32> to vector<1x1x64xf32>
    tpu.vector_store %arg8[%c0_138, %c13, %c0_139], %270 {strides = array<i32>} : memref<1x49x64xf32, #tpu.memory_space<vmem>>, vector<1x1x64xf32>,
    %271 = vector.extract_strided_slice %214 {offsets = [64, 0], sizes = [1, 64], strides = [1, 1]} : vector<224x64xf32> to vector<1x64xf32>
    %c0_140 = arith.constant 0 : index
    %c14 = arith.constant 14 : index
    %c0_141 = arith.constant 0 : index
    %272 = vector.load %arg8[%c0_140, %c14, %c0_141] : memref<1x49x64xf32, #tpu.memory_space<vmem>>, vector<1x1x64xf32>
    %273 = vector.shape_cast %272 : vector<1x1x64xf32> to vector<1x64xf32>
    %274 = vector.shape_cast %271 : vector<1x64xf32> to vector<1x1x64xf32>
    tpu.vector_store %arg8[%c0_140, %c14, %c0_141], %274 {strides = array<i32>} : memref<1x49x64xf32, #tpu.memory_space<vmem>>, vector<1x1x64xf32>,
    %275 = vector.extract_strided_slice %214 {offsets = [66, 0], sizes = [1, 64], strides = [1, 1]} : vector<224x64xf32> to vector<1x64xf32>
    %c0_142 = arith.constant 0 : index
    %c15 = arith.constant 15 : index
    %c0_143 = arith.constant 0 : index
    %276 = vector.load %arg8[%c0_142, %c15, %c0_143] : memref<1x49x64xf32, #tpu.memory_space<vmem>>, vector<1x1x64xf32>
    %277 = vector.shape_cast %276 : vector<1x1x64xf32> to vector<1x64xf32>
    %278 = vector.shape_cast %275 : vector<1x64xf32> to vector<1x1x64xf32>
    tpu.vector_store %arg8[%c0_142, %c15, %c0_143], %278 {strides = array<i32>} : memref<1x49x64xf32, #tpu.memory_space<vmem>>, vector<1x1x64xf32>,
    %279 = vector.extract_strided_slice %214 {offsets = [68, 0], sizes = [1, 64], strides = [1, 1]} : vector<224x64xf32> to vector<1x64xf32>
    %c0_144 = arith.constant 0 : index
    %c16_145 = arith.constant 16 : index
    %c0_146 = arith.constant 0 : index
    %280 = vector.load %arg8[%c0_144, %c16_145, %c0_146] : memref<1x49x64xf32, #tpu.memory_space<vmem>>, vector<1x1x64xf32>
    %281 = vector.shape_cast %280 : vector<1x1x64xf32> to vector<1x64xf32>
    %282 = vector.shape_cast %279 : vector<1x64xf32> to vector<1x1x64xf32>
    tpu.vector_store %arg8[%c0_144, %c16_145, %c0_146], %282 {strides = array<i32>} : memref<1x49x64xf32, #tpu.memory_space<vmem>>, vector<1x1x64xf32>,
    %283 = vector.extract_strided_slice %214 {offsets = [70, 0], sizes = [1, 64], strides = [1, 1]} : vector<224x64xf32> to vector<1x64xf32>
    %c0_147 = arith.constant 0 : index
    %c17_148 = arith.constant 17 : index
    %c0_149 = arith.constant 0 : index
    %284 = vector.load %arg8[%c0_147, %c17_148, %c0_149] : memref<1x49x64xf32, #tpu.memory_space<vmem>>, vector<1x1x64xf32>
    %285 = vector.shape_cast %284 : vector<1x1x64xf32> to vector<1x64xf32>
    %286 = vector.shape_cast %283 : vector<1x64xf32> to vector<1x1x64xf32>
    tpu.vector_store %arg8[%c0_147, %c17_148, %c0_149], %286 {strides = array<i32>} : memref<1x49x64xf32, #tpu.memory_space<vmem>>, vector<1x1x64xf32>,
    %287 = vector.extract_strided_slice %214 {offsets = [72, 0], sizes = [1, 64], strides = [1, 1]} : vector<224x64xf32> to vector<1x64xf32>
    %c0_150 = arith.constant 0 : index
    %c18_151 = arith.constant 18 : index
    %c0_152 = arith.constant 0 : index
    %288 = vector.load %arg8[%c0_150, %c18_151, %c0_152] : memref<1x49x64xf32, #tpu.memory_space<vmem>>, vector<1x1x64xf32>
    %289 = vector.shape_cast %288 : vector<1x1x64xf32> to vector<1x64xf32>
    %290 = vector.shape_cast %287 : vector<1x64xf32> to vector<1x1x64xf32>
    tpu.vector_store %arg8[%c0_150, %c18_151, %c0_152], %290 {strides = array<i32>} : memref<1x49x64xf32, #tpu.memory_space<vmem>>, vector<1x1x64xf32>,
    %291 = vector.extract_strided_slice %214 {offsets = [74, 0], sizes = [1, 64], strides = [1, 1]} : vector<224x64xf32> to vector<1x64xf32>
    %c0_153 = arith.constant 0 : index
    %c19 = arith.constant 19 : index
    %c0_154 = arith.constant 0 : index
    %292 = vector.load %arg8[%c0_153, %c19, %c0_154] : memref<1x49x64xf32, #tpu.memory_space<vmem>>, vector<1x1x64xf32>
    %293 = vector.shape_cast %292 : vector<1x1x64xf32> to vector<1x64xf32>
    %294 = vector.shape_cast %291 : vector<1x64xf32> to vector<1x1x64xf32>
    tpu.vector_store %arg8[%c0_153, %c19, %c0_154], %294 {strides = array<i32>} : memref<1x49x64xf32, #tpu.memory_space<vmem>>, vector<1x1x64xf32>,
    %295 = vector.extract_strided_slice %214 {offsets = [76, 0], sizes = [1, 64], strides = [1, 1]} : vector<224x64xf32> to vector<1x64xf32>
    %c0_155 = arith.constant 0 : index
    %c20 = arith.constant 20 : index
    %c0_156 = arith.constant 0 : index
    %296 = vector.load %arg8[%c0_155, %c20, %c0_156] : memref<1x49x64xf32, #tpu.memory_space<vmem>>, vector<1x1x64xf32>
    %297 = vector.shape_cast %296 : vector<1x1x64xf32> to vector<1x64xf32>
    %298 = vector.shape_cast %295 : vector<1x64xf32> to vector<1x1x64xf32>
    tpu.vector_store %arg8[%c0_155, %c20, %c0_156], %298 {strides = array<i32>} : memref<1x49x64xf32, #tpu.memory_space<vmem>>, vector<1x1x64xf32>,
    %299 = vector.extract_strided_slice %214 {offsets = [96, 0], sizes = [1, 64], strides = [1, 1]} : vector<224x64xf32> to vector<1x64xf32>
    %c0_157 = arith.constant 0 : index
    %c21 = arith.constant 21 : index
    %c0_158 = arith.constant 0 : index
    %300 = vector.load %arg8[%c0_157, %c21, %c0_158] : memref<1x49x64xf32, #tpu.memory_space<vmem>>, vector<1x1x64xf32>
    %301 = vector.shape_cast %300 : vector<1x1x64xf32> to vector<1x64xf32>
    %302 = vector.shape_cast %299 : vector<1x64xf32> to vector<1x1x64xf32>
    tpu.vector_store %arg8[%c0_157, %c21, %c0_158], %302 {strides = array<i32>} : memref<1x49x64xf32, #tpu.memory_space<vmem>>, vector<1x1x64xf32>,
    %303 = vector.extract_strided_slice %214 {offsets = [98, 0], sizes = [1, 64], strides = [1, 1]} : vector<224x64xf32> to vector<1x64xf32>
    %c0_159 = arith.constant 0 : index
    %c22 = arith.constant 22 : index
    %c0_160 = arith.constant 0 : index
    %304 = vector.load %arg8[%c0_159, %c22, %c0_160] : memref<1x49x64xf32, #tpu.memory_space<vmem>>, vector<1x1x64xf32>
    %305 = vector.shape_cast %304 : vector<1x1x64xf32> to vector<1x64xf32>
    %306 = vector.shape_cast %303 : vector<1x64xf32> to vector<1x1x64xf32>
    tpu.vector_store %arg8[%c0_159, %c22, %c0_160], %306 {strides = array<i32>} : memref<1x49x64xf32, #tpu.memory_space<vmem>>, vector<1x1x64xf32>,
    %307 = vector.extract_strided_slice %214 {offsets = [100, 0], sizes = [1, 64], strides = [1, 1]} : vector<224x64xf32> to vector<1x64xf32>
    %c0_161 = arith.constant 0 : index
    %c23 = arith.constant 23 : index
    %c0_162 = arith.constant 0 : index
    %308 = vector.load %arg8[%c0_161, %c23, %c0_162] : memref<1x49x64xf32, #tpu.memory_space<vmem>>, vector<1x1x64xf32>
    %309 = vector.shape_cast %308 : vector<1x1x64xf32> to vector<1x64xf32>
    %310 = vector.shape_cast %307 : vector<1x64xf32> to vector<1x1x64xf32>
    tpu.vector_store %arg8[%c0_161, %c23, %c0_162], %310 {strides = array<i32>} : memref<1x49x64xf32, #tpu.memory_space<vmem>>, vector<1x1x64xf32>,
    %311 = vector.extract_strided_slice %214 {offsets = [102, 0], sizes = [1, 64], strides = [1, 1]} : vector<224x64xf32> to vector<1x64xf32>
    %c0_163 = arith.constant 0 : index
    %c24 = arith.constant 24 : index
    %c0_164 = arith.constant 0 : index
    %312 = vector.load %arg8[%c0_163, %c24, %c0_164] : memref<1x49x64xf32, #tpu.memory_space<vmem>>, vector<1x1x64xf32>
    %313 = vector.shape_cast %312 : vector<1x1x64xf32> to vector<1x64xf32>
    %314 = vector.shape_cast %311 : vector<1x64xf32> to vector<1x1x64xf32>
    tpu.vector_store %arg8[%c0_163, %c24, %c0_164], %314 {strides = array<i32>} : memref<1x49x64xf32, #tpu.memory_space<vmem>>, vector<1x1x64xf32>,
    %315 = vector.extract_strided_slice %214 {offsets = [104, 0], sizes = [1, 64], strides = [1, 1]} : vector<224x64xf32> to vector<1x64xf32>
    %c0_165 = arith.constant 0 : index
    %c25 = arith.constant 25 : index
    %c0_166 = arith.constant 0 : index
    %316 = vector.load %arg8[%c0_165, %c25, %c0_166] : memref<1x49x64xf32, #tpu.memory_space<vmem>>, vector<1x1x64xf32>
    %317 = vector.shape_cast %316 : vector<1x1x64xf32> to vector<1x64xf32>
    %318 = vector.shape_cast %315 : vector<1x64xf32> to vector<1x1x64xf32>
    tpu.vector_store %arg8[%c0_165, %c25, %c0_166], %318 {strides = array<i32>} : memref<1x49x64xf32, #tpu.memory_space<vmem>>, vector<1x1x64xf32>,
    %319 = vector.extract_strided_slice %214 {offsets = [106, 0], sizes = [1, 64], strides = [1, 1]} : vector<224x64xf32> to vector<1x64xf32>
    %c0_167 = arith.constant 0 : index
    %c26 = arith.constant 26 : index
    %c0_168 = arith.constant 0 : index
    %320 = vector.load %arg8[%c0_167, %c26, %c0_168] : memref<1x49x64xf32, #tpu.memory_space<vmem>>, vector<1x1x64xf32>
    %321 = vector.shape_cast %320 : vector<1x1x64xf32> to vector<1x64xf32>
    %322 = vector.shape_cast %319 : vector<1x64xf32> to vector<1x1x64xf32>
    tpu.vector_store %arg8[%c0_167, %c26, %c0_168], %322 {strides = array<i32>} : memref<1x49x64xf32, #tpu.memory_space<vmem>>, vector<1x1x64xf32>,
    %323 = vector.extract_strided_slice %214 {offsets = [108, 0], sizes = [1, 64], strides = [1, 1]} : vector<224x64xf32> to vector<1x64xf32>
    %c0_169 = arith.constant 0 : index
    %c27 = arith.constant 27 : index
    %c0_170 = arith.constant 0 : index
    %324 = vector.load %arg8[%c0_169, %c27, %c0_170] : memref<1x49x64xf32, #tpu.memory_space<vmem>>, vector<1x1x64xf32>
    %325 = vector.shape_cast %324 : vector<1x1x64xf32> to vector<1x64xf32>
    %326 = vector.shape_cast %323 : vector<1x64xf32> to vector<1x1x64xf32>
    tpu.vector_store %arg8[%c0_169, %c27, %c0_170], %326 {strides = array<i32>} : memref<1x49x64xf32, #tpu.memory_space<vmem>>, vector<1x1x64xf32>,
    %327 = vector.extract_strided_slice %214 {offsets = [128, 0], sizes = [1, 64], strides = [1, 1]} : vector<224x64xf32> to vector<1x64xf32>
    %c0_171 = arith.constant 0 : index
    %c28 = arith.constant 28 : index
    %c0_172 = arith.constant 0 : index
    %328 = vector.load %arg8[%c0_171, %c28, %c0_172] : memref<1x49x64xf32, #tpu.memory_space<vmem>>, vector<1x1x64xf32>
    %329 = vector.shape_cast %328 : vector<1x1x64xf32> to vector<1x64xf32>
    %330 = vector.shape_cast %327 : vector<1x64xf32> to vector<1x1x64xf32>
    tpu.vector_store %arg8[%c0_171, %c28, %c0_172], %330 {strides = array<i32>} : memref<1x49x64xf32, #tpu.memory_space<vmem>>, vector<1x1x64xf32>,
    %331 = vector.extract_strided_slice %214 {offsets = [130, 0], sizes = [1, 64], strides = [1, 1]} : vector<224x64xf32> to vector<1x64xf32>
    %c0_173 = arith.constant 0 : index
    %c29 = arith.constant 29 : index
    %c0_174 = arith.constant 0 : index
    %332 = vector.load %arg8[%c0_173, %c29, %c0_174] : memref<1x49x64xf32, #tpu.memory_space<vmem>>, vector<1x1x64xf32>
    %333 = vector.shape_cast %332 : vector<1x1x64xf32> to vector<1x64xf32>
    %334 = vector.shape_cast %331 : vector<1x64xf32> to vector<1x1x64xf32>
    tpu.vector_store %arg8[%c0_173, %c29, %c0_174], %334 {strides = array<i32>} : memref<1x49x64xf32, #tpu.memory_space<vmem>>, vector<1x1x64xf32>,
    %335 = vector.extract_strided_slice %214 {offsets = [132, 0], sizes = [1, 64], strides = [1, 1]} : vector<224x64xf32> to vector<1x64xf32>
    %c0_175 = arith.constant 0 : index
    %c30 = arith.constant 30 : index
    %c0_176 = arith.constant 0 : index
    %336 = vector.load %arg8[%c0_175, %c30, %c0_176] : memref<1x49x64xf32, #tpu.memory_space<vmem>>, vector<1x1x64xf32>
    %337 = vector.shape_cast %336 : vector<1x1x64xf32> to vector<1x64xf32>
    %338 = vector.shape_cast %335 : vector<1x64xf32> to vector<1x1x64xf32>
    tpu.vector_store %arg8[%c0_175, %c30, %c0_176], %338 {strides = array<i32>} : memref<1x49x64xf32, #tpu.memory_space<vmem>>, vector<1x1x64xf32>,
    %339 = vector.extract_strided_slice %214 {offsets = [134, 0], sizes = [1, 64], strides = [1, 1]} : vector<224x64xf32> to vector<1x64xf32>
    %c0_177 = arith.constant 0 : index
    %c31 = arith.constant 31 : index
    %c0_178 = arith.constant 0 : index
    %340 = vector.load %arg8[%c0_177, %c31, %c0_178] : memref<1x49x64xf32, #tpu.memory_space<vmem>>, vector<1x1x64xf32>
    %341 = vector.shape_cast %340 : vector<1x1x64xf32> to vector<1x64xf32>
    %342 = vector.shape_cast %339 : vector<1x64xf32> to vector<1x1x64xf32>
    tpu.vector_store %arg8[%c0_177, %c31, %c0_178], %342 {strides = array<i32>} : memref<1x49x64xf32, #tpu.memory_space<vmem>>, vector<1x1x64xf32>,
    %343 = vector.extract_strided_slice %214 {offsets = [136, 0], sizes = [1, 64], strides = [1, 1]} : vector<224x64xf32> to vector<1x64xf32>
    %c0_179 = arith.constant 0 : index
    %c32_180 = arith.constant 32 : index
    %c0_181 = arith.constant 0 : index
    %344 = vector.load %arg8[%c0_179, %c32_180, %c0_181] : memref<1x49x64xf32, #tpu.memory_space<vmem>>, vector<1x1x64xf32>
    %345 = vector.shape_cast %344 : vector<1x1x64xf32> to vector<1x64xf32>
    %346 = vector.shape_cast %343 : vector<1x64xf32> to vector<1x1x64xf32>
    tpu.vector_store %arg8[%c0_179, %c32_180, %c0_181], %346 {strides = array<i32>} : memref<1x49x64xf32, #tpu.memory_space<vmem>>, vector<1x1x64xf32>,
    %347 = vector.extract_strided_slice %214 {offsets = [138, 0], sizes = [1, 64], strides = [1, 1]} : vector<224x64xf32> to vector<1x64xf32>
    %c0_182 = arith.constant 0 : index
    %c33_183 = arith.constant 33 : index
    %c0_184 = arith.constant 0 : index
    %348 = vector.load %arg8[%c0_182, %c33_183, %c0_184] : memref<1x49x64xf32, #tpu.memory_space<vmem>>, vector<1x1x64xf32>
    %349 = vector.shape_cast %348 : vector<1x1x64xf32> to vector<1x64xf32>
    %350 = vector.shape_cast %347 : vector<1x64xf32> to vector<1x1x64xf32>
    tpu.vector_store %arg8[%c0_182, %c33_183, %c0_184], %350 {strides = array<i32>} : memref<1x49x64xf32, #tpu.memory_space<vmem>>, vector<1x1x64xf32>,
    %351 = vector.extract_strided_slice %214 {offsets = [140, 0], sizes = [1, 64], strides = [1, 1]} : vector<224x64xf32> to vector<1x64xf32>
    %c0_185 = arith.constant 0 : index
    %c34_186 = arith.constant 34 : index
    %c0_187 = arith.constant 0 : index
    %352 = vector.load %arg8[%c0_185, %c34_186, %c0_187] : memref<1x49x64xf32, #tpu.memory_space<vmem>>, vector<1x1x64xf32>
    %353 = vector.shape_cast %352 : vector<1x1x64xf32> to vector<1x64xf32>
    %354 = vector.shape_cast %351 : vector<1x64xf32> to vector<1x1x64xf32>
    tpu.vector_store %arg8[%c0_185, %c34_186, %c0_187], %354 {strides = array<i32>} : memref<1x49x64xf32, #tpu.memory_space<vmem>>, vector<1x1x64xf32>,
    %355 = vector.extract_strided_slice %214 {offsets = [160, 0], sizes = [1, 64], strides = [1, 1]} : vector<224x64xf32> to vector<1x64xf32>
    %c0_188 = arith.constant 0 : index
    %c35 = arith.constant 35 : index
    %c0_189 = arith.constant 0 : index
    %356 = vector.load %arg8[%c0_188, %c35, %c0_189] : memref<1x49x64xf32, #tpu.memory_space<vmem>>, vector<1x1x64xf32>
    %357 = vector.shape_cast %356 : vector<1x1x64xf32> to vector<1x64xf32>
    %358 = vector.shape_cast %355 : vector<1x64xf32> to vector<1x1x64xf32>
    tpu.vector_store %arg8[%c0_188, %c35, %c0_189], %358 {strides = array<i32>} : memref<1x49x64xf32, #tpu.memory_space<vmem>>, vector<1x1x64xf32>,
    %359 = vector.extract_strided_slice %214 {offsets = [162, 0], sizes = [1, 64], strides = [1, 1]} : vector<224x64xf32> to vector<1x64xf32>
    %c0_190 = arith.constant 0 : index
    %c36 = arith.constant 36 : index
    %c0_191 = arith.constant 0 : index
    %360 = vector.load %arg8[%c0_190, %c36, %c0_191] : memref<1x49x64xf32, #tpu.memory_space<vmem>>, vector<1x1x64xf32>
    %361 = vector.shape_cast %360 : vector<1x1x64xf32> to vector<1x64xf32>
    %362 = vector.shape_cast %359 : vector<1x64xf32> to vector<1x1x64xf32>
    tpu.vector_store %arg8[%c0_190, %c36, %c0_191], %362 {strides = array<i32>} : memref<1x49x64xf32, #tpu.memory_space<vmem>>, vector<1x1x64xf32>,
    %363 = vector.extract_strided_slice %214 {offsets = [164, 0], sizes = [1, 64], strides = [1, 1]} : vector<224x64xf32> to vector<1x64xf32>
    %c0_192 = arith.constant 0 : index
    %c37 = arith.constant 37 : index
    %c0_193 = arith.constant 0 : index
    %364 = vector.load %arg8[%c0_192, %c37, %c0_193] : memref<1x49x64xf32, #tpu.memory_space<vmem>>, vector<1x1x64xf32>
    %365 = vector.shape_cast %364 : vector<1x1x64xf32> to vector<1x64xf32>
    %366 = vector.shape_cast %363 : vector<1x64xf32> to vector<1x1x64xf32>
    tpu.vector_store %arg8[%c0_192, %c37, %c0_193], %366 {strides = array<i32>} : memref<1x49x64xf32, #tpu.memory_space<vmem>>, vector<1x1x64xf32>,
    %367 = vector.extract_strided_slice %214 {offsets = [166, 0], sizes = [1, 64], strides = [1, 1]} : vector<224x64xf32> to vector<1x64xf32>
    %c0_194 = arith.constant 0 : index
    %c38 = arith.constant 38 : index
    %c0_195 = arith.constant 0 : index
    %368 = vector.load %arg8[%c0_194, %c38, %c0_195] : memref<1x49x64xf32, #tpu.memory_space<vmem>>, vector<1x1x64xf32>
    %369 = vector.shape_cast %368 : vector<1x1x64xf32> to vector<1x64xf32>
    %370 = vector.shape_cast %367 : vector<1x64xf32> to vector<1x1x64xf32>
    tpu.vector_store %arg8[%c0_194, %c38, %c0_195], %370 {strides = array<i32>} : memref<1x49x64xf32, #tpu.memory_space<vmem>>, vector<1x1x64xf32>,
    %371 = vector.extract_strided_slice %214 {offsets = [168, 0], sizes = [1, 64], strides = [1, 1]} : vector<224x64xf32> to vector<1x64xf32>
    %c0_196 = arith.constant 0 : index
    %c39 = arith.constant 39 : index
    %c0_197 = arith.constant 0 : index
    %372 = vector.load %arg8[%c0_196, %c39, %c0_197] : memref<1x49x64xf32, #tpu.memory_space<vmem>>, vector<1x1x64xf32>
    %373 = vector.shape_cast %372 : vector<1x1x64xf32> to vector<1x64xf32>
    %374 = vector.shape_cast %371 : vector<1x64xf32> to vector<1x1x64xf32>
    tpu.vector_store %arg8[%c0_196, %c39, %c0_197], %374 {strides = array<i32>} : memref<1x49x64xf32, #tpu.memory_space<vmem>>, vector<1x1x64xf32>,
    %375 = vector.extract_strided_slice %214 {offsets = [170, 0], sizes = [1, 64], strides = [1, 1]} : vector<224x64xf32> to vector<1x64xf32>
    %c0_198 = arith.constant 0 : index
    %c40 = arith.constant 40 : index
    %c0_199 = arith.constant 0 : index
    %376 = vector.load %arg8[%c0_198, %c40, %c0_199] : memref<1x49x64xf32, #tpu.memory_space<vmem>>, vector<1x1x64xf32>
    %377 = vector.shape_cast %376 : vector<1x1x64xf32> to vector<1x64xf32>
    %378 = vector.shape_cast %375 : vector<1x64xf32> to vector<1x1x64xf32>
    tpu.vector_store %arg8[%c0_198, %c40, %c0_199], %378 {strides = array<i32>} : memref<1x49x64xf32, #tpu.memory_space<vmem>>, vector<1x1x64xf32>,
    %379 = vector.extract_strided_slice %214 {offsets = [172, 0], sizes = [1, 64], strides = [1, 1]} : vector<224x64xf32> to vector<1x64xf32>
    %c0_200 = arith.constant 0 : index
    %c41 = arith.constant 41 : index
    %c0_201 = arith.constant 0 : index
    %380 = vector.load %arg8[%c0_200, %c41, %c0_201] : memref<1x49x64xf32, #tpu.memory_space<vmem>>, vector<1x1x64xf32>
    %381 = vector.shape_cast %380 : vector<1x1x64xf32> to vector<1x64xf32>
    %382 = vector.shape_cast %379 : vector<1x64xf32> to vector<1x1x64xf32>
    tpu.vector_store %arg8[%c0_200, %c41, %c0_201], %382 {strides = array<i32>} : memref<1x49x64xf32, #tpu.memory_space<vmem>>, vector<1x1x64xf32>,
    %383 = vector.extract_strided_slice %214 {offsets = [192, 0], sizes = [1, 64], strides = [1, 1]} : vector<224x64xf32> to vector<1x64xf32>
    %c0_202 = arith.constant 0 : index
    %c42 = arith.constant 42 : index
    %c0_203 = arith.constant 0 : index
    %384 = vector.load %arg8[%c0_202, %c42, %c0_203] : memref<1x49x64xf32, #tpu.memory_space<vmem>>, vector<1x1x64xf32>
    %385 = vector.shape_cast %384 : vector<1x1x64xf32> to vector<1x64xf32>
    %386 = vector.shape_cast %383 : vector<1x64xf32> to vector<1x1x64xf32>
    tpu.vector_store %arg8[%c0_202, %c42, %c0_203], %386 {strides = array<i32>} : memref<1x49x64xf32, #tpu.memory_space<vmem>>, vector<1x1x64xf32>,
    %387 = vector.extract_strided_slice %214 {offsets = [194, 0], sizes = [1, 64], strides = [1, 1]} : vector<224x64xf32> to vector<1x64xf32>
    %c0_204 = arith.constant 0 : index
    %c43 = arith.constant 43 : index
    %c0_205 = arith.constant 0 : index
    %388 = vector.load %arg8[%c0_204, %c43, %c0_205] : memref<1x49x64xf32, #tpu.memory_space<vmem>>, vector<1x1x64xf32>
    %389 = vector.shape_cast %388 : vector<1x1x64xf32> to vector<1x64xf32>
    %390 = vector.shape_cast %387 : vector<1x64xf32> to vector<1x1x64xf32>
    tpu.vector_store %arg8[%c0_204, %c43, %c0_205], %390 {strides = array<i32>} : memref<1x49x64xf32, #tpu.memory_space<vmem>>, vector<1x1x64xf32>,
    %391 = vector.extract_strided_slice %214 {offsets = [196, 0], sizes = [1, 64], strides = [1, 1]} : vector<224x64xf32> to vector<1x64xf32>
    %c0_206 = arith.constant 0 : index
    %c44 = arith.constant 44 : index
    %c0_207 = arith.constant 0 : index
    %392 = vector.load %arg8[%c0_206, %c44, %c0_207] : memref<1x49x64xf32, #tpu.memory_space<vmem>>, vector<1x1x64xf32>
    %393 = vector.shape_cast %392 : vector<1x1x64xf32> to vector<1x64xf32>
    %394 = vector.shape_cast %391 : vector<1x64xf32> to vector<1x1x64xf32>
    tpu.vector_store %arg8[%c0_206, %c44, %c0_207], %394 {strides = array<i32>} : memref<1x49x64xf32, #tpu.memory_space<vmem>>, vector<1x1x64xf32>,
    %395 = vector.extract_strided_slice %214 {offsets = [198, 0], sizes = [1, 64], strides = [1, 1]} : vector<224x64xf32> to vector<1x64xf32>
    %c0_208 = arith.constant 0 : index
    %c45 = arith.constant 45 : index
    %c0_209 = arith.constant 0 : index
    %396 = vector.load %arg8[%c0_208, %c45, %c0_209] : memref<1x49x64xf32, #tpu.memory_space<vmem>>, vector<1x1x64xf32>
    %397 = vector.shape_cast %396 : vector<1x1x64xf32> to vector<1x64xf32>
    %398 = vector.shape_cast %395 : vector<1x64xf32> to vector<1x1x64xf32>
    tpu.vector_store %arg8[%c0_208, %c45, %c0_209], %398 {strides = array<i32>} : memref<1x49x64xf32, #tpu.memory_space<vmem>>, vector<1x1x64xf32>,
    %399 = vector.extract_strided_slice %214 {offsets = [200, 0], sizes = [1, 64], strides = [1, 1]} : vector<224x64xf32> to vector<1x64xf32>
    %c0_210 = arith.constant 0 : index
    %c46 = arith.constant 46 : index
    %c0_211 = arith.constant 0 : index
    %400 = vector.load %arg8[%c0_210, %c46, %c0_211] : memref<1x49x64xf32, #tpu.memory_space<vmem>>, vector<1x1x64xf32>
    %401 = vector.shape_cast %400 : vector<1x1x64xf32> to vector<1x64xf32>
    %402 = vector.shape_cast %399 : vector<1x64xf32> to vector<1x1x64xf32>
    tpu.vector_store %arg8[%c0_210, %c46, %c0_211], %402 {strides = array<i32>} : memref<1x49x64xf32, #tpu.memory_space<vmem>>, vector<1x1x64xf32>,
    %403 = vector.extract_strided_slice %214 {offsets = [202, 0], sizes = [1, 64], strides = [1, 1]} : vector<224x64xf32> to vector<1x64xf32>
    %c0_212 = arith.constant 0 : index
    %c47 = arith.constant 47 : index
    %c0_213 = arith.constant 0 : index
    %404 = vector.load %arg8[%c0_212, %c47, %c0_213] : memref<1x49x64xf32, #tpu.memory_space<vmem>>, vector<1x1x64xf32>
    %405 = vector.shape_cast %404 : vector<1x1x64xf32> to vector<1x64xf32>
    %406 = vector.shape_cast %403 : vector<1x64xf32> to vector<1x1x64xf32>
    tpu.vector_store %arg8[%c0_212, %c47, %c0_213], %406 {strides = array<i32>} : memref<1x49x64xf32, #tpu.memory_space<vmem>>, vector<1x1x64xf32>,
    %407 = vector.extract_strided_slice %214 {offsets = [204, 0], sizes = [1, 64], strides = [1, 1]} : vector<224x64xf32> to vector<1x64xf32>
    %c0_214 = arith.constant 0 : index
    %c48_215 = arith.constant 48 : index
    %c0_216 = arith.constant 0 : index
    %408 = vector.load %arg8[%c0_214, %c48_215, %c0_216] : memref<1x49x64xf32, #tpu.memory_space<vmem>>, vector<1x1x64xf32>
    %409 = vector.shape_cast %408 : vector<1x1x64xf32> to vector<1x64xf32>
    %410 = vector.shape_cast %407 : vector<1x64xf32> to vector<1x1x64xf32>
    tpu.vector_store %arg8[%c0_214, %c48_215, %c0_216], %410 {strides = array<i32>} : memref<1x49x64xf32, #tpu.memory_space<vmem>>, vector<1x1x64xf32>,
    return
  }
  func.func @transform_0(%arg0: i32) -> (i32, i32, i32) {
    %c0_i32 = arith.constant 0 : i32
    %c0_i32_0 = arith.constant 0 : i32
    %c0_i32_1 = arith.constant 0 : i32
    return %arg0, %c0_i32, %c0_i32_0 : i32, i32, i32
  }
  func.func @transform_1(%arg0: i32) -> (i32, i32) {
    %c0_i32 = arith.constant 0 : i32
    %c0_i32_0 = arith.constant 0 : i32
    %c0_i32_1 = arith.constant 0 : i32
    return %c0_i32, %c0_i32_0 : i32, i32
  }
  func.func @transform_2(%arg0: i32) -> (i32, i32) {
    %c0_i32 = arith.constant 0 : i32
    %c0_i32_0 = arith.constant 0 : i32
    %c0_i32_1 = arith.constant 0 : i32
    return %c0_i32, %c0_i32_0 : i32, i32
  }
  func.func @transform_3(%arg0: i32) -> (i32, i32) {
    %c0_i32 = arith.constant 0 : i32
    %c0_i32_0 = arith.constant 0 : i32
    %c0_i32_1 = arith.constant 0 : i32
    return %c0_i32, %c0_i32_0 : i32, i32
  }
  func.func @transform_4(%arg0: i32) -> (i32, i32) {
    %c0_i32 = arith.constant 0 : i32
    %c0_i32_0 = arith.constant 0 : i32
    %c0_i32_1 = arith.constant 0 : i32
    return %c0_i32, %c0_i32_0 : i32, i32
  }
  func.func @transform_5(%arg0: i32) -> (i32, i32) {
    %c0_i32 = arith.constant 0 : i32
    %c0_i32_0 = arith.constant 0 : i32
    %c0_i32_1 = arith.constant 0 : i32
    return %c0_i32, %c0_i32_0 : i32, i32
  }
  func.func @transform_6(%arg0: i32) -> (i32, i32) {
    %c0_i32 = arith.constant 0 : i32
    %c0_i32_0 = arith.constant 0 : i32
    %c0_i32_1 = arith.constant 0 : i32
    return %c0_i32, %c0_i32_0 : i32, i32
  }
  func.func @transform_7(%arg0: i32) -> (i32, i32, i32) {
    %c0_i32 = arith.constant 0 : i32
    %c0_i32_0 = arith.constant 0 : i32
    %c0_i32_1 = arith.constant 0 : i32
    return %arg0, %c0_i32, %c0_i32_0 : i32, i32, i32
  }
}

module attributes {stable_mosaic.version = 11 : i64} {
  func.func @_fc_kernel(%arg0: memref<2x3136xf32, #tpu.memory_space<vmem>>, %arg1: memref<3136x512xbf16, #tpu.memory_space<vmem>>, %arg2: memref<1x512xf32, #tpu.memory_space<vmem>>, %arg3: memref<512x10xbf16, #tpu.memory_space<vmem>>, %arg4: memref<1x10xf32, #tpu.memory_space<vmem>>, %arg5: memref<2x10xf32, #tpu.memory_space<vmem>>) attributes {dimension_semantics = [], scalar_prefetch = 0 : i64, scratch_operands = 0 : i64, tpu.core_type = #tpu.core_type<tc>} {
    %c0 = arith.constant 0 : index
    %c0_0 = arith.constant 0 : index
    %0 = vector.load %arg0[%c0, %c0_0] : memref<2x3136xf32, #tpu.memory_space<vmem>>, vector<2x3136xf32>
    %1 = arith.truncf %0 : vector<2x3136xf32> to vector<2x3136xbf16>
    %c0_1 = arith.constant 0 : index
    %c0_2 = arith.constant 0 : index
    %2 = vector.load %arg1[%c0_1, %c0_2] : memref<3136x512xbf16, #tpu.memory_space<vmem>>, vector<3136x512xbf16>
    %cst = arith.constant dense<0.000000e+00> : vector<2x512xf32>
    %3 = tpu.matmul %1, %2, %cst {dimension_numbers = #tpu.dot_dimension_numbers<[1], [0], [0], [1], [0, 0, 1, 1], [], []>} : vector<2x3136xbf16>, vector<3136x512xbf16>, vector<2x512xf32> -> vector<2x512xf32>
    %c0_3 = arith.constant 0 : index
    %c0_4 = arith.constant 0 : index
    %4 = vector.load %arg2[%c0_3, %c0_4] : memref<1x512xf32, #tpu.memory_space<vmem>>, vector<1x512xf32>
    %5 = vector.broadcast %4 : vector<1x512xf32> to vector<2x512xf32>
    %6 = arith.addf %3, %5 : vector<2x512xf32>
    %cst_5 = arith.constant 0.000000e+00 : f32
    %7 = vector.broadcast %cst_5 : f32 to vector<2x512xf32>
    %8 = arith.maximumf %6, %7 : vector<2x512xf32>
    %9 = arith.truncf %8 : vector<2x512xf32> to vector<2x512xbf16>
    %c0_6 = arith.constant 0 : index
    %c0_7 = arith.constant 0 : index
    %10 = vector.load %arg3[%c0_6, %c0_7] : memref<512x10xbf16, #tpu.memory_space<vmem>>, vector<512x10xbf16>
    %cst_8 = arith.constant dense<0.000000e+00> : vector<2x10xf32>
    %11 = tpu.matmul %9, %10, %cst_8 {dimension_numbers = #tpu.dot_dimension_numbers<[1], [0], [0], [1], [0, 0, 1, 1], [], []>} : vector<2x512xbf16>, vector<512x10xbf16>, vector<2x10xf32> -> vector<2x10xf32>
    %c0_9 = arith.constant 0 : index
    %c0_10 = arith.constant 0 : index
    %12 = vector.load %arg4[%c0_9, %c0_10] : memref<1x10xf32, #tpu.memory_space<vmem>>, vector<1x10xf32>
    %13 = vector.broadcast %12 : vector<1x10xf32> to vector<2x10xf32>
    %14 = arith.addf %11, %13 : vector<2x10xf32>
    %c0_11 = arith.constant 0 : index
    %c0_12 = arith.constant 0 : index
    %15 = vector.load %arg5[%c0_11, %c0_12] : memref<2x10xf32, #tpu.memory_space<vmem>>, vector<2x10xf32>
    tpu.vector_store %arg5[%c0_11, %c0_12], %14 {strides = array<i32>} : memref<2x10xf32, #tpu.memory_space<vmem>>, vector<2x10xf32>,
    return
  }
}

</mosaic_0001>

<bundles_post_ra>
// kernel: forward_pallas.3
= control target key start
LH: loop header
LB: loop body
LE: loop exit
PB: predicated region body
PF: predicated region fallthrough
CT: control target
= control target key end

     0   :  { %10 = vsyncpa [#allocation3], 0  ;;  %s8999_s0 = inlined_call_operand.vmem [shape: f32[2,3136], index: 0, kind: input, shape index: {}]   ;;  %s9000_s1 = inlined_call_operand.hbm [shape: bf16[3136,512], index: 1, kind: input, shape index: {}]   ;;  %s9001_s2 = inlined_call_operand.hbm [shape: f32[1,512], index: 2, kind: input, shape index: {}]   ;;  %s9002_s3 = inlined_call_operand.vmem [shape: bf16[512,10], index: 3, kind: input, shape index: {}]   ;;  %s9003_s4 = inlined_call_operand.hbm [shape: f32[1,10], index: 4, kind: input, shape index: {}]   ;;  %s9004_s5 = inlined_call_operand.hbm [shape: f32[2,10], index: 5, kind: output, shape index: {}]  }
   0x1   :  { %11 = vsyncpa [#allocation6], 0 }
   0x2   :  { %12 = vsyncpa [#allocation4], 0  ;;  %s8677_s18 = smov [#allocation5]   ;;  %s8678_s20 = smov [#allocation2]  }
   0x3   :  { %s33_s19 = sshll.u32 %s8677_s18, 4  ;;  %s20_s21 = sshll.u32 %s8678_s20, 4  ;;  %s34_s19 = int_to_ptr.vmem [resolvable:$true] %s33_s19  ;;  %s8715_s21 = int_to_ptr.vmem [resolvable:$true] %s20_s21 }
   0x4   :  { %s8583_s24 = scalar_lea.hbm %s9001_s2, 64 }
   0x5   :  { %p8584_p0 = scmp.ne.s32.totalorder %s9001_s2, %s8583_s24  ;;  %p8587_p1 = scmp.lt.u32.totalorder %s8583_s24, %s9001_s2 }
   0x7   :  { %p8589_p2 = pnand %p8587_p1, %p8584_p0 }
   0x9   :  { %8592 = shalt.err (!%p8589_p2)
}
   0xa   :  { %s8593_s29 = scalar_lea.vmem %s34_s19, 64  ;;  %p8598_p4 = scmp.lt.s32.totalorder %s34_s19, %s34_s19 }
   0xb   :  { %p8594_p3 = scmp.ne.s32.totalorder %s34_s19, %s8593_s29  ;;  %p8599_p5 = scmp.lt.s32.totalorder %s8593_s29, %s8593_s29 }
   0xd   :  { %p8600_p6 = por %p8599_p5, %p8598_p4 }
   0xf   :  { %p8601_p7 = pnand %p8600_p6, %p8594_p3 }
  0x11   :  { %8604 = shalt.err (!%p8601_p7)
}
  0x12   :  { %36 = dma.hbm_to_vmem [thread:$0]  %s9001_s2, 64, %s34_s19, [#allocation6]  }
  0x13   :  { %s8605_s9 = scalar_lea.hbm %s9000_s1, 100352 }
  0x14   :  { %p8606_p8 = scmp.ne.s32.totalorder %s9000_s1, %s8605_s9  ;;  %p8609_p9 = scmp.lt.u32.totalorder %s8605_s9, %s9000_s1 }
  0x16   :  { %p8611_p10 = pnand %p8609_p9, %p8606_p8 }
  0x18   :  { %8614 = shalt.err (!%p8611_p10)
}
  0x19   :  { %s8615_s14 = scalar_lea.vmem %s8715_s21, 100352  ;;  %p8620_p12 = scmp.lt.s32.totalorder %s8715_s21, %s8715_s21 }
  0x1a   :  { %p8616_p11 = scmp.ne.s32.totalorder %s8715_s21, %s8615_s14  ;;  %p8621_p13 = scmp.lt.s32.totalorder %s8615_s14, %s8615_s14 }
  0x1c   :  { %p8622_p0 = por %p8621_p13, %p8620_p12 }
  0x1e   :  { %p8623_p1 = pnand %p8622_p0, %p8616_p11 }
  0x20   :  { %8626 = shalt.err (!%p8623_p1)
}
  0x21   :  { %s8679_s2 = smov 256   ;;  %s8680_s15 = smov 16  }
  0x22   :  { %26 = dma.hbm_to_vmem [thread:$0]  %s9000_s1, 100352, %s8715_s21, [#allocation3], %s8679_s2, %s8679_s2, %s8680_s15  }
  0x23   :  { %s8681_s18 = smov [#allocation7]   ;;  %s8627_s23 = scalar_lea.hbm %s9003_s4, 16 }
  0x24   :  { %s45_s19 = sshll.u32 %s8681_s18, 4  ;;  %p8628_p2 = scmp.ne.s32.totalorder %s9003_s4, %s8627_s23  ;;  %s46_s19 = int_to_ptr.vmem [resolvable:$true] %s45_s19 }
  0x25   :  { %p8631_p3 = scmp.lt.u32.totalorder %s8627_s23, %s9003_s4 }
  0x27   :  { %p8633_p4 = pnand %p8631_p3, %p8628_p2 }
  0x29   :  { %8636 = shalt.err (!%p8633_p4)
}
  0x2a   :  { %s8637_s28 = scalar_lea.vmem %s46_s19, 16  ;;  %s8641_s1 = scalar_lea.vmem %s46_s19, 32 }
  0x2b   :  { %p8638_p5 = scmp.ne.s32.totalorder %s46_s19, %s8637_s28  ;;  %p8642_p6 = scmp.lt.s32.totalorder %s46_s19, %s46_s19 }
  0x2c   :  { %p8643_p7 = scmp.lt.s32.totalorder %s8641_s1, %s8637_s28 }
  0x2e   :  { %p8644_p8 = por %p8643_p7, %p8642_p6 }
  0x30   :  { %p8645_p9 = pnand %p8644_p8, %p8638_p5 }
  0x32   :  { %8648 = shalt.err (!%p8645_p9)
}
  0x33   :  { %48 = dma.hbm_to_vmem [thread:$0]  %s9003_s4, 16, %s46_s19, [#allocation6]  }
  0x34   :  { %8671 = dma.done.wait [#allocation3], 100352  }
  0x35   :  { %8672 = vsyncadd [#allocation3], 4294866944 }
  0x36   :  { %8673 = dma.done.wait [#allocation6], 80  }
  0x37   :  { %8674 = vsyncadd [#allocation6], 4294967216  ;;  %v7369_v0 = vld [vmem:[#allocation2 + $0x4] ss:$16 sps:$4 sm:$0xff]   ;;  %v7371_v1 = vld [vmem:[#allocation2 + $0xc] ss:$16 sps:$4 sm:$0xff]   ;;  %v77_v38 = vlaneseq }
  0x38   :  { %4962 = vmatprep.subr.bf16.mxu0 %v7369_v0  ;;  %v7373_v2 = vld [vmem:[#allocation2] ss:$16 sps:$4 sm:$0xff]   ;;  %v7374_v3 = vld [vmem:[#allocation2 + $0x8] ss:$16 sps:$4 sm:$0xff]   ;;  %5495 = vmatprep.subr.bf16.mxu1 %v7371_v1  ;;  %v7375_v4 = vld [vmem:[#allocation2 + $0x24] ss:$16 sps:$4 sm:$0xff]  }
  0x39   :  { %4963 = vmatpush1.bf16.msra.mxu0 %v7373_v2  ;;  %5496 = vmatpush1.bf16.msra.mxu1 %v7374_v3  ;;  %v7377_v5 = vld [vmem:[#allocation2 + $0x2c] ss:$16 sps:$4 sm:$0xff]   ;;  %v7379_v6 = vld [vmem:[#allocation2 + $0x20] ss:$16 sps:$4 sm:$0xff]   ;;  %v7380_v7 = vld [vmem:[#allocation2 + $0x28] ss:$16 sps:$4 sm:$0xff]  }
  0x3a   :  { %4964 = vmatprep.subr.bf16.mxu0 %v7375_v4  ;;  %5497 = vmatprep.subr.bf16.mxu1 %v7377_v5  ;;  %v7381_v8 = vld [vmem:[#allocation2 + $0x44] ss:$16 sps:$4 sm:$0xff]   ;;  %v7383_v9 = vld [vmem:[#allocation2 + $0x4c] ss:$16 sps:$4 sm:$0xff]   ;;  %v7385_v10 = vld [vmem:[#allocation2 + $0x40] ss:$16 sps:$4 sm:$0xff]  }
  0x3b   :  { %v7386_v11 = vld [vmem:[#allocation2 + $0x48] ss:$16 sps:$4 sm:$0xff]   ;;  %v7387_v12 = vld [vmem:[#allocation2 + $0x64] ss:$16 sps:$4 sm:$0xff]   ;;  %v7389_v13 = vld [vmem:[#allocation2 + $0x6c] ss:$16 sps:$4 sm:$0xff]  }
  0x3c   :  { %v7391_v14 = vld [vmem:[#allocation2 + $0x60] ss:$16 sps:$4 sm:$0xff]   ;;  %v7392_v15 = vld [vmem:[#allocation2 + $0x68] ss:$16 sps:$4 sm:$0xff]   ;;  %v7393_v16 = vld [vmem:[#allocation2 + $0x84] ss:$16 sps:$4 sm:$0xff]  }
  0x3d   :  { %4965 = vmatpush1.bf16.msra.mxu0 %v7379_v6  ;;  %5498 = vmatpush1.bf16.msra.mxu1 %v7380_v7  ;;  %v7395_v17 = vld [vmem:[#allocation2 + $0x8c] ss:$16 sps:$4 sm:$0xff]   ;;  %v7397_v18 = vld [vmem:[#allocation2 + $0x80] ss:$16 sps:$4 sm:$0xff]   ;;  %v7398_v19 = vld [vmem:[#allocation2 + $0x88] ss:$16 sps:$4 sm:$0xff]  }
  0x3e   :  { %4966 = vmatprep.subr.bf16.mxu0 %v7381_v8  ;;  %5499 = vmatprep.subr.bf16.mxu1 %v7383_v9  ;;  %v7399_v20 = vld [vmem:[#allocation2 + $0xa4] ss:$16 sps:$4 sm:$0xff]   ;;  %v7401_v21 = vld [vmem:[#allocation2 + $0xac] ss:$16 sps:$4 sm:$0xff]   ;;  %v7403_v22 = vld [vmem:[#allocation2 + $0xa0] ss:$16 sps:$4 sm:$0xff]  }
  0x3f   :  { %v7404_v23 = vld [vmem:[#allocation2 + $0xa8] ss:$16 sps:$4 sm:$0xff]   ;;  %v7405_v24 = vld [vmem:[#allocation2 + $0xc4] ss:$16 sps:$4 sm:$0xff]   ;;  %v7407_v25 = vld [vmem:[#allocation2 + $0xcc] ss:$16 sps:$4 sm:$0xff]  }
  0x40   :  { %v7409_v26 = vld [vmem:[#allocation2 + $0xc0] ss:$16 sps:$4 sm:$0xff]   ;;  %v7410_v27 = vld [vmem:[#allocation2 + $0xc8] ss:$16 sps:$4 sm:$0xff]   ;;  %v7411_v28 = vld [vmem:[#allocation2 + $0xe4] ss:$16 sps:$4 sm:$0xff]  }
  0x41   :  { %4967 = vmatpush1.bf16.msra.mxu0 %v7385_v10  ;;  %5500 = vmatpush1.bf16.msra.mxu1 %v7386_v11  ;;  %v7413_v29 = vld [vmem:[#allocation2 + $0xec] ss:$16 sps:$4 sm:$0xff]   ;;  %v7415_v30 = vld [vmem:[#allocation2 + $0xe0] ss:$16 sps:$4 sm:$0xff]   ;;  %v7416_v31 = vld [vmem:[#allocation2 + $0xe8] ss:$16 sps:$4 sm:$0xff]  }
  0x42   :  { %4968 = vmatprep.subr.bf16.mxu0 %v7387_v12  ;;  %5501 = vmatprep.subr.bf16.mxu1 %v7389_v13  ;;  %v7417_v32 = vld [vmem:[#allocation2 + $0x104] ss:$16 sps:$4 sm:$0xff]   ;;  %v7419_v33 = vld [vmem:[#allocation2 + $0x10c] ss:$16 sps:$4 sm:$0xff]   ;;  %v7421_v34 = vld [vmem:[#allocation2 + $0x100] ss:$16 sps:$4 sm:$0xff]  }
  0x43   :  { %v7422_v35 = vld [vmem:[#allocation2 + $0x108] ss:$16 sps:$4 sm:$0xff]   ;;  %v8682_v36 = vmov 1983009808   ;;  %v7423_v39 = vld [vmem:[#allocation2 + $0x124] ss:$16 sps:$4 sm:$0xff]  }
  0x44   :  { %v75_v37 = vunpack.c.l.s4 %v8682_v36  ;;  %v7425_v40 = vld [vmem:[#allocation2 + $0x12c] ss:$16 sps:$4 sm:$0xff]   ;;  %v7427_v41 = vld [vmem:[#allocation2 + $0x120] ss:$16 sps:$4 sm:$0xff]   ;;  %v8758_v43 = vshrl.u32 %v77_v38, 7  ;;  %vm4958_vm0 = vcmask 523264  }
  0x45   :  { %4969 = vmatpush1.bf16.msra.mxu0 %v7391_v14  ;;  %5502 = vmatpush1.bf16.msra.mxu1 %v7392_v15  ;;  %v7428_v44 = vld [vmem:[#allocation2 + $0x128] ss:$16 sps:$4 sm:$0xff]   ;;  %v7429_v45 = vld [vmem:[#allocation2 + $0x144] ss:$16 sps:$4 sm:$0xff]   ;;  %v7431_v46 = vld [vmem:[#allocation2 + $0x14c] ss:$16 sps:$4 sm:$0xff]  }
  0x46   :  { %4970 = vmatprep.subr.bf16.mxu0 %v7393_v16  ;;  %5503 = vmatprep.subr.bf16.mxu1 %v7395_v17  ;;  %v76_v42 = vunpack.c.0.s8 %v75_v37  ;;  %v7433_v47 = vld [vmem:[#allocation2 + $0x140] ss:$16 sps:$4 sm:$0xff]   ;;  %v7434_v48 = vld [vmem:[#allocation2 + $0x148] ss:$16 sps:$4 sm:$0xff]   ;;  %v7435_v50 = vld [vmem:[#allocation2 + $0x164] ss:$16 sps:$4 sm:$0xff]  }
  0x47   :  { %v7437_v51 = vld [vmem:[#allocation2 + $0x16c] ss:$16 sps:$4 sm:$0xff]   ;;  %v59_v52 = vld [vmem:[%s8999_s0] sm:$0xff]  ;;  %v7440_v55 = vld [vmem:[#allocation2 + $0x168] ss:$16 sps:$4 sm:$0xff]   ;;  %vm6379_vm1 = vcmask 74752  }
  0x48   :  { %v8761_v49 = vsub.s32 %v76_v42, %v8758_v43  ;;  %v7439_v53 = vld [vmem:[#allocation2 + $0x160] ss:$16 sps:$4 sm:$0xff]   ;;  %v7441_v56 = vld [vmem:[#allocation2 + $0x184] ss:$16 sps:$4 sm:$0xff]   ;;  %v7443_v57 = vld [vmem:[#allocation2 + $0x18c] ss:$16 sps:$4 sm:$0xff]   ;;  %v73_v4 = vcombine.high %v59_v52, %v59_v52 }
  0x49   :  { %4971 = vmatpush1.bf16.msra.mxu0 %v7397_v18  ;;  %5504 = vmatpush1.bf16.msra.mxu1 %v7398_v19  ;;  %v7445_v59 = vld [vmem:[#allocation2 + $0x180] ss:$16 sps:$4 sm:$0xff]   ;;  %v7446_v61 = vld [vmem:[#allocation2 + $0x188] ss:$16 sps:$4 sm:$0xff]   ;;  %v7447_v62 = vld [vmem:[#allocation2 + $0x1a4] ss:$16 sps:$4 sm:$0xff]  }
  0x4a   :  { %4972 = vmatprep.subr.bf16.mxu0 %v7399_v20  ;;  %5505 = vmatprep.subr.bf16.mxu1 %v7401_v21  ;;  %v80_v54 = vrot.slane %v59_v52, %v8761_v49  ;;  %v7449_v63 = vld [vmem:[#allocation2 + $0x1ac] ss:$16 sps:$4 sm:$0xff]   ;;  %v7451_v0 = vld [vmem:[#allocation2 + $0x1a0] ss:$16 sps:$4 sm:$0xff]   ;;  %v7452_v1 = vld [vmem:[#allocation2 + $0x1a8] ss:$16 sps:$4 sm:$0xff]   ;;  %v8768_v9 = vrot.slane %v73_v4, %v8761_v49 }
  0x4b   :  { %v7453_v2 = vld [vmem:[#allocation2 + $0x1c4] ss:$16 sps:$4 sm:$0xff]   ;;  %v7455_v3 = vld [vmem:[#allocation2 + $0x1cc] ss:$16 sps:$4 sm:$0xff]   ;;  %v7457_v5 = vld [vmem:[#allocation2 + $0x1c0] ss:$16 sps:$4 sm:$0xff]  }
  0x4c   :  { %v88_v58 = vcombine.high %v80_v54, %v80_v54  ;;  %v7458_v6 = vld [vmem:[#allocation2 + $0x1c8] ss:$16 sps:$4 sm:$0xff]   ;;  %v7459_v7 = vld [vmem:[#allocation2 + $0x1e4] ss:$16 sps:$4 sm:$0xff]   ;;  %v7461_v8 = vld [vmem:[#allocation2 + $0x1ec] ss:$16 sps:$4 sm:$0xff]   ;;  %v89_v14 = vcombine.high %v8768_v9, %v8768_v9  ;;  %v207_v16 = vpack.c.bf16 %v80_v54, %v80_v54 }
  0x4d   :  { %4973 = vmatpush1.bf16.msra.mxu0 %v7403_v22  ;;  %5506 = vmatpush1.bf16.msra.mxu1 %v7404_v23  ;;  %v7463_v10 = vld [vmem:[#allocation2 + $0x1e0] ss:$16 sps:$4 sm:$0xff]   ;;  %v7464_v11 = vld [vmem:[#allocation2 + $0x1e8] ss:$16 sps:$4 sm:$0xff]   ;;  %v7468_v12 = vld [vmem:[#allocation2 + $0x204] ss:$16 sps:$4 sm:$0xff]  }
  0x4e   :  { %4974 = vmatprep.subr.bf16.mxu0 %v7405_v24  ;;  %5507 = vmatprep.subr.bf16.mxu1 %v7407_v25  ;;  %v208_v60 = vpack.c.bf16 %v88_v58, %v88_v58  ;;  %v7471_v13 = vld [vmem:[#allocation2 + $0x20c] ss:$16 sps:$4 sm:$0xff]   ;;  %v7466_v15 = vld [vmem:[#allocation2 + $0x200] ss:$16 sps:$4 sm:$0xff]   ;;  %v7469_v17 = vld [vmem:[#allocation2 + $0x208] ss:$16 sps:$4 sm:$0xff]   ;;  %v210_v20 = vpack.c.bf16 %v89_v14, %v89_v14 }
  0x4f   :  { %v7474_v18 = vld [vmem:[#allocation2 + $0x224] ss:$16 sps:$4 sm:$0xff]   ;;  %v7477_v19 = vld [vmem:[#allocation2 + $0x22c] ss:$16 sps:$4 sm:$0xff]   ;;  %v7472_v21 = vld [vmem:[#allocation2 + $0x220] ss:$16 sps:$4 sm:$0xff]  }
  0x50   :  { %4994 = vmatprep.mubr.bf16.mxu0 %v208_v60  ;;  %5527 = vmatprep.mubr.bf16.mxu1 %v208_v60  ;;  %v7475_v22 = vld [vmem:[#allocation2 + $0x228] ss:$16 sps:$4 sm:$0xff]   ;;  %v7480_v23 = vld [vmem:[#allocation2 + $0x244] ss:$16 sps:$4 sm:$0xff]   ;;  %v7483_v24 = vld [vmem:[#allocation2 + $0x24c] ss:$16 sps:$4 sm:$0xff]  }
  0x51   :  { %4975 = vmatpush1.bf16.msra.mxu0 %v7409_v26  ;;  %5508 = vmatpush1.bf16.msra.mxu1 %v7410_v27  ;;  %v7478_v25 = vld [vmem:[#allocation2 + $0x240] ss:$16 sps:$4 sm:$0xff]   ;;  %v7481_v26 = vld [vmem:[#allocation2 + $0x248] ss:$16 sps:$4 sm:$0xff]   ;;  %v7486_v27 = vld [vmem:[#allocation2 + $0x264] ss:$16 sps:$4 sm:$0xff]  }
  0x52   :  { %4976 = vmatprep.subr.bf16.mxu0 %v7411_v28  ;;  %5509 = vmatprep.subr.bf16.mxu1 %v7413_v29  ;;  %v7489_v28 = vld [vmem:[#allocation2 + $0x26c] ss:$16 sps:$4 sm:$0xff]   ;;  %v7484_v29 = vld [vmem:[#allocation2 + $0x260] ss:$16 sps:$4 sm:$0xff]   ;;  %v7499_v38 = vld [vmem:[#allocation2 + $0x2a8] ss:$16 sps:$4 sm:$0xff]  }
  0x53   :  { %v7501_v36 = vld [vmem:[#allocation2 + $0x2ac] ss:$16 sps:$4 sm:$0xff]   ;;  %v7496_v37 = vld [vmem:[#allocation2 + $0x2a0] ss:$16 sps:$4 sm:$0xff]   ;;  %v7505_v42 = vld [vmem:[#allocation2 + $0x2c8] ss:$16 sps:$4 sm:$0xff]  }
  0x54   :  { %v7517_v52 = vld [vmem:[#allocation2 + $0x308] ss:$16 sps:$4 sm:$0xff]   ;;  %v7525_v54 = vld [vmem:[#allocation2 + $0x32c] ss:$16 sps:$4 sm:$0xff]   ;;  %v7558_v14 = vld [vmem:[#allocation2 + $0x3e4] ss:$16 sps:$4 sm:$0xff]  }
  0x55   :  { %4977 = vmatpush1.bf16.msra.mxu0 %v7415_v30  ;;  %5510 = vmatpush1.bf16.msra.mxu1 %v7416_v31  ;;  %v7487_v30 = vld [vmem:[#allocation2 + $0x268] ss:$16 sps:$4 sm:$0xff]   ;;  %v7492_v31 = vld [vmem:[#allocation2 + $0x284] ss:$16 sps:$4 sm:$0xff]   ;;  %v7531_v58 = vld [vmem:[#allocation2 + $0x34c] ss:$16 sps:$4 sm:$0xff]  }
  0x56   :  { %4978 = vmatprep.subr.bf16.mxu0 %v7417_v32  ;;  %5511 = vmatprep.subr.bf16.mxu1 %v7419_v33  ;;  %v7495_v32 = vld [vmem:[#allocation2 + $0x28c] ss:$16 sps:$4 sm:$0xff]   ;;  %v7490_v33 = vld [vmem:[#allocation2 + $0x280] ss:$16 sps:$4 sm:$0xff]   ;;  %v7529_v60 = vld [vmem:[#allocation2 + $0x348] ss:$16 sps:$4 sm:$0xff]  }
  0x57   :  { %v7541_v4 = vld [vmem:[#allocation2 + $0x388] ss:$16 sps:$4 sm:$0xff]  }
  0x59   :  { %4979 = vmatpush1.bf16.msra.mxu0 %v7421_v34  ;;  %5512 = vmatpush1.bf16.msra.mxu1 %v7422_v35  ;;  %v7493_v34 = vld [vmem:[#allocation2 + $0x288] ss:$16 sps:$4 sm:$0xff]   ;;  %v7498_v35 = vld [vmem:[#allocation2 + $0x2a4] ss:$16 sps:$4 sm:$0xff]  }
  0x5a   :  { %4980 = vmatprep.subr.bf16.mxu0 %v7423_v39  ;;  %5513 = vmatprep.subr.bf16.mxu1 %v7425_v40  ;;  %v7504_v39 = vld [vmem:[#allocation2 + $0x2c4] ss:$16 sps:$4 sm:$0xff]   ;;  %v7507_v40 = vld [vmem:[#allocation2 + $0x2cc] ss:$16 sps:$4 sm:$0xff]  }
  0x5d   :  { %4981 = vmatpush1.bf16.msra.mxu0 %v7427_v41  ;;  %5514 = vmatpush1.bf16.msra.mxu1 %v7428_v44  ;;  %v7502_v41 = vld [vmem:[#allocation2 + $0x2c0] ss:$16 sps:$4 sm:$0xff]   ;;  %v7510_v44 = vld [vmem:[#allocation2 + $0x2e4] ss:$16 sps:$4 sm:$0xff]  }
  0x5e   :  { %4982 = vmatprep.subr.bf16.mxu0 %v7429_v45  ;;  %5515 = vmatprep.subr.bf16.mxu1 %v7431_v46  ;;  %v7513_v45 = vld [vmem:[#allocation2 + $0x2ec] ss:$16 sps:$4 sm:$0xff]   ;;  %v7508_v46 = vld [vmem:[#allocation2 + $0x2e0] ss:$16 sps:$4 sm:$0xff]  }
  0x61   :  { %4983 = vmatpush1.bf16.msra.mxu0 %v7433_v47  ;;  %5516 = vmatpush1.bf16.msra.mxu1 %v7434_v48  ;;  %v7511_v47 = vld [vmem:[#allocation2 + $0x2e8] ss:$16 sps:$4 sm:$0xff]   ;;  %v7516_v48 = vld [vmem:[#allocation2 + $0x304] ss:$16 sps:$4 sm:$0xff]  }
  0x62   :  { %4984 = vmatprep.subr.bf16.mxu0 %v7435_v50  ;;  %5517 = vmatprep.subr.bf16.mxu1 %v7437_v51  ;;  %v7519_v50 = vld [vmem:[#allocation2 + $0x30c] ss:$16 sps:$4 sm:$0xff]   ;;  %v7514_v51 = vld [vmem:[#allocation2 + $0x300] ss:$16 sps:$4 sm:$0xff]  }
  0x65   :  { %4985 = vmatpush1.bf16.msra.mxu0 %v7439_v53  ;;  %5518 = vmatpush1.bf16.msra.mxu1 %v7440_v55  ;;  %v7522_v53 = vld [vmem:[#allocation2 + $0x324] ss:$16 sps:$4 sm:$0xff]   ;;  %v7520_v55 = vld [vmem:[#allocation2 + $0x320] ss:$16 sps:$4 sm:$0xff]  }
  0x66   :  { %4986 = vmatprep.subr.bf16.mxu0 %v7441_v56  ;;  %5519 = vmatprep.subr.bf16.mxu1 %v7443_v57  ;;  %v7523_v56 = vld [vmem:[#allocation2 + $0x328] ss:$16 sps:$4 sm:$0xff]   ;;  %v7528_v57 = vld [vmem:[#allocation2 + $0x344] ss:$16 sps:$4 sm:$0xff]  }
  0x69   :  { %4987 = vmatpush1.bf16.msra.mxu0 %v7445_v59  ;;  %5520 = vmatpush1.bf16.msra.mxu1 %v7446_v61  ;;  %v7526_v59 = vld [vmem:[#allocation2 + $0x340] ss:$16 sps:$4 sm:$0xff]   ;;  %v7534_v61 = vld [vmem:[#allocation2 + $0x364] ss:$16 sps:$4 sm:$0xff]  }
  0x6a   :  { %4988 = vmatprep.subr.bf16.mxu0 %v7447_v62  ;;  %5521 = vmatprep.subr.bf16.mxu1 %v7449_v63  ;;  %v7537_v62 = vld [vmem:[#allocation2 + $0x36c] ss:$16 sps:$4 sm:$0xff]   ;;  %v7532_v63 = vld [vmem:[#allocation2 + $0x360] ss:$16 sps:$4 sm:$0xff]  }
  0x6d   :  { %4989 = vmatpush1.bf16.msra.mxu0 %v7451_v0  ;;  %5522 = vmatpush1.bf16.msra.mxu1 %v7452_v1  ;;  %v7535_v0 = vld [vmem:[#allocation2 + $0x368] ss:$16 sps:$4 sm:$0xff]   ;;  %v7540_v1 = vld [vmem:[#allocation2 + $0x384] ss:$16 sps:$4 sm:$0xff]  }
  0x6e   :  { %4990 = vmatprep.subr.bf16.mxu0 %v7453_v2  ;;  %5523 = vmatprep.subr.bf16.mxu1 %v7455_v3  ;;  %v7543_v2 = vld [vmem:[#allocation2 + $0x38c] ss:$16 sps:$4 sm:$0xff]   ;;  %v7538_v3 = vld [vmem:[#allocation2 + $0x380] ss:$16 sps:$4 sm:$0xff]  }
  0x71   :  { %4991 = vmatpush1.bf16.msra.mxu0 %v7457_v5  ;;  %5524 = vmatpush1.bf16.msra.mxu1 %v7458_v6  ;;  %v7546_v5 = vld [vmem:[#allocation2 + $0x3a4] ss:$16 sps:$4 sm:$0xff]   ;;  %v7549_v6 = vld [vmem:[#allocation2 + $0x3ac] ss:$16 sps:$4 sm:$0xff]  }
  0x72   :  { %4992 = vmatprep.subr.bf16.mxu0 %v7459_v7  ;;  %5525 = vmatprep.subr.bf16.mxu1 %v7461_v8  ;;  %v7544_v7 = vld [vmem:[#allocation2 + $0x3a0] ss:$16 sps:$4 sm:$0xff]   ;;  %v7547_v8 = vld [vmem:[#allocation2 + $0x3a8] ss:$16 sps:$4 sm:$0xff]  }
  0x75   :  { %4993 = vmatpush1.bf16.msra.mxu0 %v7463_v10  ;;  %5526 = vmatpush1.bf16.msra.mxu1 %v7464_v11  ;;  %v7552_v10 = vld [vmem:[#allocation2 + $0x3c4] ss:$16 sps:$4 sm:$0xff]   ;;  %v7555_v11 = vld [vmem:[#allocation2 + $0x3cc] ss:$16 sps:$4 sm:$0xff]  }
  0x76   :  { %5003 = vmatprep.subr.bf16.mxu0 %v7468_v12  ;;  %5536 = vmatprep.subr.bf16.mxu1 %v7471_v13  ;;  %v7550_v12 = vld [vmem:[#allocation2 + $0x3c0] ss:$16 sps:$4 sm:$0xff]   ;;  %v7553_v13 = vld [vmem:[#allocation2 + $0x3c8] ss:$16 sps:$4 sm:$0xff]  }
  0x78   :  { %4995 = vmatmul.mubr.bf16.vlgmr.msra.gmra.mrb[0].mxu0 %v207_v16  ;;  %5528 = vmatmul.mubr.bf16.vlgmr.msra.gmra.mrb[0].mxu1 %v207_v16  ;;  %v7556_v16 = vld [vmem:[#allocation2 + $0x3e0] ss:$16 sps:$4 sm:$0xff]  }
  0x79   :  { %5004 = vmatpush1.bf16.msra.mxu0 %v7466_v15  ;;  %5537 = vmatpush1.bf16.msra.mxu1 %v7469_v17  ;;  %v7561_v15 = vld [vmem:[#allocation2 + $0x3ec] ss:$16 sps:$4 sm:$0xff]   ;;  %v7559_v17 = vld [vmem:[#allocation2 + $0x3e8] ss:$16 sps:$4 sm:$0xff]  }
  0x7a   :  { %5005 = vmatprep.subr.bf16.mxu0 %v7474_v18  ;;  %5538 = vmatprep.subr.bf16.mxu1 %v7477_v19  ;;  %v7564_v18 = vld [vmem:[#allocation2 + $0x404] ss:$16 sps:$4 sm:$0xff]   ;;  %v7567_v19 = vld [vmem:[#allocation2 + $0x40c] ss:$16 sps:$4 sm:$0xff]  }
  0x7b   :  { %5035 = vmatprep.mubr.bf16.mxu0 %v210_v20  ;;  %5568 = vmatprep.mubr.bf16.mxu1 %v210_v20  ;;  %v7562_v20 = vld [vmem:[#allocation2 + $0x400] ss:$16 sps:$4 sm:$0xff]  }
  0x7d   :  { %5006 = vmatpush1.bf16.msra.mxu0 %v7472_v21  ;;  %5539 = vmatpush1.bf16.msra.mxu1 %v7475_v22  ;;  %v209_v21 = vpack.c.bf16 %v8768_v9, %v8768_v9  ;;  %v7565_v22 = vld [vmem:[#allocation2 + $0x408] ss:$16 sps:$4 sm:$0xff]  }
  0x7e   :  { %5007 = vmatprep.subr.bf16.mxu0 %v7480_v23  ;;  %5540 = vmatprep.subr.bf16.mxu1 %v7483_v24  ;;  %v8777_v23 = vld [vmem:[%s8999_s0 + $0x8] sm:$0xff]  ;;  %v7570_v24 = vld [vmem:[#allocation2 + $0x424] ss:$16 sps:$4 sm:$0xff]  }
  0x81   :  { %5008 = vmatpush1.bf16.msra.mxu0 %v7478_v25  ;;  %5541 = vmatpush1.bf16.msra.mxu1 %v7481_v26  ;;  %v7573_v25 = vld [vmem:[#allocation2 + $0x42c] ss:$16 sps:$4 sm:$0xff]   ;;  %v8781_v26 = vrot.slane %v8777_v23, %v8761_v49 }
  0x82   :  { %5009 = vmatprep.subr.bf16.mxu0 %v7486_v27  ;;  %5542 = vmatprep.subr.bf16.mxu1 %v7489_v28  ;;  %v7568_v27 = vld [vmem:[#allocation2 + $0x420] ss:$16 sps:$4 sm:$0xff]   ;;  %v7571_v28 = vld [vmem:[#allocation2 + $0x428] ss:$16 sps:$4 sm:$0xff]  }
  0x83   :  { %v105_v9 = vcombine.high %v8781_v26, %v8781_v26 }
  0x85   :  { %5010 = vmatpush1.bf16.msra.mxu0 %v7484_v29  ;;  %5543 = vmatpush1.bf16.msra.mxu1 %v7487_v30  ;;  %v7576_v29 = vld [vmem:[#allocation2 + $0x444] ss:$16 sps:$4 sm:$0xff]   ;;  %v7579_v30 = vld [vmem:[#allocation2 + $0x44c] ss:$16 sps:$4 sm:$0xff]  }
  0x86   :  { %5011 = vmatprep.subr.bf16.mxu0 %v7492_v31  ;;  %5544 = vmatprep.subr.bf16.mxu1 %v7495_v32  ;;  %v212_v31 = vpack.c.bf16 %v105_v9, %v105_v9  ;;  %v7574_v32 = vld [vmem:[#allocation2 + $0x440] ss:$16 sps:$4 sm:$0xff]  }
  0x87   :  { %v7652_v9 = vld [vmem:[#allocation2 + $0x5e0] ss:$16 sps:$4 sm:$0xff]  }
  0x89   :  { %5012 = vmatpush1.bf16.msra.mxu0 %v7490_v33  ;;  %5545 = vmatpush1.bf16.msra.mxu1 %v7493_v34  ;;  %v7577_v33 = vld [vmem:[#allocation2 + $0x448] ss:$16 sps:$4 sm:$0xff]   ;;  %v7582_v34 = vld [vmem:[#allocation2 + $0x464] ss:$16 sps:$4 sm:$0xff]  }
  0x8a   :  { %5013 = vmatprep.subr.bf16.mxu0 %v7498_v35  ;;  %5546 = vmatprep.subr.bf16.mxu1 %v7501_v36  ;;  %v7585_v35 = vld [vmem:[#allocation2 + $0x46c] ss:$16 sps:$4 sm:$0xff]   ;;  %v7580_v36 = vld [vmem:[#allocation2 + $0x460] ss:$16 sps:$4 sm:$0xff]  }
  0x8d   :  { %5014 = vmatpush1.bf16.msra.mxu0 %v7496_v37  ;;  %5547 = vmatpush1.bf16.msra.mxu1 %v7499_v38  ;;  %v7583_v37 = vld [vmem:[#allocation2 + $0x468] ss:$16 sps:$4 sm:$0xff]   ;;  %v7588_v38 = vld [vmem:[#allocation2 + $0x484] ss:$16 sps:$4 sm:$0xff]  }
  0x8e   :  { %5015 = vmatprep.subr.bf16.mxu0 %v7504_v39  ;;  %5548 = vmatprep.subr.bf16.mxu1 %v7507_v40  ;;  %v7591_v39 = vld [vmem:[#allocation2 + $0x48c] ss:$16 sps:$4 sm:$0xff]   ;;  %v7586_v40 = vld [vmem:[#allocation2 + $0x480] ss:$16 sps:$4 sm:$0xff]  }
  0x91   :  { %5016 = vmatpush1.bf16.msra.mxu0 %v7502_v41  ;;  %5549 = vmatpush1.bf16.msra.mxu1 %v7505_v42  ;;  %v7589_v41 = vld [vmem:[#allocation2 + $0x488] ss:$16 sps:$4 sm:$0xff]   ;;  %v7594_v42 = vld [vmem:[#allocation2 + $0x4a4] ss:$16 sps:$4 sm:$0xff]  }
  0x92   :  { %5017 = vmatprep.subr.bf16.mxu0 %v7510_v44  ;;  %5550 = vmatprep.subr.bf16.mxu1 %v7513_v45  ;;  %v7597_v44 = vld [vmem:[#allocation2 + $0x4ac] ss:$16 sps:$4 sm:$0xff]   ;;  %v7592_v45 = vld [vmem:[#allocation2 + $0x4a0] ss:$16 sps:$4 sm:$0xff]  }
  0x95   :  { %5018 = vmatpush1.bf16.msra.mxu0 %v7508_v46  ;;  %5551 = vmatpush1.bf16.msra.mxu1 %v7511_v47  ;;  %v7595_v46 = vld [vmem:[#allocation2 + $0x4a8] ss:$16 sps:$4 sm:$0xff]   ;;  %v7600_v47 = vld [vmem:[#allocation2 + $0x4c4] ss:$16 sps:$4 sm:$0xff]  }
  0x96   :  { %5019 = vmatprep.subr.bf16.mxu0 %v7516_v48  ;;  %5552 = vmatprep.subr.bf16.mxu1 %v7519_v50  ;;  %v7603_v48 = vld [vmem:[#allocation2 + $0x4cc] ss:$16 sps:$4 sm:$0xff]   ;;  %v7598_v50 = vld [vmem:[#allocation2 + $0x4c0] ss:$16 sps:$4 sm:$0xff]  }
  0x99   :  { %5020 = vmatpush1.bf16.msra.mxu0 %v7514_v51  ;;  %5553 = vmatpush1.bf16.msra.mxu1 %v7517_v52  ;;  %v7601_v51 = vld [vmem:[#allocation2 + $0x4c8] ss:$16 sps:$4 sm:$0xff]   ;;  %v7606_v52 = vld [vmem:[#allocation2 + $0x4e4] ss:$16 sps:$4 sm:$0xff]  }
  0x9a   :  { %5021 = vmatprep.subr.bf16.mxu0 %v7522_v53  ;;  %5554 = vmatprep.subr.bf16.mxu1 %v7525_v54  ;;  %v7609_v53 = vld [vmem:[#allocation2 + $0x4ec] ss:$16 sps:$4 sm:$0xff]   ;;  %v7604_v54 = vld [vmem:[#allocation2 + $0x4e0] ss:$16 sps:$4 sm:$0xff]  }
  0x9d   :  { %5022 = vmatpush1.bf16.msra.mxu0 %v7520_v55  ;;  %5555 = vmatpush1.bf16.msra.mxu1 %v7523_v56  ;;  %v7607_v55 = vld [vmem:[#allocation2 + $0x4e8] ss:$16 sps:$4 sm:$0xff]   ;;  %v7612_v56 = vld [vmem:[#allocation2 + $0x504] ss:$16 sps:$4 sm:$0xff]  }
  0x9e   :  { %5023 = vmatprep.subr.bf16.mxu0 %v7528_v57  ;;  %5556 = vmatprep.subr.bf16.mxu1 %v7531_v58  ;;  %v7615_v57 = vld [vmem:[#allocation2 + $0x50c] ss:$16 sps:$4 sm:$0xff]   ;;  %v7610_v58 = vld [vmem:[#allocation2 + $0x500] ss:$16 sps:$4 sm:$0xff]  }
  0xa1   :  { %5024 = vmatpush1.bf16.msra.mxu0 %v7526_v59  ;;  %5557 = vmatpush1.bf16.msra.mxu1 %v7529_v60  ;;  %v7613_v59 = vld [vmem:[#allocation2 + $0x508] ss:$16 sps:$4 sm:$0xff]   ;;  %v7618_v60 = vld [vmem:[#allocation2 + $0x524] ss:$16 sps:$4 sm:$0xff]  }
  0xa2   :  { %5025 = vmatprep.subr.bf16.mxu0 %v7534_v61  ;;  %5558 = vmatprep.subr.bf16.mxu1 %v7537_v62  ;;  %v7621_v61 = vld [vmem:[#allocation2 + $0x52c] ss:$16 sps:$4 sm:$0xff]   ;;  %v7616_v62 = vld [vmem:[#allocation2 + $0x520] ss:$16 sps:$4 sm:$0xff]  }
  0xa5   :  { %5026 = vmatpush1.bf16.msra.mxu0 %v7532_v63  ;;  %5559 = vmatpush1.bf16.msra.mxu1 %v7535_v0  ;;  %v7619_v63 = vld [vmem:[#allocation2 + $0x528] ss:$16 sps:$4 sm:$0xff]   ;;  %v7624_v0 = vld [vmem:[#allocation2 + $0x544] ss:$16 sps:$4 sm:$0xff]  }
  0xa6   :  { %5027 = vmatprep.subr.bf16.mxu0 %v7540_v1  ;;  %5560 = vmatprep.subr.bf16.mxu1 %v7543_v2  ;;  %v7627_v1 = vld [vmem:[#allocation2 + $0x54c] ss:$16 sps:$4 sm:$0xff]   ;;  %v7622_v2 = vld [vmem:[#allocation2 + $0x540] ss:$16 sps:$4 sm:$0xff]  }
  0xa9   :  { %5028 = vmatpush1.bf16.msra.mxu0 %v7538_v3  ;;  %5561 = vmatpush1.bf16.msra.mxu1 %v7541_v4  ;;  %v7625_v3 = vld [vmem:[#allocation2 + $0x548] ss:$16 sps:$4 sm:$0xff]   ;;  %v7630_v4 = vld [vmem:[#allocation2 + $0x564] ss:$16 sps:$4 sm:$0xff]  }
  0xaa   :  { %5029 = vmatprep.subr.bf16.mxu0 %v7546_v5  ;;  %5562 = vmatprep.subr.bf16.mxu1 %v7549_v6  ;;  %v7633_v5 = vld [vmem:[#allocation2 + $0x56c] ss:$16 sps:$4 sm:$0xff]   ;;  %v7628_v6 = vld [vmem:[#allocation2 + $0x560] ss:$16 sps:$4 sm:$0xff]  }
  0xad   :  { %5030 = vmatpush1.bf16.msra.mxu0 %v7544_v7  ;;  %5563 = vmatpush1.bf16.msra.mxu1 %v7547_v8  ;;  %v7631_v7 = vld [vmem:[#allocation2 + $0x568] ss:$16 sps:$4 sm:$0xff]   ;;  %v7636_v8 = vld [vmem:[#allocation2 + $0x584] ss:$16 sps:$4 sm:$0xff]  }
  0xae   :  { %5031 = vmatprep.subr.bf16.mxu0 %v7552_v10  ;;  %5564 = vmatprep.subr.bf16.mxu1 %v7555_v11  ;;  %v7639_v10 = vld [vmem:[#allocation2 + $0x58c] ss:$16 sps:$4 sm:$0xff]   ;;  %v7634_v11 = vld [vmem:[#allocation2 + $0x580] ss:$16 sps:$4 sm:$0xff]  }
  0xb1   :  { %5032 = vmatpush1.bf16.msra.mxu0 %v7550_v12  ;;  %5565 = vmatpush1.bf16.msra.mxu1 %v7553_v13  ;;  %v7637_v12 = vld [vmem:[#allocation2 + $0x588] ss:$16 sps:$4 sm:$0xff]   ;;  %v7642_v13 = vld [vmem:[#allocation2 + $0x5a4] ss:$16 sps:$4 sm:$0xff]  }
  0xb2   :  { %5033 = vmatprep.subr.bf16.mxu0 %v7558_v14  ;;  %5566 = vmatprep.subr.bf16.mxu1 %v7561_v15  ;;  %v7645_v14 = vld [vmem:[#allocation2 + $0x5ac] ss:$16 sps:$4 sm:$0xff]   ;;  %v7640_v15 = vld [vmem:[#allocation2 + $0x5a0] ss:$16 sps:$4 sm:$0xff]  }
  0xb5   :  { %5034 = vmatpush1.bf16.msra.mxu0 %v7556_v16  ;;  %5567 = vmatpush1.bf16.msra.mxu1 %v7559_v17  ;;  %v7643_v16 = vld [vmem:[#allocation2 + $0x5a8] ss:$16 sps:$4 sm:$0xff]   ;;  %v7648_v17 = vld [vmem:[#allocation2 + $0x5c4] ss:$16 sps:$4 sm:$0xff]  }
  0xb6   :  { %5044 = vmatprep.subr.bf16.mxu0 %v7564_v18  ;;  %5577 = vmatprep.subr.bf16.mxu1 %v7567_v19  ;;  %v7651_v18 = vld [vmem:[#allocation2 + $0x5cc] ss:$16 sps:$4 sm:$0xff]   ;;  %v90_v19 = vcombine.high %v8777_v23, %v8777_v23 }
  0xb8   :  { %5036 = vmatmul.mubr.bf16.vlgmr.msra.gmra.mrb[0].mxu0 %v209_v21  ;;  %5569 = vmatmul.mubr.bf16.vlgmr.msra.gmra.mrb[0].mxu1 %v209_v21  ;;  %v7649_v21 = vld [vmem:[#allocation2 + $0x5c8] ss:$16 sps:$4 sm:$0xff]  }
  0xb9   :  { %5045 = vmatpush1.bf16.msra.mxu0 %v7562_v20  ;;  %5578 = vmatpush1.bf16.msra.mxu1 %v7565_v22  ;;  %v7646_v20 = vld [vmem:[#allocation2 + $0x5c0] ss:$16 sps:$4 sm:$0xff]   ;;  %v7654_v22 = vld [vmem:[#allocation2 + $0x5e4] ss:$16 sps:$4 sm:$0xff]  }
  0xba   :  { %5046 = vmatprep.subr.bf16.mxu0 %v7570_v24  ;;  %5579 = vmatprep.subr.bf16.mxu1 %v7573_v25  ;;  %v7657_v24 = vld [vmem:[#allocation2 + $0x5ec] ss:$16 sps:$4 sm:$0xff]   ;;  %v8788_v25 = vrot.slane %v90_v19, %v8761_v49  ;;  %v7733_v19 = vld [vmem:[#allocation2 + $0x788] ss:$16 sps:$4 sm:$0xff]  }
  0xbb   :  { %5076 = vmatprep.mubr.bf16.mxu0 %v212_v31  ;;  %5609 = vmatprep.mubr.bf16.mxu1 %v212_v31  ;;  %v7658_v31 = vld [vmem:[#allocation2 + $0x600] ss:$16 sps:$4 sm:$0xff]  }
  0xbc   :  { %v106_v23 = vcombine.high %v8788_v25, %v8788_v25 }
  0xbd   :  { %5047 = vmatpush1.bf16.msra.mxu0 %v7568_v27  ;;  %5580 = vmatpush1.bf16.msra.mxu1 %v7571_v28  ;;  %v7655_v27 = vld [vmem:[#allocation2 + $0x5e8] ss:$16 sps:$4 sm:$0xff]   ;;  %v7660_v28 = vld [vmem:[#allocation2 + $0x604] ss:$16 sps:$4 sm:$0xff]  }
  0xbe   :  { %5048 = vmatprep.subr.bf16.mxu0 %v7576_v29  ;;  %5581 = vmatprep.subr.bf16.mxu1 %v7579_v30  ;;  %v7663_v29 = vld [vmem:[#allocation2 + $0x60c] ss:$16 sps:$4 sm:$0xff]   ;;  %v211_v30 = vpack.c.bf16 %v8781_v26, %v8781_v26  ;;  %v7670_v26 = vld [vmem:[#allocation2 + $0x640] ss:$16 sps:$4 sm:$0xff]  }
  0xc1   :  { %5049 = vmatpush1.bf16.msra.mxu0 %v7574_v32  ;;  %5582 = vmatpush1.bf16.msra.mxu1 %v7577_v33  ;;  %v7661_v32 = vld [vmem:[#allocation2 + $0x608] ss:$16 sps:$4 sm:$0xff]   ;;  %v7666_v33 = vld [vmem:[#allocation2 + $0x624] ss:$16 sps:$4 sm:$0xff]  }
  0xc2   :  { %5050 = vmatprep.subr.bf16.mxu0 %v7582_v34  ;;  %5583 = vmatprep.subr.bf16.mxu1 %v7585_v35  ;;  %v7669_v34 = vld [vmem:[#allocation2 + $0x62c] ss:$16 sps:$4 sm:$0xff]   ;;  %v214_v35 = vpack.c.bf16 %v106_v23, %v106_v23  ;;  %v7745_v23 = vld [vmem:[#allocation2 + $0x7c8] ss:$16 sps:$4 sm:$0xff]  }
  0xc5   :  { %5051 = vmatpush1.bf16.msra.mxu0 %v7580_v36  ;;  %5584 = vmatpush1.bf16.msra.mxu1 %v7583_v37  ;;  %v7664_v36 = vld [vmem:[#allocation2 + $0x620] ss:$16 sps:$4 sm:$0xff]   ;;  %v7667_v37 = vld [vmem:[#allocation2 + $0x628] ss:$16 sps:$4 sm:$0xff]  }
  0xc6   :  { %5052 = vmatprep.subr.bf16.mxu0 %v7588_v38  ;;  %5585 = vmatprep.subr.bf16.mxu1 %v7591_v39  ;;  %v7672_v38 = vld [vmem:[#allocation2 + $0x644] ss:$16 sps:$4 sm:$0xff]   ;;  %v7675_v39 = vld [vmem:[#allocation2 + $0x64c] ss:$16 sps:$4 sm:$0xff]  }
  0xc9   :  { %5053 = vmatpush1.bf16.msra.mxu0 %v7586_v40  ;;  %5586 = vmatpush1.bf16.msra.mxu1 %v7589_v41  ;;  %v7673_v40 = vld [vmem:[#allocation2 + $0x648] ss:$16 sps:$4 sm:$0xff]   ;;  %v7678_v41 = vld [vmem:[#allocation2 + $0x664] ss:$16 sps:$4 sm:$0xff]  }
  0xca   :  { %5054 = vmatprep.subr.bf16.mxu0 %v7594_v42  ;;  %5587 = vmatprep.subr.bf16.mxu1 %v7597_v44  ;;  %v7681_v42 = vld [vmem:[#allocation2 + $0x66c] ss:$16 sps:$4 sm:$0xff]   ;;  %v7676_v44 = vld [vmem:[#allocation2 + $0x660] ss:$16 sps:$4 sm:$0xff]  }
  0xcd   :  { %5055 = vmatpush1.bf16.msra.mxu0 %v7592_v45  ;;  %5588 = vmatpush1.bf16.msra.mxu1 %v7595_v46  ;;  %v7679_v45 = vld [vmem:[#allocation2 + $0x668] ss:$16 sps:$4 sm:$0xff]   ;;  %v7684_v46 = vld [vmem:[#allocation2 + $0x684] ss:$16 sps:$4 sm:$0xff]  }
  0xce   :  { %5056 = vmatprep.subr.bf16.mxu0 %v7600_v47  ;;  %5589 = vmatprep.subr.bf16.mxu1 %v7603_v48  ;;  %v7687_v47 = vld [vmem:[#allocation2 + $0x68c] ss:$16 sps:$4 sm:$0xff]   ;;  %v7682_v48 = vld [vmem:[#allocation2 + $0x680] ss:$16 sps:$4 sm:$0xff]  }
  0xd1   :  { %5057 = vmatpush1.bf16.msra.mxu0 %v7598_v50  ;;  %5590 = vmatpush1.bf16.msra.mxu1 %v7601_v51  ;;  %v7685_v50 = vld [vmem:[#allocation2 + $0x688] ss:$16 sps:$4 sm:$0xff]   ;;  %v7690_v51 = vld [vmem:[#allocation2 + $0x6a4] ss:$16 sps:$4 sm:$0xff]  }
  0xd2   :  { %5058 = vmatprep.subr.bf16.mxu0 %v7606_v52  ;;  %5591 = vmatprep.subr.bf16.mxu1 %v7609_v53  ;;  %v7693_v52 = vld [vmem:[#allocation2 + $0x6ac] ss:$16 sps:$4 sm:$0xff]   ;;  %v7688_v53 = vld [vmem:[#allocation2 + $0x6a0] ss:$16 sps:$4 sm:$0xff]  }
  0xd5   :  { %5059 = vmatpush1.bf16.msra.mxu0 %v7604_v54  ;;  %5592 = vmatpush1.bf16.msra.mxu1 %v7607_v55  ;;  %v7691_v54 = vld [vmem:[#allocation2 + $0x6a8] ss:$16 sps:$4 sm:$0xff]   ;;  %v7696_v55 = vld [vmem:[#allocation2 + $0x6c4] ss:$16 sps:$4 sm:$0xff]  }
  0xd6   :  { %5060 = vmatprep.subr.bf16.mxu0 %v7612_v56  ;;  %5593 = vmatprep.subr.bf16.mxu1 %v7615_v57  ;;  %v7699_v56 = vld [vmem:[#allocation2 + $0x6cc] ss:$16 sps:$4 sm:$0xff]   ;;  %v7694_v57 = vld [vmem:[#allocation2 + $0x6c0] ss:$16 sps:$4 sm:$0xff]  }
  0xd9   :  { %5061 = vmatpush1.bf16.msra.mxu0 %v7610_v58  ;;  %5594 = vmatpush1.bf16.msra.mxu1 %v7613_v59  ;;  %v7697_v58 = vld [vmem:[#allocation2 + $0x6c8] ss:$16 sps:$4 sm:$0xff]   ;;  %v7702_v59 = vld [vmem:[#allocation2 + $0x6e4] ss:$16 sps:$4 sm:$0xff]  }
  0xda   :  { %5062 = vmatprep.subr.bf16.mxu0 %v7618_v60  ;;  %5595 = vmatprep.subr.bf16.mxu1 %v7621_v61  ;;  %v7705_v60 = vld [vmem:[#allocation2 + $0x6ec] ss:$16 sps:$4 sm:$0xff]   ;;  %v7700_v61 = vld [vmem:[#allocation2 + $0x6e0] ss:$16 sps:$4 sm:$0xff]  }
  0xdd   :  { %5063 = vmatpush1.bf16.msra.mxu0 %v7616_v62  ;;  %5596 = vmatpush1.bf16.msra.mxu1 %v7619_v63  ;;  %v7703_v62 = vld [vmem:[#allocation2 + $0x6e8] ss:$16 sps:$4 sm:$0xff]   ;;  %v7708_v63 = vld [vmem:[#allocation2 + $0x704] ss:$16 sps:$4 sm:$0xff]  }
  0xde   :  { %5064 = vmatprep.subr.bf16.mxu0 %v7624_v0  ;;  %5597 = vmatprep.subr.bf16.mxu1 %v7627_v1  ;;  %v7711_v0 = vld [vmem:[#allocation2 + $0x70c] ss:$16 sps:$4 sm:$0xff]   ;;  %v7706_v1 = vld [vmem:[#allocation2 + $0x700] ss:$16 sps:$4 sm:$0xff]  }
  0xe1   :  { %5065 = vmatpush1.bf16.msra.mxu0 %v7622_v2  ;;  %5598 = vmatpush1.bf16.msra.mxu1 %v7625_v3  ;;  %v7709_v2 = vld [vmem:[#allocation2 + $0x708] ss:$16 sps:$4 sm:$0xff]   ;;  %v7714_v3 = vld [vmem:[#allocation2 + $0x724] ss:$16 sps:$4 sm:$0xff]  }
  0xe2   :  { %5066 = vmatprep.subr.bf16.mxu0 %v7630_v4  ;;  %5599 = vmatprep.subr.bf16.mxu1 %v7633_v5  ;;  %v7717_v4 = vld [vmem:[#allocation2 + $0x72c] ss:$16 sps:$4 sm:$0xff]   ;;  %v7712_v5 = vld [vmem:[#allocation2 + $0x720] ss:$16 sps:$4 sm:$0xff]  }
  0xe5   :  { %5067 = vmatpush1.bf16.msra.mxu0 %v7628_v6  ;;  %5600 = vmatpush1.bf16.msra.mxu1 %v7631_v7  ;;  %v7715_v6 = vld [vmem:[#allocation2 + $0x728] ss:$16 sps:$4 sm:$0xff]   ;;  %v7720_v7 = vld [vmem:[#allocation2 + $0x744] ss:$16 sps:$4 sm:$0xff]  }
  0xe6   :  { %5068 = vmatprep.subr.bf16.mxu0 %v7636_v8  ;;  %5601 = vmatprep.subr.bf16.mxu1 %v7639_v10  ;;  %v7723_v8 = vld [vmem:[#allocation2 + $0x74c] ss:$16 sps:$4 sm:$0xff]   ;;  %v7718_v10 = vld [vmem:[#allocation2 + $0x740] ss:$16 sps:$4 sm:$0xff]  }
  0xe9   :  { %5069 = vmatpush1.bf16.msra.mxu0 %v7634_v11  ;;  %5602 = vmatpush1.bf16.msra.mxu1 %v7637_v12  ;;  %v7721_v11 = vld [vmem:[#allocation2 + $0x748] ss:$16 sps:$4 sm:$0xff]   ;;  %v7726_v12 = vld [vmem:[#allocation2 + $0x764] ss:$16 sps:$4 sm:$0xff]  }
  0xea   :  { %5070 = vmatprep.subr.bf16.mxu0 %v7642_v13  ;;  %5603 = vmatprep.subr.bf16.mxu1 %v7645_v14  ;;  %v7729_v13 = vld [vmem:[#allocation2 + $0x76c] ss:$16 sps:$4 sm:$0xff]   ;;  %v7724_v14 = vld [vmem:[#allocation2 + $0x760] ss:$16 sps:$4 sm:$0xff]  }
  0xed   :  { %5071 = vmatpush1.bf16.msra.mxu0 %v7640_v15  ;;  %5604 = vmatpush1.bf16.msra.mxu1 %v7643_v16  ;;  %v7727_v15 = vld [vmem:[#allocation2 + $0x768] ss:$16 sps:$4 sm:$0xff]   ;;  %v7732_v16 = vld [vmem:[#allocation2 + $0x784] ss:$16 sps:$4 sm:$0xff]  }
  0xee   :  { %5072 = vmatprep.subr.bf16.mxu0 %v7648_v17  ;;  %5605 = vmatprep.subr.bf16.mxu1 %v7651_v18  ;;  %v7735_v17 = vld [vmem:[#allocation2 + $0x78c] ss:$16 sps:$4 sm:$0xff]   ;;  %v7730_v18 = vld [vmem:[#allocation2 + $0x780] ss:$16 sps:$4 sm:$0xff]  }
  0xf1   :  { %5073 = vmatpush1.bf16.msra.mxu0 %v7646_v20  ;;  %5606 = vmatpush1.bf16.msra.mxu1 %v7649_v21  ;;  %v7738_v20 = vld [vmem:[#allocation2 + $0x7a4] ss:$16 sps:$4 sm:$0xff]   ;;  %v7741_v21 = vld [vmem:[#allocation2 + $0x7ac] ss:$16 sps:$4 sm:$0xff]  }
  0xf2   :  { %5074 = vmatprep.subr.bf16.mxu0 %v7654_v22  ;;  %5607 = vmatprep.subr.bf16.mxu1 %v7657_v24  ;;  %v7736_v22 = vld [vmem:[#allocation2 + $0x7a0] ss:$16 sps:$4 sm:$0xff]   ;;  %v7739_v24 = vld [vmem:[#allocation2 + $0x7a8] ss:$16 sps:$4 sm:$0xff]  }
  0xf5   :  { %5075 = vmatpush1.bf16.msra.mxu0 %v7652_v9  ;;  %5608 = vmatpush1.bf16.msra.mxu1 %v7655_v27  ;;  %v7744_v9 = vld [vmem:[#allocation2 + $0x7c4] ss:$16 sps:$4 sm:$0xff]   ;;  %v7747_v27 = vld [vmem:[#allocation2 + $0x7cc] ss:$16 sps:$4 sm:$0xff]  }
  0xf6   :  { %5085 = vmatprep.subr.bf16.mxu0 %v7660_v28  ;;  %5618 = vmatprep.subr.bf16.mxu1 %v7663_v29  ;;  %v7742_v28 = vld [vmem:[#allocation2 + $0x7c0] ss:$16 sps:$4 sm:$0xff]  }
  0xf7   :  { %v8797_v29 = vld [vmem:[%s8999_s0 + $0x10] sm:$0xff] }
  0xf8   :  { %5077 = vmatmul.mubr.bf16.vlgmr.msra.gmra.mrb[0].mxu0 %v211_v30  ;;  %5610 = vmatmul.mubr.bf16.vlgmr.msra.gmra.mrb[0].mxu1 %v211_v30  ;;  %v7750_v30 = vld [vmem:[#allocation2 + $0x7e4] ss:$16 sps:$4 sm:$0xff]  }
  0xf9   :  { %5086 = vmatpush1.bf16.msra.mxu0 %v7658_v31  ;;  %5619 = vmatpush1.bf16.msra.mxu1 %v7661_v32  ;;  %v7753_v31 = vld [vmem:[#allocation2 + $0x7ec] ss:$16 sps:$4 sm:$0xff]   ;;  %v8801_v32 = vrot.slane %v8797_v29, %v8761_v49 }
  0xfa   :  { %5087 = vmatprep.subr.bf16.mxu0 %v7666_v33  ;;  %5620 = vmatprep.subr.bf16.mxu1 %v7669_v34  ;;  %v7748_v33 = vld [vmem:[#allocation2 + $0x7e0] ss:$16 sps:$4 sm:$0xff]   ;;  %v7751_v34 = vld [vmem:[#allocation2 + $0x7e8] ss:$16 sps:$4 sm:$0xff]  }
  0xfb   :  { %5117 = vmatprep.mubr.bf16.mxu0 %v214_v35  ;;  %5650 = vmatprep.mubr.bf16.mxu1 %v214_v35  ;;  %v7757_v35 = vld [vmem:[#allocation2 + $0x804] ss:$16 sps:$4 sm:$0xff]  }
  0xfd   :  { %5088 = vmatpush1.bf16.msra.mxu0 %v7664_v36  ;;  %5621 = vmatpush1.bf16.msra.mxu1 %v7667_v37  ;;  %v7760_v36 = vld [vmem:[#allocation2 + $0x80c] ss:$16 sps:$4 sm:$0xff]   ;;  %v122_v37 = vcombine.high %v8801_v32, %v8801_v32 }
  0xfe   :  { %5089 = vmatprep.subr.bf16.mxu0 %v7672_v38  ;;  %5622 = vmatprep.subr.bf16.mxu1 %v7675_v39  ;;  %v7755_v38 = vld [vmem:[#allocation2 + $0x800] ss:$16 sps:$4 sm:$0xff]   ;;  %v213_v39 = vpack.c.bf16 %v8788_v25, %v8788_v25 }
  0xff   :  { %v7767_v25 = vld [vmem:[#allocation2 + $0x840] ss:$16 sps:$4 sm:$0xff]  }
 0x101   :  { %5090 = vmatpush1.bf16.msra.mxu0 %v7670_v26  ;;  %5623 = vmatpush1.bf16.msra.mxu1 %v7673_v40  ;;  %v7758_v26 = vld [vmem:[#allocation2 + $0x808] ss:$16 sps:$4 sm:$0xff]   ;;  %v7763_v40 = vld [vmem:[#allocation2 + $0x824] ss:$16 sps:$4 sm:$0xff]  }
 0x102   :  { %5091 = vmatprep.subr.bf16.mxu0 %v7678_v41  ;;  %5624 = vmatprep.subr.bf16.mxu1 %v7681_v42  ;;  %v7766_v41 = vld [vmem:[#allocation2 + $0x82c] ss:$16 sps:$4 sm:$0xff]   ;;  %v216_v42 = vpack.c.bf16 %v122_v37, %v122_v37  ;;  %v7839_v37 = vld [vmem:[#allocation2 + $0x9c0] ss:$16 sps:$4 sm:$0xff]  }
 0x105   :  { %5092 = vmatpush1.bf16.msra.mxu0 %v7676_v44  ;;  %5625 = vmatpush1.bf16.msra.mxu1 %v7679_v45  ;;  %v7761_v44 = vld [vmem:[#allocation2 + $0x820] ss:$16 sps:$4 sm:$0xff]   ;;  %v7764_v45 = vld [vmem:[#allocation2 + $0x828] ss:$16 sps:$4 sm:$0xff]  }
 0x106   :  { %5093 = vmatprep.subr.bf16.mxu0 %v7684_v46  ;;  %5626 = vmatprep.subr.bf16.mxu1 %v7687_v47  ;;  %v7769_v46 = vld [vmem:[#allocation2 + $0x844] ss:$16 sps:$4 sm:$0xff]   ;;  %v7772_v47 = vld [vmem:[#allocation2 + $0x84c] ss:$16 sps:$4 sm:$0xff]  }
 0x109   :  { %5094 = vmatpush1.bf16.msra.mxu0 %v7682_v48  ;;  %5627 = vmatpush1.bf16.msra.mxu1 %v7685_v50  ;;  %v7770_v48 = vld [vmem:[#allocation2 + $0x848] ss:$16 sps:$4 sm:$0xff]   ;;  %v7775_v50 = vld [vmem:[#allocation2 + $0x864] ss:$16 sps:$4 sm:$0xff]  }
 0x10a   :  { %5095 = vmatprep.subr.bf16.mxu0 %v7690_v51  ;;  %5628 = vmatprep.subr.bf16.mxu1 %v7693_v52  ;;  %v7778_v51 = vld [vmem:[#allocation2 + $0x86c] ss:$16 sps:$4 sm:$0xff]   ;;  %v7773_v52 = vld [vmem:[#allocation2 + $0x860] ss:$16 sps:$4 sm:$0xff]  }
 0x10d   :  { %5096 = vmatpush1.bf16.msra.mxu0 %v7688_v53  ;;  %5629 = vmatpush1.bf16.msra.mxu1 %v7691_v54  ;;  %v7776_v53 = vld [vmem:[#allocation2 + $0x868] ss:$16 sps:$4 sm:$0xff]   ;;  %v7781_v54 = vld [vmem:[#allocation2 + $0x884] ss:$16 sps:$4 sm:$0xff]  }
 0x10e   :  { %5097 = vmatprep.subr.bf16.mxu0 %v7696_v55  ;;  %5630 = vmatprep.subr.bf16.mxu1 %v7699_v56  ;;  %v7784_v55 = vld [vmem:[#allocation2 + $0x88c] ss:$16 sps:$4 sm:$0xff]   ;;  %v7779_v56 = vld [vmem:[#allocation2 + $0x880] ss:$16 sps:$4 sm:$0xff]  }
 0x111   :  { %5098 = vmatpush1.bf16.msra.mxu0 %v7694_v57  ;;  %5631 = vmatpush1.bf16.msra.mxu1 %v7697_v58  ;;  %v7782_v57 = vld [vmem:[#allocation2 + $0x888] ss:$16 sps:$4 sm:$0xff]   ;;  %v7787_v58 = vld [vmem:[#allocation2 + $0x8a4] ss:$16 sps:$4 sm:$0xff]  }
 0x112   :  { %5099 = vmatprep.subr.bf16.mxu0 %v7702_v59  ;;  %5632 = vmatprep.subr.bf16.mxu1 %v7705_v60  ;;  %v7790_v59 = vld [vmem:[#allocation2 + $0x8ac] ss:$16 sps:$4 sm:$0xff]   ;;  %v7785_v60 = vld [vmem:[#allocation2 + $0x8a0] ss:$16 sps:$4 sm:$0xff]  }
 0x115   :  { %5100 = vmatpush1.bf16.msra.mxu0 %v7700_v61  ;;  %5633 = vmatpush1.bf16.msra.mxu1 %v7703_v62  ;;  %v7788_v61 = vld [vmem:[#allocation2 + $0x8a8] ss:$16 sps:$4 sm:$0xff]   ;;  %v7793_v62 = vld [vmem:[#allocation2 + $0x8c4] ss:$16 sps:$4 sm:$0xff]  }
 0x116   :  { %5101 = vmatprep.subr.bf16.mxu0 %v7708_v63  ;;  %5634 = vmatprep.subr.bf16.mxu1 %v7711_v0  ;;  %v7796_v63 = vld [vmem:[#allocation2 + $0x8cc] ss:$16 sps:$4 sm:$0xff]   ;;  %v7791_v0 = vld [vmem:[#allocation2 + $0x8c0] ss:$16 sps:$4 sm:$0xff]  }
 0x119   :  { %5102 = vmatpush1.bf16.msra.mxu0 %v7706_v1  ;;  %5635 = vmatpush1.bf16.msra.mxu1 %v7709_v2  ;;  %v7794_v1 = vld [vmem:[#allocation2 + $0x8c8] ss:$16 sps:$4 sm:$0xff]   ;;  %v7799_v2 = vld [vmem:[#allocation2 + $0x8e4] ss:$16 sps:$4 sm:$0xff]  }
 0x11a   :  { %5103 = vmatprep.subr.bf16.mxu0 %v7714_v3  ;;  %5636 = vmatprep.subr.bf16.mxu1 %v7717_v4  ;;  %v7802_v3 = vld [vmem:[#allocation2 + $0x8ec] ss:$16 sps:$4 sm:$0xff]   ;;  %v7797_v4 = vld [vmem:[#allocation2 + $0x8e0] ss:$16 sps:$4 sm:$0xff]  }
 0x11d   :  { %5104 = vmatpush1.bf16.msra.mxu0 %v7712_v5  ;;  %5637 = vmatpush1.bf16.msra.mxu1 %v7715_v6  ;;  %v7800_v5 = vld [vmem:[#allocation2 + $0x8e8] ss:$16 sps:$4 sm:$0xff]   ;;  %v7805_v6 = vld [vmem:[#allocation2 + $0x904] ss:$16 sps:$4 sm:$0xff]  }
 0x11e   :  { %5105 = vmatprep.subr.bf16.mxu0 %v7720_v7  ;;  %5638 = vmatprep.subr.bf16.mxu1 %v7723_v8  ;;  %v7808_v7 = vld [vmem:[#allocation2 + $0x90c] ss:$16 sps:$4 sm:$0xff]   ;;  %v7803_v8 = vld [vmem:[#allocation2 + $0x900] ss:$16 sps:$4 sm:$0xff]  }
 0x121   :  { %5106 = vmatpush1.bf16.msra.mxu0 %v7718_v10  ;;  %5639 = vmatpush1.bf16.msra.mxu1 %v7721_v11  ;;  %v7806_v10 = vld [vmem:[#allocation2 + $0x908] ss:$16 sps:$4 sm:$0xff]   ;;  %v7811_v11 = vld [vmem:[#allocation2 + $0x924] ss:$16 sps:$4 sm:$0xff]  }
 0x122   :  { %5107 = vmatprep.subr.bf16.mxu0 %v7726_v12  ;;  %5640 = vmatprep.subr.bf16.mxu1 %v7729_v13  ;;  %v7814_v12 = vld [vmem:[#allocation2 + $0x92c] ss:$16 sps:$4 sm:$0xff]   ;;  %v7809_v13 = vld [vmem:[#allocation2 + $0x920] ss:$16 sps:$4 sm:$0xff]  }
 0x125   :  { %5108 = vmatpush1.bf16.msra.mxu0 %v7724_v14  ;;  %5641 = vmatpush1.bf16.msra.mxu1 %v7727_v15  ;;  %v7812_v14 = vld [vmem:[#allocation2 + $0x928] ss:$16 sps:$4 sm:$0xff]   ;;  %v7817_v15 = vld [vmem:[#allocation2 + $0x944] ss:$16 sps:$4 sm:$0xff]  }
 0x126   :  { %5109 = vmatprep.subr.bf16.mxu0 %v7732_v16  ;;  %5642 = vmatprep.subr.bf16.mxu1 %v7735_v17  ;;  %v7820_v16 = vld [vmem:[#allocation2 + $0x94c] ss:$16 sps:$4 sm:$0xff]   ;;  %v7815_v17 = vld [vmem:[#allocation2 + $0x940] ss:$16 sps:$4 sm:$0xff]  }
 0x129   :  { %5110 = vmatpush1.bf16.msra.mxu0 %v7730_v18  ;;  %5643 = vmatpush1.bf16.msra.mxu1 %v7733_v19  ;;  %v7818_v18 = vld [vmem:[#allocation2 + $0x948] ss:$16 sps:$4 sm:$0xff]   ;;  %v7823_v19 = vld [vmem:[#allocation2 + $0x964] ss:$16 sps:$4 sm:$0xff]  }
 0x12a   :  { %5111 = vmatprep.subr.bf16.mxu0 %v7738_v20  ;;  %5644 = vmatprep.subr.bf16.mxu1 %v7741_v21  ;;  %v7826_v20 = vld [vmem:[#allocation2 + $0x96c] ss:$16 sps:$4 sm:$0xff]   ;;  %v7821_v21 = vld [vmem:[#allocation2 + $0x960] ss:$16 sps:$4 sm:$0xff]  }
 0x12d   :  { %5112 = vmatpush1.bf16.msra.mxu0 %v7736_v22  ;;  %5645 = vmatpush1.bf16.msra.mxu1 %v7739_v24  ;;  %v7824_v22 = vld [vmem:[#allocation2 + $0x968] ss:$16 sps:$4 sm:$0xff]   ;;  %v7829_v24 = vld [vmem:[#allocation2 + $0x984] ss:$16 sps:$4 sm:$0xff]  }
 0x12e   :  { %5113 = vmatprep.subr.bf16.mxu0 %v7744_v9  ;;  %5646 = vmatprep.subr.bf16.mxu1 %v7747_v27  ;;  %v7832_v9 = vld [vmem:[#allocation2 + $0x98c] ss:$16 sps:$4 sm:$0xff]   ;;  %v7827_v27 = vld [vmem:[#allocation2 + $0x980] ss:$16 sps:$4 sm:$0xff]  }
 0x131   :  { %5114 = vmatpush1.bf16.msra.mxu0 %v7742_v28  ;;  %5647 = vmatpush1.bf16.msra.mxu1 %v7745_v23  ;;  %v7830_v28 = vld [vmem:[#allocation2 + $0x988] ss:$16 sps:$4 sm:$0xff]   ;;  %v7835_v23 = vld [vmem:[#allocation2 + $0x9a4] ss:$16 sps:$4 sm:$0xff]  }
 0x132   :  { %5115 = vmatprep.subr.bf16.mxu0 %v7750_v30  ;;  %5648 = vmatprep.subr.bf16.mxu1 %v7753_v31  ;;  %v7838_v30 = vld [vmem:[#allocation2 + $0x9ac] ss:$16 sps:$4 sm:$0xff]   ;;  %v7833_v31 = vld [vmem:[#allocation2 + $0x9a0] ss:$16 sps:$4 sm:$0xff]  }
 0x135   :  { %5116 = vmatpush1.bf16.msra.mxu0 %v7748_v33  ;;  %5649 = vmatpush1.bf16.msra.mxu1 %v7751_v34  ;;  %v7836_v33 = vld [vmem:[#allocation2 + $0x9a8] ss:$16 sps:$4 sm:$0xff]   ;;  %v7841_v34 = vld [vmem:[#allocation2 + $0x9c4] ss:$16 sps:$4 sm:$0xff]  }
 0x136   :  { %5126 = vmatprep.subr.bf16.mxu0 %v7757_v35  ;;  %5659 = vmatprep.subr.bf16.mxu1 %v7760_v36  ;;  %v7844_v35 = vld [vmem:[#allocation2 + $0x9cc] ss:$16 sps:$4 sm:$0xff]   ;;  %v107_v36 = vcombine.high %v8797_v29, %v8797_v29 }
 0x138   :  { %5118 = vmatmul.mubr.bf16.vlgmr.msra.gmra.mrb[0].mxu0 %v213_v39  ;;  %5651 = vmatmul.mubr.bf16.vlgmr.msra.gmra.mrb[0].mxu1 %v213_v39  ;;  %v7847_v39 = vld [vmem:[#allocation2 + $0x9e4] ss:$16 sps:$4 sm:$0xff]  }
 0x139   :  { %5127 = vmatpush1.bf16.msra.mxu0 %v7755_v38  ;;  %5660 = vmatpush1.bf16.msra.mxu1 %v7758_v26  ;;  %v7842_v38 = vld [vmem:[#allocation2 + $0x9c8] ss:$16 sps:$4 sm:$0xff]   ;;  %v7850_v26 = vld [vmem:[#allocation2 + $0x9ec] ss:$16 sps:$4 sm:$0xff]  }
 0x13a   :  { %5128 = vmatprep.subr.bf16.mxu0 %v7763_v40  ;;  %5661 = vmatprep.subr.bf16.mxu1 %v7766_v41  ;;  %v8810_v40 = vrot.slane %v107_v36, %v8761_v49  ;;  %v7845_v41 = vld [vmem:[#allocation2 + $0x9e0] ss:$16 sps:$4 sm:$0xff]   ;;  %v7926_v36 = vld [vmem:[#allocation2 + $0xb88] ss:$16 sps:$4 sm:$0xff]  }
 0x13b   :  { %5158 = vmatprep.mubr.bf16.mxu0 %v216_v42  ;;  %5691 = vmatprep.mubr.bf16.mxu1 %v216_v42  ;;  %v7848_v42 = vld [vmem:[#allocation2 + $0x9e8] ss:$16 sps:$4 sm:$0xff]  }
 0x13c   :  { %v123_v29 = vcombine.high %v8810_v40, %v8810_v40 }
 0x13d   :  { %5129 = vmatpush1.bf16.msra.mxu0 %v7761_v44  ;;  %5662 = vmatpush1.bf16.msra.mxu1 %v7764_v45  ;;  %v7853_v44 = vld [vmem:[#allocation2 + $0xa04] ss:$16 sps:$4 sm:$0xff]   ;;  %v7856_v45 = vld [vmem:[#allocation2 + $0xa0c] ss:$16 sps:$4 sm:$0xff]  }
 0x13e   :  { %5130 = vmatprep.subr.bf16.mxu0 %v7769_v46  ;;  %5663 = vmatprep.subr.bf16.mxu1 %v7772_v47  ;;  %v215_v46 = vpack.c.bf16 %v8801_v32, %v8801_v32  ;;  %v7851_v47 = vld [vmem:[#allocation2 + $0xa00] ss:$16 sps:$4 sm:$0xff]  }
 0x13f   :  { %v7863_v32 = vld [vmem:[#allocation2 + $0xa40] ss:$16 sps:$4 sm:$0xff]  }
 0x141   :  { %5131 = vmatpush1.bf16.msra.mxu0 %v7767_v25  ;;  %5664 = vmatpush1.bf16.msra.mxu1 %v7770_v48  ;;  %v7854_v25 = vld [vmem:[#allocation2 + $0xa08] ss:$16 sps:$4 sm:$0xff]   ;;  %v7859_v48 = vld [vmem:[#allocation2 + $0xa24] ss:$16 sps:$4 sm:$0xff]  }
 0x142   :  { %5132 = vmatprep.subr.bf16.mxu0 %v7775_v50  ;;  %5665 = vmatprep.subr.bf16.mxu1 %v7778_v51  ;;  %v7862_v50 = vld [vmem:[#allocation2 + $0xa2c] ss:$16 sps:$4 sm:$0xff]   ;;  %v218_v51 = vpack.c.bf16 %v123_v29, %v123_v29  ;;  %v7938_v29 = vld [vmem:[#allocation2 + $0xbc8] ss:$16 sps:$4 sm:$0xff]  }
 0x145   :  { %5133 = vmatpush1.bf16.msra.mxu0 %v7773_v52  ;;  %5666 = vmatpush1.bf16.msra.mxu1 %v7776_v53  ;;  %v7857_v52 = vld [vmem:[#allocation2 + $0xa20] ss:$16 sps:$4 sm:$0xff]   ;;  %v7860_v53 = vld [vmem:[#allocation2 + $0xa28] ss:$16 sps:$4 sm:$0xff]  }
 0x146   :  { %5134 = vmatprep.subr.bf16.mxu0 %v7781_v54  ;;  %5667 = vmatprep.subr.bf16.mxu1 %v7784_v55  ;;  %v7865_v54 = vld [vmem:[#allocation2 + $0xa44] ss:$16 sps:$4 sm:$0xff]   ;;  %v7868_v55 = vld [vmem:[#allocation2 + $0xa4c] ss:$16 sps:$4 sm:$0xff]  }
 0x149   :  { %5135 = vmatpush1.bf16.msra.mxu0 %v7779_v56  ;;  %5668 = vmatpush1.bf16.msra.mxu1 %v7782_v57  ;;  %v7866_v56 = vld [vmem:[#allocation2 + $0xa48] ss:$16 sps:$4 sm:$0xff]   ;;  %v7871_v57 = vld [vmem:[#allocation2 + $0xa64] ss:$16 sps:$4 sm:$0xff]  }
 0x14a   :  { %5136 = vmatprep.subr.bf16.mxu0 %v7787_v58  ;;  %5669 = vmatprep.subr.bf16.mxu1 %v7790_v59  ;;  %v7874_v58 = vld [vmem:[#allocation2 + $0xa6c] ss:$16 sps:$4 sm:$0xff]   ;;  %v7869_v59 = vld [vmem:[#allocation2 + $0xa60] ss:$16 sps:$4 sm:$0xff]  }
 0x14d   :  { %5137 = vmatpush1.bf16.msra.mxu0 %v7785_v60  ;;  %5670 = vmatpush1.bf16.msra.mxu1 %v7788_v61  ;;  %v7872_v60 = vld [vmem:[#allocation2 + $0xa68] ss:$16 sps:$4 sm:$0xff]   ;;  %v7877_v61 = vld [vmem:[#allocation2 + $0xa84] ss:$16 sps:$4 sm:$0xff]  }
 0x14e   :  { %5138 = vmatprep.subr.bf16.mxu0 %v7793_v62  ;;  %5671 = vmatprep.subr.bf16.mxu1 %v7796_v63  ;;  %v7880_v62 = vld [vmem:[#allocation2 + $0xa8c] ss:$16 sps:$4 sm:$0xff]   ;;  %v7875_v63 = vld [vmem:[#allocation2 + $0xa80] ss:$16 sps:$4 sm:$0xff]  }
 0x151   :  { %5139 = vmatpush1.bf16.msra.mxu0 %v7791_v0  ;;  %5672 = vmatpush1.bf16.msra.mxu1 %v7794_v1  ;;  %v7878_v0 = vld [vmem:[#allocation2 + $0xa88] ss:$16 sps:$4 sm:$0xff]   ;;  %v7883_v1 = vld [vmem:[#allocation2 + $0xaa4] ss:$16 sps:$4 sm:$0xff]  }
 0x152   :  { %5140 = vmatprep.subr.bf16.mxu0 %v7799_v2  ;;  %5673 = vmatprep.subr.bf16.mxu1 %v7802_v3  ;;  %v7886_v2 = vld [vmem:[#allocation2 + $0xaac] ss:$16 sps:$4 sm:$0xff]   ;;  %v7881_v3 = vld [vmem:[#allocation2 + $0xaa0] ss:$16 sps:$4 sm:$0xff]  }
 0x155   :  { %5141 = vmatpush1.bf16.msra.mxu0 %v7797_v4  ;;  %5674 = vmatpush1.bf16.msra.mxu1 %v7800_v5  ;;  %v7884_v4 = vld [vmem:[#allocation2 + $0xaa8] ss:$16 sps:$4 sm:$0xff]   ;;  %v7889_v5 = vld [vmem:[#allocation2 + $0xac4] ss:$16 sps:$4 sm:$0xff]  }
 0x156   :  { %5142 = vmatprep.subr.bf16.mxu0 %v7805_v6  ;;  %5675 = vmatprep.subr.bf16.mxu1 %v7808_v7  ;;  %v7892_v6 = vld [vmem:[#allocation2 + $0xacc] ss:$16 sps:$4 sm:$0xff]   ;;  %v7887_v7 = vld [vmem:[#allocation2 + $0xac0] ss:$16 sps:$4 sm:$0xff]  }
 0x159   :  { %5143 = vmatpush1.bf16.msra.mxu0 %v7803_v8  ;;  %5676 = vmatpush1.bf16.msra.mxu1 %v7806_v10  ;;  %v7890_v8 = vld [vmem:[#allocation2 + $0xac8] ss:$16 sps:$4 sm:$0xff]   ;;  %v7895_v10 = vld [vmem:[#allocation2 + $0xae4] ss:$16 sps:$4 sm:$0xff]  }
 0x15a   :  { %5144 = vmatprep.subr.bf16.mxu0 %v7811_v11  ;;  %5677 = vmatprep.subr.bf16.mxu1 %v7814_v12  ;;  %v7898_v11 = vld [vmem:[#allocation2 + $0xaec] ss:$16 sps:$4 sm:$0xff]   ;;  %v7893_v12 = vld [vmem:[#allocation2 + $0xae0] ss:$16 sps:$4 sm:$0xff]  }
 0x15d   :  { %5145 = vmatpush1.bf16.msra.mxu0 %v7809_v13  ;;  %5678 = vmatpush1.bf16.msra.mxu1 %v7812_v14  ;;  %v7896_v13 = vld [vmem:[#allocation2 + $0xae8] ss:$16 sps:$4 sm:$0xff]   ;;  %v7901_v14 = vld [vmem:[#allocation2 + $0xb04] ss:$16 sps:$4 sm:$0xff]  }
 0x15e   :  { %5146 = vmatprep.subr.bf16.mxu0 %v7817_v15  ;;  %5679 = vmatprep.subr.bf16.mxu1 %v7820_v16  ;;  %v7904_v15 = vld [vmem:[#allocation2 + $0xb0c] ss:$16 sps:$4 sm:$0xff]   ;;  %v7899_v16 = vld [vmem:[#allocation2 + $0xb00] ss:$16 sps:$4 sm:$0xff]  }
 0x161   :  { %5147 = vmatpush1.bf16.msra.mxu0 %v7815_v17  ;;  %5680 = vmatpush1.bf16.msra.mxu1 %v7818_v18  ;;  %v7902_v17 = vld [vmem:[#allocation2 + $0xb08] ss:$16 sps:$4 sm:$0xff]   ;;  %v7907_v18 = vld [vmem:[#allocation2 + $0xb24] ss:$16 sps:$4 sm:$0xff]  }
 0x162   :  { %5148 = vmatprep.subr.bf16.mxu0 %v7823_v19  ;;  %5681 = vmatprep.subr.bf16.mxu1 %v7826_v20  ;;  %v7910_v19 = vld [vmem:[#allocation2 + $0xb2c] ss:$16 sps:$4 sm:$0xff]   ;;  %v7905_v20 = vld [vmem:[#allocation2 + $0xb20] ss:$16 sps:$4 sm:$0xff]  }
 0x165   :  { %5149 = vmatpush1.bf16.msra.mxu0 %v7821_v21  ;;  %5682 = vmatpush1.bf16.msra.mxu1 %v7824_v22  ;;  %v7908_v21 = vld [vmem:[#allocation2 + $0xb28] ss:$16 sps:$4 sm:$0xff]   ;;  %v7913_v22 = vld [vmem:[#allocation2 + $0xb44] ss:$16 sps:$4 sm:$0xff]  }
 0x166   :  { %5150 = vmatprep.subr.bf16.mxu0 %v7829_v24  ;;  %5683 = vmatprep.subr.bf16.mxu1 %v7832_v9  ;;  %v7916_v24 = vld [vmem:[#allocation2 + $0xb4c] ss:$16 sps:$4 sm:$0xff]   ;;  %v7911_v9 = vld [vmem:[#allocation2 + $0xb40] ss:$16 sps:$4 sm:$0xff]  }
 0x169   :  { %5151 = vmatpush1.bf16.msra.mxu0 %v7827_v27  ;;  %5684 = vmatpush1.bf16.msra.mxu1 %v7830_v28  ;;  %v7914_v27 = vld [vmem:[#allocation2 + $0xb48] ss:$16 sps:$4 sm:$0xff]   ;;  %v7919_v28 = vld [vmem:[#allocation2 + $0xb64] ss:$16 sps:$4 sm:$0xff]  }
 0x16a   :  { %5152 = vmatprep.subr.bf16.mxu0 %v7835_v23  ;;  %5685 = vmatprep.subr.bf16.mxu1 %v7838_v30  ;;  %v7922_v23 = vld [vmem:[#allocation2 + $0xb6c] ss:$16 sps:$4 sm:$0xff]   ;;  %v7917_v30 = vld [vmem:[#allocation2 + $0xb60] ss:$16 sps:$4 sm:$0xff]  }
 0x16d   :  { %5153 = vmatpush1.bf16.msra.mxu0 %v7833_v31  ;;  %5686 = vmatpush1.bf16.msra.mxu1 %v7836_v33  ;;  %v7920_v31 = vld [vmem:[#allocation2 + $0xb68] ss:$16 sps:$4 sm:$0xff]   ;;  %v7925_v33 = vld [vmem:[#allocation2 + $0xb84] ss:$16 sps:$4 sm:$0xff]  }
 0x16e   :  { %5154 = vmatprep.subr.bf16.mxu0 %v7841_v34  ;;  %5687 = vmatprep.subr.bf16.mxu1 %v7844_v35  ;;  %v7928_v34 = vld [vmem:[#allocation2 + $0xb8c] ss:$16 sps:$4 sm:$0xff]   ;;  %v7923_v35 = vld [vmem:[#allocation2 + $0xb80] ss:$16 sps:$4 sm:$0xff]  }
 0x171   :  { %5155 = vmatpush1.bf16.msra.mxu0 %v7839_v37  ;;  %5688 = vmatpush1.bf16.msra.mxu1 %v7842_v38  ;;  %v7931_v37 = vld [vmem:[#allocation2 + $0xba4] ss:$16 sps:$4 sm:$0xff]   ;;  %v7934_v38 = vld [vmem:[#allocation2 + $0xbac] ss:$16 sps:$4 sm:$0xff]  }
 0x172   :  { %5156 = vmatprep.subr.bf16.mxu0 %v7847_v39  ;;  %5689 = vmatprep.subr.bf16.mxu1 %v7850_v26  ;;  %v7929_v39 = vld [vmem:[#allocation2 + $0xba0] ss:$16 sps:$4 sm:$0xff]   ;;  %v7932_v26 = vld [vmem:[#allocation2 + $0xba8] ss:$16 sps:$4 sm:$0xff]  }
 0x175   :  { %5157 = vmatpush1.bf16.msra.mxu0 %v7845_v41  ;;  %5690 = vmatpush1.bf16.msra.mxu1 %v7848_v42  ;;  %v7937_v41 = vld [vmem:[#allocation2 + $0xbc4] ss:$16 sps:$4 sm:$0xff]   ;;  %v7940_v42 = vld [vmem:[#allocation2 + $0xbcc] ss:$16 sps:$4 sm:$0xff]  }
 0x176   :  { %5167 = vmatprep.subr.bf16.mxu0 %v7853_v44  ;;  %5700 = vmatprep.subr.bf16.mxu1 %v7856_v45  ;;  %v8819_v44 = vld [vmem:[%s8999_s0 + $0x18] sm:$0xff]  ;;  %v7935_v45 = vld [vmem:[#allocation2 + $0xbc0] ss:$16 sps:$4 sm:$0xff]  }
 0x178   :  { %5159 = vmatmul.mubr.bf16.vlgmr.msra.gmra.mrb[0].mxu0 %v215_v46  ;;  %5692 = vmatmul.mubr.bf16.vlgmr.msra.gmra.mrb[0].mxu1 %v215_v46  ;;  %v7943_v46 = vld [vmem:[#allocation2 + $0xbe4] ss:$16 sps:$4 sm:$0xff]  }
 0x179   :  { %5168 = vmatpush1.bf16.msra.mxu0 %v7851_v47  ;;  %5701 = vmatpush1.bf16.msra.mxu1 %v7854_v25  ;;  %v7946_v47 = vld [vmem:[#allocation2 + $0xbec] ss:$16 sps:$4 sm:$0xff]   ;;  %v8823_v25 = vrot.slane %v8819_v44, %v8761_v49 }
 0x17a   :  { %5169 = vmatprep.subr.bf16.mxu0 %v7859_v48  ;;  %5702 = vmatprep.subr.bf16.mxu1 %v7862_v50  ;;  %v7941_v48 = vld [vmem:[#allocation2 + $0xbe0] ss:$16 sps:$4 sm:$0xff]   ;;  %v7944_v50 = vld [vmem:[#allocation2 + $0xbe8] ss:$16 sps:$4 sm:$0xff]  }
 0x17b   :  { %5199 = vmatprep.mubr.bf16.mxu0 %v218_v51  ;;  %5732 = vmatprep.mubr.bf16.mxu1 %v218_v51  ;;  %v7950_v51 = vld [vmem:[#allocation2 + $0xc04] ss:$16 sps:$4 sm:$0xff]  }
 0x17d   :  { %5170 = vmatpush1.bf16.msra.mxu0 %v7857_v52  ;;  %5703 = vmatpush1.bf16.msra.mxu1 %v7860_v53  ;;  %v7953_v52 = vld [vmem:[#allocation2 + $0xc0c] ss:$16 sps:$4 sm:$0xff]   ;;  %v139_v53 = vcombine.high %v8823_v25, %v8823_v25 }
 0x17e   :  { %5171 = vmatprep.subr.bf16.mxu0 %v7865_v54  ;;  %5704 = vmatprep.subr.bf16.mxu1 %v7868_v55  ;;  %v217_v54 = vpack.c.bf16 %v8810_v40, %v8810_v40  ;;  %v7948_v55 = vld [vmem:[#allocation2 + $0xc00] ss:$16 sps:$4 sm:$0xff]  }
 0x17f   :  { %v7960_v40 = vld [vmem:[#allocation2 + $0xc40] ss:$16 sps:$4 sm:$0xff]  }
 0x181   :  { %5172 = vmatpush1.bf16.msra.mxu0 %v7863_v32  ;;  %5705 = vmatpush1.bf16.msra.mxu1 %v7866_v56  ;;  %v7951_v32 = vld [vmem:[#allocation2 + $0xc08] ss:$16 sps:$4 sm:$0xff]   ;;  %v7956_v56 = vld [vmem:[#allocation2 + $0xc24] ss:$16 sps:$4 sm:$0xff]  }
 0x182   :  { %5173 = vmatprep.subr.bf16.mxu0 %v7871_v57  ;;  %5706 = vmatprep.subr.bf16.mxu1 %v7874_v58  ;;  %v7959_v57 = vld [vmem:[#allocation2 + $0xc2c] ss:$16 sps:$4 sm:$0xff]   ;;  %v220_v58 = vpack.c.bf16 %v139_v53, %v139_v53  ;;  %v8032_v53 = vld [vmem:[#allocation2 + $0xdc0] ss:$16 sps:$4 sm:$0xff]  }
 0x185   :  { %5174 = vmatpush1.bf16.msra.mxu0 %v7869_v59  ;;  %5707 = vmatpush1.bf16.msra.mxu1 %v7872_v60  ;;  %v7954_v59 = vld [vmem:[#allocation2 + $0xc20] ss:$16 sps:$4 sm:$0xff]   ;;  %v7957_v60 = vld [vmem:[#allocation2 + $0xc28] ss:$16 sps:$4 sm:$0xff]  }
 0x186   :  { %5175 = vmatprep.subr.bf16.mxu0 %v7877_v61  ;;  %5708 = vmatprep.subr.bf16.mxu1 %v7880_v62  ;;  %v7962_v61 = vld [vmem:[#allocation2 + $0xc44] ss:$16 sps:$4 sm:$0xff]   ;;  %v7965_v62 = vld [vmem:[#allocation2 + $0xc4c] ss:$16 sps:$4 sm:$0xff]  }
 0x189   :  { %5176 = vmatpush1.bf16.msra.mxu0 %v7875_v63  ;;  %5709 = vmatpush1.bf16.msra.mxu1 %v7878_v0  ;;  %v7963_v63 = vld [vmem:[#allocation2 + $0xc48] ss:$16 sps:$4 sm:$0xff]   ;;  %v7968_v0 = vld [vmem:[#allocation2 + $0xc64] ss:$16 sps:$4 sm:$0xff]  }
 0x18a   :  { %5177 = vmatprep.subr.bf16.mxu0 %v7883_v1  ;;  %5710 = vmatprep.subr.bf16.mxu1 %v7886_v2  ;;  %v7971_v1 = vld [vmem:[#allocation2 + $0xc6c] ss:$16 sps:$4 sm:$0xff]   ;;  %v7966_v2 = vld [vmem:[#allocation2 + $0xc60] ss:$16 sps:$4 sm:$0xff]  }
 0x18d   :  { %5178 = vmatpush1.bf16.msra.mxu0 %v7881_v3  ;;  %5711 = vmatpush1.bf16.msra.mxu1 %v7884_v4  ;;  %v7969_v3 = vld [vmem:[#allocation2 + $0xc68] ss:$16 sps:$4 sm:$0xff]   ;;  %v7974_v4 = vld [vmem:[#allocation2 + $0xc84] ss:$16 sps:$4 sm:$0xff]  }
 0x18e   :  { %5179 = vmatprep.subr.bf16.mxu0 %v7889_v5  ;;  %5712 = vmatprep.subr.bf16.mxu1 %v7892_v6  ;;  %v7977_v5 = vld [vmem:[#allocation2 + $0xc8c] ss:$16 sps:$4 sm:$0xff]   ;;  %v7972_v6 = vld [vmem:[#allocation2 + $0xc80] ss:$16 sps:$4 sm:$0xff]  }
 0x191   :  { %5180 = vmatpush1.bf16.msra.mxu0 %v7887_v7  ;;  %5713 = vmatpush1.bf16.msra.mxu1 %v7890_v8  ;;  %v7975_v7 = vld [vmem:[#allocation2 + $0xc88] ss:$16 sps:$4 sm:$0xff]   ;;  %v7980_v8 = vld [vmem:[#allocation2 + $0xca4] ss:$16 sps:$4 sm:$0xff]  }
 0x192   :  { %5181 = vmatprep.subr.bf16.mxu0 %v7895_v10  ;;  %5714 = vmatprep.subr.bf16.mxu1 %v7898_v11  ;;  %v7983_v10 = vld [vmem:[#allocation2 + $0xcac] ss:$16 sps:$4 sm:$0xff]   ;;  %v7978_v11 = vld [vmem:[#allocation2 + $0xca0] ss:$16 sps:$4 sm:$0xff]  }
 0x195   :  { %5182 = vmatpush1.bf16.msra.mxu0 %v7893_v12  ;;  %5715 = vmatpush1.bf16.msra.mxu1 %v7896_v13  ;;  %v7981_v12 = vld [vmem:[#allocation2 + $0xca8] ss:$16 sps:$4 sm:$0xff]   ;;  %v7986_v13 = vld [vmem:[#allocation2 + $0xcc4] ss:$16 sps:$4 sm:$0xff]  }
 0x196   :  { %5183 = vmatprep.subr.bf16.mxu0 %v7901_v14  ;;  %5716 = vmatprep.subr.bf16.mxu1 %v7904_v15  ;;  %v7989_v14 = vld [vmem:[#allocation2 + $0xccc] ss:$16 sps:$4 sm:$0xff]   ;;  %v7984_v15 = vld [vmem:[#allocation2 + $0xcc0] ss:$16 sps:$4 sm:$0xff]  }
 0x199   :  { %5184 = vmatpush1.bf16.msra.mxu0 %v7899_v16  ;;  %5717 = vmatpush1.bf16.msra.mxu1 %v7902_v17  ;;  %v7987_v16 = vld [vmem:[#allocation2 + $0xcc8] ss:$16 sps:$4 sm:$0xff]   ;;  %v7992_v17 = vld [vmem:[#allocation2 + $0xce4] ss:$16 sps:$4 sm:$0xff]  }
 0x19a   :  { %5185 = vmatprep.subr.bf16.mxu0 %v7907_v18  ;;  %5718 = vmatprep.subr.bf16.mxu1 %v7910_v19  ;;  %v7995_v18 = vld [vmem:[#allocation2 + $0xcec] ss:$16 sps:$4 sm:$0xff]   ;;  %v7990_v19 = vld [vmem:[#allocation2 + $0xce0] ss:$16 sps:$4 sm:$0xff]  }
 0x19d   :  { %5186 = vmatpush1.bf16.msra.mxu0 %v7905_v20  ;;  %5719 = vmatpush1.bf16.msra.mxu1 %v7908_v21  ;;  %v7993_v20 = vld [vmem:[#allocation2 + $0xce8] ss:$16 sps:$4 sm:$0xff]   ;;  %v7998_v21 = vld [vmem:[#allocation2 + $0xd04] ss:$16 sps:$4 sm:$0xff]  }
 0x19e   :  { %5187 = vmatprep.subr.bf16.mxu0 %v7913_v22  ;;  %5720 = vmatprep.subr.bf16.mxu1 %v7916_v24  ;;  %v8001_v22 = vld [vmem:[#allocation2 + $0xd0c] ss:$16 sps:$4 sm:$0xff]   ;;  %v7996_v24 = vld [vmem:[#allocation2 + $0xd00] ss:$16 sps:$4 sm:$0xff]  }
 0x1a1   :  { %5188 = vmatpush1.bf16.msra.mxu0 %v7911_v9  ;;  %5721 = vmatpush1.bf16.msra.mxu1 %v7914_v27  ;;  %v7999_v9 = vld [vmem:[#allocation2 + $0xd08] ss:$16 sps:$4 sm:$0xff]   ;;  %v8004_v27 = vld [vmem:[#allocation2 + $0xd24] ss:$16 sps:$4 sm:$0xff]  }
 0x1a2   :  { %5189 = vmatprep.subr.bf16.mxu0 %v7919_v28  ;;  %5722 = vmatprep.subr.bf16.mxu1 %v7922_v23  ;;  %v8007_v28 = vld [vmem:[#allocation2 + $0xd2c] ss:$16 sps:$4 sm:$0xff]   ;;  %v8002_v23 = vld [vmem:[#allocation2 + $0xd20] ss:$16 sps:$4 sm:$0xff]  }
 0x1a5   :  { %5190 = vmatpush1.bf16.msra.mxu0 %v7917_v30  ;;  %5723 = vmatpush1.bf16.msra.mxu1 %v7920_v31  ;;  %v8005_v30 = vld [vmem:[#allocation2 + $0xd28] ss:$16 sps:$4 sm:$0xff]   ;;  %v8010_v31 = vld [vmem:[#allocation2 + $0xd44] ss:$16 sps:$4 sm:$0xff]  }
 0x1a6   :  { %5191 = vmatprep.subr.bf16.mxu0 %v7925_v33  ;;  %5724 = vmatprep.subr.bf16.mxu1 %v7928_v34  ;;  %v8013_v33 = vld [vmem:[#allocation2 + $0xd4c] ss:$16 sps:$4 sm:$0xff]   ;;  %v8008_v34 = vld [vmem:[#allocation2 + $0xd40] ss:$16 sps:$4 sm:$0xff]  }
 0x1a9   :  { %5192 = vmatpush1.bf16.msra.mxu0 %v7923_v35  ;;  %5725 = vmatpush1.bf16.msra.mxu1 %v7926_v36  ;;  %v8011_v35 = vld [vmem:[#allocation2 + $0xd48] ss:$16 sps:$4 sm:$0xff]   ;;  %v8016_v36 = vld [vmem:[#allocation2 + $0xd64] ss:$16 sps:$4 sm:$0xff]  }
 0x1aa   :  { %5193 = vmatprep.subr.bf16.mxu0 %v7931_v37  ;;  %5726 = vmatprep.subr.bf16.mxu1 %v7934_v38  ;;  %v8019_v37 = vld [vmem:[#allocation2 + $0xd6c] ss:$16 sps:$4 sm:$0xff]   ;;  %v8014_v38 = vld [vmem:[#allocation2 + $0xd60] ss:$16 sps:$4 sm:$0xff]  }
 0x1ad   :  { %5194 = vmatpush1.bf16.msra.mxu0 %v7929_v39  ;;  %5727 = vmatpush1.bf16.msra.mxu1 %v7932_v26  ;;  %v8017_v39 = vld [vmem:[#allocation2 + $0xd68] ss:$16 sps:$4 sm:$0xff]   ;;  %v8022_v26 = vld [vmem:[#allocation2 + $0xd84] ss:$16 sps:$4 sm:$0xff]  }
 0x1ae   :  { %5195 = vmatprep.subr.bf16.mxu0 %v7937_v41  ;;  %5728 = vmatprep.subr.bf16.mxu1 %v7940_v42  ;;  %v8025_v41 = vld [vmem:[#allocation2 + $0xd8c] ss:$16 sps:$4 sm:$0xff]   ;;  %v8020_v42 = vld [vmem:[#allocation2 + $0xd80] ss:$16 sps:$4 sm:$0xff]  }
 0x1b1   :  { %5196 = vmatpush1.bf16.msra.mxu0 %v7935_v45  ;;  %5729 = vmatpush1.bf16.msra.mxu1 %v7938_v29  ;;  %v8023_v45 = vld [vmem:[#allocation2 + $0xd88] ss:$16 sps:$4 sm:$0xff]   ;;  %v8028_v29 = vld [vmem:[#allocation2 + $0xda4] ss:$16 sps:$4 sm:$0xff]  }
 0x1b2   :  { %5197 = vmatprep.subr.bf16.mxu0 %v7943_v46  ;;  %5730 = vmatprep.subr.bf16.mxu1 %v7946_v47  ;;  %v8031_v46 = vld [vmem:[#allocation2 + $0xdac] ss:$16 sps:$4 sm:$0xff]   ;;  %v8026_v47 = vld [vmem:[#allocation2 + $0xda0] ss:$16 sps:$4 sm:$0xff]  }
 0x1b5   :  { %5198 = vmatpush1.bf16.msra.mxu0 %v7941_v48  ;;  %5731 = vmatpush1.bf16.msra.mxu1 %v7944_v50  ;;  %v8029_v48 = vld [vmem:[#allocation2 + $0xda8] ss:$16 sps:$4 sm:$0xff]   ;;  %v8034_v50 = vld [vmem:[#allocation2 + $0xdc4] ss:$16 sps:$4 sm:$0xff]  }
 0x1b6   :  { %5208 = vmatprep.subr.bf16.mxu0 %v7950_v51  ;;  %5741 = vmatprep.subr.bf16.mxu1 %v7953_v52  ;;  %v8037_v51 = vld [vmem:[#allocation2 + $0xdcc] ss:$16 sps:$4 sm:$0xff]   ;;  %v124_v52 = vcombine.high %v8819_v44, %v8819_v44 }
 0x1b8   :  { %5200 = vmatmul.mubr.bf16.vlgmr.msra.gmra.mrb[0].mxu0 %v217_v54  ;;  %5733 = vmatmul.mubr.bf16.vlgmr.msra.gmra.mrb[0].mxu1 %v217_v54  ;;  %v8035_v54 = vld [vmem:[#allocation2 + $0xdc8] ss:$16 sps:$4 sm:$0xff]  }
 0x1b9   :  { %5209 = vmatpush1.bf16.msra.mxu0 %v7948_v55  ;;  %5742 = vmatpush1.bf16.msra.mxu1 %v7951_v32  ;;  %v8040_v55 = vld [vmem:[#allocation2 + $0xde4] ss:$16 sps:$4 sm:$0xff]   ;;  %v8043_v32 = vld [vmem:[#allocation2 + $0xdec] ss:$16 sps:$4 sm:$0xff]  }
 0x1ba   :  { %5210 = vmatprep.subr.bf16.mxu0 %v7956_v56  ;;  %5743 = vmatprep.subr.bf16.mxu1 %v7959_v57  ;;  %v8832_v56 = vrot.slane %v124_v52, %v8761_v49  ;;  %v8038_v57 = vld [vmem:[#allocation2 + $0xde0] ss:$16 sps:$4 sm:$0xff]   ;;  %v8119_v52 = vld [vmem:[#allocation2 + $0xf88] ss:$16 sps:$4 sm:$0xff]  }
 0x1bb   :  { %5240 = vmatprep.mubr.bf16.mxu0 %v220_v58  ;;  %5773 = vmatprep.mubr.bf16.mxu1 %v220_v58  ;;  %v8041_v58 = vld [vmem:[#allocation2 + $0xde8] ss:$16 sps:$4 sm:$0xff]  }
 0x1bc   :  { %v140_v44 = vcombine.high %v8832_v56, %v8832_v56 }
 0x1bd   :  { %5211 = vmatpush1.bf16.msra.mxu0 %v7954_v59  ;;  %5744 = vmatpush1.bf16.msra.mxu1 %v7957_v60  ;;  %v8046_v59 = vld [vmem:[#allocation2 + $0xe04] ss:$16 sps:$4 sm:$0xff]   ;;  %v8049_v60 = vld [vmem:[#allocation2 + $0xe0c] ss:$16 sps:$4 sm:$0xff]  }
 0x1be   :  { %5212 = vmatprep.subr.bf16.mxu0 %v7962_v61  ;;  %5745 = vmatprep.subr.bf16.mxu1 %v7965_v62  ;;  %v219_v61 = vpack.c.bf16 %v8823_v25, %v8823_v25  ;;  %v8044_v62 = vld [vmem:[#allocation2 + $0xe00] ss:$16 sps:$4 sm:$0xff]  }
 0x1bf   :  { %v8056_v25 = vld [vmem:[#allocation2 + $0xe40] ss:$16 sps:$4 sm:$0xff]  }
 0x1c1   :  { %5213 = vmatpush1.bf16.msra.mxu0 %v7960_v40  ;;  %5746 = vmatpush1.bf16.msra.mxu1 %v7963_v63  ;;  %v8047_v40 = vld [vmem:[#allocation2 + $0xe08] ss:$16 sps:$4 sm:$0xff]   ;;  %v8052_v63 = vld [vmem:[#allocation2 + $0xe24] ss:$16 sps:$4 sm:$0xff]  }
 0x1c2   :  { %5214 = vmatprep.subr.bf16.mxu0 %v7968_v0  ;;  %5747 = vmatprep.subr.bf16.mxu1 %v7971_v1  ;;  %v8055_v0 = vld [vmem:[#allocation2 + $0xe2c] ss:$16 sps:$4 sm:$0xff]   ;;  %v222_v1 = vpack.c.bf16 %v140_v44, %v140_v44  ;;  %v8131_v44 = vld [vmem:[#allocation2 + $0xfc8] ss:$16 sps:$4 sm:$0xff]  }
 0x1c5   :  { %5215 = vmatpush1.bf16.msra.mxu0 %v7966_v2  ;;  %5748 = vmatpush1.bf16.msra.mxu1 %v7969_v3  ;;  %v8050_v2 = vld [vmem:[#allocation2 + $0xe20] ss:$16 sps:$4 sm:$0xff]   ;;  %v8053_v3 = vld [vmem:[#allocation2 + $0xe28] ss:$16 sps:$4 sm:$0xff]  }
 0x1c6   :  { %5216 = vmatprep.subr.bf16.mxu0 %v7974_v4  ;;  %5749 = vmatprep.subr.bf16.mxu1 %v7977_v5  ;;  %v8058_v4 = vld [vmem:[#allocation2 + $0xe44] ss:$16 sps:$4 sm:$0xff]   ;;  %v8061_v5 = vld [vmem:[#allocation2 + $0xe4c] ss:$16 sps:$4 sm:$0xff]  }
 0x1c9   :  { %5217 = vmatpush1.bf16.msra.mxu0 %v7972_v6  ;;  %5750 = vmatpush1.bf16.msra.mxu1 %v7975_v7  ;;  %v8059_v6 = vld [vmem:[#allocation2 + $0xe48] ss:$16 sps:$4 sm:$0xff]   ;;  %v8064_v7 = vld [vmem:[#allocation2 + $0xe64] ss:$16 sps:$4 sm:$0xff]  }
 0x1ca   :  { %5218 = vmatprep.subr.bf16.mxu0 %v7980_v8  ;;  %5751 = vmatprep.subr.bf16.mxu1 %v7983_v10  ;;  %v8067_v8 = vld [vmem:[#allocation2 + $0xe6c] ss:$16 sps:$4 sm:$0xff]   ;;  %v8062_v10 = vld [vmem:[#allocation2 + $0xe60] ss:$16 sps:$4 sm:$0xff]  }
 0x1cd   :  { %5219 = vmatpush1.bf16.msra.mxu0 %v7978_v11  ;;  %5752 = vmatpush1.bf16.msra.mxu1 %v7981_v12  ;;  %v8065_v11 = vld [vmem:[#allocation2 + $0xe68] ss:$16 sps:$4 sm:$0xff]   ;;  %v8070_v12 = vld [vmem:[#allocation2 + $0xe84] ss:$16 sps:$4 sm:$0xff]  }
 0x1ce   :  { %5220 = vmatprep.subr.bf16.mxu0 %v7986_v13  ;;  %5753 = vmatprep.subr.bf16.mxu1 %v7989_v14  ;;  %v8073_v13 = vld [vmem:[#allocation2 + $0xe8c] ss:$16 sps:$4 sm:$0xff]   ;;  %v8068_v14 = vld [vmem:[#allocation2 + $0xe80] ss:$16 sps:$4 sm:$0xff]  }
 0x1d1   :  { %5221 = vmatpush1.bf16.msra.mxu0 %v7984_v15  ;;  %5754 = vmatpush1.bf16.msra.mxu1 %v7987_v16  ;;  %v8071_v15 = vld [vmem:[#allocation2 + $0xe88] ss:$16 sps:$4 sm:$0xff]   ;;  %v8076_v16 = vld [vmem:[#allocation2 + $0xea4] ss:$16 sps:$4 sm:$0xff]  }
 0x1d2   :  { %5222 = vmatprep.subr.bf16.mxu0 %v7992_v17  ;;  %5755 = vmatprep.subr.bf16.mxu1 %v7995_v18  ;;  %v8079_v17 = vld [vmem:[#allocation2 + $0xeac] ss:$16 sps:$4 sm:$0xff]   ;;  %v8074_v18 = vld [vmem:[#allocation2 + $0xea0] ss:$16 sps:$4 sm:$0xff]  }
 0x1d5   :  { %5223 = vmatpush1.bf16.msra.mxu0 %v7990_v19  ;;  %5756 = vmatpush1.bf16.msra.mxu1 %v7993_v20  ;;  %v8077_v19 = vld [vmem:[#allocation2 + $0xea8] ss:$16 sps:$4 sm:$0xff]   ;;  %v8082_v20 = vld [vmem:[#allocation2 + $0xec4] ss:$16 sps:$4 sm:$0xff]  }
 0x1d6   :  { %5224 = vmatprep.subr.bf16.mxu0 %v7998_v21  ;;  %5757 = vmatprep.subr.bf16.mxu1 %v8001_v22  ;;  %v8085_v21 = vld [vmem:[#allocation2 + $0xecc] ss:$16 sps:$4 sm:$0xff]   ;;  %v8080_v22 = vld [vmem:[#allocation2 + $0xec0] ss:$16 sps:$4 sm:$0xff]  }
 0x1d9   :  { %5225 = vmatpush1.bf16.msra.mxu0 %v7996_v24  ;;  %5758 = vmatpush1.bf16.msra.mxu1 %v7999_v9  ;;  %v8083_v24 = vld [vmem:[#allocation2 + $0xec8] ss:$16 sps:$4 sm:$0xff]   ;;  %v8088_v9 = vld [vmem:[#allocation2 + $0xee4] ss:$16 sps:$4 sm:$0xff]  }
 0x1da   :  { %5226 = vmatprep.subr.bf16.mxu0 %v8004_v27  ;;  %5759 = vmatprep.subr.bf16.mxu1 %v8007_v28  ;;  %v8091_v27 = vld [vmem:[#allocation2 + $0xeec] ss:$16 sps:$4 sm:$0xff]   ;;  %v8086_v28 = vld [vmem:[#allocation2 + $0xee0] ss:$16 sps:$4 sm:$0xff]  }
 0x1dd   :  { %5227 = vmatpush1.bf16.msra.mxu0 %v8002_v23  ;;  %5760 = vmatpush1.bf16.msra.mxu1 %v8005_v30  ;;  %v8089_v23 = vld [vmem:[#allocation2 + $0xee8] ss:$16 sps:$4 sm:$0xff]   ;;  %v8094_v30 = vld [vmem:[#allocation2 + $0xf04] ss:$16 sps:$4 sm:$0xff]  }
 0x1de   :  { %5228 = vmatprep.subr.bf16.mxu0 %v8010_v31  ;;  %5761 = vmatprep.subr.bf16.mxu1 %v8013_v33  ;;  %v8097_v31 = vld [vmem:[#allocation2 + $0xf0c] ss:$16 sps:$4 sm:$0xff]   ;;  %v8092_v33 = vld [vmem:[#allocation2 + $0xf00] ss:$16 sps:$4 sm:$0xff]  }
 0x1e1   :  { %5229 = vmatpush1.bf16.msra.mxu0 %v8008_v34  ;;  %5762 = vmatpush1.bf16.msra.mxu1 %v8011_v35  ;;  %v8095_v34 = vld [vmem:[#allocation2 + $0xf08] ss:$16 sps:$4 sm:$0xff]   ;;  %v8100_v35 = vld [vmem:[#allocation2 + $0xf24] ss:$16 sps:$4 sm:$0xff]  }
 0x1e2   :  { %5230 = vmatprep.subr.bf16.mxu0 %v8016_v36  ;;  %5763 = vmatprep.subr.bf16.mxu1 %v8019_v37  ;;  %v8103_v36 = vld [vmem:[#allocation2 + $0xf2c] ss:$16 sps:$4 sm:$0xff]   ;;  %v8098_v37 = vld [vmem:[#allocation2 + $0xf20] ss:$16 sps:$4 sm:$0xff]  }
 0x1e5   :  { %5231 = vmatpush1.bf16.msra.mxu0 %v8014_v38  ;;  %5764 = vmatpush1.bf16.msra.mxu1 %v8017_v39  ;;  %v8101_v38 = vld [vmem:[#allocation2 + $0xf28] ss:$16 sps:$4 sm:$0xff]   ;;  %v8106_v39 = vld [vmem:[#allocation2 + $0xf44] ss:$16 sps:$4 sm:$0xff]  }
 0x1e6   :  { %5232 = vmatprep.subr.bf16.mxu0 %v8022_v26  ;;  %5765 = vmatprep.subr.bf16.mxu1 %v8025_v41  ;;  %v8109_v26 = vld [vmem:[#allocation2 + $0xf4c] ss:$16 sps:$4 sm:$0xff]   ;;  %v8104_v41 = vld [vmem:[#allocation2 + $0xf40] ss:$16 sps:$4 sm:$0xff]  }
 0x1e9   :  { %5233 = vmatpush1.bf16.msra.mxu0 %v8020_v42  ;;  %5766 = vmatpush1.bf16.msra.mxu1 %v8023_v45  ;;  %v8107_v42 = vld [vmem:[#allocation2 + $0xf48] ss:$16 sps:$4 sm:$0xff]   ;;  %v8112_v45 = vld [vmem:[#allocation2 + $0xf64] ss:$16 sps:$4 sm:$0xff]  }
 0x1ea   :  { %5234 = vmatprep.subr.bf16.mxu0 %v8028_v29  ;;  %5767 = vmatprep.subr.bf16.mxu1 %v8031_v46  ;;  %v8115_v29 = vld [vmem:[#allocation2 + $0xf6c] ss:$16 sps:$4 sm:$0xff]   ;;  %v8110_v46 = vld [vmem:[#allocation2 + $0xf60] ss:$16 sps:$4 sm:$0xff]  }
 0x1ed   :  { %5235 = vmatpush1.bf16.msra.mxu0 %v8026_v47  ;;  %5768 = vmatpush1.bf16.msra.mxu1 %v8029_v48  ;;  %v8113_v47 = vld [vmem:[#allocation2 + $0xf68] ss:$16 sps:$4 sm:$0xff]   ;;  %v8118_v48 = vld [vmem:[#allocation2 + $0xf84] ss:$16 sps:$4 sm:$0xff]  }
 0x1ee   :  { %5236 = vmatprep.subr.bf16.mxu0 %v8034_v50  ;;  %5769 = vmatprep.subr.bf16.mxu1 %v8037_v51  ;;  %v8121_v50 = vld [vmem:[#allocation2 + $0xf8c] ss:$16 sps:$4 sm:$0xff]   ;;  %v8116_v51 = vld [vmem:[#allocation2 + $0xf80] ss:$16 sps:$4 sm:$0xff]  }
 0x1f1   :  { %5237 = vmatpush1.bf16.msra.mxu0 %v8032_v53  ;;  %5770 = vmatpush1.bf16.msra.mxu1 %v8035_v54  ;;  %v8124_v53 = vld [vmem:[#allocation2 + $0xfa4] ss:$16 sps:$4 sm:$0xff]   ;;  %v8127_v54 = vld [vmem:[#allocation2 + $0xfac] ss:$16 sps:$4 sm:$0xff]  }
 0x1f2   :  { %5238 = vmatprep.subr.bf16.mxu0 %v8040_v55  ;;  %5771 = vmatprep.subr.bf16.mxu1 %v8043_v32  ;;  %v8122_v55 = vld [vmem:[#allocation2 + $0xfa0] ss:$16 sps:$4 sm:$0xff]   ;;  %v8125_v32 = vld [vmem:[#allocation2 + $0xfa8] ss:$16 sps:$4 sm:$0xff]  }
 0x1f5   :  { %5239 = vmatpush1.bf16.msra.mxu0 %v8038_v57  ;;  %5772 = vmatpush1.bf16.msra.mxu1 %v8041_v58  ;;  %v8130_v57 = vld [vmem:[#allocation2 + $0xfc4] ss:$16 sps:$4 sm:$0xff]   ;;  %v8133_v58 = vld [vmem:[#allocation2 + $0xfcc] ss:$16 sps:$4 sm:$0xff]  }
 0x1f6   :  { %5249 = vmatprep.subr.bf16.mxu0 %v8046_v59  ;;  %5782 = vmatprep.subr.bf16.mxu1 %v8049_v60  ;;  %v8841_v59 = vld [vmem:[%s8999_s0 + $0x20] sm:$0xff] }
 0x1f7   :  { %v8128_v60 = vld [vmem:[#allocation2 + $0xfc0] ss:$16 sps:$4 sm:$0xff]  }
 0x1f8   :  { %5241 = vmatmul.mubr.bf16.vlgmr.msra.gmra.mrb[0].mxu0 %v219_v61  ;;  %5774 = vmatmul.mubr.bf16.vlgmr.msra.gmra.mrb[0].mxu1 %v219_v61  ;;  %v8136_v61 = vld [vmem:[#allocation2 + $0xfe4] ss:$16 sps:$4 sm:$0xff]  }
 0x1f9   :  { %5250 = vmatpush1.bf16.msra.mxu0 %v8044_v62  ;;  %5783 = vmatpush1.bf16.msra.mxu1 %v8047_v40  ;;  %v8139_v62 = vld [vmem:[#allocation2 + $0xfec] ss:$16 sps:$4 sm:$0xff]   ;;  %v8845_v40 = vrot.slane %v8841_v59, %v8761_v49 }
 0x1fa   :  { %5251 = vmatprep.subr.bf16.mxu0 %v8052_v63  ;;  %5784 = vmatprep.subr.bf16.mxu1 %v8055_v0  ;;  %v8134_v63 = vld [vmem:[#allocation2 + $0xfe0] ss:$16 sps:$4 sm:$0xff]   ;;  %v8137_v0 = vld [vmem:[#allocation2 + $0xfe8] ss:$16 sps:$4 sm:$0xff]  }
 0x1fb   :  { %5281 = vmatprep.mubr.bf16.mxu0 %v222_v1  ;;  %5814 = vmatprep.mubr.bf16.mxu1 %v222_v1  ;;  %v8143_v1 = vld [vmem:[#allocation2 + $0x1004] ss:$16 sps:$4 sm:$0xff]  }
 0x1fd   :  { %5252 = vmatpush1.bf16.msra.mxu0 %v8050_v2  ;;  %5785 = vmatpush1.bf16.msra.mxu1 %v8053_v3  ;;  %v8146_v2 = vld [vmem:[#allocation2 + $0x100c] ss:$16 sps:$4 sm:$0xff]   ;;  %v156_v3 = vcombine.high %v8845_v40, %v8845_v40 }
 0x1fe   :  { %5253 = vmatprep.subr.bf16.mxu0 %v8058_v4  ;;  %5786 = vmatprep.subr.bf16.mxu1 %v8061_v5  ;;  %v221_v4 = vpack.c.bf16 %v8832_v56, %v8832_v56  ;;  %v8141_v5 = vld [vmem:[#allocation2 + $0x1000] ss:$16 sps:$4 sm:$0xff]  }
 0x1ff   :  { %v8153_v56 = vld [vmem:[#allocation2 + $0x1040] ss:$16 sps:$4 sm:$0xff]  }
 0x201   :  { %5254 = vmatpush1.bf16.msra.mxu0 %v8056_v25  ;;  %5787 = vmatpush1.bf16.msra.mxu1 %v8059_v6  ;;  %v8144_v25 = vld [vmem:[#allocation2 + $0x1008] ss:$16 sps:$4 sm:$0xff]   ;;  %v8149_v6 = vld [vmem:[#allocation2 + $0x1024] ss:$16 sps:$4 sm:$0xff]  }
 0x202   :  { %5255 = vmatprep.subr.bf16.mxu0 %v8064_v7  ;;  %5788 = vmatprep.subr.bf16.mxu1 %v8067_v8  ;;  %v8152_v7 = vld [vmem:[#allocation2 + $0x102c] ss:$16 sps:$4 sm:$0xff]   ;;  %v224_v8 = vpack.c.bf16 %v156_v3, %v156_v3  ;;  %v8225_v3 = vld [vmem:[#allocation2 + $0x11c0] ss:$16 sps:$4 sm:$0xff]  }
 0x205   :  { %5256 = vmatpush1.bf16.msra.mxu0 %v8062_v10  ;;  %5789 = vmatpush1.bf16.msra.mxu1 %v8065_v11  ;;  %v8147_v10 = vld [vmem:[#allocation2 + $0x1020] ss:$16 sps:$4 sm:$0xff]   ;;  %v8150_v11 = vld [vmem:[#allocation2 + $0x1028] ss:$16 sps:$4 sm:$0xff]  }
 0x206   :  { %5257 = vmatprep.subr.bf16.mxu0 %v8070_v12  ;;  %5790 = vmatprep.subr.bf16.mxu1 %v8073_v13  ;;  %v8155_v12 = vld [vmem:[#allocation2 + $0x1044] ss:$16 sps:$4 sm:$0xff]   ;;  %v8158_v13 = vld [vmem:[#allocation2 + $0x104c] ss:$16 sps:$4 sm:$0xff]  }
 0x209   :  { %5258 = vmatpush1.bf16.msra.mxu0 %v8068_v14  ;;  %5791 = vmatpush1.bf16.msra.mxu1 %v8071_v15  ;;  %v8156_v14 = vld [vmem:[#allocation2 + $0x1048] ss:$16 sps:$4 sm:$0xff]   ;;  %v8161_v15 = vld [vmem:[#allocation2 + $0x1064] ss:$16 sps:$4 sm:$0xff]  }
 0x20a   :  { %5259 = vmatprep.subr.bf16.mxu0 %v8076_v16  ;;  %5792 = vmatprep.subr.bf16.mxu1 %v8079_v17  ;;  %v8164_v16 = vld [vmem:[#allocation2 + $0x106c] ss:$16 sps:$4 sm:$0xff]   ;;  %v8159_v17 = vld [vmem:[#allocation2 + $0x1060] ss:$16 sps:$4 sm:$0xff]  }
 0x20d   :  { %5260 = vmatpush1.bf16.msra.mxu0 %v8074_v18  ;;  %5793 = vmatpush1.bf16.msra.mxu1 %v8077_v19  ;;  %v8162_v18 = vld [vmem:[#allocation2 + $0x1068] ss:$16 sps:$4 sm:$0xff]   ;;  %v8167_v19 = vld [vmem:[#allocation2 + $0x1084] ss:$16 sps:$4 sm:$0xff]  }
 0x20e   :  { %5261 = vmatprep.subr.bf16.mxu0 %v8082_v20  ;;  %5794 = vmatprep.subr.bf16.mxu1 %v8085_v21  ;;  %v8170_v20 = vld [vmem:[#allocation2 + $0x108c] ss:$16 sps:$4 sm:$0xff]   ;;  %v8165_v21 = vld [vmem:[#allocation2 + $0x1080] ss:$16 sps:$4 sm:$0xff]  }
 0x211   :  { %5262 = vmatpush1.bf16.msra.mxu0 %v8080_v22  ;;  %5795 = vmatpush1.bf16.msra.mxu1 %v8083_v24  ;;  %v8168_v22 = vld [vmem:[#allocation2 + $0x1088] ss:$16 sps:$4 sm:$0xff]   ;;  %v8173_v24 = vld [vmem:[#allocation2 + $0x10a4] ss:$16 sps:$4 sm:$0xff]  }
 0x212   :  { %5263 = vmatprep.subr.bf16.mxu0 %v8088_v9  ;;  %5796 = vmatprep.subr.bf16.mxu1 %v8091_v27  ;;  %v8176_v9 = vld [vmem:[#allocation2 + $0x10ac] ss:$16 sps:$4 sm:$0xff]   ;;  %v8171_v27 = vld [vmem:[#allocation2 + $0x10a0] ss:$16 sps:$4 sm:$0xff]  }
 0x215   :  { %5264 = vmatpush1.bf16.msra.mxu0 %v8086_v28  ;;  %5797 = vmatpush1.bf16.msra.mxu1 %v8089_v23  ;;  %v8174_v28 = vld [vmem:[#allocation2 + $0x10a8] ss:$16 sps:$4 sm:$0xff]   ;;  %v8179_v23 = vld [vmem:[#allocation2 + $0x10c4] ss:$16 sps:$4 sm:$0xff]  }
 0x216   :  { %5265 = vmatprep.subr.bf16.mxu0 %v8094_v30  ;;  %5798 = vmatprep.subr.bf16.mxu1 %v8097_v31  ;;  %v8182_v30 = vld [vmem:[#allocation2 + $0x10cc] ss:$16 sps:$4 sm:$0xff]   ;;  %v8177_v31 = vld [vmem:[#allocation2 + $0x10c0] ss:$16 sps:$4 sm:$0xff]  }
 0x219   :  { %5266 = vmatpush1.bf16.msra.mxu0 %v8092_v33  ;;  %5799 = vmatpush1.bf16.msra.mxu1 %v8095_v34  ;;  %v8180_v33 = vld [vmem:[#allocation2 + $0x10c8] ss:$16 sps:$4 sm:$0xff]   ;;  %v8185_v34 = vld [vmem:[#allocation2 + $0x10e4] ss:$16 sps:$4 sm:$0xff]  }
 0x21a   :  { %5267 = vmatprep.subr.bf16.mxu0 %v8100_v35  ;;  %5800 = vmatprep.subr.bf16.mxu1 %v8103_v36  ;;  %v8188_v35 = vld [vmem:[#allocation2 + $0x10ec] ss:$16 sps:$4 sm:$0xff]   ;;  %v8183_v36 = vld [vmem:[#allocation2 + $0x10e0] ss:$16 sps:$4 sm:$0xff]  }
 0x21d   :  { %5268 = vmatpush1.bf16.msra.mxu0 %v8098_v37  ;;  %5801 = vmatpush1.bf16.msra.mxu1 %v8101_v38  ;;  %v8186_v37 = vld [vmem:[#allocation2 + $0x10e8] ss:$16 sps:$4 sm:$0xff]   ;;  %v8191_v38 = vld [vmem:[#allocation2 + $0x1104] ss:$16 sps:$4 sm:$0xff]  }
 0x21e   :  { %5269 = vmatprep.subr.bf16.mxu0 %v8106_v39  ;;  %5802 = vmatprep.subr.bf16.mxu1 %v8109_v26  ;;  %v8194_v39 = vld [vmem:[#allocation2 + $0x110c] ss:$16 sps:$4 sm:$0xff]   ;;  %v8189_v26 = vld [vmem:[#allocation2 + $0x1100] ss:$16 sps:$4 sm:$0xff]  }
 0x221   :  { %5270 = vmatpush1.bf16.msra.mxu0 %v8104_v41  ;;  %5803 = vmatpush1.bf16.msra.mxu1 %v8107_v42  ;;  %v8192_v41 = vld [vmem:[#allocation2 + $0x1108] ss:$16 sps:$4 sm:$0xff]   ;;  %v8197_v42 = vld [vmem:[#allocation2 + $0x1124] ss:$16 sps:$4 sm:$0xff]  }
 0x222   :  { %5271 = vmatprep.subr.bf16.mxu0 %v8112_v45  ;;  %5804 = vmatprep.subr.bf16.mxu1 %v8115_v29  ;;  %v8200_v45 = vld [vmem:[#allocation2 + $0x112c] ss:$16 sps:$4 sm:$0xff]   ;;  %v8195_v29 = vld [vmem:[#allocation2 + $0x1120] ss:$16 sps:$4 sm:$0xff]  }
 0x225   :  { %5272 = vmatpush1.bf16.msra.mxu0 %v8110_v46  ;;  %5805 = vmatpush1.bf16.msra.mxu1 %v8113_v47  ;;  %v8198_v46 = vld [vmem:[#allocation2 + $0x1128] ss:$16 sps:$4 sm:$0xff]   ;;  %v8203_v47 = vld [vmem:[#allocation2 + $0x1144] ss:$16 sps:$4 sm:$0xff]  }
 0x226   :  { %5273 = vmatprep.subr.bf16.mxu0 %v8118_v48  ;;  %5806 = vmatprep.subr.bf16.mxu1 %v8121_v50  ;;  %v8206_v48 = vld [vmem:[#allocation2 + $0x114c] ss:$16 sps:$4 sm:$0xff]   ;;  %v8201_v50 = vld [vmem:[#allocation2 + $0x1140] ss:$16 sps:$4 sm:$0xff]  }
 0x229   :  { %5274 = vmatpush1.bf16.msra.mxu0 %v8116_v51  ;;  %5807 = vmatpush1.bf16.msra.mxu1 %v8119_v52  ;;  %v8204_v51 = vld [vmem:[#allocation2 + $0x1148] ss:$16 sps:$4 sm:$0xff]   ;;  %v8209_v52 = vld [vmem:[#allocation2 + $0x1164] ss:$16 sps:$4 sm:$0xff]  }
 0x22a   :  { %5275 = vmatprep.subr.bf16.mxu0 %v8124_v53  ;;  %5808 = vmatprep.subr.bf16.mxu1 %v8127_v54  ;;  %v8212_v53 = vld [vmem:[#allocation2 + $0x116c] ss:$16 sps:$4 sm:$0xff]   ;;  %v8207_v54 = vld [vmem:[#allocation2 + $0x1160] ss:$16 sps:$4 sm:$0xff]  }
 0x22d   :  { %5276 = vmatpush1.bf16.msra.mxu0 %v8122_v55  ;;  %5809 = vmatpush1.bf16.msra.mxu1 %v8125_v32  ;;  %v8210_v55 = vld [vmem:[#allocation2 + $0x1168] ss:$16 sps:$4 sm:$0xff]   ;;  %v8215_v32 = vld [vmem:[#allocation2 + $0x1184] ss:$16 sps:$4 sm:$0xff]  }
 0x22e   :  { %5277 = vmatprep.subr.bf16.mxu0 %v8130_v57  ;;  %5810 = vmatprep.subr.bf16.mxu1 %v8133_v58  ;;  %v8218_v57 = vld [vmem:[#allocation2 + $0x118c] ss:$16 sps:$4 sm:$0xff]   ;;  %v8213_v58 = vld [vmem:[#allocation2 + $0x1180] ss:$16 sps:$4 sm:$0xff]  }
 0x231   :  { %5278 = vmatpush1.bf16.msra.mxu0 %v8128_v60  ;;  %5811 = vmatpush1.bf16.msra.mxu1 %v8131_v44  ;;  %v8216_v60 = vld [vmem:[#allocation2 + $0x1188] ss:$16 sps:$4 sm:$0xff]   ;;  %v8221_v44 = vld [vmem:[#allocation2 + $0x11a4] ss:$16 sps:$4 sm:$0xff]  }
 0x232   :  { %5279 = vmatprep.subr.bf16.mxu0 %v8136_v61  ;;  %5812 = vmatprep.subr.bf16.mxu1 %v8139_v62  ;;  %v8224_v61 = vld [vmem:[#allocation2 + $0x11ac] ss:$16 sps:$4 sm:$0xff]   ;;  %v8219_v62 = vld [vmem:[#allocation2 + $0x11a0] ss:$16 sps:$4 sm:$0xff]  }
 0x235   :  { %5280 = vmatpush1.bf16.msra.mxu0 %v8134_v63  ;;  %5813 = vmatpush1.bf16.msra.mxu1 %v8137_v0  ;;  %v8222_v63 = vld [vmem:[#allocation2 + $0x11a8] ss:$16 sps:$4 sm:$0xff]   ;;  %v8227_v0 = vld [vmem:[#allocation2 + $0x11c4] ss:$16 sps:$4 sm:$0xff]  }
 0x236   :  { %5290 = vmatprep.subr.bf16.mxu0 %v8143_v1  ;;  %5823 = vmatprep.subr.bf16.mxu1 %v8146_v2  ;;  %v8230_v1 = vld [vmem:[#allocation2 + $0x11cc] ss:$16 sps:$4 sm:$0xff]   ;;  %v141_v2 = vcombine.high %v8841_v59, %v8841_v59 }
 0x238   :  { %5282 = vmatmul.mubr.bf16.vlgmr.msra.gmra.mrb[0].mxu0 %v221_v4  ;;  %5815 = vmatmul.mubr.bf16.vlgmr.msra.gmra.mrb[0].mxu1 %v221_v4  ;;  %v8228_v4 = vld [vmem:[#allocation2 + $0x11c8] ss:$16 sps:$4 sm:$0xff]  }
 0x239   :  { %5291 = vmatpush1.bf16.msra.mxu0 %v8141_v5  ;;  %5824 = vmatpush1.bf16.msra.mxu1 %v8144_v25  ;;  %v8233_v5 = vld [vmem:[#allocation2 + $0x11e4] ss:$16 sps:$4 sm:$0xff]   ;;  %v8236_v25 = vld [vmem:[#allocation2 + $0x11ec] ss:$16 sps:$4 sm:$0xff]  }
 0x23a   :  { %5292 = vmatprep.subr.bf16.mxu0 %v8149_v6  ;;  %5825 = vmatprep.subr.bf16.mxu1 %v8152_v7  ;;  %v8854_v6 = vrot.slane %v141_v2, %v8761_v49  ;;  %v8231_v7 = vld [vmem:[#allocation2 + $0x11e0] ss:$16 sps:$4 sm:$0xff]   ;;  %v8312_v2 = vld [vmem:[#allocation2 + $0x1388] ss:$16 sps:$4 sm:$0xff]  }
 0x23b   :  { %5322 = vmatprep.mubr.bf16.mxu0 %v224_v8  ;;  %5855 = vmatprep.mubr.bf16.mxu1 %v224_v8  ;;  %v8234_v8 = vld [vmem:[#allocation2 + $0x11e8] ss:$16 sps:$4 sm:$0xff]  }
 0x23c   :  { %v157_v59 = vcombine.high %v8854_v6, %v8854_v6 }
 0x23d   :  { %5293 = vmatpush1.bf16.msra.mxu0 %v8147_v10  ;;  %5826 = vmatpush1.bf16.msra.mxu1 %v8150_v11  ;;  %v8239_v10 = vld [vmem:[#allocation2 + $0x1204] ss:$16 sps:$4 sm:$0xff]   ;;  %v8242_v11 = vld [vmem:[#allocation2 + $0x120c] ss:$16 sps:$4 sm:$0xff]  }
 0x23e   :  { %5294 = vmatprep.subr.bf16.mxu0 %v8155_v12  ;;  %5827 = vmatprep.subr.bf16.mxu1 %v8158_v13  ;;  %v223_v12 = vpack.c.bf16 %v8845_v40, %v8845_v40  ;;  %v8237_v13 = vld [vmem:[#allocation2 + $0x1200] ss:$16 sps:$4 sm:$0xff]  }
 0x23f   :  { %v8249_v40 = vld [vmem:[#allocation2 + $0x1240] ss:$16 sps:$4 sm:$0xff]  }
 0x241   :  { %5295 = vmatpush1.bf16.msra.mxu0 %v8153_v56  ;;  %5828 = vmatpush1.bf16.msra.mxu1 %v8156_v14  ;;  %v8240_v56 = vld [vmem:[#allocation2 + $0x1208] ss:$16 sps:$4 sm:$0xff]   ;;  %v8245_v14 = vld [vmem:[#allocation2 + $0x1224] ss:$16 sps:$4 sm:$0xff]  }
 0x242   :  { %5296 = vmatprep.subr.bf16.mxu0 %v8161_v15  ;;  %5829 = vmatprep.subr.bf16.mxu1 %v8164_v16  ;;  %v8248_v15 = vld [vmem:[#allocation2 + $0x122c] ss:$16 sps:$4 sm:$0xff]   ;;  %v226_v16 = vpack.c.bf16 %v157_v59, %v157_v59  ;;  %v8324_v59 = vld [vmem:[#allocation2 + $0x13c8] ss:$16 sps:$4 sm:$0xff]  }
 0x245   :  { %5297 = vmatpush1.bf16.msra.mxu0 %v8159_v17  ;;  %5830 = vmatpush1.bf16.msra.mxu1 %v8162_v18  ;;  %v8243_v17 = vld [vmem:[#allocation2 + $0x1220] ss:$16 sps:$4 sm:$0xff]   ;;  %v8246_v18 = vld [vmem:[#allocation2 + $0x1228] ss:$16 sps:$4 sm:$0xff]  }
 0x246   :  { %5298 = vmatprep.subr.bf16.mxu0 %v8167_v19  ;;  %5831 = vmatprep.subr.bf16.mxu1 %v8170_v20  ;;  %v8251_v19 = vld [vmem:[#allocation2 + $0x1244] ss:$16 sps:$4 sm:$0xff]   ;;  %v8254_v20 = vld [vmem:[#allocation2 + $0x124c] ss:$16 sps:$4 sm:$0xff]  }
 0x249   :  { %5299 = vmatpush1.bf16.msra.mxu0 %v8165_v21  ;;  %5832 = vmatpush1.bf16.msra.mxu1 %v8168_v22  ;;  %v8252_v21 = vld [vmem:[#allocation2 + $0x1248] ss:$16 sps:$4 sm:$0xff]   ;;  %v8257_v22 = vld [vmem:[#allocation2 + $0x1264] ss:$16 sps:$4 sm:$0xff]  }
 0x24a   :  { %5300 = vmatprep.subr.bf16.mxu0 %v8173_v24  ;;  %5833 = vmatprep.subr.bf16.mxu1 %v8176_v9  ;;  %v8260_v24 = vld [vmem:[#allocation2 + $0x126c] ss:$16 sps:$4 sm:$0xff]   ;;  %v8255_v9 = vld [vmem:[#allocation2 + $0x1260] ss:$16 sps:$4 sm:$0xff]  }
 0x24d   :  { %5301 = vmatpush1.bf16.msra.mxu0 %v8171_v27  ;;  %5834 = vmatpush1.bf16.msra.mxu1 %v8174_v28  ;;  %v8258_v27 = vld [vmem:[#allocation2 + $0x1268] ss:$16 sps:$4 sm:$0xff]   ;;  %v8263_v28 = vld [vmem:[#allocation2 + $0x1284] ss:$16 sps:$4 sm:$0xff]  }
 0x24e   :  { %5302 = vmatprep.subr.bf16.mxu0 %v8179_v23  ;;  %5835 = vmatprep.subr.bf16.mxu1 %v8182_v30  ;;  %v8266_v23 = vld [vmem:[#allocation2 + $0x128c] ss:$16 sps:$4 sm:$0xff]   ;;  %v8261_v30 = vld [vmem:[#allocation2 + $0x1280] ss:$16 sps:$4 sm:$0xff]  }
 0x251   :  { %5303 = vmatpush1.bf16.msra.mxu0 %v8177_v31  ;;  %5836 = vmatpush1.bf16.msra.mxu1 %v8180_v33  ;;  %v8264_v31 = vld [vmem:[#allocation2 + $0x1288] ss:$16 sps:$4 sm:$0xff]   ;;  %v8269_v33 = vld [vmem:[#allocation2 + $0x12a4] ss:$16 sps:$4 sm:$0xff]  }
 0x252   :  { %5304 = vmatprep.subr.bf16.mxu0 %v8185_v34  ;;  %5837 = vmatprep.subr.bf16.mxu1 %v8188_v35  ;;  %v8272_v34 = vld [vmem:[#allocation2 + $0x12ac] ss:$16 sps:$4 sm:$0xff]   ;;  %v8267_v35 = vld [vmem:[#allocation2 + $0x12a0] ss:$16 sps:$4 sm:$0xff]  }
 0x255   :  { %5305 = vmatpush1.bf16.msra.mxu0 %v8183_v36  ;;  %5838 = vmatpush1.bf16.msra.mxu1 %v8186_v37  ;;  %v8270_v36 = vld [vmem:[#allocation2 + $0x12a8] ss:$16 sps:$4 sm:$0xff]   ;;  %v8275_v37 = vld [vmem:[#allocation2 + $0x12c4] ss:$16 sps:$4 sm:$0xff]  }
 0x256   :  { %5306 = vmatprep.subr.bf16.mxu0 %v8191_v38  ;;  %5839 = vmatprep.subr.bf16.mxu1 %v8194_v39  ;;  %v8278_v38 = vld [vmem:[#allocation2 + $0x12cc] ss:$16 sps:$4 sm:$0xff]   ;;  %v8273_v39 = vld [vmem:[#allocation2 + $0x12c0] ss:$16 sps:$4 sm:$0xff]  }
 0x259   :  { %5307 = vmatpush1.bf16.msra.mxu0 %v8189_v26  ;;  %5840 = vmatpush1.bf16.msra.mxu1 %v8192_v41  ;;  %v8276_v26 = vld [vmem:[#allocation2 + $0x12c8] ss:$16 sps:$4 sm:$0xff]   ;;  %v8281_v41 = vld [vmem:[#allocation2 + $0x12e4] ss:$16 sps:$4 sm:$0xff]  }
 0x25a   :  { %5308 = vmatprep.subr.bf16.mxu0 %v8197_v42  ;;  %5841 = vmatprep.subr.bf16.mxu1 %v8200_v45  ;;  %v8284_v42 = vld [vmem:[#allocation2 + $0x12ec] ss:$16 sps:$4 sm:$0xff]   ;;  %v8279_v45 = vld [vmem:[#allocation2 + $0x12e0] ss:$16 sps:$4 sm:$0xff]  }
 0x25d   :  { %5309 = vmatpush1.bf16.msra.mxu0 %v8195_v29  ;;  %5842 = vmatpush1.bf16.msra.mxu1 %v8198_v46  ;;  %v8282_v29 = vld [vmem:[#allocation2 + $0x12e8] ss:$16 sps:$4 sm:$0xff]   ;;  %v8287_v46 = vld [vmem:[#allocation2 + $0x1304] ss:$16 sps:$4 sm:$0xff]  }
 0x25e   :  { %5310 = vmatprep.subr.bf16.mxu0 %v8203_v47  ;;  %5843 = vmatprep.subr.bf16.mxu1 %v8206_v48  ;;  %v8290_v47 = vld [vmem:[#allocation2 + $0x130c] ss:$16 sps:$4 sm:$0xff]   ;;  %v8285_v48 = vld [vmem:[#allocation2 + $0x1300] ss:$16 sps:$4 sm:$0xff]  }
 0x261   :  { %5311 = vmatpush1.bf16.msra.mxu0 %v8201_v50  ;;  %5844 = vmatpush1.bf16.msra.mxu1 %v8204_v51  ;;  %v8288_v50 = vld [vmem:[#allocation2 + $0x1308] ss:$16 sps:$4 sm:$0xff]   ;;  %v8293_v51 = vld [vmem:[#allocation2 + $0x1324] ss:$16 sps:$4 sm:$0xff]  }
 0x262   :  { %5312 = vmatprep.subr.bf16.mxu0 %v8209_v52  ;;  %5845 = vmatprep.subr.bf16.mxu1 %v8212_v53  ;;  %v8296_v52 = vld [vmem:[#allocation2 + $0x132c] ss:$16 sps:$4 sm:$0xff]   ;;  %v8291_v53 = vld [vmem:[#allocation2 + $0x1320] ss:$16 sps:$4 sm:$0xff]  }
 0x265   :  { %5313 = vmatpush1.bf16.msra.mxu0 %v8207_v54  ;;  %5846 = vmatpush1.bf16.msra.mxu1 %v8210_v55  ;;  %v8294_v54 = vld [vmem:[#allocation2 + $0x1328] ss:$16 sps:$4 sm:$0xff]   ;;  %v8299_v55 = vld [vmem:[#allocation2 + $0x1344] ss:$16 sps:$4 sm:$0xff]  }
 0x266   :  { %5314 = vmatprep.subr.bf16.mxu0 %v8215_v32  ;;  %5847 = vmatprep.subr.bf16.mxu1 %v8218_v57  ;;  %v8302_v32 = vld [vmem:[#allocation2 + $0x134c] ss:$16 sps:$4 sm:$0xff]   ;;  %v8297_v57 = vld [vmem:[#allocation2 + $0x1340] ss:$16 sps:$4 sm:$0xff]  }
 0x269   :  { %5315 = vmatpush1.bf16.msra.mxu0 %v8213_v58  ;;  %5848 = vmatpush1.bf16.msra.mxu1 %v8216_v60  ;;  %v8300_v58 = vld [vmem:[#allocation2 + $0x1348] ss:$16 sps:$4 sm:$0xff]   ;;  %v8305_v60 = vld [vmem:[#allocation2 + $0x1364] ss:$16 sps:$4 sm:$0xff]  }
 0x26a   :  { %5316 = vmatprep.subr.bf16.mxu0 %v8221_v44  ;;  %5849 = vmatprep.subr.bf16.mxu1 %v8224_v61  ;;  %v8308_v44 = vld [vmem:[#allocation2 + $0x136c] ss:$16 sps:$4 sm:$0xff]   ;;  %v8303_v61 = vld [vmem:[#allocation2 + $0x1360] ss:$16 sps:$4 sm:$0xff]  }
 0x26d   :  { %5317 = vmatpush1.bf16.msra.mxu0 %v8219_v62  ;;  %5850 = vmatpush1.bf16.msra.mxu1 %v8222_v63  ;;  %v8306_v62 = vld [vmem:[#allocation2 + $0x1368] ss:$16 sps:$4 sm:$0xff]   ;;  %v8311_v63 = vld [vmem:[#allocation2 + $0x1384] ss:$16 sps:$4 sm:$0xff]  }
 0x26e   :  { %5318 = vmatprep.subr.bf16.mxu0 %v8227_v0  ;;  %5851 = vmatprep.subr.bf16.mxu1 %v8230_v1  ;;  %v8314_v0 = vld [vmem:[#allocation2 + $0x138c] ss:$16 sps:$4 sm:$0xff]   ;;  %v8309_v1 = vld [vmem:[#allocation2 + $0x1380] ss:$16 sps:$4 sm:$0xff]  }
 0x271   :  { %5319 = vmatpush1.bf16.msra.mxu0 %v8225_v3  ;;  %5852 = vmatpush1.bf16.msra.mxu1 %v8228_v4  ;;  %v8317_v3 = vld [vmem:[#allocation2 + $0x13a4] ss:$16 sps:$4 sm:$0xff]   ;;  %v8320_v4 = vld [vmem:[#allocation2 + $0x13ac] ss:$16 sps:$4 sm:$0xff]  }
 0x272   :  { %5320 = vmatprep.subr.bf16.mxu0 %v8233_v5  ;;  %5853 = vmatprep.subr.bf16.mxu1 %v8236_v25  ;;  %v8315_v5 = vld [vmem:[#allocation2 + $0x13a0] ss:$16 sps:$4 sm:$0xff]   ;;  %v8318_v25 = vld [vmem:[#allocation2 + $0x13a8] ss:$16 sps:$4 sm:$0xff]  }
 0x275   :  { %5321 = vmatpush1.bf16.msra.mxu0 %v8231_v7  ;;  %5854 = vmatpush1.bf16.msra.mxu1 %v8234_v8  ;;  %v8323_v7 = vld [vmem:[#allocation2 + $0x13c4] ss:$16 sps:$4 sm:$0xff]   ;;  %v8326_v8 = vld [vmem:[#allocation2 + $0x13cc] ss:$16 sps:$4 sm:$0xff]  }
 0x276   :  { %5331 = vmatprep.subr.bf16.mxu0 %v8239_v10  ;;  %5864 = vmatprep.subr.bf16.mxu1 %v8242_v11  ;;  %v8863_v10 = vld [vmem:[%s8999_s0 + $0x28] sm:$0xff]  ;;  %v8321_v11 = vld [vmem:[#allocation2 + $0x13c0] ss:$16 sps:$4 sm:$0xff]  }
 0x278   :  { %5323 = vmatmul.mubr.bf16.vlgmr.msra.gmra.mrb[0].mxu0 %v223_v12  ;;  %5856 = vmatmul.mubr.bf16.vlgmr.msra.gmra.mrb[0].mxu1 %v223_v12  ;;  %v8329_v12 = vld [vmem:[#allocation2 + $0x13e4] ss:$16 sps:$4 sm:$0xff]  }
 0x279   :  { %5332 = vmatpush1.bf16.msra.mxu0 %v8237_v13  ;;  %5865 = vmatpush1.bf16.msra.mxu1 %v8240_v56  ;;  %v8332_v13 = vld [vmem:[#allocation2 + $0x13ec] ss:$16 sps:$4 sm:$0xff]   ;;  %v8867_v56 = vrot.slane %v8863_v10, %v8761_v49 }
 0x27a   :  { %5333 = vmatprep.subr.bf16.mxu0 %v8245_v14  ;;  %5866 = vmatprep.subr.bf16.mxu1 %v8248_v15  ;;  %v8327_v14 = vld [vmem:[#allocation2 + $0x13e0] ss:$16 sps:$4 sm:$0xff]   ;;  %v8330_v15 = vld [vmem:[#allocation2 + $0x13e8] ss:$16 sps:$4 sm:$0xff]  }
 0x27b   :  { %5363 = vmatprep.mubr.bf16.mxu0 %v226_v16  ;;  %5896 = vmatprep.mubr.bf16.mxu1 %v226_v16  ;;  %v8336_v16 = vld [vmem:[#allocation2 + $0x1404] ss:$16 sps:$4 sm:$0xff]  }
 0x27d   :  { %5334 = vmatpush1.bf16.msra.mxu0 %v8243_v17  ;;  %5867 = vmatpush1.bf16.msra.mxu1 %v8246_v18  ;;  %v8339_v17 = vld [vmem:[#allocation2 + $0x140c] ss:$16 sps:$4 sm:$0xff]   ;;  %v173_v18 = vcombine.high %v8867_v56, %v8867_v56 }
 0x27e   :  { %5335 = vmatprep.subr.bf16.mxu0 %v8251_v19  ;;  %5868 = vmatprep.subr.bf16.mxu1 %v8254_v20  ;;  %v225_v19 = vpack.c.bf16 %v8854_v6, %v8854_v6  ;;  %v8334_v20 = vld [vmem:[#allocation2 + $0x1400] ss:$16 sps:$4 sm:$0xff]  }
 0x27f   :  { %v8346_v6 = vld [vmem:[#allocation2 + $0x1440] ss:$16 sps:$4 sm:$0xff]  }
 0x281   :  { %5336 = vmatpush1.bf16.msra.mxu0 %v8249_v40  ;;  %5869 = vmatpush1.bf16.msra.mxu1 %v8252_v21  ;;  %v8337_v40 = vld [vmem:[#allocation2 + $0x1408] ss:$16 sps:$4 sm:$0xff]   ;;  %v8342_v21 = vld [vmem:[#allocation2 + $0x1424] ss:$16 sps:$4 sm:$0xff]  }
 0x282   :  { %5337 = vmatprep.subr.bf16.mxu0 %v8257_v22  ;;  %5870 = vmatprep.subr.bf16.mxu1 %v8260_v24  ;;  %v8345_v22 = vld [vmem:[#allocation2 + $0x142c] ss:$16 sps:$4 sm:$0xff]   ;;  %v228_v24 = vpack.c.bf16 %v173_v18, %v173_v18  ;;  %v8418_v18 = vld [vmem:[#allocation2 + $0x15c0] ss:$16 sps:$4 sm:$0xff]  }
 0x285   :  { %5338 = vmatpush1.bf16.msra.mxu0 %v8255_v9  ;;  %5871 = vmatpush1.bf16.msra.mxu1 %v8258_v27  ;;  %v8340_v9 = vld [vmem:[#allocation2 + $0x1420] ss:$16 sps:$4 sm:$0xff]   ;;  %v8343_v27 = vld [vmem:[#allocation2 + $0x1428] ss:$16 sps:$4 sm:$0xff]  }
 0x286   :  { %5339 = vmatprep.subr.bf16.mxu0 %v8263_v28  ;;  %5872 = vmatprep.subr.bf16.mxu1 %v8266_v23  ;;  %v8348_v28 = vld [vmem:[#allocation2 + $0x1444] ss:$16 sps:$4 sm:$0xff]   ;;  %v8351_v23 = vld [vmem:[#allocation2 + $0x144c] ss:$16 sps:$4 sm:$0xff]  }
 0x289   :  { %5340 = vmatpush1.bf16.msra.mxu0 %v8261_v30  ;;  %5873 = vmatpush1.bf16.msra.mxu1 %v8264_v31  ;;  %v8349_v30 = vld [vmem:[#allocation2 + $0x1448] ss:$16 sps:$4 sm:$0xff]   ;;  %v8354_v31 = vld [vmem:[#allocation2 + $0x1464] ss:$16 sps:$4 sm:$0xff]  }
 0x28a   :  { %5341 = vmatprep.subr.bf16.mxu0 %v8269_v33  ;;  %5874 = vmatprep.subr.bf16.mxu1 %v8272_v34  ;;  %v8357_v33 = vld [vmem:[#allocation2 + $0x146c] ss:$16 sps:$4 sm:$0xff]   ;;  %v8352_v34 = vld [vmem:[#allocation2 + $0x1460] ss:$16 sps:$4 sm:$0xff]  }
 0x28d   :  { %5342 = vmatpush1.bf16.msra.mxu0 %v8267_v35  ;;  %5875 = vmatpush1.bf16.msra.mxu1 %v8270_v36  ;;  %v8355_v35 = vld [vmem:[#allocation2 + $0x1468] ss:$16 sps:$4 sm:$0xff]   ;;  %v8360_v36 = vld [vmem:[#allocation2 + $0x1484] ss:$16 sps:$4 sm:$0xff]  }
 0x28e   :  { %5343 = vmatprep.subr.bf16.mxu0 %v8275_v37  ;;  %5876 = vmatprep.subr.bf16.mxu1 %v8278_v38  ;;  %v8363_v37 = vld [vmem:[#allocation2 + $0x148c] ss:$16 sps:$4 sm:$0xff]   ;;  %v8358_v38 = vld [vmem:[#allocation2 + $0x1480] ss:$16 sps:$4 sm:$0xff]  }
 0x291   :  { %5344 = vmatpush1.bf16.msra.mxu0 %v8273_v39  ;;  %5877 = vmatpush1.bf16.msra.mxu1 %v8276_v26  ;;  %v8361_v39 = vld [vmem:[#allocation2 + $0x1488] ss:$16 sps:$4 sm:$0xff]   ;;  %v8366_v26 = vld [vmem:[#allocation2 + $0x14a4] ss:$16 sps:$4 sm:$0xff]  }
 0x292   :  { %5345 = vmatprep.subr.bf16.mxu0 %v8281_v41  ;;  %5878 = vmatprep.subr.bf16.mxu1 %v8284_v42  ;;  %v8369_v41 = vld [vmem:[#allocation2 + $0x14ac] ss:$16 sps:$4 sm:$0xff]   ;;  %v8364_v42 = vld [vmem:[#allocation2 + $0x14a0] ss:$16 sps:$4 sm:$0xff]  }
 0x295   :  { %5346 = vmatpush1.bf16.msra.mxu0 %v8279_v45  ;;  %5879 = vmatpush1.bf16.msra.mxu1 %v8282_v29  ;;  %v8367_v45 = vld [vmem:[#allocation2 + $0x14a8] ss:$16 sps:$4 sm:$0xff]   ;;  %v8372_v29 = vld [vmem:[#allocation2 + $0x14c4] ss:$16 sps:$4 sm:$0xff]  }
 0x296   :  { %5347 = vmatprep.subr.bf16.mxu0 %v8287_v46  ;;  %5880 = vmatprep.subr.bf16.mxu1 %v8290_v47  ;;  %v8375_v46 = vld [vmem:[#allocation2 + $0x14cc] ss:$16 sps:$4 sm:$0xff]   ;;  %v8370_v47 = vld [vmem:[#allocation2 + $0x14c0] ss:$16 sps:$4 sm:$0xff]  }
 0x299   :  { %5348 = vmatpush1.bf16.msra.mxu0 %v8285_v48  ;;  %5881 = vmatpush1.bf16.msra.mxu1 %v8288_v50  ;;  %v8373_v48 = vld [vmem:[#allocation2 + $0x14c8] ss:$16 sps:$4 sm:$0xff]   ;;  %v8378_v50 = vld [vmem:[#allocation2 + $0x14e4] ss:$16 sps:$4 sm:$0xff]  }
 0x29a   :  { %5349 = vmatprep.subr.bf16.mxu0 %v8293_v51  ;;  %5882 = vmatprep.subr.bf16.mxu1 %v8296_v52  ;;  %v8381_v51 = vld [vmem:[#allocation2 + $0x14ec] ss:$16 sps:$4 sm:$0xff]   ;;  %v8376_v52 = vld [vmem:[#allocation2 + $0x14e0] ss:$16 sps:$4 sm:$0xff]  }
 0x29d   :  { %5350 = vmatpush1.bf16.msra.mxu0 %v8291_v53  ;;  %5883 = vmatpush1.bf16.msra.mxu1 %v8294_v54  ;;  %v8379_v53 = vld [vmem:[#allocation2 + $0x14e8] ss:$16 sps:$4 sm:$0xff]   ;;  %v8384_v54 = vld [vmem:[#allocation2 + $0x1504] ss:$16 sps:$4 sm:$0xff]  }
 0x29e   :  { %5351 = vmatprep.subr.bf16.mxu0 %v8299_v55  ;;  %5884 = vmatprep.subr.bf16.mxu1 %v8302_v32  ;;  %v8387_v55 = vld [vmem:[#allocation2 + $0x150c] ss:$16 sps:$4 sm:$0xff]   ;;  %v8382_v32 = vld [vmem:[#allocation2 + $0x1500] ss:$16 sps:$4 sm:$0xff]  }
 0x2a1   :  { %5352 = vmatpush1.bf16.msra.mxu0 %v8297_v57  ;;  %5885 = vmatpush1.bf16.msra.mxu1 %v8300_v58  ;;  %v8385_v57 = vld [vmem:[#allocation2 + $0x1508] ss:$16 sps:$4 sm:$0xff]   ;;  %v8390_v58 = vld [vmem:[#allocation2 + $0x1524] ss:$16 sps:$4 sm:$0xff]  }
 0x2a2   :  { %5353 = vmatprep.subr.bf16.mxu0 %v8305_v60  ;;  %5886 = vmatprep.subr.bf16.mxu1 %v8308_v44  ;;  %v8393_v60 = vld [vmem:[#allocation2 + $0x152c] ss:$16 sps:$4 sm:$0xff]   ;;  %v8388_v44 = vld [vmem:[#allocation2 + $0x1520] ss:$16 sps:$4 sm:$0xff]  }
 0x2a5   :  { %5354 = vmatpush1.bf16.msra.mxu0 %v8303_v61  ;;  %5887 = vmatpush1.bf16.msra.mxu1 %v8306_v62  ;;  %v8391_v61 = vld [vmem:[#allocation2 + $0x1528] ss:$16 sps:$4 sm:$0xff]   ;;  %v8396_v62 = vld [vmem:[#allocation2 + $0x1544] ss:$16 sps:$4 sm:$0xff]  }
 0x2a6   :  { %5355 = vmatprep.subr.bf16.mxu0 %v8311_v63  ;;  %5888 = vmatprep.subr.bf16.mxu1 %v8314_v0  ;;  %v8399_v63 = vld [vmem:[#allocation2 + $0x154c] ss:$16 sps:$4 sm:$0xff]   ;;  %v8394_v0 = vld [vmem:[#allocation2 + $0x1540] ss:$16 sps:$4 sm:$0xff]  }
 0x2a9   :  { %5356 = vmatpush1.bf16.msra.mxu0 %v8309_v1  ;;  %5889 = vmatpush1.bf16.msra.mxu1 %v8312_v2  ;;  %v8397_v1 = vld [vmem:[#allocation2 + $0x1548] ss:$16 sps:$4 sm:$0xff]   ;;  %v8402_v2 = vld [vmem:[#allocation2 + $0x1564] ss:$16 sps:$4 sm:$0xff]  }
 0x2aa   :  { %5357 = vmatprep.subr.bf16.mxu0 %v8317_v3  ;;  %5890 = vmatprep.subr.bf16.mxu1 %v8320_v4  ;;  %v8405_v3 = vld [vmem:[#allocation2 + $0x156c] ss:$16 sps:$4 sm:$0xff]   ;;  %v8400_v4 = vld [vmem:[#allocation2 + $0x1560] ss:$16 sps:$4 sm:$0xff]  }
 0x2ad   :  { %5358 = vmatpush1.bf16.msra.mxu0 %v8315_v5  ;;  %5891 = vmatpush1.bf16.msra.mxu1 %v8318_v25  ;;  %v8403_v5 = vld [vmem:[#allocation2 + $0x1568] ss:$16 sps:$4 sm:$0xff]   ;;  %v8408_v25 = vld [vmem:[#allocation2 + $0x1584] ss:$16 sps:$4 sm:$0xff]  }
 0x2ae   :  { %5359 = vmatprep.subr.bf16.mxu0 %v8323_v7  ;;  %5892 = vmatprep.subr.bf16.mxu1 %v8326_v8  ;;  %v8411_v7 = vld [vmem:[#allocation2 + $0x158c] ss:$16 sps:$4 sm:$0xff]   ;;  %v8406_v8 = vld [vmem:[#allocation2 + $0x1580] ss:$16 sps:$4 sm:$0xff]  }
 0x2b1   :  { %5360 = vmatpush1.bf16.msra.mxu0 %v8321_v11  ;;  %5893 = vmatpush1.bf16.msra.mxu1 %v8324_v59  ;;  %v8409_v11 = vld [vmem:[#allocation2 + $0x1588] ss:$16 sps:$4 sm:$0xff]   ;;  %v8414_v59 = vld [vmem:[#allocation2 + $0x15a4] ss:$16 sps:$4 sm:$0xff]  }
 0x2b2   :  { %5361 = vmatprep.subr.bf16.mxu0 %v8329_v12  ;;  %5894 = vmatprep.subr.bf16.mxu1 %v8332_v13  ;;  %v8417_v12 = vld [vmem:[#allocation2 + $0x15ac] ss:$16 sps:$4 sm:$0xff]   ;;  %v8412_v13 = vld [vmem:[#allocation2 + $0x15a0] ss:$16 sps:$4 sm:$0xff]  }
 0x2b5   :  { %5362 = vmatpush1.bf16.msra.mxu0 %v8327_v14  ;;  %5895 = vmatpush1.bf16.msra.mxu1 %v8330_v15  ;;  %v8415_v14 = vld [vmem:[#allocation2 + $0x15a8] ss:$16 sps:$4 sm:$0xff]   ;;  %v8420_v15 = vld [vmem:[#allocation2 + $0x15c4] ss:$16 sps:$4 sm:$0xff]  }
 0x2b6   :  { %5372 = vmatprep.subr.bf16.mxu0 %v8336_v16  ;;  %5905 = vmatprep.subr.bf16.mxu1 %v8339_v17  ;;  %v8423_v16 = vld [vmem:[#allocation2 + $0x15cc] ss:$16 sps:$4 sm:$0xff]   ;;  %v158_v17 = vcombine.high %v8863_v10, %v8863_v10 }
 0x2b8   :  { %5364 = vmatmul.mubr.bf16.vlgmr.msra.gmra.mrb[0].mxu0 %v225_v19  ;;  %5897 = vmatmul.mubr.bf16.vlgmr.msra.gmra.mrb[0].mxu1 %v225_v19  ;;  %v8421_v19 = vld [vmem:[#allocation2 + $0x15c8] ss:$16 sps:$4 sm:$0xff]  }
 0x2b9   :  { %5373 = vmatpush1.bf16.msra.mxu0 %v8334_v20  ;;  %5906 = vmatpush1.bf16.msra.mxu1 %v8337_v40  ;;  %v8426_v20 = vld [vmem:[#allocation2 + $0x15e4] ss:$16 sps:$4 sm:$0xff]   ;;  %v8429_v40 = vld [vmem:[#allocation2 + $0x15ec] ss:$16 sps:$4 sm:$0xff]  }
 0x2ba   :  { %5374 = vmatprep.subr.bf16.mxu0 %v8342_v21  ;;  %5907 = vmatprep.subr.bf16.mxu1 %v8345_v22  ;;  %v8876_v21 = vrot.slane %v158_v17, %v8761_v49  ;;  %v8424_v22 = vld [vmem:[#allocation2 + $0x15e0] ss:$16 sps:$4 sm:$0xff]   ;;  %v8438_v49 = vld [vmem:[#allocation2 + $0x1624] ss:$16 sps:$4 sm:$0xff]  }
 0x2bb   :  { %5404 = vmatprep.mubr.bf16.mxu0 %v228_v24  ;;  %5937 = vmatprep.mubr.bf16.mxu1 %v228_v24  ;;  %v8427_v24 = vld [vmem:[#allocation2 + $0x15e8] ss:$16 sps:$4 sm:$0xff]   ;;  %v8510_v17 = vld [vmem:[#allocation2 + $0x17a4] ss:$16 sps:$4 sm:$0xff]  }
 0x2bc   :  { %v174_v10 = vcombine.high %v8876_v21, %v8876_v21 }
 0x2bd   :  { %5375 = vmatpush1.bf16.msra.mxu0 %v8340_v9  ;;  %5908 = vmatpush1.bf16.msra.mxu1 %v8343_v27  ;;  %v8432_v9 = vld [vmem:[#allocation2 + $0x1604] ss:$16 sps:$4 sm:$0xff]   ;;  %v8435_v27 = vld [vmem:[#allocation2 + $0x160c] ss:$16 sps:$4 sm:$0xff]  }
 0x2be   :  { %5376 = vmatprep.subr.bf16.mxu0 %v8348_v28  ;;  %5909 = vmatprep.subr.bf16.mxu1 %v8351_v23  ;;  %v227_v28 = vpack.c.bf16 %v8867_v56, %v8867_v56  ;;  %v8430_v23 = vld [vmem:[#allocation2 + $0x1600] ss:$16 sps:$4 sm:$0xff]  }
 0x2bf   :  { %v8442_v56 = vld [vmem:[#allocation2 + $0x1640] ss:$16 sps:$4 sm:$0xff]  }
 0x2c1   :  { %5377 = vmatpush1.bf16.msra.mxu0 %v8346_v6  ;;  %5910 = vmatpush1.bf16.msra.mxu1 %v8349_v30  ;;  %v8433_v6 = vld [vmem:[#allocation2 + $0x1608] ss:$16 sps:$4 sm:$0xff]   ;;  %v8441_v30 = vld [vmem:[#allocation2 + $0x162c] ss:$16 sps:$4 sm:$0xff]  }
 0x2c2   :  { %5378 = vmatprep.subr.bf16.mxu0 %v8354_v31  ;;  %5911 = vmatprep.subr.bf16.mxu1 %v8357_v33  ;;  %v230_v31 = vpack.c.bf16 %v174_v10, %v174_v10  ;;  %v8436_v33 = vld [vmem:[#allocation2 + $0x1620] ss:$16 sps:$4 sm:$0xff]   ;;  %v8525_v10 = vld [vmem:[#allocation2 + $0x17ec] ss:$16 sps:$4 sm:$0xff]  }
 0x2c5   :  { %5379 = vmatpush1.bf16.msra.mxu0 %v8352_v34  ;;  %5912 = vmatpush1.bf16.msra.mxu1 %v8355_v35  ;;  %v8439_v34 = vld [vmem:[#allocation2 + $0x1628] ss:$16 sps:$4 sm:$0xff]   ;;  %v8444_v35 = vld [vmem:[#allocation2 + $0x1644] ss:$16 sps:$4 sm:$0xff]  }
 0x2c6   :  { %5380 = vmatprep.subr.bf16.mxu0 %v8360_v36  ;;  %5913 = vmatprep.subr.bf16.mxu1 %v8363_v37  ;;  %v8447_v36 = vld [vmem:[#allocation2 + $0x164c] ss:$16 sps:$4 sm:$0xff]   ;;  %v8445_v37 = vld [vmem:[#allocation2 + $0x1648] ss:$16 sps:$4 sm:$0xff]  }
 0x2c9   :  { %5381 = vmatpush1.bf16.msra.mxu0 %v8358_v38  ;;  %5914 = vmatpush1.bf16.msra.mxu1 %v8361_v39  ;;  %v8450_v38 = vld [vmem:[#allocation2 + $0x1664] ss:$16 sps:$4 sm:$0xff]   ;;  %v8453_v39 = vld [vmem:[#allocation2 + $0x166c] ss:$16 sps:$4 sm:$0xff]  }
 0x2ca   :  { %5382 = vmatprep.subr.bf16.mxu0 %v8366_v26  ;;  %5915 = vmatprep.subr.bf16.mxu1 %v8369_v41  ;;  %v8448_v26 = vld [vmem:[#allocation2 + $0x1660] ss:$16 sps:$4 sm:$0xff]   ;;  %v8451_v41 = vld [vmem:[#allocation2 + $0x1668] ss:$16 sps:$4 sm:$0xff]  }
 0x2cd   :  { %5383 = vmatpush1.bf16.msra.mxu0 %v8364_v42  ;;  %5916 = vmatpush1.bf16.msra.mxu1 %v8367_v45  ;;  %v8456_v42 = vld [vmem:[#allocation2 + $0x1684] ss:$16 sps:$4 sm:$0xff]   ;;  %v8459_v45 = vld [vmem:[#allocation2 + $0x168c] ss:$16 sps:$4 sm:$0xff]  }
 0x2ce   :  { %5384 = vmatprep.subr.bf16.mxu0 %v8372_v29  ;;  %5917 = vmatprep.subr.bf16.mxu1 %v8375_v46  ;;  %v8454_v29 = vld [vmem:[#allocation2 + $0x1680] ss:$16 sps:$4 sm:$0xff]   ;;  %v8457_v46 = vld [vmem:[#allocation2 + $0x1688] ss:$16 sps:$4 sm:$0xff]  }
 0x2d1   :  { %5385 = vmatpush1.bf16.msra.mxu0 %v8370_v47  ;;  %5918 = vmatpush1.bf16.msra.mxu1 %v8373_v48  ;;  %v8462_v47 = vld [vmem:[#allocation2 + $0x16a4] ss:$16 sps:$4 sm:$0xff]   ;;  %v8465_v48 = vld [vmem:[#allocation2 + $0x16ac] ss:$16 sps:$4 sm:$0xff]  }
 0x2d2   :  { %5386 = vmatprep.subr.bf16.mxu0 %v8378_v50  ;;  %5919 = vmatprep.subr.bf16.mxu1 %v8381_v51  ;;  %v8460_v50 = vld [vmem:[#allocation2 + $0x16a0] ss:$16 sps:$4 sm:$0xff]   ;;  %v8463_v51 = vld [vmem:[#allocation2 + $0x16a8] ss:$16 sps:$4 sm:$0xff]  }
 0x2d5   :  { %5387 = vmatpush1.bf16.msra.mxu0 %v8376_v52  ;;  %5920 = vmatpush1.bf16.msra.mxu1 %v8379_v53  ;;  %v8468_v52 = vld [vmem:[#allocation2 + $0x16c4] ss:$16 sps:$4 sm:$0xff]   ;;  %v8471_v53 = vld [vmem:[#allocation2 + $0x16cc] ss:$16 sps:$4 sm:$0xff]  }
 0x2d6   :  { %5388 = vmatprep.subr.bf16.mxu0 %v8384_v54  ;;  %5921 = vmatprep.subr.bf16.mxu1 %v8387_v55  ;;  %v8466_v54 = vld [vmem:[#allocation2 + $0x16c0] ss:$16 sps:$4 sm:$0xff]   ;;  %v8469_v55 = vld [vmem:[#allocation2 + $0x16c8] ss:$16 sps:$4 sm:$0xff]  }
 0x2d9   :  { %5389 = vmatpush1.bf16.msra.mxu0 %v8382_v32  ;;  %5922 = vmatpush1.bf16.msra.mxu1 %v8385_v57  ;;  %v8474_v32 = vld [vmem:[#allocation2 + $0x16e4] ss:$16 sps:$4 sm:$0xff]   ;;  %v8477_v57 = vld [vmem:[#allocation2 + $0x16ec] ss:$16 sps:$4 sm:$0xff]  }
 0x2da   :  { %5390 = vmatprep.subr.bf16.mxu0 %v8390_v58  ;;  %5923 = vmatprep.subr.bf16.mxu1 %v8393_v60  ;;  %v8472_v58 = vld [vmem:[#allocation2 + $0x16e0] ss:$16 sps:$4 sm:$0xff]   ;;  %v8475_v60 = vld [vmem:[#allocation2 + $0x16e8] ss:$16 sps:$4 sm:$0xff]  }
 0x2dd   :  { %5391 = vmatpush1.bf16.msra.mxu0 %v8388_v44  ;;  %5924 = vmatpush1.bf16.msra.mxu1 %v8391_v61  ;;  %v8480_v44 = vld [vmem:[#allocation2 + $0x1704] ss:$16 sps:$4 sm:$0xff]   ;;  %v8483_v61 = vld [vmem:[#allocation2 + $0x170c] ss:$16 sps:$4 sm:$0xff]  }
 0x2de   :  { %5392 = vmatprep.subr.bf16.mxu0 %v8396_v62  ;;  %5925 = vmatprep.subr.bf16.mxu1 %v8399_v63  ;;  %v8478_v62 = vld [vmem:[#allocation2 + $0x1700] ss:$16 sps:$4 sm:$0xff]   ;;  %v8481_v63 = vld [vmem:[#allocation2 + $0x1708] ss:$16 sps:$4 sm:$0xff]  }
 0x2e1   :  { %5393 = vmatpush1.bf16.msra.mxu0 %v8394_v0  ;;  %5926 = vmatpush1.bf16.msra.mxu1 %v8397_v1  ;;  %v8486_v0 = vld [vmem:[#allocation2 + $0x1724] ss:$16 sps:$4 sm:$0xff]   ;;  %v8489_v1 = vld [vmem:[#allocation2 + $0x172c] ss:$16 sps:$4 sm:$0xff]  }
 0x2e2   :  { %5394 = vmatprep.subr.bf16.mxu0 %v8402_v2  ;;  %5927 = vmatprep.subr.bf16.mxu1 %v8405_v3  ;;  %v8484_v2 = vld [vmem:[#allocation2 + $0x1720] ss:$16 sps:$4 sm:$0xff]   ;;  %v8487_v3 = vld [vmem:[#allocation2 + $0x1728] ss:$16 sps:$4 sm:$0xff]  }
 0x2e5   :  { %5395 = vmatpush1.bf16.msra.mxu0 %v8400_v4  ;;  %5928 = vmatpush1.bf16.msra.mxu1 %v8403_v5  ;;  %v8492_v4 = vld [vmem:[#allocation2 + $0x1744] ss:$16 sps:$4 sm:$0xff]   ;;  %v8495_v5 = vld [vmem:[#allocation2 + $0x174c] ss:$16 sps:$4 sm:$0xff]  }
 0x2e6   :  { %5396 = vmatprep.subr.bf16.mxu0 %v8408_v25  ;;  %5929 = vmatprep.subr.bf16.mxu1 %v8411_v7  ;;  %v8490_v25 = vld [vmem:[#allocation2 + $0x1740] ss:$16 sps:$4 sm:$0xff]   ;;  %v8493_v7 = vld [vmem:[#allocation2 + $0x1748] ss:$16 sps:$4 sm:$0xff]  }
 0x2e9   :  { %5397 = vmatpush1.bf16.msra.mxu0 %v8406_v8  ;;  %5930 = vmatpush1.bf16.msra.mxu1 %v8409_v11  ;;  %v8498_v8 = vld [vmem:[#allocation2 + $0x1764] ss:$16 sps:$4 sm:$0xff]   ;;  %v8501_v11 = vld [vmem:[#allocation2 + $0x176c] ss:$16 sps:$4 sm:$0xff]  }
 0x2ea   :  { %5398 = vmatprep.subr.bf16.mxu0 %v8414_v59  ;;  %5931 = vmatprep.subr.bf16.mxu1 %v8417_v12  ;;  %v8496_v59 = vld [vmem:[#allocation2 + $0x1760] ss:$16 sps:$4 sm:$0xff]   ;;  %v8499_v12 = vld [vmem:[#allocation2 + $0x1768] ss:$16 sps:$4 sm:$0xff]  }
 0x2ed   :  { %5399 = vmatpush1.bf16.msra.mxu0 %v8412_v13  ;;  %5932 = vmatpush1.bf16.msra.mxu1 %v8415_v14  ;;  %v8504_v13 = vld [vmem:[#allocation2 + $0x1784] ss:$16 sps:$4 sm:$0xff]   ;;  %v8507_v14 = vld [vmem:[#allocation2 + $0x178c] ss:$16 sps:$4 sm:$0xff]  }
 0x2ee   :  { %5400 = vmatprep.subr.bf16.mxu0 %v8420_v15  ;;  %5933 = vmatprep.subr.bf16.mxu1 %v8423_v16  ;;  %v8502_v15 = vld [vmem:[#allocation2 + $0x1780] ss:$16 sps:$4 sm:$0xff]   ;;  %v8505_v16 = vld [vmem:[#allocation2 + $0x1788] ss:$16 sps:$4 sm:$0xff]  }
 0x2f1   :  { %5401 = vmatpush1.bf16.msra.mxu0 %v8418_v18  ;;  %5934 = vmatpush1.bf16.msra.mxu1 %v8421_v19  ;;  %v8513_v18 = vld [vmem:[#allocation2 + $0x17ac] ss:$16 sps:$4 sm:$0xff]   ;;  %v8508_v19 = vld [vmem:[#allocation2 + $0x17a0] ss:$16 sps:$4 sm:$0xff]  }
 0x2f2   :  { %5402 = vmatprep.subr.bf16.mxu0 %v8426_v20  ;;  %5935 = vmatprep.subr.bf16.mxu1 %v8429_v40  ;;  %v8511_v20 = vld [vmem:[#allocation2 + $0x17a8] ss:$16 sps:$4 sm:$0xff]   ;;  %v8516_v40 = vld [vmem:[#allocation2 + $0x17c4] ss:$16 sps:$4 sm:$0xff]  }
 0x2f5   :  { %5403 = vmatpush1.bf16.msra.mxu0 %v8424_v22  ;;  %5936 = vmatpush1.bf16.msra.mxu1 %v8427_v24  ;;  %v8519_v22 = vld [vmem:[#allocation2 + $0x17cc] ss:$16 sps:$4 sm:$0xff]   ;;  %v8514_v24 = vld [vmem:[#allocation2 + $0x17c0] ss:$16 sps:$4 sm:$0xff]  }
 0x2f6   :  { %5413 = vmatprep.subr.bf16.mxu0 %v8432_v9  ;;  %5946 = vmatprep.subr.bf16.mxu1 %v8435_v27  ;;  %v8517_v9 = vld [vmem:[#allocation2 + $0x17c8] ss:$16 sps:$4 sm:$0xff]   ;;  %v8522_v27 = vld [vmem:[#allocation2 + $0x17e4] ss:$16 sps:$4 sm:$0xff]  }
 0x2f8   :  { %5405 = vmatmul.mubr.bf16.vlgmr.msra.gmra.mrb[0].mxu0 %v227_v28  ;;  %5938 = vmatmul.mubr.bf16.vlgmr.msra.gmra.mrb[0].mxu1 %v227_v28  ;;  %v8520_v28 = vld [vmem:[#allocation2 + $0x17e0] ss:$16 sps:$4 sm:$0xff]  }
 0x2f9   :  { %5414 = vmatpush1.bf16.msra.mxu0 %v8430_v23  ;;  %5947 = vmatpush1.bf16.msra.mxu1 %v8433_v6  ;;  %v8523_v23 = vld [vmem:[#allocation2 + $0x17e8] ss:$16 sps:$4 sm:$0xff]   ;;  %v8529_v6 = vld [vmem:[#allocation2 + $0x1804] ss:$16 sps:$4 sm:$0xff]  }
 0x2fa   :  { %5415 = vmatprep.subr.bf16.mxu0 %v8438_v49  ;;  %5948 = vmatprep.subr.bf16.mxu1 %v8441_v30  ;;  %v8532_v49 = vld [vmem:[#allocation2 + $0x180c] ss:$16 sps:$4 sm:$0xff]   ;;  %v229_v30 = vpack.c.bf16 %v8876_v21, %v8876_v21  ;;  %v8539_v21 = vld [vmem:[#allocation2 + $0x1840] ss:$16 sps:$4 sm:$0xff]  }
 0x2fb   :  { %5445 = vmatprep.mubr.bf16.mxu0 %v230_v31  ;;  %5978 = vmatprep.mubr.bf16.mxu1 %v230_v31  ;;  %v8527_v31 = vld [vmem:[#allocation2 + $0x1800] ss:$16 sps:$4 sm:$0xff]  }
 0x2fd   :  { %5416 = vmatpush1.bf16.msra.mxu0 %v8436_v33  ;;  %5949 = vmatpush1.bf16.msra.mxu1 %v8439_v34  ;;  %v8530_v33 = vld [vmem:[#allocation2 + $0x1808] ss:$16 sps:$4 sm:$0xff]   ;;  %v8535_v34 = vld [vmem:[#allocation2 + $0x1824] ss:$16 sps:$4 sm:$0xff]  }
 0x2fe   :  { %5417 = vmatprep.subr.bf16.mxu0 %v8444_v35  ;;  %5950 = vmatprep.subr.bf16.mxu1 %v8447_v36  ;;  %v8538_v35 = vld [vmem:[#allocation2 + $0x182c] ss:$16 sps:$4 sm:$0xff]   ;;  %v8533_v36 = vld [vmem:[#allocation2 + $0x1820] ss:$16 sps:$4 sm:$0xff]  }
 0x301   :  { %5418 = vmatpush1.bf16.msra.mxu0 %v8442_v56  ;;  %5951 = vmatpush1.bf16.msra.mxu1 %v8445_v37  ;;  %v8536_v56 = vld [vmem:[#allocation2 + $0x1828] ss:$16 sps:$4 sm:$0xff]   ;;  %v8541_v37 = vld [vmem:[#allocation2 + $0x1844] ss:$16 sps:$4 sm:$0xff]  }
 0x302   :  { %5419 = vmatprep.subr.bf16.mxu0 %v8450_v38  ;;  %5952 = vmatprep.subr.bf16.mxu1 %v8453_v39  ;;  %v8544_v38 = vld [vmem:[#allocation2 + $0x184c] ss:$16 sps:$4 sm:$0xff]   ;;  %v8683_v39 = vmov 0  }
 0x305   :  { %5420 = vmatpush1.bf16.msra.mxu0 %v8448_v26  ;;  %5953 = vmatpush1.bf16.msra.mxu1 %v8451_v41  ;;  %v8542_v26 = vld [vmem:[#allocation2 + $0x1848] ss:$16 sps:$4 sm:$0xff]   ;;  %v8547_v41 = vld [vmem:[#allocation2 + $0x1864] ss:$16 sps:$4 sm:$0xff]  }
 0x306   :  { %5421 = vmatprep.subr.bf16.mxu0 %v8456_v42  ;;  %5954 = vmatprep.subr.bf16.mxu1 %v8459_v45  ;;  %v8550_v42 = vld [vmem:[#allocation2 + $0x186c] ss:$16 sps:$4 sm:$0xff]   ;;  %v8545_v45 = vld [vmem:[#allocation2 + $0x1860] ss:$16 sps:$4 sm:$0xff]  }
 0x309   :  { %5422 = vmatpush1.bf16.msra.mxu0 %v8454_v29  ;;  %5955 = vmatpush1.bf16.msra.mxu1 %v8457_v46  ;;  %v8548_v29 = vld [vmem:[#allocation2 + $0x1868] ss:$16 sps:$4 sm:$0xff]   ;;  %v6397_v46 = vld.sshfl [vmem:[%s8999_s0 + $0x30] sm:$0x3 pattern:$0x76325410] }
 0x30a   :  { %5423 = vmatprep.subr.bf16.mxu0 %v8462_v47  ;;  %5956 = vmatprep.subr.bf16.mxu1 %v8465_v48  ;;  %v8551_v47 = vld [vmem:[%s9002_s3 + $0x40] sm:$0xff]  }
 0x30b   :  { %v8552_v48 = vld [vmem:[%s9002_s3 + $0xc0] sm:$0xff]  }
 0x30d   :  { %5424 = vmatpush1.bf16.msra.mxu0 %v8460_v50  ;;  %5957 = vmatpush1.bf16.msra.mxu1 %v8463_v51  ;;  %v231_v50 = vpack.c.bf16 %v6397_v46, %v6397_v46  ;;  %v8553_v51 = vld [vmem:[%s9002_s3] sm:$0xff]  }
 0x30e   :  { %5425 = vmatprep.subr.bf16.mxu0 %v8468_v52  ;;  %5958 = vmatprep.subr.bf16.mxu1 %v8471_v53  ;;  %v8554_v52 = vld [vmem:[%s9002_s3 + $0x80] sm:$0xff]   ;;  %v8555_v53 = vld [vmem:[%s9002_s3 + $0x48] sm:$0xff]  }
 0x311   :  { %5426 = vmatpush1.bf16.msra.mxu0 %v8466_v54  ;;  %5959 = vmatpush1.bf16.msra.mxu1 %v8469_v55  ;;  %v8556_v54 = vld [vmem:[%s9002_s3 + $0xc8] sm:$0xff]  }
 0x312   :  { %5427 = vmatprep.subr.bf16.mxu0 %v8474_v32  ;;  %5960 = vmatprep.subr.bf16.mxu1 %v8477_v57  ;;  %v8557_v55 = vld [vmem:[%s9002_s3 + $0x8] sm:$0xff]   ;;  %v8559_v57 = vld [vmem:[%s9002_s3 + $0x50] sm:$0xff]  }
 0x313   :  { %v8558_v32 = vld [vmem:[%s9002_s3 + $0x88] sm:$0xff]  }
 0x315   :  { %5428 = vmatpush1.bf16.msra.mxu0 %v8472_v58  ;;  %5961 = vmatpush1.bf16.msra.mxu1 %v8475_v60  ;;  %v8560_v58 = vld [vmem:[%s9002_s3 + $0xd0] sm:$0xff]  }
 0x316   :  { %5429 = vmatprep.subr.bf16.mxu0 %v8480_v44  ;;  %5962 = vmatprep.subr.bf16.mxu1 %v8483_v61  ;;  %v8561_v60 = vld [vmem:[%s9002_s3 + $0x10] sm:$0xff]   ;;  %v8563_v61 = vld [vmem:[%s9002_s3 + $0x58] sm:$0xff]  }
 0x317   :  { %v8562_v44 = vld [vmem:[%s9002_s3 + $0x90] sm:$0xff]  }
 0x319   :  { %5430 = vmatpush1.bf16.msra.mxu0 %v8478_v62  ;;  %5963 = vmatpush1.bf16.msra.mxu1 %v8481_v63  ;;  %v8564_v62 = vld [vmem:[%s9002_s3 + $0xd8] sm:$0xff]  }
 0x31a   :  { %5431 = vmatprep.subr.bf16.mxu0 %v8486_v0  ;;  %5964 = vmatprep.subr.bf16.mxu1 %v8489_v1  ;;  %v8565_v63 = vld [vmem:[%s9002_s3 + $0x18] sm:$0xff]   ;;  %v8567_v1 = vld [vmem:[%s9002_s3 + $0x60] sm:$0xff]  }
 0x31b   :  { %v8566_v0 = vld [vmem:[%s9002_s3 + $0x98] sm:$0xff]  }
 0x31d   :  { %5432 = vmatpush1.bf16.msra.mxu0 %v8484_v2  ;;  %5965 = vmatpush1.bf16.msra.mxu1 %v8487_v3  ;;  %v8568_v2 = vld [vmem:[%s9002_s3 + $0xe0] sm:$0xff]  }
 0x31e   :  { %5433 = vmatprep.subr.bf16.mxu0 %v8492_v4  ;;  %5966 = vmatprep.subr.bf16.mxu1 %v8495_v5  ;;  %v8569_v3 = vld [vmem:[%s9002_s3 + $0x20] sm:$0xff]   ;;  %v8571_v5 = vld [vmem:[%s9002_s3 + $0x68] sm:$0xff]  }
 0x31f   :  { %v8570_v4 = vld [vmem:[%s9002_s3 + $0xa0] sm:$0xff]  }
 0x321   :  { %5434 = vmatpush1.bf16.msra.mxu0 %v8490_v25  ;;  %5967 = vmatpush1.bf16.msra.mxu1 %v8493_v7  ;;  %v8572_v25 = vld [vmem:[%s9002_s3 + $0xe8] sm:$0xff]  }
 0x322   :  { %5435 = vmatprep.subr.bf16.mxu0 %v8498_v8  ;;  %5968 = vmatprep.subr.bf16.mxu1 %v8501_v11  ;;  %v8573_v7 = vld [vmem:[%s9002_s3 + $0x28] sm:$0xff]   ;;  %v8575_v11 = vld [vmem:[%s9002_s3 + $0x70] sm:$0xff]  }
 0x323   :  { %v8574_v8 = vld [vmem:[%s9002_s3 + $0xa8] sm:$0xff]  }
 0x325   :  { %5436 = vmatpush1.bf16.msra.mxu0 %v8496_v59  ;;  %5969 = vmatpush1.bf16.msra.mxu1 %v8499_v12  ;;  %v8576_v59 = vld [vmem:[%s9002_s3 + $0xf0] sm:$0xff]  }
 0x326   :  { %5437 = vmatprep.subr.bf16.mxu0 %v8504_v13  ;;  %5970 = vmatprep.subr.bf16.mxu1 %v8507_v14  ;;  %v8577_v12 = vld [vmem:[%s9002_s3 + $0x30] sm:$0xff]   ;;  %v8579_v14 = vld [vmem:[%s9002_s3 + $0x78] sm:$0xff]  }
 0x327   :  { %v8578_v13 = vld [vmem:[%s9002_s3 + $0xb0] sm:$0xff]  }
 0x329   :  { %5438 = vmatpush1.bf16.msra.mxu0 %v8502_v15  ;;  %5971 = vmatpush1.bf16.msra.mxu1 %v8505_v16  ;;  %v8580_v15 = vld [vmem:[%s9002_s3 + $0xf8] sm:$0xff]  }
 0x32a   :  { %5439 = vmatprep.subr.bf16.mxu0 %v8510_v17  ;;  %5972 = vmatprep.subr.bf16.mxu1 %v8513_v18  ;;  %v8581_v16 = vld [vmem:[%s9002_s3 + $0x38] sm:$0xff]   ;;  %v1020_v18 = vsub.s32 0, %v8758_v43 }
 0x32b   :  { %v8582_v17 = vld [vmem:[%s9002_s3 + $0xb8] sm:$0xff]   ;;  %s8684_s3 = smov [#allocation8]  }
 0x32c   :  { %s6387_s24 = sshll.u32 %s8684_s3, 4  ;;  %s6388_s24 = int_to_ptr.vmem [resolvable:$true] %s6387_s24 }
 0x32d   :  { %5440 = vmatpush1.bf16.msra.mxu0 %v8508_v19  ;;  %5973 = vmatpush1.bf16.msra.mxu1 %v8511_v20  ;;  %v1028_v19 = vsub.s32 2, %v8758_v43  ;;  %v1016_v20 = vld [vmem:[#allocation5] sm:$0xf]  ;;  %s8649_s0 = scalar_lea.vmem %s6388_s24, 32  ;;  %p8654_p11 = scmp.lt.s32.totalorder %s6388_s24, %s6388_s24 }
 0x32e   :  { %5441 = vmatprep.subr.bf16.mxu0 %v8516_v40  ;;  %5974 = vmatprep.subr.bf16.mxu1 %v8519_v22  ;;  %v1024_v40 = vsub.s32 1, %v8758_v43  ;;  %v1032_v22 = vsub.s32 3, %v8758_v43  ;;  %p8650_p10 = scmp.ne.s32.totalorder %s6388_s24, %s8649_s0  ;;  %p8655_p12 = scmp.lt.s32.totalorder %s8649_s0, %s8649_s0 }
 0x330   :  { %p8656_p13 = por %p8655_p12, %p8654_p11 }
 0x331   :  { %5442 = vmatpush1.bf16.msra.mxu0 %v8514_v24  ;;  %5975 = vmatpush1.bf16.msra.mxu1 %v8517_v9  ;;  %v1021_v24 = vrot.slane %v1016_v20, %v1020_v18  ;;  %v1029_v9 = vrot.slane %v1016_v20, %v1028_v19 }
 0x332   :  { %5443 = vmatprep.subr.bf16.mxu0 %v8522_v27  ;;  %5976 = vmatprep.subr.bf16.mxu1 %v8525_v10  ;;  %v1025_v27 = vrot.slane %v1016_v20, %v1024_v40  ;;  %v1033_v10 = vrot.slane %v1016_v20, %v1032_v22  ;;  %p8657_p0 = pnand %p8656_p13, %p8650_p10 }
 0x335   :  { %5444 = vmatpush1.bf16.msra.mxu0 %v8520_v28  ;;  %5977 = vmatpush1.bf16.msra.mxu1 %v8523_v23 }
 0x336   :  { %5454 = vmatprep.subr.bf16.mxu0 %v8529_v6  ;;  %5987 = vmatprep.subr.bf16.mxu1 %v8532_v49 }
 0x338   :  { %5446 = vmatmul.mubr.bf16.vlgmr.msra.gmra.mrb[0].mxu0 %v229_v30  ;;  %5979 = vmatmul.mubr.bf16.vlgmr.msra.gmra.mrb[0].mxu1 %v229_v30 }
 0x339   :  { %5455 = vmatpush1.bf16.msra.mxu0 %v8527_v31  ;;  %5988 = vmatpush1.bf16.msra.mxu1 %v8530_v33 }
 0x33a   :  { %5456 = vmatprep.subr.bf16.mxu0 %v8535_v34  ;;  %5989 = vmatprep.subr.bf16.mxu1 %v8538_v35 }
 0x33b   :  { %5486 = vmatprep.mubr.bf16.mxu0 %v8683_v39  ;;  %6019 = vmatprep.mubr.bf16.mxu1 %v8683_v39 }
 0x33d   :  { %5457 = vmatpush1.bf16.msra.mxu0 %v8533_v36  ;;  %5990 = vmatpush1.bf16.msra.mxu1 %v8536_v56 }
 0x33e   :  { %5458 = vmatprep.subr.bf16.mxu0 %v8541_v37  ;;  %5991 = vmatprep.subr.bf16.mxu1 %v8544_v38 }
 0x341   :  { %5459 = vmatpush1.bf16.msra.mxu0 %v8539_v21  ;;  %5992 = vmatpush1.bf16.msra.mxu1 %v8542_v26 }
 0x342   :  { %5460 = vmatprep.subr.bf16.mxu0 %v8547_v41  ;;  %5993 = vmatprep.subr.bf16.mxu1 %v8550_v42 }
 0x345   :  { %5461 = vmatpush1.bf16.msra.mxu0 %v8545_v45  ;;  %5994 = vmatpush1.bf16.msra.mxu1 %v8548_v29 }
 0x346   :  { %7217 = vmatprep.subr.bf16.mxu0 %v8551_v47  ;;  %7239 = vmatprep.subr.bf16.mxu1 %v8552_v48  ;;  %v7184_v47 = vld [vmem:[#allocation7] ss:$0 sm:$0xff] }
 0x348   :  { %7182 = vmatmul.mubr.msk.bf16.vlgmr.msra.gmra.mrb[0].mxu0 %vm4958_vm0, %v231_v50  ;;  %7183 = vmatmul.mubr.msk.bf16.vlgmr.msra.gmra.mrb[0].mxu1 %vm4958_vm0, %v231_v50 }
 0x349   :  { %7218 = vmatpush3.bf16.msra.mxu0 %v8553_v51  ;;  %7240 = vmatpush3.bf16.msra.mxu1 %v8554_v52 }
 0x34a   :  { %7219 = vmatprep.subr.bf16.mxu0 %v8555_v53  ;;  %7241 = vmatprep.subr.bf16.mxu1 %v8556_v54 }
 0x34d   :  { %7220 = vmatpush3.bf16.msra.mxu0 %v8557_v55  ;;  %7242 = vmatpush3.bf16.msra.mxu1 %v8558_v32 }
 0x34e   :  { %7221 = vmatprep.subr.bf16.mxu0 %v8559_v57  ;;  %7243 = vmatprep.subr.bf16.mxu1 %v8560_v58 }
 0x351   :  { %7222 = vmatpush3.bf16.msra.mxu0 %v8561_v60  ;;  %7244 = vmatpush3.bf16.msra.mxu1 %v8562_v44 }
 0x352   :  { %7223 = vmatprep.subr.bf16.mxu0 %v8563_v61  ;;  %7245 = vmatprep.subr.bf16.mxu1 %v8564_v62 }
 0x355   :  { %7224 = vmatpush3.bf16.msra.mxu0 %v8565_v63  ;;  %7246 = vmatpush3.bf16.msra.mxu1 %v8566_v0 }
 0x356   :  { %7225 = vmatprep.subr.bf16.mxu0 %v8567_v1  ;;  %7247 = vmatprep.subr.bf16.mxu1 %v8568_v2 }
 0x359   :  { %7226 = vmatpush3.bf16.msra.mxu0 %v8569_v3  ;;  %7248 = vmatpush3.bf16.msra.mxu1 %v8570_v4 }
 0x35a   :  { %7227 = vmatprep.subr.bf16.mxu0 %v8571_v5  ;;  %7249 = vmatprep.subr.bf16.mxu1 %v8572_v25 }
 0x35d   :  { %7228 = vmatpush3.bf16.msra.mxu0 %v8573_v7  ;;  %7250 = vmatpush3.bf16.msra.mxu1 %v8574_v8 }
 0x35e   :  { %7229 = vmatprep.subr.bf16.mxu0 %v8575_v11  ;;  %7251 = vmatprep.subr.bf16.mxu1 %v8576_v59 }
 0x361   :  { %7230 = vmatpush3.bf16.msra.mxu0 %v8577_v12  ;;  %7252 = vmatpush3.bf16.msra.mxu1 %v8578_v13 }
 0x362   :  { %7231 = vmatprep.subr.bf16.mxu0 %v8579_v14  ;;  %7253 = vmatprep.subr.bf16.mxu1 %v8580_v15 }
 0x365   :  { %7232 = vmatpush3.bf16.msra.mxu0 %v8581_v16  ;;  %7254 = vmatpush3.bf16.msra.mxu1 %v8582_v17 }
 0x41b   :  { %v5488_v28 = vpop.f32.mrb[0].mxu0  ;;  %v6021_v23 = vpop.f32.mrb[0].mxu1 }
 0x41c   :  { %v7261_v6 = vadd.f32 %v5488_v28, %v1021_v24  ;;  %v7263_v49 = vadd.f32 %v6021_v23, %v1029_v9  ;;  %v5490_v30 = vpop.f32.mrb[1].mxu0  ;;  %v6023_v31 = vpop.f32.mrb[1].mxu1 }
 0x41d   :  { %v7262_v33 = vadd.f32 %v5490_v30, %v1025_v27  ;;  %v7264_v34 = vadd.f32 %v6023_v31, %v1033_v10  ;;  %v5492_v35 = vpop.f32.mrb[2].mxu0  ;;  %v6025_v36 = vpop.f32.mrb[2].mxu1 }
 0x41e   :  { %v6028_v56 = vmax.f32 %v7261_v6, 0.0  ;;  %v6030_v37 = vmax.f32 %v7263_v49, 0.0  ;;  %v5493_v38 = vpop.f32.mrb[3].mxu0  ;;  %v6026_v39 = vpop.f32.mrb[3].mxu1 }
 0x41f   :  { %v6029_v21 = vmax.f32 %v7262_v33, 0.0  ;;  %v6031_v43 = vmax.f32 %v7264_v34, 0.0 }
 0x420   :  { %v6032_v42 = vpack.c.bf16 %v6028_v56, %v6028_v56  ;;  %v6034_v45 = vpack.c.bf16 %v6030_v37, %v6030_v37 }
 0x421   :  { %v6033_v26 = vpack.c.bf16 %v6029_v21, %v6029_v21  ;;  %v6035_v41 = vpack.c.bf16 %v6031_v43, %v6031_v43 }
 0x423   :  { %6331 = vmatprep.mubr.bf16.mxu0 %v6033_v26  ;;  %6371 = vmatprep.mubr.bf16.mxu1 %v6035_v41 }
 0x424   :  { %6332 = vmatmul.mubr.bf16.vlgmr.msra.gmra.mrb[4].mxu0 %v6032_v42  ;;  %6372 = vmatmul.mubr.bf16.vlgmr.msra.gmra.mrb[4].mxu1 %v6034_v45 }
 0x4f7   :  { %v7233_v29 = vpop.f32.mrb[4].mxu0  ;;  %v7255_v46 = vpop.f32.mrb[4].mxu1 }
 0x4f8   :  { %v7234_v48 = vpop.f32.mrb[5].mxu0  ;;  %v7256_v50 = vpop.f32.mrb[5].mxu1 }
 0x4f9   :  { %v7235_v51 = vadd.f32 %v7234_v48, %v7233_v29  ;;  %v7257_v52 = vadd.f32 %v7256_v50, %v7255_v46  ;;  %v7236_v53 = vpop.f32.mrb[6].mxu0  ;;  %v7258_v54 = vpop.f32.mrb[6].mxu1 }
 0x4fa   :  { %v7237_v55 = vpop.f32.mrb[7].mxu0  ;;  %v7259_v32 = vpop.f32.mrb[7].mxu1 }
 0x4fb   :  { %v6334_v57 = vadd.f32 %v7235_v51, %v7184_v47 }
 0x4fd   :  { %v6374_v58 = vadd.f32 %v7257_v52, %v6334_v57 }
 0x4ff   :  { %6380 = vst.msk [vmem:[#allocation8] sm:$0x3] %vm6379_vm1, %v6374_v58 }
 0x500   :  { %8660 = shalt.err (!%p8657_p0)
}
 0x501   :  { %s8661_s27 = scalar_lea.hbm %s9004_s5, 32 }
 0x502   :  { %p8662_p1 = scmp.ne.s32.totalorder %s9004_s5, %s8661_s27  ;;  %p8665_p2 = scmp.lt.u32.totalorder %s8661_s27, %s9004_s5 }
 0x504   :  { %p8667_p3 = pnand %p8665_p2, %p8662_p1 }
 0x506   :  { %8670 = shalt.err (!%p8667_p3)
}
 0x507   :  { %6390 = dma.vmem_to_hbm [thread:$0]  %s6388_s24, 32, %s9004_s5, [#allocation4]  }
 0x508   :  { %8675 = dma.done.wait [#allocation4], 32  }
 0x509   :  { %8676 = vsyncadd [#allocation4], 4294967264 }
 0x50a   :  { %6394 = vsyncpa [#allocation3], 1 }
 0x50b   :  { %6395 = vsyncpa [#allocation6], 1 }
 0x50c   :  { %6396 = vsyncpa [#allocation4], 1 }

// kernel: forward_pallas.2
= control target key start
LH: loop header
LB: loop body
LE: loop exit
PB: predicated region body
PF: predicated region fallthrough
CT: control target
= control target key end

     0   :  { %12 = vsyncpa [#allocation5], 0  ;;  %s12223_s0 = inlined_call_operand.vmem [shape: bf16[2,224,9], index: 0, kind: input, shape index: {}]   ;;  %s12224_s1 = inlined_call_operand.hbm [shape: bf16[9,16], index: 1, kind: input, shape index: {}]   ;;  %s12225_s2 = inlined_call_operand.hbm [shape: f32[1,16], index: 2, kind: input, shape index: {}]   ;;  %s12226_s3 = inlined_call_operand.vmem [shape: bf16[144,32], index: 3, kind: input, shape index: {}]   ;;  %s12227_s4 = inlined_call_operand.hbm [shape: f32[1,32], index: 4, kind: input, shape index: {}]   ;;  %s12228_s5 = inlined_call_operand.vmem [shape: bf16[288,64], index: 5, kind: input, shape index: {}]   ;;  %s12229_s6 = inlined_call_operand.hbm [shape: f32[1,64], index: 6, kind: input, shape index: {}]   ;;  %s12230_s7 = inlined_call_operand.vmem [shape: f32[2,49,64], index: 7, kind: output, shape index: {}]  }
   0x1   :  { %13 = vsyncpa [#allocation7], 0 }
   0x2   :  { %14 = vsyncpa [#allocation10], 0  ;;  %s9750_s24 = smov 0  }
   0x3 LB: > { %s9694_s25 = smov [#allocation6]   ;;  %s9756_s27 = sadd.s32 4294967295, %s9692_s24   ;;  %s9692_s24 = sphi %s9750_s24, %s20_s24  }
   0x4   : > { %s229_s26 = sshll.u32 %s9694_s25, 4  ;;  %p7362_p0 = scmp.ge.s32.totalorder %s9692_s24, 1  ;;  %s9761_s26 = int_to_ptr.vmem [resolvable:$true] %s229_s26 }
   0x5   : > { %p203_p1 = scmp.lt.s32.totalorder %s9692_s24, 3  ;;  %p12231_p2 = scmp.eq.s32.totalorder %s9756_s27, 0 }
   0x6   : > { %s9695_s29 = smov [#allocation4]   ;;  %s9696_s9 = smov [#allocation8]  }
   0x7   : > { %p9763_p3 = pnand %p7362_p0, %p203_p1  ;;  %s215_s30 = sshll.u32 %s9695_s29, 4  ;;  %s9769_s30 = int_to_ptr.vmem [resolvable:$true] %s215_s30 }
   0x8   : > { %s243_s10 = sshll.u32 %s9696_s9, 4  ;;  %s9697_s11 = smov [#allocation9]   ;;  %s9777_s10 = int_to_ptr.vmem [resolvable:$true] %s243_s10 }
   0x9   : > { %s12285_s28 = scalar_select %p9763_p3, 1, 0 }
   0xa   : > { %p8807_p4 = pneg %p9763_p3  ;;  %s9779_s12 = sshll.u32 %s9697_s11, 4  ;;  %s258_s12 = int_to_ptr.vmem [resolvable:$true] %s9779_s12 }
   0xb   : > { %s9562_s15 = scalar_lea.hbm %s12225_s2, 16 }
   0xc   : > { %p9773_p5 = pnand %p12231_p2, %p8807_p4  ;;  %p9563_p6 = scmp.ne.s32.totalorder %s12225_s2, %s9562_s15 }
   0xd   : > { %p9569_p10 = scmp.lt.u32.totalorder %s9562_s15, %s12225_s2 }
   0xe   : > { %p9789_p7 = pneg %p9773_p5 }
  0x10   : > { %p9565_p8 = pnand %p9789_p7, %p9563_p6 }
  0x12   : > { %p9566_p9 = pneg %p9565_p8 }
  0x14   : > { %p9571_p11 = pnand %p9569_p10, %p9566_p9 }
  0x16   : > { %9574 = shalt.err (!%p9571_p11)
}
  0x17   : > { %s9575_s21 = scalar_lea.vmem %s9761_s26, 16  ;;  %s9582_s22 = scalar_lea.vmem %s9761_s26, 32 }
  0x18   : > { %p9576_p12 = scmp.ne.s32.totalorder %s9761_s26, %s9575_s21  ;;  %p9583_p1 = scmp.lt.s32.totalorder %s9761_s26, %s9761_s26 }
  0x19   : > { %p9584_p4 = scmp.lt.s32.totalorder %s9582_s22, %s9575_s21 }
  0x1a   : > { %p9578_p13 = pnand %p9576_p12, %p9789_p7 }
  0x1b   : > { %p9585_p6 = por %p9584_p4, %p9583_p1 }
  0x1c   : > { %p9579_p0 = pneg %p9578_p13 }
  0x1e   : > { %p9586_p8 = pnand %p9585_p6, %p9579_p0 }
  0x20   : > { %9589 = shalt.err (!%p9586_p8)
}
  0x21   : > { %8813 = dma.hbm_to_vmem [thread:$0]  (!%p9773_p5), %s12225_s2, 16, %s9761_s26, [#allocation7]  }
  0x22   : > { %s9590_s11 = scalar_lea.hbm %s12224_s1, 128 }
  0x23   : > { %p9591_p9 = scmp.ne.s32.totalorder %s12224_s1, %s9590_s11  ;;  %p9597_p12 = scmp.lt.u32.totalorder %s9590_s11, %s12224_s1 }
  0x25   : > { %p9593_p10 = pnand %p9591_p9, %p9789_p7 }
  0x27   : > { %p9594_p11 = pneg %p9593_p10 }
  0x29   : > { %p9599_p13 = pnand %p9597_p12, %p9594_p11 }
  0x2b   : > { %9602 = shalt.err (!%p9599_p13)
}
  0x2c   : > { %s9603_s26 = scalar_lea.vmem %s9769_s30, 128  ;;  %p9611_p6 = scmp.lt.s32.totalorder %s9769_s30, %s9769_s30 }
  0x2d   : > { %p9604_p0 = scmp.ne.s32.totalorder %s9769_s30, %s9603_s26  ;;  %p9612_p8 = scmp.lt.s32.totalorder %s9603_s26, %s9603_s26 }
  0x2f   : > { %p9606_p1 = pnand %p9604_p0, %p9789_p7  ;;  %p9613_p9 = por %p9612_p8, %p9611_p6 }
  0x31   : > { %p9607_p4 = pneg %p9606_p1 }
  0x33   : > { %p9614_p10 = pnand %p9613_p9, %p9607_p4 }
  0x35   : > { %9617 = shalt.err (!%p9614_p10)
}
  0x36   : > { %s9698_s17 = smov 64   ;;  %s9699_s19 = smov 4  }
  0x37   : > { %8810 = dma.hbm_to_vmem [thread:$0]  (!%p9773_p5), %s12224_s1, 128, %s9769_s30, [#allocation5], %s9698_s17, %s9698_s17, %s9699_s19  }
  0x38   : > { %s9618_s25 = scalar_lea.hbm %s12227_s4, 16 }
  0x39   : > { %p9619_p11 = scmp.ne.s32.totalorder %s12227_s4, %s9618_s25  ;;  %p9625_p0 = scmp.lt.u32.totalorder %s9618_s25, %s12227_s4 }
  0x3b   : > { %p9621_p12 = pnand %p9619_p11, %p9789_p7 }
  0x3d   : > { %p9622_p13 = pneg %p9621_p12 }
  0x3f   : > { %p9627_p1 = pnand %p9625_p0, %p9622_p13 }
  0x41   : > { %9630 = shalt.err (!%p9627_p1)
}
  0x42   : > { %s9631_s30 = scalar_lea.vmem %s9777_s10, 16  ;;  %s9638_s14 = scalar_lea.vmem %s9777_s10, 32 }
  0x43   : > { %p9632_p4 = scmp.ne.s32.totalorder %s9777_s10, %s9631_s30  ;;  %p9639_p9 = scmp.lt.s32.totalorder %s9777_s10, %s9777_s10 }
  0x44   : > { %p9640_p10 = scmp.lt.s32.totalorder %s9638_s14, %s9631_s30 }
  0x45   : > { %p9634_p6 = pnand %p9632_p4, %p9789_p7 }
  0x46   : > { %p9641_p11 = por %p9640_p10, %p9639_p9 }
  0x47   : > { %p9635_p8 = pneg %p9634_p6 }
  0x49   : > { %p9642_p12 = pnand %p9641_p11, %p9635_p8 }
  0x4b   : > { %9645 = shalt.err (!%p9642_p12)
}
  0x4c   : > { %8816 = dma.hbm_to_vmem [thread:$0]  (!%p9773_p5), %s12227_s4, 16, %s9777_s10, [#allocation7]  }
  0x4d   : > { %s9646_s19 = scalar_lea.hbm %s12229_s6, 16 }
  0x4e   : > { %p9647_p13 = scmp.ne.s32.totalorder %s12229_s6, %s9646_s19  ;;  %p9653_p4 = scmp.lt.u32.totalorder %s9646_s19, %s12229_s6 }
  0x50   : > { %p9649_p0 = pnand %p9647_p13, %p9789_p7 }
  0x52   : > { %p9650_p1 = pneg %p9649_p0 }
  0x54   : > { %p9655_p6 = pnand %p9653_p4, %p9650_p1 }
  0x56   : > { %9658 = shalt.err (!%p9655_p6)
}
  0x57   : > { %s9659_s25 = scalar_lea.vmem %s258_s12, 16  ;;  %s9666_s10 = scalar_lea.vmem %s258_s12, 32 }
  0x58   : > { %p9660_p8 = scmp.ne.s32.totalorder %s258_s12, %s9659_s25  ;;  %p9667_p11 = scmp.lt.s32.totalorder %s258_s12, %s258_s12 }
  0x59   : > { %p9668_p12 = scmp.lt.s32.totalorder %s9666_s10, %s9659_s25 }
  0x5a   : > { %p9662_p9 = pnand %p9660_p8, %p9789_p7 }
  0x5b   : > { %p9669_p2 = por %p9668_p12, %p9667_p11 }
  0x5c   : > { %p9663_p10 = pneg %p9662_p9 }
  0x5e   : > { %p9670_p3 = pnand %p9669_p2, %p9663_p10 }
  0x60   : > { %9673 = shalt.err (!%p9670_p3)
}
  0x61   : > { %8819 = dma.hbm_to_vmem [thread:$0]  (!%p9773_p5), %s12229_s6, 16, %s258_s12, [#allocation10]  }
  0x62   : > { %p12288_p13 = scmp.ne.s32.totalorder %s12285_s28, 0 }
  0x64   : > { %278 = sbr.rel (%p12288_p13) target bundleno = 1991 (0x7c7), region = 48 }
  0x6b   : > { %p12289_p0 = scmp.eq.s32.totalorder %s9756_s27, 0 }
  0x6d   : > { %9679 = dma.done.wait (%p12289_p0), [#allocation5], 128   ;;  %p12290_p7 = pmov %p12289_p0 }
  0x6e   : > { %p12291_p1 = pmov %p12289_p0 }
  0x6f   : > { %9681 = vsyncadd (%p12290_p7), [#allocation5], 4294967168 }
  0x70   : > { %9683 = dma.done.wait (%p12291_p1), [#allocation7], 32   ;;  %p12292_p2 = pmov %p12289_p0 }
  0x71   : > { %p12293_p3 = pmov %p12289_p0 }
  0x72   : > { %9685 = vsyncadd (%p12292_p2), [#allocation7], 4294967264 }
  0x73   : > { %9687 = dma.done.wait (%p12293_p3), [#allocation10], 16   ;;  %p12294_p5 = pmov %p12289_p0 }
  0x74   : > { %vm2453_vm0 = vcmask 130048   ;;  %vm4936_vm1 = vcmask 261120   ;;  %v9700_v0 = vmov 0.0   ;;  %v12243_v1 = vmov 4   ;;  %p322_p4 = scmp.lt.s32.totalorder %s9756_s27, 1  ;;  %v9533_v62 = vld [vmem:[%s12226_s3 + $0x8] sm:$0xff]  }
  0x75   : > { %9689 = vsyncadd (%p12294_p5), [#allocation10], 4294967280  ;;  %2454 = vst.msk [vmem:[#allocation2] sm:$0xff] %vm2453_vm0, %v9700_v0  ;;  %8918 = vset.pattern.permute.xlu0 %v12243_v1  ;;  %v12237_v2 = vmov 2   ;;  %v12241_v18 = vmov 8   ;;  %v12245_v19 = vmov 3   ;;  %8007 = vmatprep.subr.bf16.mxu0 %v9533_v62 }
  0x76   : > { %2455 = vst.msk [vmem:[#allocation2 + $0x8] sm:$0xff] %vm2453_vm0, %v9700_v0  ;;  %2456 = vst.msk [vmem:[#allocation2 + $0x10] sm:$0xff] %vm2453_vm0, %v9700_v0  ;;  %8852 = vset.pattern.permute.xlu1 %v12237_v2  ;;  %s12393_s27 = smov (!%p322_p4, %s9756_s27), 1  ;;  %v12233_v25 = vmov 1   ;;  %v12239_v26 = vmov 0   ;;  %v12235_v31 = vmov 5   ;;  %8008 = vmatpush3.bf16.msra.mxu0 %v9533_v62 }
  0x77   : > { %2457 = vst.msk [vmem:[#allocation2 + $0x18] sm:$0xff] %vm2453_vm0, %v9700_v0  ;;  %2458 = vst.msk [vmem:[#allocation2 + $0x20] sm:$0xff] %vm2453_vm0, %v9700_v0  ;;  %s8789_s28 = smul.u32 112, %s12393_s27  ;;  %v12249_v37 = vmov 6   ;;  %v12247_v45 = vmov 7  }
  0x78   : > { %2459 = vst.msk [vmem:[#allocation2 + $0x28] sm:$0xff] %vm2453_vm0, %v9700_v0  ;;  %2460 = vst.msk [vmem:[#allocation2 + $0x30] sm:$0xff] %vm2453_vm0, %v9700_v0  ;;  %s8790_s23 = smul.u32 56, %s12393_s27 }
  0x79   : > { %2461 = vst.msk [vmem:[#allocation2 + $0x38] sm:$0xff] %vm2453_vm0, %v9700_v0  ;;  %2462 = vst.msk [vmem:[#allocation2 + $0x40] sm:$0xff] %vm2453_vm0, %v9700_v0  ;;  %s10033_s18 = scalar_lea.vmem %s12223_s0, %s8789_s28 }
  0x7a   : > { %2463 = vst.msk [vmem:[#allocation2 + $0x48] sm:$0xff] %vm2453_vm0, %v9700_v0  ;;  %2464 = vst.msk [vmem:[#allocation2 + $0x50] sm:$0xff] %vm2453_vm0, %v9700_v0  ;;  %v7716_v3 = vld [vmem:[%s10033_s18 + $0x10] sm:$0xff]   ;;  %v7660_v4 = vld [vmem:[%s10033_s18] sm:$0xff]   ;;  %s12097_s29 = scalar_lea.vmem %s12230_s7, %s8790_s23 }
  0x7b   : > { %2465 = vst.msk [vmem:[#allocation2 + $0x58] sm:$0xff] %vm2453_vm0, %v9700_v0  ;;  %2466 = vst.msk [vmem:[#allocation2 + $0x60] sm:$0xff] %vm2453_vm0, %v9700_v0  ;;  %v7715_v5 = vld [vmem:[%s10033_s18 + $0x8] sm:$0xff]   ;;  %v7669_v6 = vunpack.c.l.bf16 %v7716_v3  ;;  %v7670_v7 = vunpack.c.h.bf16 %v7716_v3  ;;  %v7661_v8 = vunpack.c.l.bf16 %v7660_v4  ;;  %v7662_v9 = vunpack.c.h.bf16 %v7660_v4  ;;  %v7718_v14 = vld [vmem:[%s10033_s18 + $0x20] sm:$0xff]  }
  0x7c   : > { %2467 = vst.msk [vmem:[#allocation2 + $0x68] sm:$0xff] %vm2453_vm0, %v9700_v0  ;;  %2468 = vst.msk [vmem:[#allocation2 + $0x70] sm:$0xff] %vm2453_vm0, %v9700_v0  ;;  %v7665_v10 = vunpack.c.l.bf16 %v7715_v5  ;;  %v7666_v11 = vunpack.c.h.bf16 %v7715_v5  ;;  %v7677_v16 = vunpack.c.l.bf16 %v7718_v14  ;;  %v7678_v17 = vunpack.c.h.bf16 %v7718_v14  ;;  %v7717_v20 = vld [vmem:[%s10033_s18 + $0x18] sm:$0xff]   ;;  %v7723_v27 = vld [vmem:[%s10033_s18 + $0x48] sm:$0xff]  }
  0x7d   : > { %2469 = vst.msk [vmem:[#allocation2 + $0x78] sm:$0xff] %vm2453_vm0, %v9700_v0  ;;  %2470 = vst.msk [vmem:[#allocation2 + $0x80] sm:$0xff] %vm2453_vm0, %v9700_v0  ;;  %v10038_v12 = vpack.i.bf16 %v7669_v6, %v7670_v7  ;;  %v10040_v13 = vpack.i.bf16 %v7661_v8, %v7662_v9  ;;  %v7673_v22 = vunpack.c.l.bf16 %v7717_v20  ;;  %v7674_v23 = vunpack.c.h.bf16 %v7717_v20  ;;  %v7724_v30 = vld [vmem:[%s10033_s18 + $0x50] sm:$0xff]   ;;  %v7719_v36 = vld [vmem:[%s10033_s18 + $0x28] sm:$0xff]  }
  0x7e   : > { %2471 = vst.msk [vmem:[#allocation2 + $0x88] sm:$0xff] %vm2453_vm0, %v9700_v0  ;;  %2472 = vst.msk [vmem:[#allocation2 + $0x90] sm:$0xff] %vm2453_vm0, %v9700_v0  ;;  %v10045_v15 = vpack.i.bf16 %v7665_v10, %v7666_v11  ;;  %v10052_v21 = vpack.i.bf16 %v7677_v16, %v7678_v17  ;;  %v7697_v28 = vunpack.c.l.bf16 %v7723_v27  ;;  %v7698_v29 = vunpack.c.h.bf16 %v7723_v27  ;;  %v7722_v40 = vld [vmem:[%s10033_s18 + $0x40] sm:$0xff]   ;;  %v7721_v46 = vld [vmem:[%s10033_s18 + $0x38] sm:$0xff]  }
  0x7f   : > { %2473 = vst.msk [vmem:[#allocation2 + $0x98] sm:$0xff] %vm2453_vm0, %v9700_v0  ;;  %2474 = vst.msk [vmem:[#allocation2 + $0xa0] sm:$0xff] %vm2453_vm0, %v9700_v0  ;;  %8920 = vperm.xlu0 %8918, %v10038_v12   ;;  %8854 = vperm.xlu1 %8852, %v10040_v13   ;;  %v10057_v24 = vpack.i.bf16 %v7673_v22, %v7674_v23  ;;  %v7701_v33 = vunpack.c.l.bf16 %v7724_v30  ;;  %v7702_v34 = vunpack.c.h.bf16 %v7724_v30  ;;  %v7681_v38 = vunpack.c.l.bf16 %v7719_v36  ;;  %v7720_v50 = vld [vmem:[%s10033_s18 + $0x30] sm:$0xff]   ;;  %v7725_v53 = vld [vmem:[%s10033_s18 + $0x58] sm:$0xff]  }
  0x80   : > { %2475 = vst.msk [vmem:[#allocation2 + $0xa8] sm:$0xff] %vm2453_vm0, %v9700_v0  ;;  %2476 = vst.msk [vmem:[#allocation2 + $0xb0] sm:$0xff] %vm2453_vm0, %v9700_v0  ;;  %v10072_v32 = vpack.i.bf16 %v7697_v28, %v7698_v29  ;;  %v7682_v39 = vunpack.c.h.bf16 %v7719_v36  ;;  %v7693_v42 = vunpack.c.l.bf16 %v7722_v40  ;;  %v7694_v43 = vunpack.c.h.bf16 %v7722_v40  ;;  %v7726_v57 = vld [vmem:[%s10033_s18 + $0x60] sm:$0xff]  }
  0x81   : > { %2477 = vst.msk [vmem:[#allocation2 + $0xb8] sm:$0xff] %vm2453_vm0, %v9700_v0  ;;  %2478 = vst.msk [vmem:[#allocation2 + $0xc0] sm:$0xff] %vm2453_vm0, %v9700_v0  ;;  %v10077_v35 = vpack.i.bf16 %v7701_v33, %v7702_v34  ;;  %v7689_v47 = vunpack.c.l.bf16 %v7721_v46  ;;  %v7690_v48 = vunpack.c.h.bf16 %v7721_v46  ;;  %v7685_v51 = vunpack.c.l.bf16 %v7720_v50  ;;  %v2560_v63 = vld [vmem:[#allocation2 + $0x1] sm:$0xff] }
  0x82   : > { %2479 = vst.msk [vmem:[#allocation2 + $0xc8] sm:$0xff] %vm2453_vm0, %v9700_v0  ;;  %2480 = vst.msk [vmem:[#allocation2 + $0xd0] sm:$0xff] %vm2453_vm0, %v9700_v0  ;;  %v10087_v41 = vpack.i.bf16 %v7681_v38, %v7682_v39  ;;  %v10091_v44 = vpack.i.bf16 %v7693_v42, %v7694_v43  ;;  %v7686_v52 = vunpack.c.h.bf16 %v7720_v50  ;;  %v7705_v55 = vunpack.c.l.bf16 %v7725_v53  ;;  %v389_v38 = vld [vmem:[#allocation4] sm:$0xf]  ;;  %v390_v39 = vld [vmem:[#allocation4 + $0x4] sm:$0x1] }
  0x83   : > { %2481 = vst.msk [vmem:[#allocation2 + $0xd8] sm:$0xff] %vm2453_vm0, %v9700_v0  ;;  %2482 = vst.msk [vmem:[#allocation2 + $0xe0] sm:$0xff] %vm2453_vm0, %v9700_v0  ;;  %8989 = vset.pattern.permute.xlu0 %v12241_v18  ;;  %8858 = vset.pattern.permute.xlu1 %v12245_v19  ;;  %v10104_v49 = vpack.i.bf16 %v7689_v47, %v7690_v48  ;;  %v7706_v56 = vunpack.c.h.bf16 %v7725_v53  ;;  %v7709_v59 = vunpack.c.l.bf16 %v7726_v57  ;;  %v7710_v60 = vunpack.c.h.bf16 %v7726_v57 }
  0x84   : > { %2483 = vst.msk [vmem:[#allocation2 + $0xe8] sm:$0xff] %vm2453_vm0, %v9700_v0  ;;  %2484 = vst.msk [vmem:[#allocation2 + $0xf0] sm:$0xff] %vm2453_vm0, %v9700_v0  ;;  %8991 = vperm.xlu0 %8989, %v10045_v15   ;;  %8860 = vperm.xlu1 %8858, %v10040_v13   ;;  %v10122_v54 = vpack.i.bf16 %v7685_v51, %v7686_v52  ;;  %v533_v30 = vlaneseq  ;;  %v391_v42 = vunpack.c.l.bf16 %v389_v38  ;;  %v392_v50 = vunpack.c.l.bf16 %v390_v39 }
  0x85   : > { %2485 = vst.msk [vmem:[#allocation2 + $0xf8] sm:$0xff] %vm2453_vm0, %v9700_v0  ;;  %2486 = vst.msk [vmem:[#allocation2 + $0x100] sm:$0xff] %vm2453_vm0, %v9700_v0  ;;  %v10128_v58 = vpack.i.bf16 %v7705_v55, %v7706_v56  ;;  %v10133_v61 = vpack.i.bf16 %v7709_v59, %v7710_v60 }
  0x86   : > { %4937 = vst.msk [vmem:[#allocation3] sm:$0xff] %vm4936_vm1, %v9700_v0  ;;  %4938 = vst.msk [vmem:[#allocation3 + $0x8] sm:$0xff] %vm4936_vm1, %v9700_v0  ;;  %v10241_v34 = vshrl.u32 %v533_v30, 7 }
  0x87   : > { %4939 = vst.msk [vmem:[#allocation3 + $0x10] sm:$0xff] %vm4936_vm1, %v9700_v0  ;;  %4940 = vst.msk [vmem:[#allocation3 + $0x18] sm:$0xff] %vm4936_vm1, %v9700_v0 }
  0x88   : > { %4941 = vst.msk [vmem:[#allocation3 + $0x20] sm:$0xff] %vm4936_vm1, %v9700_v0  ;;  %4942 = vst.msk [vmem:[#allocation3 + $0x28] sm:$0xff] %vm4936_vm1, %v9700_v0  ;;  %9071 = vperm.xlu0 %8989, %v10052_v21   ;;  %8864 = vset.pattern.permute.xlu1 %v12243_v1  ;;  %v879_v43 = vsub.s32 2, %v10241_v34  ;;  %v1223_v47 = vsub.s32 4, %v10241_v34  ;;  %v1051_v48 = vsub.s32 3, %v10241_v34  ;;  %v535_v51 = vsub.s32 0, %v10241_v34 }
  0x89   : > { %4943 = vst.msk [vmem:[#allocation3 + $0x30] sm:$0xff] %vm4936_vm1, %v9700_v0  ;;  %4944 = vst.msk [vmem:[#allocation3 + $0x38] sm:$0xff] %vm4936_vm1, %v9700_v0  ;;  %8866 = vperm.xlu1 %8864, %v10040_v13   ;;  %v707_v52 = vsub.s32 1, %v10241_v34  ;;  %v1395_v53 = vsub.s32 5, %v10241_v34  ;;  %v1567_v55 = vsub.s32 6, %v10241_v34  ;;  %v1739_v56 = vsub.s32 7, %v10241_v34 }
  0x8a   : > { %4945 = vst.msk [vmem:[#allocation3 + $0x40] sm:$0xff] %vm4936_vm1, %v9700_v0  ;;  %4946 = vst.msk [vmem:[#allocation3 + $0x48] sm:$0xff] %vm4936_vm1, %v9700_v0  ;;  %v10261_v57 = vrot.slane %v391_v42, %v879_v43  ;;  %v10267_v62 = vrot.slane %v391_v42, %v1223_v47  ;;  %v10287_v47 = vadd.s32 8, %v10241_v34 }
  0x8b   : > { %4947 = vst.msk [vmem:[#allocation3 + $0x50] sm:$0xff] %vm4936_vm1, %v9700_v0  ;;  %4948 = vst.msk [vmem:[#allocation3 + $0x58] sm:$0xff] %vm4936_vm1, %v9700_v0  ;;  %v10275_v30 = vrot.slane %v391_v42, %v707_v52  ;;  %v10277_v38 = vrot.slane %v391_v42, %v1395_v53  ;;  %v10279_v39 = vrot.slane %v391_v42, %v1567_v55 }
  0x8c   : > { %4949 = vst.msk [vmem:[#allocation3 + $0x60] sm:$0xff] %vm4936_vm1, %v9700_v0  ;;  %4950 = vst.msk [vmem:[#allocation3 + $0x68] sm:$0xff] %vm4936_vm1, %v9700_v0  ;;  %9075 = vset.pattern.permute.xlu0 %v12233_v25  ;;  %v10281_v43 = vrot.slane %v391_v42, %v1739_v56 }
  0x8d   : > { %4951 = vst.msk [vmem:[#allocation3 + $0x70] sm:$0xff] %vm4936_vm1, %v9700_v0  ;;  %4952 = vst.msk [vmem:[#allocation3 + $0x78] sm:$0xff] %vm4936_vm1, %v9700_v0  ;;  %9077 = vperm.xlu0 %9075, %v10040_v13   ;;  %8870 = vset.pattern.permute.xlu1 %v12233_v25 }
  0x8e   : > { %4953 = vst.msk [vmem:[#allocation3 + $0x80] sm:$0xff] %vm4936_vm1, %v9700_v0  ;;  %4954 = vst.msk [vmem:[#allocation3 + $0x88] sm:$0xff] %vm4936_vm1, %v9700_v0  ;;  %8872 = vperm.xlu1 %8870, %v10045_v15  }
  0x8f   : > { %4955 = vst.msk [vmem:[#allocation3 + $0x90] sm:$0xff] %vm4936_vm1, %v9700_v0  ;;  %4956 = vst.msk [vmem:[#allocation3 + $0x98] sm:$0xff] %vm4936_vm1, %v9700_v0 }
  0x90   : > { %4957 = vst.msk [vmem:[#allocation3 + $0xa0] sm:$0xff] %vm4936_vm1, %v9700_v0  ;;  %4958 = vst.msk [vmem:[#allocation3 + $0xa8] sm:$0xff] %vm4936_vm1, %v9700_v0 }
  0x91   : > { %4959 = vst.msk [vmem:[#allocation3 + $0xb0] sm:$0xff] %vm4936_vm1, %v9700_v0  ;;  %4960 = vst.msk [vmem:[#allocation3 + $0xb8] sm:$0xff] %vm4936_vm1, %v9700_v0  ;;  %9082 = vperm.xlu0 %9075, %v10038_v12  }
  0x92   : > { %4961 = vst.msk [vmem:[#allocation3 + $0xc0] sm:$0xff] %vm4936_vm1, %v9700_v0  ;;  %4962 = vst.msk [vmem:[#allocation3 + $0xc8] sm:$0xff] %vm4936_vm1, %v9700_v0  ;;  %8876 = vset.pattern.permute.xlu1 %v12239_v26 }
  0x93   : > { %4963 = vst.msk [vmem:[#allocation3 + $0xd0] sm:$0xff] %vm4936_vm1, %v9700_v0  ;;  %4964 = vst.msk [vmem:[#allocation3 + $0xd8] sm:$0xff] %vm4936_vm1, %v9700_v0  ;;  %8878 = vperm.xlu1 %8876, %v10038_v12  }
  0x94   : > { %4965 = vst.msk [vmem:[#allocation3 + $0xe0] sm:$0xff] %vm4936_vm1, %v9700_v0  ;;  %4966 = vst.msk [vmem:[#allocation3 + $0xe8] sm:$0xff] %vm4936_vm1, %v9700_v0 }
  0x95   : > { %4967 = vst.msk [vmem:[#allocation3 + $0xf0] sm:$0xff] %vm4936_vm1, %v9700_v0  ;;  %4968 = vst.msk [vmem:[#allocation3 + $0xf8] sm:$0xff] %vm4936_vm1, %v9700_v0  ;;  %9087 = vperm.xlu0 %9075, %v10057_v24  }
  0x96   : > { %4969 = vst.msk [vmem:[#allocation3 + $0x100] sm:$0xff] %vm4936_vm1, %v9700_v0  ;;  %12295 = vst [vmem:[#allocation14_spill] sm:$0xff] %v10133_v61  ;;  %v2561_v0 = vld [vmem:[#allocation2 + $0x9] sm:$0xff] }
  0x97   : > { %8882 = vset.pattern.permute.xlu1 %v12235_v31  ;;  %v2588_v3 = vpack.c.bf16 %v2561_v0, %v2560_v63  ;;  %12304 = vst [vmem:[#allocation23_spill] sm:$0xff] %v10261_v57  ;;  %v10269_v63 = vrot.slane %v391_v42, %v1051_v48  ;;  %v10271_v0 = vrot.slane %v392_v50, %v535_v51  ;;  %12308 = vst [vmem:[#allocation27_spill] sm:$0xff] %v10275_v30 }
  0x98   : > { %8884 = vperm.xlu1 %8882, %v10040_v13  }
  0x99   : > { %9092 = vperm.xlu0 %9075, %v10052_v21   ;;  %8009 = vmatprep.mubr.msk.bf16.mxu0 %vm2453_vm0, %v2588_v3  ;;  %v10273_v3 = vrot.slane %v391_v42, %v535_v51 }
  0x9b   : > { %12307 = vst [vmem:[#allocation26_spill] sm:$0xff] %v10273_v3 }
  0x9c   : > { %8888 = vset.pattern.permute.xlu1 %v12237_v2 }
  0x9d   : > { %9173 = vperm.xlu0 %9075, %v10072_v32   ;;  %8890 = vperm.xlu1 %8888, %v10045_v15  }
  0xa1   : > { %9190 = vperm.xlu0 %9075, %v10077_v35   ;;  %8894 = vset.pattern.permute.xlu1 %v12249_v37 }
  0xa2   : > { %8896 = vperm.xlu1 %8894, %v10040_v13  }
  0xa5   : > { %9194 = vset.pattern.permute.xlu0 %v12249_v37 }
  0xa6   : > { %9196 = vperm.xlu0 %9194, %v10038_v12   ;;  %8900 = vset.pattern.permute.xlu1 %v12245_v19 }
  0xa7   : > { %8902 = vperm.xlu1 %8900, %v10045_v15  }
  0xaa   : > { %9201 = vperm.xlu0 %9194, %v10087_v41  }
  0xab   : > { %8906 = vset.pattern.permute.xlu1 %v12247_v45 }
  0xac   : > { %8908 = vperm.xlu1 %8906, %v10040_v13  }
  0xae   : > { %9224 = vperm.xlu0 %9194, %v10091_v44  }
  0xb0   : > { %8912 = vset.pattern.permute.xlu1 %v12243_v1 }
  0xb1   : > { %8914 = vperm.xlu1 %8912, %v10045_v15  }
  0xb2   : > { %9228 = vset.pattern.permute.xlu0 %v12245_v19 }
  0xb3   : > { %9230 = vperm.xlu0 %9228, %v10038_v12  }
  0xb5   : > { %8924 = vset.pattern.permute.xlu1 %v12241_v18 }
  0xb6   : > { %8926 = vperm.xlu1 %8924, %v10040_v13  }
  0xb7   : > { %9235 = vperm.xlu0 %9228, %v10052_v21  }
  0xba   : > { %8930 = vset.pattern.permute.xlu1 %v12239_v26 }
  0xbb   : > { %9240 = vperm.xlu0 %9228, %v10104_v49   ;;  %8932 = vperm.xlu1 %8930, %v10057_v24  }
  0xbf   : > { %9257 = vperm.xlu0 %9228, %v10077_v35   ;;  %8936 = vset.pattern.permute.xlu1 %v12235_v31 }
  0xc0   : > { %8938 = vperm.xlu1 %8936, %v10045_v15  }
  0xc3   : > { %9261 = vset.pattern.permute.xlu0 %v12239_v26 }
  0xc4   : > { %9263 = vperm.xlu0 %9261, %v10040_v13   ;;  %8942 = vset.pattern.permute.xlu1 %v12239_v26 }
  0xc5   : > { %8944 = vperm.xlu1 %8942, %v10052_v21  }
  0xc8   : > { %9268 = vperm.xlu0 %9261, %v10045_v15  }
  0xc9   : > { %8948 = vset.pattern.permute.xlu1 %v12235_v31 }
  0xca   : > { %8950 = vperm.xlu1 %8948, %v10038_v12  }
  0xcc   : > { %9273 = vperm.xlu0 %9261, %v10087_v41  }
  0xce   : > { %8954 = vset.pattern.permute.xlu1 %v12249_v37 }
  0xcf   : > { %8956 = vperm.xlu1 %8954, %v10045_v15  }
  0xd0   : > { %9278 = vperm.xlu0 %9261, %v10122_v54  }
  0xd3   : > { %8960 = vset.pattern.permute.xlu1 %v12237_v2 }
  0xd4   : > { %9305 = vperm.xlu0 %9261, %v10128_v58   ;;  %8962 = vperm.xlu1 %8960, %v10052_v21  }
  0xd8   : > { %9322 = vperm.xlu0 %9261, %v10133_v61   ;;  %8966 = vset.pattern.permute.xlu1 %v12245_v19 }
  0xd9   : > { %8968 = vperm.xlu1 %8966, %v10057_v24  }
  0xdc   : > { %9326 = vset.pattern.permute.xlu0 %v12235_v31 }
  0xdd   : > { %9328 = vperm.xlu0 %9326, %v10052_v21   ;;  %8972 = vset.pattern.permute.xlu1 %v12247_v45 }
  0xde   : > { %8974 = vperm.xlu1 %8972, %v10045_v15  }
  0xe1   : > { %9333 = vperm.xlu0 %9326, %v10087_v41  }
  0xe2   : > { %8979 = vperm.xlu1 %8972, %v10038_v12  }
  0xe5   : > { %9338 = vperm.xlu0 %9326, %v10122_v54  }
  0xe6   : > { %8983 = vset.pattern.permute.xlu1 %v12243_v1 }
  0xe7   : > { %8985 = vperm.xlu1 %8983, %v10057_v24  }
  0xe9   : > { %9349 = vperm.xlu0 %9326, %v10077_v35  }
  0xeb   : > { %8996 = vperm.xlu1 %8983, %v10052_v21  }
  0xed   : > { %9353 = vset.pattern.permute.xlu0 %v12237_v2 }
  0xee   : > { %9355 = vperm.xlu0 %9353, %v10038_v12  }
  0xef   : > { %9000 = vset.pattern.permute.xlu1 %v12241_v18 }
  0xf0   : > { %9002 = vperm.xlu1 %9000, %v10038_v12  }
  0xf2   : > { %9360 = vperm.xlu0 %9353, %v10057_v24  }
  0xf4   : > { %9006 = vset.pattern.permute.xlu1 %v12233_v25 }
  0xf5   : > { %9008 = vperm.xlu1 %9006, %v10087_v41  }
  0xf6   : > { %9365 = vperm.xlu0 %9353, %v10122_v54  }
  0xf9   : > { %9012 = vset.pattern.permute.xlu1 %v12235_v31 }
  0xfa   : > { %9014 = vperm.xlu1 %9012, %v10057_v24   ;;  %9370 = vperm.xlu0 %9353, %v10072_v32  }
  0xfe   : > { %9018 = vset.pattern.permute.xlu1 %v12233_v25  ;;  %v10165_v4 = vpop.permute.xlu1 %8854  ;;  %v10167_v5 = vpop.permute.xlu0 %8920  ;;  %9387 = vperm.xlu0 %9353, %v10133_v61  }
  0xff   : > { %12296 = vst [vmem:[#allocation15_spill] sm:$0xff] %v10167_v5  ;;  %9020 = vperm.xlu1 %9018, %v10122_v54   ;;  %v8856_v31 = vunpack.i.l.bf16 %v10165_v4 }
 0x102   : > { %9391 = vset.pattern.permute.xlu0 %v12247_v45 }
 0x103   : > { %9024 = vset.pattern.permute.xlu1 %v12237_v2  ;;  %v10173_v6 = vpop.permute.xlu1 %8860  ;;  %v10175_v7 = vpop.permute.xlu0 %8991  ;;  %9393 = vperm.xlu0 %9391, %v10057_v24  }
 0x104   : > { %9026 = vperm.xlu1 %9024, %v10087_v41   ;;  %v8863_v48 = vunpack.i.h.bf16 %v10173_v6  ;;  %v8862_v50 = vunpack.i.l.bf16 %v10173_v6  ;;  %v882_v6 = vmul.f32 %v8856_v31, %v10261_v57 }
 0x107   : > { %v10179_v8 = vpop.permute.xlu0 %9071  ;;  %9398 = vperm.xlu0 %9391, %v10122_v54  }
 0x108   : > { %12297 = vst [vmem:[#allocation16_spill] sm:$0xff] %v10179_v8  ;;  %9030 = vset.pattern.permute.xlu1 %v12249_v37  ;;  %v10183_v9 = vpop.permute.xlu1 %8866 }
 0x109   : > { %9032 = vperm.xlu1 %9030, %v10057_v24   ;;  %v8869_v42 = vunpack.i.h.bf16 %v10183_v9  ;;  %v8868_v52 = vunpack.i.l.bf16 %v10183_v9 }
 0x10b   : > { %9414 = vperm.xlu0 %9391, %v10072_v32  }
 0x10c   : > { %v10187_v10 = vpop.permute.xlu0 %9077 }
 0x10d   : > { %9037 = vperm.xlu1 %9030, %v10052_v21   ;;  %v10190_v11 = vpop.permute.xlu1 %8872  ;;  %v9080_v53 = vunpack.i.h.bf16 %v10187_v10  ;;  %v9079_v56 = vunpack.i.l.bf16 %v10187_v10  ;;  %v1226_v10 = vmul.f32 %v8868_v52, %v10267_v62 }
 0x10e   : > { %v8875_v55 = vunpack.i.h.bf16 %v10190_v11 }
 0x10f   : > { %9418 = vset.pattern.permute.xlu0 %v12243_v1 }
 0x110   : > { %v10193_v12 = vpop.permute.xlu0 %9082  ;;  %9420 = vperm.xlu0 %9418, %v10087_v41  }
 0x111   : > { %9041 = vset.pattern.permute.xlu1 %v12245_v19 }
 0x112   : > { %9043 = vperm.xlu1 %9041, %v10087_v41   ;;  %v10198_v13 = vpop.permute.xlu1 %8878 }
 0x114   : > { %v10200_v14 = vpop.permute.xlu0 %9087  ;;  %9425 = vperm.xlu0 %9418, %v10091_v44  }
 0x115   : > { %12298 = vst [vmem:[#allocation17_spill] sm:$0xff] %v10200_v14 }
 0x116   : > { %9048 = vperm.xlu1 %9041, %v10122_v54  }
 0x117   : > { %v10204_v15 = vpop.permute.xlu1 %8884 }
 0x118   : > { %v10206_v16 = vpop.permute.xlu0 %9092  ;;  %9441 = vperm.xlu0 %9418, %v10128_v58   ;;  %v8887_v9 = vunpack.i.h.bf16 %v10204_v15  ;;  %v8886_v19 = vunpack.i.l.bf16 %v10204_v15 }
 0x119   : > { %v9095_v31 = vunpack.i.h.bf16 %v10206_v16 }
 0x11a   : > { %9052 = vset.pattern.permute.xlu1 %v12247_v45  ;;  %v1225_v45 = vmul.f32 %v8869_v42, %v10267_v62  ;;  %v1397_v52 = vmul.f32 %v8887_v9, %v10277_v38 }
 0x11b   : > { %9054 = vperm.xlu1 %9052, %v10052_v21  }
 0x11c   : > { %v10211_v17 = vpop.permute.xlu1 %8890  ;;  %v10213_v20 = vpop.permute.xlu0 %9173  ;;  %9445 = vset.pattern.permute.xlu0 %v12241_v18 }
 0x11d   : > { %12299 = vst [vmem:[#allocation18_spill] sm:$0xff] %v10213_v20  ;;  %9447 = vperm.xlu0 %9445, %v10104_v49   ;;  %v8893_v42 = vunpack.i.h.bf16 %v10211_v17  ;;  %v12310_v20 = vmov 6  }
 0x11f   : > { %9058 = vset.pattern.permute.xlu1 %v12241_v18  ;;  %v1053_v18 = vmul.f32 %v8863_v48, %v10269_v63  ;;  %v710_v48 = vmul.f32 %v9079_v56, %v10275_v30  ;;  %v8892_v56 = vunpack.i.l.bf16 %v10211_v17 }
 0x120   : > { %9060 = vperm.xlu1 %9058, %v10057_v24   ;;  %v10219_v22 = vpop.permute.xlu0 %9190 }
 0x121   : > { %12300 = vst [vmem:[#allocation19_spill] sm:$0xff] %v10219_v22  ;;  %v10221_v23 = vpop.permute.xlu1 %8896  ;;  %9464 = vperm.xlu0 %9445, %v10077_v35  }
 0x124   : > { %9064 = vset.pattern.permute.xlu1 %v12243_v1  ;;  %v1054_v1 = vmul.f32 %v8862_v50, %v10269_v63 }
 0x125   : > { %9066 = vperm.xlu1 %9064, %v10122_v54   ;;  %v10225_v21 = vpop.permute.xlu0 %9196  ;;  %9479 = vset.pattern.permute.xlu0 %v12310_v20 }
 0x126   : > { %12301 = vst [vmem:[#allocation20_spill] sm:$0xff] %v10225_v21  ;;  %v10227_v27 = vpop.permute.xlu1 %8902  ;;  %9481 = vperm.xlu0 %9479, %v10128_v58  }
 0x127   : > { %v8905_v17 = vunpack.i.h.bf16 %v10227_v27  ;;  %v8904_v14 = vunpack.i.l.bf16 %v10227_v27 }
 0x129   : > { %9096 = vset.pattern.permute.xlu1 %v12239_v26  ;;  %v10230_v28 = vpop.permute.xlu0 %9201 }
 0x12a   : > { %12302 = vst [vmem:[#allocation21_spill] sm:$0xff] %v10230_v28  ;;  %9098 = vperm.xlu1 %9096, %v10104_v49  }
 0x12b   : > { %v10233_v29 = vpop.permute.xlu1 %8908 }
 0x12d   : > { %v10235_v24 = vpop.permute.xlu0 %9224 }
 0x12e   : > { %12303 = vst [vmem:[#allocation22_spill] sm:$0xff] %v10235_v24  ;;  %9102 = vset.pattern.permute.xlu1 %v12233_v25  ;;  %v9094_v24 = vunpack.i.l.bf16 %v10206_v16  ;;  %v8898_v16 = vunpack.i.l.bf16 %v10221_v23 }
 0x12f   : > { %9104 = vperm.xlu1 %9102, %v10104_v49  }
 0x130   : > { %v10239_v33 = vpop.permute.xlu1 %8914 }
 0x132   : > { %v10243_v36 = vpop.permute.xlu0 %9230 }
 0x133   : > { %9108 = vset.pattern.permute.xlu1 %v12239_v26  ;;  %v8874_v26 = vunpack.i.l.bf16 %v10190_v11  ;;  %v711_v11 = vmul.f32 %v8875_v55, %v10275_v30 }
 0x134   : > { %9110 = vperm.xlu1 %9108, %v10091_v44  }
 0x135   : > { %v10247_v40 = vpop.permute.xlu1 %8926  ;;  %v712_v15 = vmul.f32 %v8874_v26, %v10275_v30  ;;  %v8899_v26 = vunpack.i.h.bf16 %v10221_v23 }
 0x136   : > { %v10250_v46 = vpop.permute.xlu0 %9235 }
 0x138   : > { %9114 = vset.pattern.permute.xlu1 %v12233_v25  ;;  %v8857_v25 = vunpack.i.h.bf16 %v10165_v4 }
 0x139   : > { %9116 = vperm.xlu1 %9114, %v10091_v44  }
 0x13a   : > { %v10263_v59 = vpop.permute.xlu1 %8932  ;;  %v10265_v60 = vpop.permute.xlu0 %9240 }
 0x13b   : > { %12305 = vst [vmem:[#allocation24_spill] sm:$0xff] %v10263_v59  ;;  %12306 = vst [vmem:[#allocation25_spill] sm:$0xff] %v10265_v60  ;;  %v10334_v59 = vmul.f32 %v9094_v24, %v10275_v30  ;;  %v1570_v24 = vmul.f32 %v8898_v16, %v10279_v39  ;;  %v8917_v16 = vunpack.i.h.bf16 %v10239_v33 }
 0x13d   : > { %9120 = vset.pattern.permute.xlu1 %v12237_v2  ;;  %v881_v2 = vmul.f32 %v8857_v25, %v10261_v57  ;;  %v709_v25 = vmul.f32 %v9080_v53, %v10275_v30  ;;  %v1398_v53 = vmul.f32 %v8886_v19, %v10277_v38 }
 0x13e   : > { %9122 = vperm.xlu1 %9120, %v10104_v49   ;;  %v10292_v51 = vpop.permute.xlu0 %9257 }
 0x13f   : > { %12309 = vst [vmem:[#allocation28_spill] sm:$0xff] %v10292_v51  ;;  %v10297_v4 = vpop.permute.xlu1 %8938 }
 0x142   : > { %9127 = vperm.xlu1 %9120, %v10091_v44  }
 0x143   : > { %v9264_v37 = vpop.permute.xlu0 %9263 }
 0x144   : > { %v9266_v50 = vunpack.i.h.bf16 %v9264_v37  ;;  %v9265_v51 = vunpack.i.l.bf16 %v9264_v37  ;;  %v10315_v60 = vpop.permute.xlu1 %8944  ;;  %v10326_v37 = vmul.f32 %v9095_v31, %v10275_v30  ;;  %v883_v31 = vmul.f32 %v8893_v42, %v10261_v57 }
 0x145   : > { %v12311_v42 = vmov 7  }
 0x146   : > { %v537_v22 = vmul.f32 %v9266_v50, %v10273_v3  ;;  %v538_v55 = vmul.f32 %v9265_v51, %v10273_v3  ;;  %9131 = vset.pattern.permute.xlu1 %v12310_v20  ;;  %9497 = vset.pattern.permute.xlu0 %v12311_v42 }
 0x147   : > { %v9269_v28 = vpop.permute.xlu0 %9268  ;;  %9133 = vperm.xlu1 %9131, %v10122_v54   ;;  %9499 = vperm.xlu0 %9497, %v10133_v61  }
 0x148   : > { %v737_v19 = vadd.f32 %v709_v25, %v537_v22  ;;  %v738_v9 = vadd.f32 %v710_v48, %v538_v55  ;;  %v9271_v50 = vunpack.i.h.bf16 %v9269_v28  ;;  %v9270_v51 = vunpack.i.l.bf16 %v9269_v28 }
 0x149   : > { %v10339_v8 = vpop.permute.xlu1 %8950  ;;  %v884_v25 = vmul.f32 %v8892_v56, %v10261_v57  ;;  %v1569_v28 = vmul.f32 %v8899_v26, %v10279_v39  ;;  %v2072_v48 = vand.u32 15, %v10287_v47  ;;  %v8911_v56 = vunpack.i.h.bf16 %v10233_v29 }
 0x14a   : > { %v909_v23 = vadd.f32 %v881_v2, %v737_v19  ;;  %v910_v21 = vadd.f32 %v882_v6, %v738_v9  ;;  %v539_v5 = vmul.f32 %v9271_v50, %v10273_v3  ;;  %v540_v22 = vmul.f32 %v9270_v51, %v10273_v3 }
 0x14b   : > { %9137 = vset.pattern.permute.xlu1 %v12311_v42  ;;  %v10348_v55 = vpop.permute.xlu0 %9273  ;;  %v8910_v26 = vunpack.i.l.bf16 %v10233_v29  ;;  %v8916_v47 = vunpack.i.l.bf16 %v10239_v33  ;;  %v1055_v9 = vmul.f32 %v8905_v17, %v10269_v63  ;;  %v1056_v50 = vmul.f32 %v8904_v14, %v10269_v63 }
 0x14c   : > { %12312 = vst [vmem:[#allocation29_spill] sm:$0xff] %v10348_v55  ;;  %v1081_v2 = vadd.f32 %v1053_v18, %v909_v23  ;;  %v1082_v27 = vadd.f32 %v1054_v1, %v910_v21  ;;  %v739_v6 = vadd.f32 %v711_v11, %v539_v5  ;;  %v740_v19 = vadd.f32 %v712_v15, %v540_v22 }
 0x14d   : > { %9139 = vperm.xlu1 %9137, %v10087_v41   ;;  %v8929_v1 = vunpack.i.h.bf16 %v10247_v40  ;;  %v8928_v5 = vunpack.i.l.bf16 %v10247_v40  ;;  %v8947_v21 = vunpack.i.h.bf16 %v10315_v60  ;;  %v8946_v29 = vunpack.i.l.bf16 %v10315_v60 }
 0x14e   : > { %v1253_v51 = vadd.f32 %v1225_v45, %v1081_v2  ;;  %v1254_v55 = vadd.f32 %v1226_v10, %v1082_v27  ;;  %v10358_v18 = vpop.permute.xlu1 %8956  ;;  %v911_v23 = vadd.f32 %v883_v31, %v739_v6  ;;  %v912_v17 = vadd.f32 %v884_v25, %v740_v19 }
 0x14f   : > { %v10364_v11 = vpop.permute.xlu0 %9278  ;;  %v12313_v22 = vmov 3   ;;  %v1741_v45 = vmul.f32 %v8911_v56, %v10281_v43  ;;  %v1742_v14 = vmul.f32 %v8910_v26, %v10281_v43  ;;  %v1227_v10 = vmul.f32 %v8917_v16, %v10267_v62 }
 0x150   : > { %v1425_v15 = vadd.f32 %v1397_v52, %v1253_v51  ;;  %v1426_v33 = vadd.f32 %v1398_v53, %v1254_v55  ;;  %v1228_v40 = vmul.f32 %v8916_v47, %v10267_v62  ;;  %vm10371_vm2 = vcmp.lt.s32.totalorder %v2072_v48, 14 }
 0x151   : > { %9143 = vset.pattern.permute.xlu1 %v12313_v22  ;;  %v12314_v2 = vmov 0  ;;  %v9238_v60 = vunpack.i.h.bf16 %v10250_v46  ;;  %v9237_v52 = vunpack.i.l.bf16 %v10250_v46  ;;  %v1913_v25 = vmul.f32 %v8929_v1, %v10271_v0 }
 0x152   : > { %v12315_v2 = vsel %vm10371_vm2, 4294967295, %v12314_v2  ;;  %9145 = vperm.xlu1 %9143, %v10091_v44   ;;  %v1597_v53 = vadd.f32 %v1569_v28, %v1425_v15  ;;  %v1598_v31 = vadd.f32 %v1570_v24, %v1426_v33  ;;  %v1914_v55 = vmul.f32 %v8928_v5, %v10271_v0  ;;  %v10386_v28 = vld [vmem:[#allocation6] ss:$0 sm:$0xff] }
 0x153   : > { %12316 = vst [vmem:[#allocation30_spill] sm:$0xff] %v12315_v2  ;;  %v545_v27 = vmul.f32 %v8947_v21, %v10273_v3  ;;  %v546_v6 = vmul.f32 %v8946_v29, %v10273_v3  ;;  %v8963_v48 = vpop.permute.xlu1 %8962  ;;  %v10382_v19 = vpop.permute.xlu0 %9305  ;;  %v1083_v16 = vadd.f32 %v1055_v9, %v911_v23  ;;  %v1084_v47 = vadd.f32 %v1056_v50, %v912_v17 }
 0x154   : > { %12317 = vst [vmem:[#allocation31_spill] sm:$0xff] %v10382_v19  ;;  %v1769_v56 = vadd.f32 %v1741_v45, %v1597_v53  ;;  %v1770_v26 = vadd.f32 %v1742_v14, %v1598_v31  ;;  %v8941_v51 = vunpack.i.h.bf16 %v10297_v4  ;;  %v8940_v46 = vunpack.i.l.bf16 %v10297_v4 }
 0x155   : > { %v8965_v24 = vunpack.i.h.bf16 %v8963_v48  ;;  %v8964_v1 = vunpack.i.l.bf16 %v8963_v48  ;;  %v12318_v5 = vmov 4   ;;  %v1061_v21 = vmul.f32 %v9238_v60, %v10269_v63 }
 0x156   : > { %9149 = vset.pattern.permute.xlu1 %v12318_v5  ;;  %v1062_v29 = vmul.f32 %v9237_v52, %v10269_v63  ;;  %v1941_v15 = vadd.f32 %v1913_v25, %v1769_v56  ;;  %v1942_v33 = vadd.f32 %v1914_v55, %v1770_v26  ;;  %v745_v9 = vadd.f32 %v10326_v37, %v545_v27 }
 0x157   : > { %9151 = vperm.xlu1 %9149, %v10104_v49   ;;  %v746_v50 = vadd.f32 %v10334_v59, %v546_v6  ;;  %v889_v4 = vmul.f32 %v8965_v24, %v10261_v57  ;;  %v890_v23 = vmul.f32 %v8964_v1, %v10261_v57  ;;  %v10396_v17 = vpop.permute.xlu0 %9322  ;;  %v1255_v60 = vadd.f32 %v1227_v10, %v1083_v16 }
 0x158   : > { %12319 = vst [vmem:[#allocation32_spill] sm:$0xff] %v10396_v17  ;;  %v1976_v45 = vadd.f32 %v10386_v28, %v1941_v15  ;;  %v1977_v14 = vadd.f32 %v10386_v28, %v1942_v33  ;;  %v1256_v52 = vadd.f32 %v1228_v40, %v1084_v47  ;;  %v10400_v53 = vpop.permute.xlu1 %8968  ;;  %v1399_v31 = vmul.f32 %v8941_v51, %v10277_v38 }
 0x159   : > { %v1400_v37 = vmul.f32 %v8940_v46, %v10277_v38  ;;  %v917_v25 = vadd.f32 %v889_v4, %v745_v9  ;;  %v918_v59 = vadd.f32 %v890_v23, %v746_v50  ;;  %v8959_v6 = vunpack.i.h.bf16 %v10358_v18 }
 0x15a   : > { %v2004_v55 = vmax.f32 %v1976_v45, 0.0  ;;  %v2005_v27 = vmax.f32 %v1977_v14, 0.0  ;;  %v8958_v48 = vunpack.i.l.bf16 %v10358_v18  ;;  %v12320_v56 = vmov 8  }
 0x15b   : > { %9155 = vset.pattern.permute.xlu1 %v12320_v56  ;;  %v8994_v26 = vunpack.i.h.bf16 %v10175_v7  ;;  %v8993_v10 = vunpack.i.l.bf16 %v10175_v7  ;;  %v10410_v40 = vadd.f32 %v1061_v21, %v917_v25  ;;  %v10412_v16 = vadd.f32 %v1062_v29, %v918_v59 }
 0x15c   : > { %9157 = vperm.xlu1 %9155, %v10087_v41   ;;  %v2426_v47 = vsel %vm10371_vm2, %v2005_v27, 0.0  ;;  %2488 = vst.msk [vmem:[#allocation2 + $0x11] sm:$0xff] %vm2453_vm0, %v2004_v55  ;;  %v1427_v51 = vadd.f32 %v1399_v31, %v1255_v60  ;;  %v1428_v46 = vadd.f32 %v1400_v37, %v1256_v52  ;;  %v10417_v18 = vpop.permute.xlu0 %9328  ;;  %v2036_v24 = vadd.s32 24, %v10241_v34 }
 0x15d   : > { %2489 = vst.msk [vmem:[#allocation2 + $0x19] sm:$0xff] %vm2453_vm0, %v2426_v47  ;;  %v8975_v7 = vpop.permute.xlu1 %8974  ;;  %v1571_v41 = vmul.f32 %v8959_v6, %v10279_v39  ;;  %v1572_v1 = vmul.f32 %v8958_v48, %v10279_v39  ;;  %v1915_v15 = vmul.f32 %v8994_v26, %v10271_v0  ;;  %v1916_v33 = vmul.f32 %v8993_v10, %v10271_v0 }
 0x15e   : > { %v8977_v21 = vunpack.i.h.bf16 %v8975_v7  ;;  %v8976_v29 = vunpack.i.l.bf16 %v8975_v7  ;;  %v2086_v60 = vand.u32 15, %v2036_v24  ;;  %v12321_v37 = vmov 0  }
 0x15f   : > { %v1599_v9 = vadd.f32 %v1571_v41, %v1427_v51  ;;  %v1600_v50 = vadd.f32 %v1572_v1, %v1428_v46  ;;  %v12322_v48 = vmov 0  ;;  %v9085_v51 = vunpack.i.h.bf16 %v10193_v12  ;;  %9514 = vset.pattern.permute.xlu0 %v12321_v37 }
 0x160   : > { %9162 = vperm.xlu1 %9155, %v10122_v54   ;;  %v1743_v4 = vmul.f32 %v8977_v21, %v10281_v43  ;;  %v1744_v23 = vmul.f32 %v8976_v29, %v10281_v43  ;;  %v10429_v45 = vpop.permute.xlu0 %9333  ;;  %vm10439_vm3 = vcmp.lt.s32.totalorder %v2086_v60, 14  ;;  %v9084_v46 = vunpack.i.l.bf16 %v10193_v12  ;;  %v12327_v60 = vld [vmem:[#allocation15_spill] sm:$0xff] }
 0x161   : > { %v10431_v14 = vpop.permute.xlu1 %8979  ;;  %v12323_v48 = vsel %vm10439_vm3, 4294967295, %v12322_v48  ;;  %v8881_v24 = vunpack.i.h.bf16 %v10198_v13  ;;  %v8880_v7 = vunpack.i.l.bf16 %v10198_v13  ;;  %v12325_v21 = vmov 5  }
 0x162   : > { %v1771_v52 = vadd.f32 %v1743_v4, %v1599_v9  ;;  %v1772_v31 = vadd.f32 %v1744_v23, %v1600_v50  ;;  %12324 = vst [vmem:[#allocation33_spill] sm:$0xff] %v12323_v48  ;;  %v713_v13 = vmul.f32 %v9085_v51, %v10275_v30  ;;  %v9233_v4 = vunpack.i.h.bf16 %v10243_v36  ;;  %v12329_v51 = vld [vmem:[#allocation20_spill] sm:$0xff] }
 0x163   : > { %v2562_v25 = vld [vmem:[#allocation2 + $0x11] sm:$0xff]  ;;  %v541_v9 = vmul.f32 %v8881_v24, %v10273_v3  ;;  %v542_v50 = vmul.f32 %v8880_v7, %v10273_v3  ;;  %v9232_v23 = vunpack.i.l.bf16 %v10243_v36  ;;  %v9199_v36 = vunpack.i.h.bf16 %v12329_v51  ;;  %v12330_v48 = vld [vmem:[#allocation16_spill] sm:$0xff] }
 0x164   : > { %9166 = vset.pattern.permute.xlu1 %v12321_v37  ;;  %v1943_v54 = vadd.f32 %v1915_v15, %v1771_v52  ;;  %v1944_v59 = vadd.f32 %v1916_v33, %v1772_v31  ;;  %v10437_v55 = vpop.permute.xlu0 %9338  ;;  %v2563_v27 = vld [vmem:[#allocation2 + $0x19] sm:$0xff]  ;;  %v714_v33 = vmul.f32 %v9084_v46, %v10275_v30  ;;  %v8923_v52 = vunpack.i.h.bf16 %v12327_v60 }
 0x165   : > { %9168 = vperm.xlu1 %9166, %v10072_v32   ;;  %v2589_v6 = vpack.c.bf16 %v2563_v27, %v2562_v25  ;;  %v10472_v25 = vld [vmem:[%s10033_s18 + $0x68] sm:$0xff]   ;;  %v2038_v46 = vadd.s32 40, %v10241_v34  ;;  %v1057_v7 = vmul.f32 %v9233_v4, %v10269_v63  ;;  %v9074_v19 = vunpack.i.h.bf16 %v12330_v48 }
 0x166   : > { %v1978_v26 = vadd.f32 %v10386_v28, %v1943_v54  ;;  %v1979_v10 = vadd.f32 %v10386_v28, %v1944_v59  ;;  %v10445_v47 = vpop.permute.xlu1 %8985  ;;  %v8922_v54 = vunpack.i.l.bf16 %v12327_v60  ;;  %v9198_v60 = vunpack.i.l.bf16 %v12329_v51 }
 0x167   : > { %8010 = vmatmul.mubr.msk.bf16.vlgmr.msra.gmra.mrb[0].mxu0 %vm2453_vm0, %v2589_v6  ;;  %v10477_v6 = vunpack.c.l.bf16 %v10472_v25 }
 0x168   : > { %v2006_v41 = vmax.f32 %v1978_v26, 0.0  ;;  %v2007_v1 = vmax.f32 %v1979_v10, 0.0  ;;  %v10454_v29 = vpop.permute.xlu0 %9349  ;;  %v741_v26 = vadd.f32 %v713_v13, %v541_v9  ;;  %v742_v10 = vadd.f32 %v714_v33, %v542_v50 }
 0x169   : > { %9177 = vset.pattern.permute.xlu1 %v12325_v21  ;;  %12326 = vst [vmem:[#allocation34_spill] sm:$0xff] %v10454_v29  ;;  %12328 = vst [vmem:[#allocation15_spill] sm:$0xff] %v10477_v6  ;;  %525 = vperm.xlu0 %9514, %v10477_v6   ;;  %v8953_v13 = vunpack.i.h.bf16 %v10339_v8  ;;  %v8952_v33 = vunpack.i.l.bf16 %v10339_v8  ;;  %v1230_v4 = vmul.f32 %v8922_v54, %v10267_v62 }
 0x16a   : > { %9179 = vperm.xlu1 %9177, %v10104_v49   ;;  %v2428_v12 = vsel %vm10439_vm3, %v2007_v1, 0.0  ;;  %2490 = vst.msk [vmem:[#allocation2 + $0x21] sm:$0xff] %vm2453_vm0, %v2006_v41  ;;  %v10460_v15 = vpop.permute.xlu1 %8996  ;;  %v1058_v41 = vmul.f32 %v9232_v23, %v10269_v63  ;;  %v1573_v8 = vmul.f32 %v9199_v36, %v10279_v39  ;;  %v1574_v54 = vmul.f32 %v9198_v60, %v10279_v39 }
 0x16b   : > { %2491 = vst.msk [vmem:[#allocation2 + $0x29] sm:$0xff] %vm2453_vm0, %v2428_v12  ;;  %v8982_v36 = vunpack.i.h.bf16 %v10431_v14 }
 0x16d   : > { %v9356_v31 = vpop.permute.xlu0 %9355  ;;  %9517 = vset.pattern.permute.xlu0 %v12313_v22 }
 0x16e   : > { %9183 = vset.pattern.permute.xlu1 %v12321_v37  ;;  %v9358_v59 = vunpack.i.h.bf16 %v9356_v31  ;;  %v9357_v27 = vunpack.i.l.bf16 %v9356_v31  ;;  %v1229_v31 = vmul.f32 %v8923_v52, %v10267_v62  ;;  %v9073_v52 = vunpack.i.l.bf16 %v12330_v48  ;;  %1042 = vperm.xlu0 %9517, %v10477_v6  }
 0x16f   : > { %9185 = vperm.xlu1 %9183, %v10077_v35   ;;  %v9003_v24 = vpop.permute.xlu1 %9002 }
 0x170   : > { %v885_v1 = vmul.f32 %v9358_v59, %v10261_v57  ;;  %v886_v12 = vmul.f32 %v9357_v27, %v10261_v57  ;;  %v2100_v27 = vand.u32 15, %v2038_v46  ;;  %v9004_v60 = vunpack.i.l.bf16 %v9003_v24 }
 0x171   : > { %v10489_v9 = vpop.permute.xlu0 %9360  ;;  %v2564_v50 = vld [vmem:[#allocation2 + $0x21] sm:$0xff] }
 0x172   : > { %v913_v23 = vadd.f32 %v885_v1, %v741_v26  ;;  %v914_v2 = vadd.f32 %v886_v12, %v742_v10  ;;  %v2565_v59 = vld [vmem:[#allocation2 + $0x29] sm:$0xff]  ;;  %v1401_v26 = vmul.f32 %v8953_v13, %v10277_v38  ;;  %v1402_v10 = vmul.f32 %v8952_v33, %v10277_v38  ;;  %9520 = vset.pattern.permute.xlu0 %v12310_v20 }
 0x173   : > { %9205 = vset.pattern.permute.xlu1 %v12325_v21  ;;  %v2590_v51 = vpack.c.bf16 %v2565_v59, %v2564_v50  ;;  %v9005_v12 = vunpack.i.h.bf16 %v9003_v24  ;;  %v10511_v13 = vmul.f32 %v9074_v19, %v10271_v0  ;;  %v10514_v33 = vmul.f32 %v9073_v52, %v10271_v0  ;;  %v12331_v50 = vld [vmem:[#allocation17_spill] sm:$0xff]  ;;  %1558 = vperm.xlu0 %9520, %v10477_v6  }
 0x174   : > { %9207 = vperm.xlu1 %9205, %v10091_v44   ;;  %v1085_v17 = vadd.f32 %v1057_v7, %v913_v23  ;;  %v1086_v29 = vadd.f32 %v1058_v41, %v914_v2  ;;  %v10497_v61 = vpop.permute.xlu1 %9008  ;;  %v8981_v2 = vunpack.i.l.bf16 %v10431_v14  ;;  %v9090_v23 = vunpack.i.h.bf16 %v12331_v50 }
 0x175   : > { %8013 = vmatprep.mubr.msk.bf16.mxu0 %vm2453_vm0, %v2590_v51  ;;  %v9366_v46 = vpop.permute.xlu0 %9365  ;;  %v9089_v14 = vunpack.i.l.bf16 %v12331_v50  ;;  %vm10518_vm4 = vcmp.lt.s32.totalorder %v2100_v27, 14  ;;  %v1745_v19 = vmul.f32 %v8982_v36, %v10281_v43  ;;  %v9281_v51 = vunpack.i.h.bf16 %v10364_v11 }
 0x176   : > { %v1257_v7 = vadd.f32 %v1229_v31, %v1085_v17  ;;  %v1258_v41 = vadd.f32 %v1230_v4, %v1086_v29  ;;  %v12332_v17 = vmov 0  ;;  %v1746_v24 = vmul.f32 %v8981_v2, %v10281_v43 }
 0x177   : > { %v12333_v17 = vsel %vm10518_vm4, 4294967295, %v12332_v17  ;;  %v9280_v27 = vunpack.i.l.bf16 %v10364_v11  ;;  %v1917_v52 = vmul.f32 %v9005_v12, %v10271_v0  ;;  %v715_v36 = vmul.f32 %v9090_v23, %v10275_v30  ;;  %9523 = vset.pattern.permute.xlu0 %v12321_v37 }
 0x178   : > { %9211 = vset.pattern.permute.xlu1 %v12310_v20  ;;  %v1429_v48 = vadd.f32 %v1401_v26, %v1257_v7  ;;  %v1430_v1 = vadd.f32 %v1402_v10, %v1258_v41  ;;  %12334 = vst [vmem:[#allocation20_spill] sm:$0xff] %v12333_v17  ;;  %v1918_v7 = vmul.f32 %v9004_v60, %v10271_v0  ;;  %v12336_v41 = vmov 2  }
 0x179   : > { %9213 = vperm.xlu1 %9211, %v10104_v49   ;;  %v10522_v29 = vpop.permute.xlu1 %9014  ;;  %v10524_v31 = vpop.permute.xlu0 %9370  ;;  %v716_v2 = vmul.f32 %v9089_v14, %v10275_v30  ;;  %v549_v60 = vmul.f32 %v9281_v51, %v10273_v3  ;;  %v550_v23 = vmul.f32 %v9280_v27, %v10273_v3 }
 0x17a   : > { %12335 = vst [vmem:[#allocation16_spill] sm:$0xff] %v10524_v31  ;;  %v1601_v4 = vadd.f32 %v1573_v8, %v1429_v48  ;;  %v1602_v59 = vadd.f32 %v1574_v54, %v1430_v1  ;;  %v9368_v8 = vunpack.i.h.bf16 %v9366_v46  ;;  %v9367_v54 = vunpack.i.l.bf16 %v9366_v46  ;;  %v12338_v1 = vld [vmem:[#allocation24_spill] sm:$0xff]  ;;  %v12339_v46 = vld [vmem:[#allocation21_spill] sm:$0xff] }
 0x17b   : > { %v8935_v11 = vunpack.i.h.bf16 %v12338_v1  ;;  %v8934_v12 = vunpack.i.l.bf16 %v12338_v1  ;;  %v10549_v31 = vadd.s32 72, %v10241_v34  ;;  %v9203_v27 = vunpack.i.l.bf16 %v12339_v46 }
 0x17c   : > { %v1773_v26 = vadd.f32 %v1745_v19, %v1601_v4  ;;  %v1774_v10 = vadd.f32 %v1746_v24, %v1602_v59  ;;  %v9204_v59 = vunpack.i.h.bf16 %v12339_v46 }
 0x17d   : > { %9217 = vset.pattern.permute.xlu1 %v12336_v41  ;;  %v10538_v48 = vpop.permute.xlu0 %9387 }
 0x17e   : > { %9219 = vperm.xlu1 %9217, %v10077_v35   ;;  %12337 = vst [vmem:[#allocation17_spill] sm:$0xff] %v10538_v48  ;;  %v1945_v50 = vadd.f32 %v1917_v52, %v1773_v26  ;;  %v1946_v19 = vadd.f32 %v1918_v7, %v1774_v10  ;;  %v9021_v24 = vpop.permute.xlu1 %9020  ;;  %v893_v52 = vmul.f32 %v9368_v8, %v10261_v57 }
 0x17f   : > { %v9023_v14 = vunpack.i.h.bf16 %v9021_v24  ;;  %v9022_v4 = vunpack.i.l.bf16 %v9021_v24  ;;  %v894_v26 = vmul.f32 %v9367_v54, %v10261_v57  ;;  %v543_v10 = vmul.f32 %v8935_v11, %v10273_v3 }
 0x180   : > { %v1980_v6 = vadd.f32 %v10386_v28, %v1945_v50  ;;  %v1981_v48 = vadd.f32 %v10386_v28, %v1946_v19  ;;  %v544_v8 = vmul.f32 %v8934_v12, %v10273_v3  ;;  %v12340_v19 = vld [vmem:[#allocation29_spill] sm:$0xff]  ;;  %v10574_v12 = vmul.f32 %v9204_v59, %v10279_v39 }
 0x181   : > { %v721_v37 = vmul.f32 %v9023_v14, %v10275_v30  ;;  %v722_v51 = vmul.f32 %v9022_v4, %v10275_v30  ;;  %v9276_v54 = vunpack.i.h.bf16 %v12340_v19  ;;  %v9275_v4 = vunpack.i.l.bf16 %v12340_v19 }
 0x182   : > { %9244 = vset.pattern.permute.xlu1 %v12313_v22  ;;  %v2008_v7 = vmax.f32 %v1980_v6, 0.0  ;;  %v2009_v1 = vmax.f32 %v1981_v48, 0.0  ;;  %v10559_v50 = vpop.permute.xlu0 %9393  ;;  %v8999_v19 = vunpack.i.h.bf16 %v10460_v15 }
 0x183   : > { %9246 = vperm.xlu1 %9244, %v10072_v32   ;;  %v749_v24 = vadd.f32 %v721_v37, %v549_v60  ;;  %v750_v14 = vadd.f32 %v722_v51, %v550_v23  ;;  %v9027_v41 = vpop.permute.xlu1 %9026  ;;  %v10577_v60 = vmul.f32 %v9203_v27, %v10279_v39  ;;  %v8971_v23 = vunpack.i.h.bf16 %v10400_v53 }
 0x184   : > { %v2430_v46 = vsel %vm10518_vm4, %v2009_v1, 0.0  ;;  %2492 = vst.msk [vmem:[#allocation2 + $0x31] sm:$0xff] %vm2453_vm0, %v2008_v7  ;;  %v9363_v37 = vunpack.i.h.bf16 %v10489_v9  ;;  %v744_v7 = vadd.f32 %v716_v2, %v544_v8  ;;  %v8970_v1 = vunpack.i.l.bf16 %v10400_v53 }
 0x185   : > { %2493 = vst.msk [vmem:[#allocation2 + $0x39] sm:$0xff] %vm2453_vm0, %v2430_v46  ;;  %v10568_v6 = vadd.f32 %v893_v52, %v749_v24  ;;  %v10570_v48 = vadd.f32 %v894_v26, %v750_v14  ;;  %v743_v52 = vadd.f32 %v715_v36, %v543_v10  ;;  %v547_v26 = vmul.f32 %v9276_v54, %v10273_v3 }
 0x186   : > { %v10582_v51 = vpop.permute.xlu0 %9398  ;;  %v548_v59 = vmul.f32 %v9275_v4, %v10273_v3  ;;  %v9331_v27 = vunpack.i.h.bf16 %v10417_v18  ;;  %v8998_v24 = vunpack.i.l.bf16 %v10460_v15  ;;  %v9330_v46 = vunpack.i.l.bf16 %v10417_v18 }
 0x187   : > { %12341 = vst [vmem:[#allocation24_spill] sm:$0xff] %v10570_v48  ;;  %9250 = vset.pattern.permute.xlu1 %v12311_v42  ;;  %12342 = vst [vmem:[#allocation21_spill] sm:$0xff] %v10582_v51  ;;  %v9362_v36 = vunpack.i.l.bf16 %v10489_v9  ;;  %v9011_v2 = vunpack.i.h.bf16 %v10497_v61  ;;  %v9010_v53 = vunpack.i.l.bf16 %v10497_v61  ;;  %v9336_v10 = vunpack.i.h.bf16 %v10429_v45 }
 0x188   : > { %9252 = vperm.xlu1 %9250, %v10104_v49   ;;  %v10591_v14 = vpop.permute.xlu1 %9032  ;;  %v1059_v49 = vmul.f32 %v8971_v23, %v10269_v63  ;;  %v9335_v8 = vunpack.i.l.bf16 %v10429_v45  ;;  %v887_v54 = vmul.f32 %v9363_v37, %v10261_v57  ;;  %v1060_v15 = vmul.f32 %v8970_v1, %v10269_v63 }
 0x189   : > { %v8988_v18 = vunpack.i.h.bf16 %v10445_v47  ;;  %v9029_v11 = vunpack.i.h.bf16 %v9027_v41  ;;  %v9028_v9 = vunpack.i.l.bf16 %v9027_v41  ;;  %v1405_v61 = vmul.f32 %v9331_v27, %v10277_v38 }
 0x18a   : > { %v10601_v4 = vpop.permute.xlu0 %9414  ;;  %v1233_v23 = vmul.f32 %v8999_v19, %v10267_v62  ;;  %v1234_v3 = vmul.f32 %v8998_v24, %v10267_v62  ;;  %v1406_v1 = vmul.f32 %v9330_v46, %v10277_v38  ;;  %v888_v51 = vmul.f32 %v9362_v36, %v10261_v57 }
 0x18b   : > { %12343 = vst [vmem:[#allocation29_spill] sm:$0xff] %v10601_v4  ;;  %v2566_v17 = vld [vmem:[#allocation2 + $0x31] sm:$0xff]  ;;  %v10612_v4 = vunpack.c.h.bf16 %v10472_v25  ;;  %v719_v41 = vmul.f32 %v9011_v2, %v10275_v30  ;;  %v720_v42 = vmul.f32 %v9010_v53, %v10275_v30  ;;  %v10619_v27 = vmul.f32 %v9336_v10, %v10277_v38 }
 0x18c   : > { %9283 = vperm.xlu1 %9250, %v10091_v44   ;;  %v10609_v45 = vpop.permute.xlu1 %9037  ;;  %v2567_v37 = vld [vmem:[#allocation2 + $0x39] sm:$0xff]  ;;  %v10622_v19 = vmul.f32 %v9335_v8, %v10277_v38  ;;  %v915_v24 = vadd.f32 %v887_v54, %v743_v52  ;;  %v1231_v25 = vmul.f32 %v8988_v18, %v10267_v62  ;;  %v8987_v46 = vunpack.i.l.bf16 %v10445_v47 }
 0x18d   : > { %v2591_v48 = vpack.c.bf16 %v2567_v37, %v2566_v17  ;;  %530 = vperm.xlu0 %9523, %v10612_v4   ;;  %v891_v36 = vmul.f32 %v9029_v11, %v10261_v57  ;;  %v892_v2 = vmul.f32 %v9028_v9, %v10261_v57  ;;  %v1261_v10 = vadd.f32 %v1233_v23, %v10410_v40 }
 0x18e   : > { %v1262_v8 = vadd.f32 %v1234_v3, %v10412_v16  ;;  %v916_v54 = vadd.f32 %v888_v51, %v744_v7  ;;  %v747_v18 = vadd.f32 %v719_v41, %v547_v26  ;;  %v748_v47 = vadd.f32 %v720_v42, %v548_v59 }
 0x18f   : > { %v9421_v53 = vpop.permute.xlu0 %9420  ;;  %8014 = vmatmul.mubr.msk.bf16.gmra.mrb[4].mxu0 %vm2453_vm0, %v2591_v48  ;;  %v9017_v11 = vunpack.i.h.bf16 %v10522_v29  ;;  %v1087_v9 = vadd.f32 %v1059_v49, %v915_v24  ;;  %v9016_v57 = vunpack.i.l.bf16 %v10522_v29  ;;  %v9035_v16 = vunpack.i.h.bf16 %v10591_v14 }
 0x190   : > { %9287 = vset.pattern.permute.xlu1 %v12318_v5  ;;  %v9423_v17 = vunpack.i.h.bf16 %v9421_v53  ;;  %v9422_v52 = vunpack.i.l.bf16 %v9421_v53  ;;  %v919_v3 = vadd.f32 %v891_v36, %v747_v18  ;;  %v920_v40 = vadd.f32 %v892_v2, %v748_v47 }
 0x191   : > { %9289 = vperm.xlu1 %9287, %v10072_v32   ;;  %v9044_v37 = vpop.permute.xlu1 %9043  ;;  %9526 = vset.pattern.permute.xlu0 %v12313_v22  ;;  %v9040_v48 = vunpack.i.h.bf16 %v10609_v45  ;;  %v1232_v26 = vmul.f32 %v8987_v46, %v10267_v62  ;;  %v1088_v59 = vadd.f32 %v1060_v15, %v916_v54  ;;  %v1403_v49 = vmul.f32 %v9017_v11, %v10277_v38 }
 0x192   : > { %v9046_v30 = vunpack.i.h.bf16 %v9044_v37  ;;  %v9045_v5 = vunpack.i.l.bf16 %v9044_v37  ;;  %1046 = vperm.xlu0 %9526, %v10612_v4   ;;  %v1235_v7 = vmul.f32 %v9423_v17, %v10267_v62  ;;  %v1236_v29 = vmul.f32 %v9422_v52, %v10267_v62 }
 0x193   : > { %v9039_v23 = vunpack.i.l.bf16 %v10609_v45  ;;  %v9034_v24 = vunpack.i.l.bf16 %v10591_v14  ;;  %v1433_v36 = vadd.f32 %v1405_v61, %v1261_v10  ;;  %v1404_v53 = vmul.f32 %v9016_v57, %v10277_v38 }
 0x194   : > { %v1063_v42 = vmul.f32 %v9046_v30, %v10269_v63  ;;  %v1064_v51 = vmul.f32 %v9045_v5, %v10269_v63  ;;  %v1259_v5 = vadd.f32 %v1231_v25, %v1087_v9  ;;  %v9396_v17 = vunpack.i.h.bf16 %v10559_v50 }
 0x195   : > { %9294 = vperm.xlu1 %9287, %v10077_v35   ;;  %v9049_v41 = vpop.permute.xlu1 %9048  ;;  %v1434_v52 = vadd.f32 %v1406_v1, %v1262_v8  ;;  %v1575_v15 = vmul.f32 %v9035_v16, %v10279_v39  ;;  %v1577_v46 = vmul.f32 %v9040_v48, %v10279_v39  ;;  %v1260_v14 = vadd.f32 %v1232_v26, %v1088_v59 }
 0x196   : > { %v1091_v30 = vadd.f32 %v1063_v42, %v919_v3  ;;  %v1092_v2 = vadd.f32 %v1064_v51, %v920_v40  ;;  %9529 = vset.pattern.permute.xlu0 %v12310_v20  ;;  %v1431_v61 = vadd.f32 %v1403_v49, %v1259_v5  ;;  %v1578_v10 = vmul.f32 %v9039_v23, %v10279_v39 }
 0x197   : > { %v2040_v57 = vadd.s32 56, %v10241_v34  ;;  %1562 = vperm.xlu0 %9529, %v10612_v4   ;;  %v9395_v1 = vunpack.i.l.bf16 %v10559_v50  ;;  %v1576_v25 = vmul.f32 %v9034_v24, %v10279_v39  ;;  %v1432_v11 = vadd.f32 %v1404_v53, %v1260_v14 }
 0x198   : > { %v1263_v54 = vadd.f32 %v1235_v7, %v1091_v30  ;;  %v1264_v45 = vadd.f32 %v1236_v29, %v1092_v2  ;;  %v1747_v37 = vmul.f32 %v9396_v17, %v10281_v43  ;;  %v1603_v40 = vadd.f32 %v1575_v15, %v1431_v61 }
 0x199   : > { %9298 = vset.pattern.permute.xlu1 %v12320_v56  ;;  %v1606_v50 = vadd.f32 %v1578_v10, %v1434_v52  ;;  %v1748_v51 = vmul.f32 %v9395_v1, %v10281_v43  ;;  %v1604_v7 = vadd.f32 %v1576_v25, %v1432_v11  ;;  %v9051_v29 = vunpack.i.h.bf16 %v9049_v41 }
 0x19a   : > { %9300 = vperm.xlu1 %9298, %v10091_v44   ;;  %v1435_v8 = vadd.f32 %v10619_v27, %v1263_v54  ;;  %v1436_v18 = vadd.f32 %v10622_v19, %v1264_v45  ;;  %v9055_v47 = vpop.permute.xlu1 %9054  ;;  %v1605_v44 = vadd.f32 %v1577_v46, %v1433_v36  ;;  %v12344_v19 = vmov 1  }
 0x19b   : > { %v9057_v9 = vunpack.i.h.bf16 %v9055_v47  ;;  %v9056_v3 = vunpack.i.l.bf16 %v9055_v47  ;;  %9532 = vset.pattern.permute.xlu0 %v12320_v56  ;;  %v12345_v26 = vand.u32 15, %v10549_v31  ;;  %v9341_v24 = vunpack.i.h.bf16 %v10437_v55 }
 0x19c   : > { %v10665_v16 = vadd.f32 %v10574_v12, %v1435_v8  ;;  %v10668_v48 = vadd.f32 %v10577_v60, %v1436_v18  ;;  %v9050_v60 = vunpack.i.l.bf16 %v9049_v41  ;;  %v2114_v36 = vand.u32 15, %v2040_v57 }
 0x19d   : > { %v1749_v42 = vmul.f32 %v9057_v9, %v10281_v43  ;;  %v1750_v27 = vmul.f32 %v9056_v3, %v10281_v43  ;;  %vm10677_vm5 = vcmp.lt.s32.totalorder %v12345_v26, 14  ;;  %v9340_v5 = vunpack.i.l.bf16 %v10437_v55  ;;  %v12350_v9 = vld [vmem:[#allocation24_spill] sm:$0xff] }
 0x19e   : > { %9309 = vset.pattern.permute.xlu1 %v12344_v19  ;;  %v1775_v17 = vadd.f32 %v1747_v37, %v1603_v40  ;;  %v1065_v52 = vmul.f32 %v9051_v29, %v10269_v63  ;;  %v1776_v41 = vadd.f32 %v1748_v51, %v1604_v7  ;;  %v1066_v54 = vmul.f32 %v9050_v60, %v10269_v63 }
 0x19f   : > { %9311 = vperm.xlu1 %9309, %v10128_v58   ;;  %v1777_v59 = vadd.f32 %v1749_v42, %v1605_v44  ;;  %v1778_v49 = vadd.f32 %v1750_v27, %v1606_v50  ;;  %v9061_v23 = vpop.permute.xlu1 %9060  ;;  %vm10695_vm6 = vcmp.lt.s32.totalorder %v2114_v36, 14  ;;  %v1410_v18 = vmul.f32 %v9340_v5, %v10277_v38  ;;  %v12351_v27 = vld [vmem:[#allocation14_spill] sm:$0xff] }
 0x1a0   : > { %v9063_v30 = vunpack.i.h.bf16 %v9061_v23  ;;  %v9062_v2 = vunpack.i.l.bf16 %v9061_v23  ;;  %v1093_v47 = vadd.f32 %v1065_v52, %v10568_v6  ;;  %v1094_v3 = vadd.f32 %v1066_v54, %v12350_v9 }
 0x1a1   : > { %v1949_v53 = vadd.f32 %v10511_v13, %v1777_v59  ;;  %v1950_v31 = vadd.f32 %v10514_v33, %v1778_v49  ;;  %v1409_v13 = vmul.f32 %v9341_v24, %v10277_v38  ;;  %v12352_v49 = vmov 2   ;;  %v9545_v33 = vld [vmem:[%s12228_s5 + $0x8] sm:$0xff]  }
 0x1a2   : > { %v1919_v15 = vmul.f32 %v9063_v30, %v10271_v0  ;;  %v1920_v46 = vmul.f32 %v9062_v2, %v10271_v0 }
 0x1a3   : > { %9315 = vset.pattern.permute.xlu1 %v12325_v21  ;;  %v1984_v45 = vadd.f32 %v10386_v28, %v1949_v53  ;;  %v1985_v55 = vadd.f32 %v10386_v28, %v1950_v31 }
 0x1a4   : > { %9317 = vperm.xlu1 %9315, %v10072_v32   ;;  %v1947_v14 = vadd.f32 %v1919_v15, %v1775_v17  ;;  %v1948_v61 = vadd.f32 %v1920_v46, %v1776_v41  ;;  %v9067_v10 = vpop.permute.xlu1 %9066  ;;  %v12353_v41 = vmov 7  }
 0x1a5   : > { %v2012_v57 = vmax.f32 %v1984_v45, 0.0  ;;  %v2013_v1 = vmax.f32 %v1985_v55, 0.0  ;;  %v9069_v25 = vunpack.i.h.bf16 %v9067_v10  ;;  %v9068_v8 = vunpack.i.l.bf16 %v9067_v10 }
 0x1a6   : > { %v1982_v11 = vadd.f32 %v10386_v28, %v1947_v14  ;;  %v1983_v37 = vadd.f32 %v10386_v28, %v1948_v61  ;;  %v12354_v45 = vmov 4   ;;  %v2044_v10 = vadd.s32 88, %v10241_v34 }
 0x1a7   : > { %v2434_v40 = vsel %vm10677_vm5, %v2013_v1, 0.0  ;;  %2496 = vst.msk [vmem:[#allocation2 + $0x51] sm:$0xff] %vm2453_vm0, %v2012_v57  ;;  %v1237_v44 = vmul.f32 %v9069_v25, %v10267_v62  ;;  %v1238_v50 = vmul.f32 %v9068_v8, %v10267_v62  ;;  %v12355_v57 = vld [vmem:[#allocation21_spill] sm:$0xff] }
 0x1a8   : > { %9342 = vset.pattern.permute.xlu1 %v12344_v19  ;;  %2497 = vst.msk [vmem:[#allocation2 + $0x59] sm:$0xff] %vm2453_vm0, %v2434_v40  ;;  %v2010_v6 = vmax.f32 %v1982_v11, 0.0  ;;  %v2011_v42 = vmax.f32 %v1983_v37, 0.0  ;;  %v9401_v1 = vunpack.i.h.bf16 %v12355_v57  ;;  %v9400_v25 = vunpack.i.l.bf16 %v12355_v57  ;;  %v12356_v37 = vld [vmem:[#allocation18_spill] sm:$0xff] }
 0x1a9   : > { %9344 = vperm.xlu1 %9342, %v12351_v27   ;;  %v1265_v51 = vadd.f32 %v1237_v44, %v1093_v47  ;;  %v1266_v7 = vadd.f32 %v1238_v50, %v1094_v3  ;;  %v10712_v29 = vpop.permute.xlu1 %9098  ;;  %v9176_v9 = vunpack.i.h.bf16 %v12356_v37  ;;  %v9175_v3 = vunpack.i.l.bf16 %v12356_v37 }
 0x1aa   : > { %v2432_v26 = vsel %vm10695_vm6, %v2011_v42, 0.0  ;;  %2494 = vst.msk [vmem:[#allocation2 + $0x41] sm:$0xff] %vm2453_vm0, %v2010_v6  ;;  %v2046_v44 = vadd.s32 104, %v10241_v34  ;;  %v2142_v50 = vand.u32 15, %v2044_v10 }
 0x1ab   : > { %2495 = vst.msk [vmem:[#allocation2 + $0x49] sm:$0xff] %vm2453_vm0, %v2432_v26  ;;  %v1437_v60 = vadd.f32 %v1409_v13, %v1265_v51  ;;  %v1438_v59 = vadd.f32 %v1410_v18, %v1266_v7  ;;  %v1753_v51 = vmul.f32 %v9401_v1, %v10281_v43  ;;  %v1754_v7 = vmul.f32 %v9400_v25, %v10281_v43 }
 0x1ac   : > { %vm10776_vm7 = vcmp.lt.s32.totalorder %v2142_v50, 14 }
 0x1ad   : > { %9374 = vset.pattern.permute.xlu1 %v12352_v49 }
 0x1ae   : > { %9376 = vperm.xlu1 %9374, %v10128_v58   ;;  %v10720_v23 = vpop.permute.xlu1 %9104  ;;  %v2570_v36 = vld [vmem:[#allocation2 + $0x51] sm:$0xff] }
 0x1af   : > { %v2571_v30 = vld [vmem:[#allocation2 + $0x59] sm:$0xff] }
 0x1b0   : > { %v2593_v31 = vpack.c.bf16 %v2571_v30, %v2570_v36 }
 0x1b1   : > { %v2568_v24 = vld [vmem:[#allocation2 + $0x41] sm:$0xff] }
 0x1b2   : > { %9380 = vset.pattern.permute.xlu1 %v12310_v20  ;;  %v2569_v2 = vld [vmem:[#allocation2 + $0x49] sm:$0xff] }
 0x1b3   : > { %9382 = vperm.xlu1 %9380, %v10072_v32   ;;  %v10724_v5 = vpop.permute.xlu1 %9110  ;;  %v2592_v53 = vpack.c.bf16 %v2569_v2, %v2568_v24 }
 0x1b5   : > { %8017 = vmatprep.mubr.msk.bf16.mxu0 %vm2453_vm0, %v2592_v53 }
 0x1b6   : > { %8018 = vmatmul.mubr.msk.bf16.gmra.mrb[8].mxu0 %vm2453_vm0, %v2593_v31  ;;  %v12357_v31 = vld [vmem:[#allocation27_spill] sm:$0xff] }
 0x1b7   : > { %9403 = vperm.xlu1 %9380, %v10077_v35  }
 0x1b8   : > { %v10729_v17 = vpop.permute.xlu1 %9116 }
 0x1bb   : > { %9407 = vset.pattern.permute.xlu1 %v12313_v22 }
 0x1bc   : > { %9409 = vperm.xlu1 %9407, %v10128_v58  }
 0x1bd   : > { %v10733_v52 = vpop.permute.xlu1 %9122 }
 0x1c0   : > { %9430 = vperm.xlu1 %9407, %v12351_v27  }
 0x1c1   : > { %v10736_v15 = vpop.permute.xlu1 %9127 }
 0x1c4   : > { %9434 = vset.pattern.permute.xlu1 %v12353_v41 }
 0x1c5   : > { %9436 = vperm.xlu1 %9434, %v10077_v35   ;;  %v9534_v35 = vld [vmem:[%s12226_s3] sm:$0xff]  }
 0x1c6   : > { %v9134_v46 = vpop.permute.xlu1 %9133  ;;  %8037 = vmatprep.subr.bf16.mxu0 %v9534_v35 }
 0x1c7   : > { %v9136_v55 = vunpack.i.h.bf16 %v9134_v46  ;;  %v9135_v13 = vunpack.i.l.bf16 %v9134_v46  ;;  %8038 = vmatpush3.bf16.msra.mxu0 %v9534_v35  ;;  %v727_v46 = vmul.f32 %v9176_v9, %v12357_v31 }
 0x1c9   : > { %9451 = vset.pattern.permute.xlu1 %v12320_v56  ;;  %v1581_v8 = vmul.f32 %v9136_v55, %v10279_v39  ;;  %v1582_v18 = vmul.f32 %v9135_v13, %v10279_v39  ;;  %v2156_v13 = vand.u32 15, %v2046_v44 }
 0x1ca   : > { %9453 = vperm.xlu1 %9451, %v10072_v32  }
 0x1cb   : > { %v1609_v26 = vadd.f32 %v1581_v8, %v1437_v60  ;;  %v1610_v24 = vadd.f32 %v1582_v18, %v1438_v59  ;;  %vm10787_vm8 = vcmp.lt.s32.totalorder %v2156_v13, 14  ;;  %v9130_v13 = vunpack.i.h.bf16 %v10736_v15 }
 0x1cc   : > { %v9140_v54 = vpop.permute.xlu1 %9139 }
 0x1cd   : > { %v9142_v14 = vunpack.i.h.bf16 %v9140_v54  ;;  %v9141_v61 = vunpack.i.l.bf16 %v9140_v54  ;;  %v12358_v54 = vld [vmem:[#allocation16_spill] sm:$0xff]  ;;  %v1781_v10 = vadd.f32 %v1753_v51, %v1609_v26  ;;  %v1782_v57 = vadd.f32 %v1754_v7, %v1610_v24  ;;  %v10797_v24 = vld [vmem:[#allocation6] ss:$0 sm:$0xff] }
 0x1ce   : > { %9457 = vset.pattern.permute.xlu1 %v12354_v45  ;;  %v9373_v55 = vunpack.i.h.bf16 %v12358_v54  ;;  %v9118_v7 = vunpack.i.l.bf16 %v10729_v17 }
 0x1cf   : > { %9459 = vperm.xlu1 %9457, %v12351_v27   ;;  %v1751_v47 = vmul.f32 %v9142_v14, %v10281_v43  ;;  %v1752_v11 = vmul.f32 %v9141_v61, %v10281_v43 }
 0x1d1   : > { %v10744_v22 = vpop.permute.xlu1 %9145  ;;  %v1779_v36 = vadd.f32 %v1751_v47, %v10665_v16  ;;  %v1780_v30 = vadd.f32 %v1752_v11, %v10668_v48  ;;  %v9372_v16 = vunpack.i.l.bf16 %v12358_v54  ;;  %v12361_v47 = vld [vmem:[#allocation23_spill] sm:$0xff] }
 0x1d2   : > { %v899_v11 = vmul.f32 %v9373_v55, %v12361_v47 }
 0x1d3   : > { %9468 = vset.pattern.permute.xlu1 %v12325_v21 }
 0x1d4   : > { %9470 = vperm.xlu1 %9468, %v10128_v58  }
 0x1d6   : > { %v10751_v32 = vpop.permute.xlu1 %9151 }
 0x1d8   : > { %9475 = vperm.xlu1 %9468, %v12351_v27  }
 0x1db   : > { %v9158_v40 = vpop.permute.xlu1 %9157 }
 0x1dc   : > { %v9160_v6 = vunpack.i.h.bf16 %v9158_v40  ;;  %v9159_v42 = vunpack.i.l.bf16 %v9158_v40  ;;  %9485 = vset.pattern.permute.xlu1 %v12310_v20  ;;  %v728_v20 = vmul.f32 %v9175_v3, %v12357_v31 }
 0x1dd   : > { %9487 = vperm.xlu1 %9485, %v12351_v27  }
 0x1de   : > { %v1923_v2 = vmul.f32 %v9160_v6, %v10271_v0  ;;  %v1924_v53 = vmul.f32 %v9159_v42, %v10271_v0  ;;  %v900_v6 = vmul.f32 %v9372_v16, %v12361_v47 }
 0x1df   : > { %v9163_v35 = vpop.permute.xlu1 %9162 }
 0x1e0   : > { %v1951_v60 = vadd.f32 %v1923_v2, %v1779_v36  ;;  %v1952_v59 = vadd.f32 %v1924_v53, %v1780_v30  ;;  %v9165_v14 = vunpack.i.h.bf16 %v9163_v35  ;;  %v9164_v61 = vunpack.i.l.bf16 %v9163_v35 }
 0x1e1   : > { %9491 = vset.pattern.permute.xlu1 %v12353_v41  ;;  %v9113_v2 = vunpack.i.h.bf16 %v10724_v5  ;;  %v9112_v53 = vunpack.i.l.bf16 %v10724_v5  ;;  %v9129_v35 = vunpack.i.l.bf16 %v10736_v15  ;;  %v726_v5 = vmul.f32 %v9118_v7, %v12357_v31 }
 0x1e2   : > { %v1986_v1 = vadd.f32 %v10386_v28, %v1951_v60  ;;  %v1987_v25 = vadd.f32 %v10386_v28, %v1952_v59  ;;  %v1925_v8 = vmul.f32 %v9165_v14, %v10271_v0  ;;  %v1926_v18 = vmul.f32 %v9164_v61, %v10271_v0  ;;  %9493 = vperm.xlu1 %9491, %v10128_v58  }
 0x1e3   : > { %v9119_v28 = vunpack.i.h.bf16 %v10729_v17  ;;  %v12364_v17 = vld [vmem:[#allocation26_spill] sm:$0xff] }
 0x1e4   : > { %v2014_v9 = vmax.f32 %v1986_v1, 0.0  ;;  %v2015_v3 = vmax.f32 %v1987_v25, 0.0  ;;  %v1953_v40 = vadd.f32 %v1925_v8, %v1781_v10  ;;  %v1954_v44 = vadd.f32 %v1926_v18, %v1782_v57  ;;  %v9169_v50 = vpop.permute.xlu1 %9168  ;;  %v9426_v25 = vpop.permute.xlu0 %9425 }
 0x1e5   : > { %v9171_v42 = vunpack.i.h.bf16 %v9169_v50  ;;  %v9170_v51 = vunpack.i.l.bf16 %v9169_v50  ;;  %v725_v14 = vmul.f32 %v9119_v28, %v12357_v31  ;;  %v9148_v57 = vunpack.i.h.bf16 %v10744_v22 }
 0x1e6   : > { %v2436_v26 = vsel %vm10776_vm7, %v2015_v3, 0.0  ;;  %2498 = vst.msk [vmem:[#allocation2 + $0x61] sm:$0xff] %vm2453_vm0, %v2014_v9  ;;  %v1988_v36 = vadd.f32 %v10797_v24, %v1953_v40  ;;  %v1989_v30 = vadd.f32 %v10797_v24, %v1954_v44  ;;  %9503 = vset.pattern.permute.xlu1 %v12320_v56  ;;  %v9147_v1 = vunpack.i.l.bf16 %v10744_v22  ;;  %v12365_v9 = vld [vmem:[#allocation19_spill] sm:$0xff] }
 0x1e7   : > { %2499 = vst.msk [vmem:[#allocation2 + $0x69] sm:$0xff] %vm2453_vm0, %v2436_v26  ;;  %v555_v54 = vmul.f32 %v9171_v42, %v12364_v17  ;;  %v556_v55 = vmul.f32 %v9170_v51, %v12364_v17  ;;  %9505 = vperm.xlu1 %9503, %v10128_v58   ;;  %v554_v8 = vmul.f32 %v9112_v53, %v12364_v17  ;;  %v9193_v3 = vunpack.i.h.bf16 %v12365_v9 }
 0x1e8   : > { %v2016_v60 = vmax.f32 %v1988_v36, 0.0  ;;  %v2017_v59 = vmax.f32 %v1989_v30, 0.0  ;;  %v897_v22 = vmul.f32 %v9130_v13, %v12361_v47  ;;  %v898_v18 = vmul.f32 %v9129_v35, %v12361_v47 }
 0x1e9   : > { %v755_v61 = vadd.f32 %v727_v46, %v555_v54  ;;  %v756_v16 = vadd.f32 %v728_v20, %v556_v55  ;;  %v10811_v10 = vpop.permute.xlu1 %9179  ;;  %v553_v20 = vmul.f32 %v9113_v2, %v12364_v17  ;;  %v9192_v40 = vunpack.i.l.bf16 %v12365_v9  ;;  %v12366_v54 = vld [vmem:[#allocation15_spill] sm:$0xff] }
 0x1ea   : > { %v2438_v58 = vsel %vm10787_vm8, %v2017_v59, 0.0  ;;  %2500 = vst.msk [vmem:[#allocation2 + $0x71] sm:$0xff] %vm2453_vm0, %v2016_v60  ;;  %v9428_v44 = vunpack.i.h.bf16 %v9426_v25  ;;  %v9427_v50 = vunpack.i.l.bf16 %v9426_v25  ;;  %v1070_v42 = vmul.f32 %v9147_v1, %v10269_v63 }
 0x1eb   : > { %2501 = vst.msk [vmem:[#allocation2 + $0x79] sm:$0xff] %vm2453_vm0, %v2438_v58  ;;  %9510 = vperm.xlu1 %9503, %v12351_v27   ;;  %v10821_v15 = vadd.f32 %v899_v11, %v755_v61  ;;  %v10823_v46 = vadd.f32 %v900_v6, %v756_v16  ;;  %v753_v27 = vadd.f32 %v725_v14, %v553_v20 }
 0x1ec   : > { %v754_v11 = vadd.f32 %v726_v5, %v554_v8  ;;  %v1069_v6 = vmul.f32 %v9148_v57, %v10269_v63  ;;  %v729_v55 = vmul.f32 %v9193_v3, %v12357_v31  ;;  %v730_v13 = vmul.f32 %v9192_v40, %v12357_v31  ;;  %v12367_v8 = vld [vmem:[#allocation22_spill] sm:$0xff] }
 0x1ed   : > { %v2572_v28 = vld [vmem:[#allocation2 + $0x61] sm:$0xff]  ;;  %v925_v2 = vadd.f32 %v897_v22, %v753_v27  ;;  %v1241_v16 = vmul.f32 %v9428_v44, %v10267_v62  ;;  %v1242_v5 = vmul.f32 %v9427_v50, %v10267_v62  ;;  %v9227_v22 = vunpack.i.h.bf16 %v12367_v8 }
 0x1ee   : > { %v9186_v51 = vpop.permute.xlu1 %9185  ;;  %v2573_v7 = vld [vmem:[#allocation2 + $0x69] sm:$0xff]  ;;  %v926_v53 = vadd.f32 %v898_v18, %v754_v11  ;;  %v9226_v18 = vunpack.i.l.bf16 %v12367_v8  ;;  %v9107_v40 = vunpack.i.h.bf16 %v10720_v23  ;;  %v9106_v44 = vunpack.i.l.bf16 %v10720_v23 }
 0x1ef   : > { %v9188_v26 = vunpack.i.h.bf16 %v9186_v51  ;;  %v9187_v36 = vunpack.i.l.bf16 %v9186_v51  ;;  %9515 = vset.pattern.permute.xlu1 %v12344_v19  ;;  %v2594_v30 = vpack.c.bf16 %v2573_v7, %v2572_v28  ;;  %v1097_v14 = vadd.f32 %v1069_v6, %v925_v2 }
 0x1f0   : > { %698 = vperm.xlu1 %9515, %v12366_v54   ;;  %v1098_v61 = vadd.f32 %v1070_v42, %v926_v53  ;;  %v9101_v6 = vunpack.i.h.bf16 %v10712_v29  ;;  %v9100_v42 = vunpack.i.l.bf16 %v10712_v29  ;;  %v9125_v51 = vunpack.i.h.bf16 %v10733_v52 }
 0x1f1   : > { %v557_v35 = vmul.f32 %v9188_v26, %v12364_v17  ;;  %v558_v60 = vmul.f32 %v9187_v36, %v12364_v17  ;;  %8021 = vmatprep.mubr.msk.bf16.mxu0 %vm2453_vm0, %v2594_v30  ;;  %v2574_v59 = vld [vmem:[#allocation2 + $0x71] sm:$0xff]  ;;  %v1269_v50 = vadd.f32 %v1241_v16, %v1097_v14  ;;  %v9124_v7 = vunpack.i.l.bf16 %v10733_v52 }
 0x1f2   : > { %v2575_v57 = vld [vmem:[#allocation2 + $0x79] sm:$0xff]  ;;  %v1270_v28 = vadd.f32 %v1242_v5, %v1098_v61  ;;  %v1585_v23 = vmul.f32 %v9227_v22, %v10279_v39  ;;  %v1586_v26 = vmul.f32 %v9226_v18, %v10279_v39  ;;  %v723_v53 = vmul.f32 %v9107_v40, %v12357_v31 }
 0x1f3   : > { %v10842_v1 = vadd.f32 %v729_v55, %v557_v35  ;;  %v10844_v25 = vadd.f32 %v730_v13, %v558_v60  ;;  %v9208_v58 = vpop.permute.xlu1 %9207  ;;  %v2595_v20 = vpack.c.bf16 %v2575_v57, %v2574_v59  ;;  %v724_v55 = vmul.f32 %v9106_v44, %v12357_v31  ;;  %v12368_v13 = vld [vmem:[#allocation25_spill] sm:$0xff]  ;;  %v12369_v5 = vld [vmem:[#allocation28_spill] sm:$0xff] }
 0x1f4   : > { %v9210_v9 = vunpack.i.h.bf16 %v9208_v58  ;;  %v9209_v3 = vunpack.i.l.bf16 %v9208_v58  ;;  %9516 = vset.pattern.permute.xlu1 %v12352_v49  ;;  %v9243_v35 = vunpack.i.h.bf16 %v12368_v13  ;;  %v9242_v29 = vunpack.i.l.bf16 %v12368_v13 }
 0x1f5   : > { %870 = vperm.xlu1 %9516, %v12366_v54   ;;  %8022 = vmatmul.mubr.msk.bf16.gmra.mrb[12].mxu0 %vm2453_vm0, %v2595_v20  ;;  %v551_v59 = vmul.f32 %v9101_v6, %v12364_v17  ;;  %v552_v14 = vmul.f32 %v9100_v42, %v12364_v17  ;;  %v895_v61 = vmul.f32 %v9125_v51, %v12361_v47  ;;  %v9260_v57 = vunpack.i.h.bf16 %v12369_v5  ;;  %v10877_v20 = vpop.permute.xlu0 %9441 }
 0x1f6   : > { %v1413_v27 = vmul.f32 %v9210_v9, %v10277_v38  ;;  %v1414_v11 = vmul.f32 %v9209_v3, %v10277_v38  ;;  %v896_v16 = vmul.f32 %v9124_v7, %v12361_v47  ;;  %v9259_v58 = vunpack.i.l.bf16 %v12369_v5 }
 0x1f7   : > { %v751_v8 = vadd.f32 %v723_v53, %v551_v59  ;;  %v752_v22 = vadd.f32 %v724_v55, %v552_v14  ;;  %v9154_v18 = vunpack.i.h.bf16 %v10751_v32  ;;  %v9153_v9 = vunpack.i.l.bf16 %v10751_v32 }
 0x1f8   : > { %v1441_v36 = vadd.f32 %v1413_v27, %v1269_v50  ;;  %v1442_v30 = vadd.f32 %v1414_v11, %v1270_v28  ;;  %v9214_v2 = vpop.permute.xlu1 %9213  ;;  %v1067_v50 = vmul.f32 %v9243_v35, %v10269_v63  ;;  %v1068_v28 = vmul.f32 %v9242_v29, %v10269_v63 }
 0x1f9   : > { %9518 = vset.pattern.permute.xlu1 %v12354_v45  ;;  %v923_v27 = vadd.f32 %v895_v61, %v751_v8  ;;  %v924_v11 = vadd.f32 %v896_v16, %v752_v22  ;;  %v9182_v6 = vunpack.i.h.bf16 %v10811_v10  ;;  %v9181_v42 = vunpack.i.l.bf16 %v10811_v10  ;;  %v9448_v10 = vpop.permute.xlu0 %9447  ;;  %v10906_v22 = vld [vmem:[%s12226_s3 + $0x10] sm:$0xff]  }
 0x1fa   : > { %1214 = vperm.xlu1 %9518, %v12366_v54   ;;  %v10867_v52 = vadd.f32 %v1585_v23, %v1441_v36  ;;  %v10869_v60 = vadd.f32 %v1586_v26, %v1442_v30  ;;  %v1073_v7 = vmul.f32 %v9260_v57, %v10269_v63  ;;  %v1074_v23 = vmul.f32 %v9259_v58, %v10269_v63 }
 0x1fb   : > { %v1239_v26 = vmul.f32 %v9154_v18, %v10267_v62  ;;  %v1240_v36 = vmul.f32 %v9153_v9, %v10267_v62  ;;  %v9216_v30 = vunpack.i.h.bf16 %v9214_v2  ;;  %v9215_v53 = vunpack.i.l.bf16 %v9214_v2  ;;  %8067 = vmatprep.subr.bf16.mxu0 %v10906_v22 }
 0x1fc   : > { %v1095_v29 = vadd.f32 %v1067_v50, %v923_v27  ;;  %v1096_v59 = vadd.f32 %v1068_v28, %v924_v11  ;;  %v1411_v14 = vmul.f32 %v9182_v6, %v10277_v38  ;;  %v1412_v61 = vmul.f32 %v9181_v42, %v10277_v38 }
 0x1fd   : > { %v9220_v3 = vpop.permute.xlu1 %9219  ;;  %v9450_v2 = vunpack.i.h.bf16 %v9448_v10  ;;  %v9449_v57 = vunpack.i.l.bf16 %v9448_v10  ;;  %v1584_v8 = vmul.f32 %v9215_v53, %v10279_v39  ;;  %v2048_v50 = vadd.s32 120, %v10241_v34 }
 0x1fe   : > { %v9222_v40 = vunpack.i.h.bf16 %v9220_v3  ;;  %v9221_v44 = vunpack.i.l.bf16 %v9220_v3  ;;  %9519 = vset.pattern.permute.xlu1 %v12325_v21  ;;  %v1268_v58 = vadd.f32 %v1240_v36, %v1096_v59  ;;  %v12372_v59 = vld [vmem:[#allocation34_spill] sm:$0xff] }
 0x1ff   : > { %1386 = vperm.xlu1 %9519, %v12366_v54   ;;  %v1927_v28 = vmul.f32 %v9450_v2, %v10271_v0  ;;  %v1928_v27 = vmul.f32 %v9449_v57, %v10271_v0 }
 0x200   : > { %v901_v51 = vmul.f32 %v9222_v40, %v12361_v47  ;;  %v902_v32 = vmul.f32 %v9221_v44, %v12361_v47  ;;  %v1440_v3 = vadd.f32 %v1412_v61, %v1268_v58 }
 0x202   : > { %v929_v55 = vadd.f32 %v901_v51, %v10842_v1  ;;  %v930_v13 = vadd.f32 %v902_v32, %v10844_v25  ;;  %v10895_v35 = vpop.permute.xlu1 %9246  ;;  %v1267_v1 = vadd.f32 %v1239_v26, %v1095_v29  ;;  %v1583_v25 = vmul.f32 %v9216_v30, %v10279_v39 }
 0x203   : > { %9521 = vset.pattern.permute.xlu1 %v12353_v41  ;;  %v1612_v6 = vadd.f32 %v1584_v8, %v1440_v3  ;;  %v2170_v26 = vand.u32 15, %v2048_v50 }
 0x204   : > { %1730 = vperm.xlu1 %9521, %v12366_v54   ;;  %v1101_v16 = vadd.f32 %v1073_v7, %v929_v55  ;;  %v1102_v5 = vadd.f32 %v1074_v23, %v930_v13  ;;  %v1439_v9 = vadd.f32 %v1411_v14, %v1267_v1  ;;  %v9351_v14 = vunpack.i.l.bf16 %v12372_v59 }
 0x205   : > { %vm10922_vm9 = vcmp.lt.s32.totalorder %v2170_v26, 14 }
 0x206   : > { %v1611_v11 = vadd.f32 %v1583_v25, %v1439_v9  ;;  %v1418_v8 = vmul.f32 %v9351_v14, %v10277_v38  ;;  %v12375_v14 = vld [vmem:[#allocation32_spill] sm:$0xff] }
 0x207   : > { %v9253_v18 = vpop.permute.xlu1 %9252 }
 0x208   : > { %v9255_v40 = vunpack.i.h.bf16 %v9253_v18  ;;  %v9254_v44 = vunpack.i.l.bf16 %v9253_v18  ;;  %9522 = vset.pattern.permute.xlu1 %v12320_v56 }
 0x209   : > { %1902 = vperm.xlu1 %9522, %v12366_v54  }
 0x20a   : > { %v1755_v42 = vmul.f32 %v9255_v40, %v10281_v43  ;;  %v1756_v51 = vmul.f32 %v9254_v44, %v10281_v43 }
 0x20b   : > { %v9284_v32 = vpop.permute.xlu1 %9283 }
 0x20c   : > { %v1783_v7 = vadd.f32 %v1755_v42, %v1611_v11  ;;  %v1784_v23 = vadd.f32 %v1756_v51, %v1612_v6  ;;  %v9286_v2 = vunpack.i.h.bf16 %v9284_v32  ;;  %v9285_v57 = vunpack.i.l.bf16 %v9284_v32 }
 0x20d   : > { %9524 = vset.pattern.permute.xlu1 %v12344_v19  ;;  %v9352_v19 = vunpack.i.h.bf16 %v12372_v59 }
 0x20e   : > { %v1955_v36 = vadd.f32 %v1927_v28, %v1783_v7  ;;  %v1956_v30 = vadd.f32 %v1928_v27, %v1784_v23  ;;  %702 = vperm.xlu1 %9524, %v10612_v4   ;;  %v1757_v3 = vmul.f32 %v9286_v2, %v10281_v43  ;;  %v1758_v40 = vmul.f32 %v9285_v57, %v10281_v43  ;;  %v12376_v57 = vld [vmem:[#allocation17_spill] sm:$0xff] }
 0x20f   : > { %v2050_v28 = vadd.s32 136, %v10241_v34  ;;  %v9324_v2 = vunpack.i.l.bf16 %v12375_v14 }
 0x210   : > { %v1990_v53 = vadd.f32 %v10797_v24, %v1955_v36  ;;  %v1991_v54 = vadd.f32 %v10797_v24, %v1956_v30  ;;  %v10920_v55 = vpop.permute.xlu1 %9289  ;;  %v1786_v7 = vadd.f32 %v1758_v40, %v10869_v60 }
 0x212   : > { %v2018_v10 = vmax.f32 %v1990_v53, 0.0  ;;  %v2019_v29 = vmax.f32 %v1991_v54, 0.0  ;;  %9525 = vset.pattern.permute.xlu1 %v12352_v49  ;;  %v1417_v49 = vmul.f32 %v9352_v19, %v10277_v38 }
 0x213   : > { %874 = vperm.xlu1 %9525, %v10612_v4  }
 0x214   : > { %v2440_v61 = vsel %vm10922_vm9, %v2019_v29, 0.0  ;;  %2502 = vst.msk [vmem:[#allocation2 + $0x81] sm:$0xff] %vm2453_vm0, %v2018_v10  ;;  %v9295_v1 = vpop.permute.xlu1 %9294 }
 0x215   : > { %2503 = vst.msk [vmem:[#allocation2 + $0x89] sm:$0xff] %vm2453_vm0, %v2440_v61  ;;  %v9297_v58 = vunpack.i.h.bf16 %v9295_v1  ;;  %v9296_v25 = vunpack.i.l.bf16 %v9295_v1  ;;  %v9325_v61 = vunpack.i.h.bf16 %v12375_v14  ;;  %v9390_v1 = vunpack.i.h.bf16 %v12376_v57 }
 0x217   : > { %v1245_v18 = vmul.f32 %v9297_v58, %v10267_v62  ;;  %v1246_v9 = vmul.f32 %v9296_v25, %v10267_v62  ;;  %9527 = vset.pattern.permute.xlu1 %v12354_v45  ;;  %v1785_v45 = vadd.f32 %v1757_v3, %v10867_v52  ;;  %v9249_v58 = vunpack.i.h.bf16 %v10895_v35 }
 0x218   : > { %1218 = vperm.xlu1 %9527, %v10612_v4   ;;  %v9248_v25 = vunpack.i.l.bf16 %v10895_v35  ;;  %v562_v3 = vmul.f32 %v9324_v2, %v12364_v17  ;;  %v905_v40 = vmul.f32 %v9390_v1, %v12361_v47 }
 0x219   : > { %v1273_v44 = vadd.f32 %v1245_v18, %v1101_v16  ;;  %v1274_v50 = vadd.f32 %v1246_v9, %v1102_v5  ;;  %v9301_v27 = vpop.permute.xlu1 %9300  ;;  %v2184_v5 = vand.u32 15, %v2050_v28  ;;  %v561_v9 = vmul.f32 %v9325_v61, %v12364_v17 }
 0x21a   : > { %v9303_v11 = vunpack.i.h.bf16 %v9301_v27  ;;  %v9302_v6 = vunpack.i.l.bf16 %v9301_v27  ;;  %v1071_v27 = vmul.f32 %v9249_v58, %v10269_v63 }
 0x21b   : > { %v2576_v42 = vld [vmem:[#allocation2 + $0x81] sm:$0xff]  ;;  %v10943_v51 = vadd.f32 %v1417_v49, %v1273_v44  ;;  %v10945_v32 = vadd.f32 %v1418_v8, %v1274_v50  ;;  %vm10961_vm10 = vcmp.lt.s32.totalorder %v2184_v5, 14  ;;  %v9292_v44 = vunpack.i.h.bf16 %v10920_v55 }
 0x21c   : > { %v1929_v23 = vmul.f32 %v9303_v11, %v10271_v0  ;;  %v1930_v26 = vmul.f32 %v9302_v6, %v10271_v0  ;;  %9528 = vset.pattern.permute.xlu1 %v12325_v21  ;;  %v2577_v16 = vld [vmem:[#allocation2 + $0x89] sm:$0xff]  ;;  %v1072_v11 = vmul.f32 %v9248_v25, %v10269_v63 }
 0x21d   : > { %1390 = vperm.xlu1 %9528, %v10612_v4   ;;  %v10953_v36 = vpack.c.bf16 %v2577_v16, %v2576_v42 }
 0x21e   : > { %v1957_v30 = vadd.f32 %v1929_v23, %v1785_v45  ;;  %v1958_v53 = vadd.f32 %v1930_v26, %v1786_v7  ;;  %v10955_v54 = vpop.permute.xlu1 %9311 }
 0x21f   : > { %8025 = vmatprep.mubr.msk.bf16.mxu0 %vm2453_vm0, %v10953_v36 }
 0x220   : > { %v1992_v52 = vadd.f32 %v10797_v24, %v1957_v30  ;;  %v1993_v60 = vadd.f32 %v10797_v24, %v1958_v53 }
 0x221   : > { %9530 = vset.pattern.permute.xlu1 %v12353_v41  ;;  %v9389_v41 = vunpack.i.l.bf16 %v12376_v57 }
 0x222   : > { %v2020_v21 = vmax.f32 %v1992_v52, 0.0  ;;  %v2021_v29 = vmax.f32 %v1993_v60, 0.0  ;;  %1734 = vperm.xlu1 %9530, %v10612_v4   ;;  %v12377_v52 = vld [vmem:[#allocation29_spill] sm:$0xff] }
 0x223   : > { %v9318_v59 = vpop.permute.xlu1 %9317  ;;  %v906_v35 = vmul.f32 %v9389_v41, %v12361_v47  ;;  %v9417_v60 = vunpack.i.h.bf16 %v12377_v52 }
 0x224   : > { %v2442_v19 = vsel %vm10961_vm10, %v2021_v29, 0.0  ;;  %2504 = vst.msk [vmem:[#allocation2 + $0x91] sm:$0xff] %vm2453_vm0, %v2020_v21  ;;  %v9320_v6 = vunpack.i.h.bf16 %v9318_v59  ;;  %v9319_v45 = vunpack.i.l.bf16 %v9318_v59  ;;  %v9416_v21 = vunpack.i.l.bf16 %v12377_v52 }
 0x225   : > { %2505 = vst.msk [vmem:[#allocation2 + $0x99] sm:$0xff] %vm2453_vm0, %v2442_v19  ;;  %v1099_v29 = vadd.f32 %v1071_v27, %v10821_v15  ;;  %v1100_v59 = vadd.f32 %v1072_v11, %v10823_v46  ;;  %v1759_v58 = vmul.f32 %v9417_v60, %v10281_v43 }
 0x226   : > { %9531 = vset.pattern.permute.xlu1 %v12320_v56  ;;  %v9291_v56 = vunpack.i.l.bf16 %v10920_v55  ;;  %v1243_v55 = vmul.f32 %v9292_v44, %v10267_v62  ;;  %v1415_v19 = vmul.f32 %v9320_v6, %v10277_v38  ;;  %v1416_v14 = vmul.f32 %v9319_v45, %v10277_v38 }
 0x227   : > { %1906 = vperm.xlu1 %9531, %v10612_v4   ;;  %v1760_v25 = vmul.f32 %v9416_v21, %v10281_v43  ;;  %v9443_v6 = vunpack.i.l.bf16 %v10877_v20 }
 0x228   : > { %v9345_v49 = vpop.permute.xlu1 %9344  ;;  %v1244_v5 = vmul.f32 %v9291_v56, %v10267_v62  ;;  %v1271_v2 = vadd.f32 %v1243_v55, %v1099_v29 }
 0x229   : > { %v9347_v8 = vunpack.i.h.bf16 %v9345_v49  ;;  %v9346_v18 = vunpack.i.l.bf16 %v9345_v49  ;;  %v9314_v49 = vunpack.i.h.bf16 %v10955_v54 }
 0x22a   : > { %v1272_v57 = vadd.f32 %v1244_v5, %v1100_v59  ;;  %v1443_v15 = vadd.f32 %v1415_v19, %v1271_v2  ;;  %v1248_v19 = vmul.f32 %v9443_v6, %v10267_v62 }
 0x22b   : > { %v733_v4 = vmul.f32 %v9347_v8, %v12357_v31  ;;  %v734_v50 = vmul.f32 %v9346_v18, %v12357_v31  ;;  %v2578_v28 = vld [vmem:[#allocation2 + $0x91] sm:$0xff]  ;;  %v9313_v8 = vunpack.i.l.bf16 %v10955_v54  ;;  %v731_v27 = vmul.f32 %v9314_v49, %v12357_v31 }
 0x22c   : > { %v2579_v42 = vld [vmem:[#allocation2 + $0x99] sm:$0xff]  ;;  %v1444_v18 = vadd.f32 %v1416_v14, %v1272_v57  ;;  %v9444_v54 = vunpack.i.h.bf16 %v10877_v20 }
 0x22d   : > { %v761_v7 = vadd.f32 %v733_v4, %v561_v9  ;;  %v762_v23 = vadd.f32 %v734_v50, %v562_v3  ;;  %v9377_v26 = vpop.permute.xlu1 %9376  ;;  %v10989_v16 = vpack.c.bf16 %v2579_v42, %v2578_v28  ;;  %v12378_v3 = vld [vmem:[#allocation31_spill] sm:$0xff]  ;;  %v732_v11 = vmul.f32 %v9313_v8, %v12357_v31 }
 0x22e   : > { %v9307_v44 = vunpack.i.l.bf16 %v12378_v3  ;;  %v9379_v56 = vunpack.i.h.bf16 %v9377_v26  ;;  %v9378_v4 = vunpack.i.l.bf16 %v9377_v26  ;;  %v1247_v59 = vmul.f32 %v9444_v54, %v10267_v62 }
 0x22f   : > { %8026 = vmatmul.mubr.msk.bf16.gmra.mrb[16].mxu0 %vm2453_vm0, %v10989_v16  ;;  %v10995_v30 = vadd.f32 %v905_v40, %v761_v7  ;;  %v10997_v53 = vadd.f32 %v906_v35, %v762_v23  ;;  %v9308_v40 = vunpack.i.h.bf16 %v12378_v3 }
 0x230   : > { %v560_v23 = vmul.f32 %v9307_v44, %v12364_v17  ;;  %v903_v55 = vmul.f32 %v9379_v56, %v12361_v47  ;;  %v904_v26 = vmul.f32 %v9378_v4, %v12361_v47  ;;  %v2054_v4 = vadd.s32 168, %v10241_v34 }
 0x231   : > { %v559_v7 = vmul.f32 %v9308_v40, %v12364_v17 }
 0x232   : > { %v9383_v61 = vpop.permute.xlu1 %9382  ;;  %v760_v60 = vadd.f32 %v732_v11, %v560_v23  ;;  %v2052_v23 = vadd.s32 152, %v10241_v34 }
 0x233   : > { %v9385_v1 = vunpack.i.h.bf16 %v9383_v61  ;;  %v9384_v41 = vunpack.i.l.bf16 %v9383_v61  ;;  %v759_v52 = vadd.f32 %v731_v27, %v559_v7 }
 0x234   : > { %v932_v14 = vadd.f32 %v904_v26, %v760_v60  ;;  %v2212_v26 = vand.u32 15, %v2054_v4 }
 0x235   : > { %v1587_v46 = vmul.f32 %v9385_v1, %v10279_v39  ;;  %v1588_v9 = vmul.f32 %v9384_v41, %v10279_v39  ;;  %v931_v20 = vadd.f32 %v903_v55, %v759_v52 }
 0x236   : > { %v9404_v50 = vpop.permute.xlu1 %9403  ;;  %vm11045_vm11 = vcmp.lt.s32.totalorder %v2212_v26, 14 }
 0x237   : > { %v1615_v28 = vadd.f32 %v1587_v46, %v1443_v15  ;;  %v1616_v35 = vadd.f32 %v1588_v9, %v1444_v18  ;;  %v9406_v57 = vunpack.i.h.bf16 %v9404_v50  ;;  %v9405_v1 = vunpack.i.l.bf16 %v9404_v50 }
 0x239   : > { %v1787_v42 = vadd.f32 %v1759_v58, %v1615_v28  ;;  %v1788_v45 = vadd.f32 %v1760_v25, %v1616_v35  ;;  %v9465_v58 = vpop.permute.xlu0 %9464  ;;  %v1589_v9 = vmul.f32 %v9406_v57, %v10279_v39  ;;  %v1590_v3 = vmul.f32 %v9405_v1, %v10279_v39 }
 0x23a   : > { %v9467_v8 = vunpack.i.h.bf16 %v9465_v58  ;;  %v9466_v15 = vunpack.i.l.bf16 %v9465_v58 }
 0x23b   : > { %v9410_v5 = vpop.permute.xlu1 %9409  ;;  %v1617_v35 = vadd.f32 %v1589_v9, %v10943_v51  ;;  %v1618_v27 = vadd.f32 %v1590_v3, %v10945_v32 }
 0x23c   : > { %v9412_v21 = vunpack.i.h.bf16 %v9410_v5  ;;  %v9411_v29 = vunpack.i.l.bf16 %v9410_v5  ;;  %v1933_v50 = vmul.f32 %v9467_v8, %v10271_v0  ;;  %v1934_v28 = vmul.f32 %v9466_v15, %v10271_v0 }
 0x23e   : > { %v1075_v61 = vmul.f32 %v9412_v21, %v10269_v63  ;;  %v1076_v2 = vmul.f32 %v9411_v29, %v10269_v63 }
 0x23f   : > { %v11025_v41 = vpop.permute.xlu1 %9430 }
 0x240   : > { %v1103_v25 = vadd.f32 %v1075_v61, %v931_v20  ;;  %v1104_v49 = vadd.f32 %v1076_v2, %v932_v14 }
 0x242   : > { %v11027_v18 = vadd.f32 %v1247_v59, %v1103_v25  ;;  %v11029_v46 = vadd.f32 %v1248_v19, %v1104_v49  ;;  %v2198_v19 = vand.u32 15, %v2052_v23 }
 0x244   : > { %v9437_v40 = vpop.permute.xlu1 %9436  ;;  %vm11054_vm12 = vcmp.lt.s32.totalorder %v2198_v19, 14 }
 0x245   : > { %v9439_v44 = vunpack.i.h.bf16 %v9437_v40  ;;  %v9438_v56 = vunpack.i.l.bf16 %v9437_v40  ;;  %v9433_v40 = vunpack.i.h.bf16 %v11025_v41 }
 0x247   : > { %v1761_v11 = vmul.f32 %v9439_v44, %v10281_v43  ;;  %v1762_v54 = vmul.f32 %v9438_v56, %v10281_v43  ;;  %v9432_v44 = vunpack.i.l.bf16 %v11025_v41  ;;  %v9482_v56 = vpop.permute.xlu0 %9481 }
 0x249   : > { %v1789_v6 = vadd.f32 %v1761_v11, %v1617_v35  ;;  %v1790_v7 = vadd.f32 %v1762_v54, %v1618_v27  ;;  %v9454_v55 = vpop.permute.xlu1 %9453  ;;  %v1078_v26 = vmul.f32 %v9432_v44, %v10269_v63 }
 0x24a   : > { %v9456_v5 = vunpack.i.h.bf16 %v9454_v55  ;;  %v9455_v52 = vunpack.i.l.bf16 %v9454_v55  ;;  %v1077_v55 = vmul.f32 %v9433_v40, %v10269_v63 }
 0x24b   : > { %v1961_v60 = vadd.f32 %v1933_v50, %v1789_v6  ;;  %v1962_v21 = vadd.f32 %v1934_v28, %v1790_v7  ;;  %v9484_v6 = vunpack.i.h.bf16 %v9482_v56 }
 0x24c   : > { %v1931_v29 = vmul.f32 %v9456_v5, %v10271_v0  ;;  %v1932_v51 = vmul.f32 %v9455_v52, %v10271_v0  ;;  %v9483_v5 = vunpack.i.l.bf16 %v9482_v56 }
 0x24d   : > { %v1996_v32 = vadd.f32 %v10797_v24, %v1961_v60  ;;  %v1997_v59 = vadd.f32 %v10797_v24, %v1962_v21 }
 0x24e   : > { %v1959_v14 = vadd.f32 %v1931_v29, %v1787_v42  ;;  %v1960_v61 = vadd.f32 %v1932_v51, %v1788_v45  ;;  %v9460_v2 = vpop.permute.xlu1 %9459 }
 0x24f   : > { %v2024_v57 = vmax.f32 %v1996_v32, 0.0  ;;  %v2025_v1 = vmax.f32 %v1997_v59, 0.0  ;;  %v9462_v11 = vunpack.i.h.bf16 %v9460_v2  ;;  %v9461_v54 = vunpack.i.l.bf16 %v9460_v2 }
 0x250   : > { %v1994_v58 = vadd.f32 %v10797_v24, %v1959_v14  ;;  %v1995_v25 = vadd.f32 %v10797_v24, %v1960_v61  ;;  %v9500_v61 = vpop.permute.xlu0 %9499  ;;  %v1105_v2 = vadd.f32 %v1077_v55, %v10995_v30 }
 0x251   : > { %v2446_v49 = vsel %vm11045_vm11, %v2025_v1, 0.0  ;;  %2508 = vst.msk [vmem:[#allocation2 + $0xb1] sm:$0xff] %vm2453_vm0, %v2024_v57  ;;  %v1249_v32 = vmul.f32 %v9462_v11, %v10267_v62  ;;  %v1250_v59 = vmul.f32 %v9461_v54, %v10267_v62  ;;  %v1106_v57 = vadd.f32 %v1078_v26, %v10997_v53 }
 0x252   : > { %2509 = vst.msk [vmem:[#allocation2 + $0xb9] sm:$0xff] %vm2453_vm0, %v2446_v49  ;;  %v2022_v42 = vmax.f32 %v1994_v58, 0.0  ;;  %v2023_v45 = vmax.f32 %v1995_v25, 0.0  ;;  %v1591_v1 = vmul.f32 %v9484_v6, %v10279_v39  ;;  %v1592_v58 = vmul.f32 %v9483_v5, %v10279_v39 }
 0x253   : > { %v9471_v15 = vpop.permute.xlu1 %9470  ;;  %v9502_v40 = vunpack.i.h.bf16 %v9500_v61  ;;  %v9501_v44 = vunpack.i.l.bf16 %v9500_v61  ;;  %v1277_v30 = vadd.f32 %v1249_v32, %v1105_v2  ;;  %v1278_v56 = vadd.f32 %v1250_v59, %v1106_v57 }
 0x254   : > { %v2444_v9 = vsel %vm11054_vm12, %v2023_v45, 0.0  ;;  %2506 = vst.msk [vmem:[#allocation2 + $0xa1] sm:$0xff] %vm2453_vm0, %v2022_v42  ;;  %v9473_v4 = vunpack.i.h.bf16 %v9471_v15  ;;  %v9472_v50 = vunpack.i.l.bf16 %v9471_v15  ;;  %v2056_v11 = vadd.s32 184, %v10241_v34 }
 0x255   : > { %2507 = vst.msk [vmem:[#allocation2 + $0xa9] sm:$0xff] %vm2453_vm0, %v2444_v9  ;;  %v1765_v26 = vmul.f32 %v9502_v40, %v10281_v43  ;;  %v1766_v5 = vmul.f32 %v9501_v44, %v10281_v43  ;;  %v2058_v59 = vadd.s32 200, %v10241_v34 }
 0x256   : > { %v1419_v29 = vmul.f32 %v9473_v4, %v10277_v38  ;;  %v1420_v51 = vmul.f32 %v9472_v50, %v10277_v38  ;;  %v2226_v32 = vand.u32 15, %v2056_v11 }
 0x257   : > { %v9476_v3 = vpop.permute.xlu1 %9475 }
 0x258   : > { %v2582_v35 = vld [vmem:[#allocation2 + $0xb1] sm:$0xff]  ;;  %v9478_v60 = vunpack.i.h.bf16 %v9476_v3  ;;  %v9477_v41 = vunpack.i.l.bf16 %v9476_v3  ;;  %v1447_v9 = vadd.f32 %v1419_v29, %v11027_v18  ;;  %v1448_v3 = vadd.f32 %v1420_v51, %v11029_v46 }
 0x259   : > { %v2583_v27 = vld [vmem:[#allocation2 + $0xb9] sm:$0xff]  ;;  %vm11101_vm13 = vcmp.lt.s32.totalorder %v2226_v32, 14 }
 0x25a   : > { %v11069_v21 = vpack.c.bf16 %v2583_v27, %v2582_v35  ;;  %v1421_v49 = vmul.f32 %v9478_v60, %v10277_v38  ;;  %v1422_v42 = vmul.f32 %v9477_v41, %v10277_v38  ;;  %v1619_v18 = vadd.f32 %v1591_v1, %v1447_v9  ;;  %v526_v1 = vpop.permute.xlu0 %525 }
 0x25b   : > { %v2580_v28 = vld [vmem:[#allocation2 + $0xa1] sm:$0xff]  ;;  %v1620_v6 = vadd.f32 %v1592_v58, %v1448_v3  ;;  %v2240_v3 = vand.u32 15, %v2058_v59  ;;  %v563_v40 = vmul.f32 %v12364_v17, %v526_v1 }
 0x25c   : > { %v9488_v7 = vpop.permute.xlu1 %9487  ;;  %v2581_v23 = vld [vmem:[#allocation2 + $0xa9] sm:$0xff]  ;;  %v1449_v35 = vadd.f32 %v1421_v49, %v1277_v30  ;;  %v1450_v27 = vadd.f32 %v1422_v42, %v1278_v56 }
 0x25d   : > { %v11067_v52 = vpack.c.bf16 %v2581_v23, %v2580_v28  ;;  %v9490_v19 = vunpack.i.h.bf16 %v9488_v7  ;;  %v9489_v14 = vunpack.i.l.bf16 %v9488_v7  ;;  %vm11113_vm14 = vcmp.lt.s32.totalorder %v2240_v3, 14 }
 0x25f   : > { %8029 = vmatprep.mubr.msk.bf16.mxu0 %vm2453_vm0, %v11067_v52  ;;  %v1593_v53 = vmul.f32 %v9490_v19, %v10279_v39  ;;  %v1594_v4 = vmul.f32 %v9489_v14, %v10279_v39 }
 0x260   : > { %8030 = vmatmul.mubr.msk.bf16.gmra.mrb[20].mxu0 %vm2453_vm0, %v11069_v21 }
 0x261   : > { %v9494_v25 = vpop.permute.xlu1 %9493  ;;  %v1621_v23 = vadd.f32 %v1593_v53, %v1449_v35  ;;  %v1622_v55 = vadd.f32 %v1594_v4, %v1450_v27 }
 0x262   : > { %v9496_v45 = vunpack.i.h.bf16 %v9494_v25  ;;  %v9495_v15 = vunpack.i.l.bf16 %v9494_v25 }
 0x263   : > { %v1793_v58 = vadd.f32 %v1765_v26, %v1621_v23  ;;  %v1794_v25 = vadd.f32 %v1766_v5, %v1622_v55 }
 0x264   : > { %v1763_v50 = vmul.f32 %v9496_v45, %v10281_v43  ;;  %v1764_v28 = vmul.f32 %v9495_v15, %v10281_v43 }
 0x266   : > { %v9506_v54 = vpop.permute.xlu1 %9505  ;;  %v1791_v60 = vadd.f32 %v1763_v50, %v1619_v18  ;;  %v1792_v41 = vadd.f32 %v1764_v28, %v1620_v6 }
 0x267   : > { %v9508_v46 = vunpack.i.h.bf16 %v9506_v54  ;;  %v9507_v7 = vunpack.i.l.bf16 %v9506_v54  ;;  %v1043_v54 = vpop.permute.xlu0 %1042 }
 0x268   : > { %v1079_v26 = vmul.f32 %v10269_v63, %v1043_v54 }
 0x269   : > { %v1935_v29 = vmul.f32 %v9508_v46, %v10271_v0  ;;  %v1936_v51 = vmul.f32 %v9507_v7, %v10271_v0 }
 0x26a   : > { %v9511_v19 = vpop.permute.xlu1 %9510 }
 0x26b   : > { %v1963_v14 = vadd.f32 %v1935_v29, %v1791_v60  ;;  %v1964_v61 = vadd.f32 %v1936_v51, %v1792_v41  ;;  %v9513_v2 = vunpack.i.h.bf16 %v9511_v19  ;;  %v9512_v57 = vunpack.i.l.bf16 %v9511_v19  ;;  %v2516_v19 = vld [vmem:[#allocation2] sm:$0xff] }
 0x26d   : > { %v1998_v49 = vadd.f32 %v10797_v24, %v1963_v14  ;;  %v1999_v42 = vadd.f32 %v10797_v24, %v1964_v61  ;;  %v1937_v45 = vmul.f32 %v9513_v2, %v10271_v0  ;;  %v1938_v15 = vmul.f32 %v9512_v57, %v10271_v0  ;;  %v2517_v14 = vld [vmem:[#allocation2 + $0x8] sm:$0xff]  ;;  %v1559_v2 = vpop.permute.xlu0 %1558 }
 0x26f   : > { %v2026_v44 = vmax.f32 %v1998_v49, 0.0  ;;  %v2027_v30 = vmax.f32 %v1999_v42, 0.0  ;;  %v1965_v56 = vadd.f32 %v1937_v45, %v1793_v58  ;;  %v1966_v53 = vadd.f32 %v1938_v15, %v1794_v25  ;;  %v699_v4 = vpop.permute.xlu1 %698 }
 0x270   : > { %v735_v50 = vmul.f32 %v12357_v31, %v699_v4  ;;  %v2544_v58 = vpack.c.bf16 %v2517_v14, %v2516_v19  ;;  %v1595_v45 = vmul.f32 %v10279_v39, %v1559_v2  ;;  %v2521_v4 = vld [vmem:[#allocation2 + $0x28] sm:$0xff] }
 0x271   : > { %v2448_v28 = vsel %vm11101_vm13, %v2027_v30, 0.0  ;;  %2510 = vst.msk [vmem:[#allocation2 + $0xc1] sm:$0xff] %vm2453_vm0, %v2026_v44  ;;  %v2000_v35 = vadd.f32 %v10797_v24, %v1965_v56  ;;  %v2001_v27 = vadd.f32 %v10797_v24, %v1966_v53  ;;  %v2518_v44 = vld [vmem:[#allocation2 + $0x10] sm:$0xff]  ;;  %v2519_v30 = vld [vmem:[#allocation2 + $0x18] sm:$0xff]  ;;  %v2520_v53 = vld [vmem:[#allocation2 + $0x20] sm:$0xff] }
 0x272   : > { %2511 = vst.msk [vmem:[#allocation2 + $0xc9] sm:$0xff] %vm2453_vm0, %v2448_v28  ;;  %v763_v46 = vadd.f32 %v735_v50, %v563_v40  ;;  %v11136_v50 = vpack.c.bf16 %v2519_v30, %v2518_v44  ;;  %v11141_v28 = vld [vmem:[%s12226_s3 + $0x18] sm:$0xff]  }
 0x273   : > { %v2028_v18 = vmax.f32 %v2000_v35, 0.0  ;;  %v2029_v6 = vmax.f32 %v2001_v27, 0.0  ;;  %v11143_v27 = vpack.c.bf16 %v2521_v4, %v2520_v53  ;;  %v2531_v44 = vld [vmem:[#allocation2 + $0x78] sm:$0xff]  ;;  %v2533_v53 = vld [vmem:[#allocation2 + $0x88] sm:$0xff] }
 0x274   : > { %v871_v7 = vpop.permute.xlu1 %870 }
 0x275   : > { %v2450_v23 = vsel %vm11113_vm14, %v2029_v6, 0.0  ;;  %2512 = vst.msk [vmem:[#allocation2 + $0xd1] sm:$0xff] %vm2453_vm0, %v2028_v18  ;;  %v907_v55 = vmul.f32 %v12361_v47, %v871_v7  ;;  %v531_v6 = vpop.permute.xlu0 %530  ;;  %v2522_v7 = vld [vmem:[#allocation2 + $0x30] sm:$0xff] }
 0x276   : > { %2513 = vst.msk [vmem:[#allocation2 + $0xd9] sm:$0xff] %vm2453_vm0, %v2450_v23  ;;  %v2523_v23 = vld [vmem:[#allocation2 + $0x38] sm:$0xff] }
 0x277   : > { %v935_v5 = vadd.f32 %v907_v55, %v763_v46  ;;  %v2524_v55 = vld [vmem:[#allocation2 + $0x40] sm:$0xff] }
 0x278   : > { %v2584_v60 = vld [vmem:[#allocation2 + $0xc1] sm:$0xff] }
 0x279   : > { %v1215_v41 = vpop.permute.xlu1 %1214  ;;  %v2585_v29 = vld [vmem:[#allocation2 + $0xc9] sm:$0xff]  ;;  %v1107_v51 = vadd.f32 %v1079_v26, %v935_v5  ;;  %v1047_v19 = vpop.permute.xlu0 %1046 }
 0x27a   : > { %v1251_v32 = vmul.f32 %v10267_v62, %v1215_v41  ;;  %v11124_v59 = vpack.c.bf16 %v2585_v29, %v2584_v60  ;;  %v2525_v26 = vld [vmem:[#allocation2 + $0x48] sm:$0xff]  ;;  %v564_v41 = vmul.f32 %v12364_v17, %v531_v6  ;;  %v11154_v29 = vpack.c.bf16 %v2523_v23, %v2522_v7  ;;  %v2534_v23 = vld [vmem:[#allocation2 + $0x90] sm:$0xff] }
 0x27b   : > { %v1080_v2 = vmul.f32 %v10269_v63, %v1047_v19 }
 0x27c   : > { %8033 = vmatprep.mubr.msk.bf16.mxu0 %vm2453_vm0, %v11124_v59  ;;  %v2586_v61 = vld [vmem:[#allocation2 + $0xd1] sm:$0xff]  ;;  %v1279_v57 = vadd.f32 %v1251_v32, %v1107_v51  ;;  %v11157_v32 = vpack.c.bf16 %v2525_v26, %v2524_v55  ;;  %v2537_v26 = vld [vmem:[#allocation2 + $0xa8] sm:$0xff] }
 0x27d   : > { %v2587_v1 = vld [vmem:[#allocation2 + $0xd9] sm:$0xff] }
 0x27e   : > { %v1387_v25 = vpop.permute.xlu1 %1386  ;;  %v11128_v49 = vpack.c.bf16 %v2587_v1, %v2586_v61  ;;  %v2526_v61 = vld [vmem:[#allocation2 + $0x50] sm:$0xff]  ;;  %v2527_v1 = vld [vmem:[#allocation2 + $0x58] sm:$0xff] }
 0x27f   : > { %v1423_v42 = vmul.f32 %v10277_v38, %v1387_v25  ;;  %v11166_v25 = vpack.c.bf16 %v2527_v1, %v2526_v61  ;;  %v2535_v55 = vld [vmem:[#allocation2 + $0x98] sm:$0xff]  ;;  %v2540_v61 = vld [vmem:[#allocation2 + $0xc0] sm:$0xff] }
 0x280   : > { %8034 = vmatmul.mubr.msk.bf16.gmra.mrb[24].mxu0 %vm2453_vm0, %v11128_v49 }
 0x281   : > { %v1451_v15 = vadd.f32 %v1423_v42, %v1279_v57  ;;  %8039 = vmatprep.mubr.msk.bf16.mxu0 %vm2453_vm0, %v2544_v58  ;;  %v2529_v57 = vld [vmem:[#allocation2 + $0x68] sm:$0xff] }
 0x283   : > { %v1623_v3 = vadd.f32 %v1595_v45, %v1451_v15  ;;  %v1731_v40 = vpop.permute.xlu1 %1730 }
 0x284   : > { %v1767_v56 = vmul.f32 %v10281_v43, %v1731_v40  ;;  %v2530_v40 = vld [vmem:[#allocation2 + $0x70] sm:$0xff] }
 0x286   : > { %v1795_v35 = vadd.f32 %v1767_v56, %v1623_v3  ;;  %v2532_v56 = vld [vmem:[#allocation2 + $0x80] sm:$0xff] }
 0x287   : > { %v11179_v6 = vpack.c.bf16 %v2533_v53, %v2532_v56  ;;  %v2992_v56 = vld [vmem:[#allocation2 + $0x12] sm:$0xff] }
 0x288   : > { %v1903_v54 = vpop.permute.xlu1 %1902  ;;  %8040 = vmatmul.mubr.msk.bf16.vlgmr.msra.gmra.mrb[0].mxu0 %vm2453_vm0, %v11136_v50 }
 0x289   : > { %v1939_v18 = vmul.f32 %v10271_v0, %v1903_v54  ;;  %8068 = vmatpush3.bf16.msra.mxu0 %v10906_v22  ;;  %8043 = vmatprep.mubr.msk.bf16.mxu0 %vm2453_vm0, %v11143_v27  ;;  %v11177_v54 = vpack.c.bf16 %v2531_v44, %v2530_v40  ;;  %v2993_v44 = vld [vmem:[#allocation2 + $0x1a] sm:$0xff] }
 0x28a   : > { %8097 = vmatprep.subr.bf16.mxu0 %v11141_v28  ;;  %v11216_v53 = vpack.c.bf16 %v2993_v44, %v2992_v56 }
 0x28b   : > { %v1967_v46 = vadd.f32 %v1939_v18, %v1795_v35 }
 0x28d   : > { %v2002_v5 = vadd.f32 %v10797_v24, %v1967_v46  ;;  %v703_v60 = vpop.permute.xlu1 %702 }
 0x28e   : > { %v736_v22 = vmul.f32 %v12357_v31, %v703_v60  ;;  %v2528_v31 = vld [vmem:[#allocation2 + $0x60] sm:$0xff] }
 0x28f   : > { %v2030_v51 = vmax.f32 %v2002_v5, 0.0  ;;  %v11168_v42 = vpack.c.bf16 %v2529_v57, %v2528_v31  ;;  %v2539_v31 = vld [vmem:[#allocation2 + $0xb8] sm:$0xff] }
 0x290   : > { %8044 = vmatmul.mubr.msk.bf16.gmra.mrb[4].mxu0 %vm2453_vm0, %v11154_v29  ;;  %v764_v24 = vadd.f32 %v736_v22, %v564_v41  ;;  %v11187_v41 = vpack.c.bf16 %v2535_v55, %v2534_v23  ;;  %v2996_v23 = vld [vmem:[#allocation2 + $0x32] sm:$0xff] }
 0x291   : > { %2514 = vst.msk [vmem:[#allocation2 + $0xe1] sm:$0xff] %vm2453_vm0, %v2030_v51  ;;  %8047 = vmatprep.mubr.msk.bf16.mxu0 %vm2453_vm0, %v11157_v32 }
 0x292   : > { %v875_v14 = vpop.permute.xlu1 %874 }
 0x293   : > { %v908_v17 = vmul.f32 %v12361_v47, %v875_v14  ;;  %v1563_v47 = vpop.permute.xlu0 %1562  ;;  %v2538_v14 = vld [vmem:[#allocation2 + $0xb0] sm:$0xff] }
 0x294   : > { %v1596_v35 = vmul.f32 %v10279_v39, %v1563_v47  ;;  %v2536_v39 = vld [vmem:[#allocation2 + $0xa0] sm:$0xff]  ;;  %v11200_v57 = vpack.c.bf16 %v2539_v31, %v2538_v14  ;;  %v2991_v47 = vld [vmem:[#allocation2 + $0xa] sm:$0xff] }
 0x295   : > { %v936_v58 = vadd.f32 %v908_v17, %v764_v24  ;;  %v11190_v51 = vpack.c.bf16 %v2537_v26, %v2536_v39  ;;  %v3001_v39 = vld [vmem:[#allocation2 + $0x5a] sm:$0xff]  ;;  %v3000_v26 = vld [vmem:[#allocation2 + $0x52] sm:$0xff]  ;;  %v3006_v14 = vld [vmem:[#allocation2 + $0x82] sm:$0xff] }
 0x296   : > { %v3011_v31 = vld [vmem:[#allocation2 + $0xaa] sm:$0xff] }
 0x297   : > { %v1219_v45 = vpop.permute.xlu1 %1218  ;;  %v1108_v15 = vadd.f32 %v1080_v2, %v936_v58  ;;  %v2541_v2 = vld [vmem:[#allocation2 + $0xc8] sm:$0xff]  ;;  %v4999_v17 = vld [vmem:[#allocation3] sm:$0xff] }
 0x298   : > { %8048 = vmatmul.mubr.msk.bf16.gmra.mrb[8].mxu0 %vm2453_vm0, %v11166_v25  ;;  %v1252_v3 = vmul.f32 %v10267_v62, %v1219_v45  ;;  %v11204_v58 = vpack.c.bf16 %v2541_v2, %v2540_v61  ;;  %v2542_v45 = vld [vmem:[#allocation2 + $0xd0] sm:$0xff]  ;;  %v3009_v2 = vld [vmem:[#allocation2 + $0x9a] sm:$0xff] }
 0x299   : > { %8051 = vmatprep.mubr.msk.bf16.mxu0 %vm2453_vm0, %v11168_v42 }
 0x29a   : > { %v1280_v63 = vadd.f32 %v1252_v3, %v1108_v15  ;;  %v2543_v15 = vld [vmem:[#allocation2 + $0xd8] sm:$0xff]  ;;  %v2990_v3 = vld [vmem:[#allocation2 + $0x2] sm:$0xff] }
 0x29b   : > { %v3018_v40 = vpack.c.bf16 %v2991_v47, %v2990_v3  ;;  %v3013_v3 = vld [vmem:[#allocation2 + $0xba] sm:$0xff]  ;;  %v3015_v47 = vld [vmem:[#allocation2 + $0xca] sm:$0xff] }
 0x29c   : > { %v1391_v30 = vpop.permute.xlu1 %1390 }
 0x29d   : > { %v1424_v4 = vmul.f32 %v10277_v38, %v1391_v30  ;;  %v2060_v38 = vadd.s32 216, %v10241_v34  ;;  %v2995_v30 = vld [vmem:[#allocation2 + $0x2a] sm:$0xff] }
 0x29f   : > { %v1452_v18 = vadd.f32 %v1424_v4, %v1280_v63  ;;  %v2254_v19 = vand.u32 15, %v2060_v38  ;;  %v11211_v63 = vpack.c.bf16 %v2543_v15, %v2542_v45  ;;  %v2994_v4 = vld [vmem:[#allocation2 + $0x22] sm:$0xff] }
 0x2a0   : > { %8052 = vmatmul.mubr.msk.bf16.gmra.mrb[12].mxu0 %vm2453_vm0, %v11177_v54 }
 0x2a1   : > { %8055 = vmatprep.mubr.msk.bf16.mxu0 %vm2453_vm0, %v11179_v6  ;;  %v1624_v62 = vadd.f32 %v1596_v35, %v1452_v18  ;;  %v1735_v46 = vpop.permute.xlu1 %1734  ;;  %vm11196_vm15 = vcmp.lt.s32.totalorder %v2254_v19, 14  ;;  %v9537_v35 = vld [vmem:[%s12226_s3 + $0x20] sm:$0xff]   ;;  %v11221_v18 = vpack.c.bf16 %v2995_v30, %v2994_v4 }
 0x2a2   : > { %v1768_v7 = vmul.f32 %v10281_v43, %v1735_v46  ;;  %v9561_v43 = vld [vmem:[#allocation6] ss:$0 sm:$0xff]  ;;  %v3005_v19 = vld [vmem:[#allocation2 + $0x7a] sm:$0xff] }
 0x2a3   : > { %v2998_v46 = vld [vmem:[#allocation2 + $0x42] sm:$0xff]  ;;  %v3017_v4 = vld [vmem:[#allocation2 + $0xda] sm:$0xff] }
 0x2a4   : > { %v1796_v5 = vadd.f32 %v1768_v7, %v1624_v62  ;;  %v2997_v62 = vld [vmem:[#allocation2 + $0x3a] sm:$0xff]  ;;  %v2999_v7 = vld [vmem:[#allocation2 + $0x4a] sm:$0xff]  ;;  %v3014_v30 = vld [vmem:[#allocation2 + $0xc2] sm:$0xff] }
 0x2a5   : > { %v11228_v55 = vpack.c.bf16 %v2997_v62, %v2996_v23  ;;  %v11230_v38 = vpack.c.bf16 %v2999_v7, %v2998_v46  ;;  %v11262_v56 = vpack.c.bf16 %v3015_v47, %v3014_v30  ;;  %v3016_v62 = vld [vmem:[#allocation2 + $0xd2] sm:$0xff]  ;;  %v9538_v7 = vld [vmem:[%s12226_s3 + $0x28] sm:$0xff]  }
 0x2a6   : > { %v1907_v60 = vpop.permute.xlu1 %1906  ;;  %v11268_v46 = vpack.c.bf16 %v3017_v4, %v3016_v62  ;;  %v3521_v23 = vld [vmem:[#allocation2 + $0x19] sm:$0xff]  ;;  %v3530_v4 = vld [vmem:[#allocation2 + $0x61] sm:$0xff]  ;;  %v3531_v62 = vld [vmem:[#allocation2 + $0x69] sm:$0xff] }
 0x2a7   : > { %v1940_v22 = vmul.f32 %v10271_v0, %v1907_v60  ;;  %v3002_v60 = vld [vmem:[#allocation2 + $0x62] sm:$0xff]  ;;  %v3529_v47 = vld [vmem:[#allocation2 + $0x59] sm:$0xff] }
 0x2a8   : > { %8056 = vmatmul.mubr.msk.bf16.gmra.mrb[16].mxu0 %vm2453_vm0, %v11187_v41 }
 0x2a9   : > { %v1968_v24 = vadd.f32 %v1940_v22, %v1796_v5  ;;  %8059 = vmatprep.mubr.msk.bf16.mxu0 %vm2453_vm0, %v11190_v51  ;;  %v11236_v5 = vpack.c.bf16 %v3001_v39, %v3000_v26  ;;  %v3281_v39 = vld [vmem:[#allocation2 + $0xe0] sm:$0xff] }
 0x2ab   : > { %v2003_v34 = vadd.f32 %v9561_v43, %v1968_v24  ;;  %v3007_v24 = vld [vmem:[#allocation2 + $0x8a] sm:$0xff]  ;;  %v3004_v43 = vld [vmem:[#allocation2 + $0x72] sm:$0xff] }
 0x2ac   : > { %v11246_v61 = vpack.c.bf16 %v3007_v24, %v3006_v14  ;;  %v3524_v24 = vld [vmem:[#allocation2 + $0x31] sm:$0xff] }
 0x2ad   : > { %v2031_v0 = vmax.f32 %v2003_v34, 0.0  ;;  %v11244_v34 = vpack.c.bf16 %v3005_v19, %v3004_v43  ;;  %v3523_v19 = vld [vmem:[#allocation2 + $0x29] sm:$0xff]  ;;  %v3525_v43 = vld [vmem:[#allocation2 + $0x39] sm:$0xff] }
 0x2af   : > { %v2452_v1 = vsel %vm11196_vm15, %v2031_v0, 0.0  ;;  %v3010_v0 = vld [vmem:[#allocation2 + $0xa2] sm:$0xff] }
 0x2b0   : > { %2515 = vst.msk [vmem:[#allocation2 + $0xe9] sm:$0xff] %vm2453_vm0, %v2452_v1  ;;  %8060 = vmatmul.mubr.msk.bf16.gmra.mrb[20].mxu0 %vm2453_vm0, %v11200_v57  ;;  %v3008_v1 = vld [vmem:[#allocation2 + $0x92] sm:$0xff]  ;;  %v11254_v15 = vpack.c.bf16 %v3011_v31, %v3010_v0  ;;  %v11311_v0 = vpack.c.bf16 %v3525_v43, %v3524_v24  ;;  %v3526_v31 = vld [vmem:[#allocation2 + $0x41] sm:$0xff] }
 0x2b1   : > { %8063 = vmatprep.mubr.msk.bf16.mxu0 %vm2453_vm0, %v11204_v58  ;;  %v11252_v45 = vpack.c.bf16 %v3009_v2, %v3008_v1  ;;  %v9539_v2 = vld [vmem:[%s12226_s3 + $0x30] sm:$0xff]  }
 0x2b2   : > { %v3527_v1 = vld [vmem:[#allocation2 + $0x49] sm:$0xff]  ;;  %v4341_v43 = vld [vmem:[#allocation2 + $0xf1] sm:$0xff] }
 0x2b8   : > { %8064 = vmatmul.mubr.msk.bf16.gmra.mrb[24].mxu0 %vm2453_vm0, %v11211_v63 }
 0x2b9   : > { %8069 = vmatprep.mubr.msk.bf16.mxu0 %vm2453_vm0, %v3018_v40  ;;  %v3012_v40 = vld [vmem:[#allocation2 + $0xb2] sm:$0xff] }
 0x2ba   : > { %v11260_v44 = vpack.c.bf16 %v3013_v3, %v3012_v40  ;;  %v3528_v3 = vld [vmem:[#allocation2 + $0x51] sm:$0xff]  ;;  %v11317_v40 = vpack.c.bf16 %v3527_v1, %v3526_v31 }
 0x2bb   : > { %v11319_v30 = vpack.c.bf16 %v3529_v47, %v3528_v3 }
 0x2c0   : > { %8070 = vmatmul.mubr.msk.bf16.vlgmr.msra.gmra.mrb[0].mxu0 %vm2453_vm0, %v11216_v53 }
 0x2c1   : > { %8098 = vmatpush3.bf16.msra.mxu0 %v11141_v28  ;;  %8073 = vmatprep.mubr.msk.bf16.mxu0 %vm2453_vm0, %v11221_v18  ;;  %v3003_v28 = vld [vmem:[#allocation2 + $0x6a] sm:$0xff] }
 0x2c2   : > { %8127 = vmatprep.subr.bf16.mxu0 %v9537_v35  ;;  %v11238_v22 = vpack.c.bf16 %v3003_v28, %v3002_v60  ;;  %v3522_v60 = vld [vmem:[#allocation2 + $0x21] sm:$0xff] }
 0x2c3   : > { %v11306_v14 = vpack.c.bf16 %v3523_v19, %v3522_v60  ;;  %v4334_v19 = vld [vmem:[#allocation2 + $0xb9] sm:$0xff] }
 0x2c8   : > { %8074 = vmatmul.mubr.msk.bf16.gmra.mrb[4].mxu0 %vm2453_vm0, %v11228_v55 }
 0x2c9   : > { %8077 = vmatprep.mubr.msk.bf16.mxu0 %vm2453_vm0, %v11230_v38 }
 0x2d0   : > { %8078 = vmatmul.mubr.msk.bf16.gmra.mrb[8].mxu0 %vm2453_vm0, %v11236_v5 }
 0x2d1   : > { %8081 = vmatprep.mubr.msk.bf16.mxu0 %vm2453_vm0, %v11238_v22 }
 0x2d8   : > { %8082 = vmatmul.mubr.msk.bf16.gmra.mrb[12].mxu0 %vm2453_vm0, %v11244_v34 }
 0x2d9   : > { %8085 = vmatprep.mubr.msk.bf16.mxu0 %vm2453_vm0, %v11246_v61 }
 0x2e0   : > { %8086 = vmatmul.mubr.msk.bf16.gmra.mrb[16].mxu0 %vm2453_vm0, %v11252_v45 }
 0x2e1   : > { %8089 = vmatprep.mubr.msk.bf16.mxu0 %vm2453_vm0, %v11254_v15 }
 0x2e8   : > { %8090 = vmatmul.mubr.msk.bf16.gmra.mrb[20].mxu0 %vm2453_vm0, %v11260_v44 }
 0x2e9   : > { %8093 = vmatprep.mubr.msk.bf16.mxu0 %vm2453_vm0, %v11262_v56 }
 0x2f0   : > { %8094 = vmatmul.mubr.msk.bf16.gmra.mrb[24].mxu0 %vm2453_vm0, %v11268_v46 }
 0x2f1   : > { %8099 = vmatprep.mubr.msk.bf16.mxu0 %vm2453_vm0, %v11136_v50  ;;  %v3282_v50 = vld [vmem:[#allocation2 + $0xe8] sm:$0xff] }
 0x2f2   : > { %v11301_v28 = vpack.c.bf16 %v3282_v50, %v3281_v39  ;;  %v3533_v50 = vld [vmem:[#allocation2 + $0x79] sm:$0xff]  ;;  %v3546_v39 = vld [vmem:[#allocation2 + $0xe1] sm:$0xff] }
 0x2f8   : > { %8100 = vmatmul.mubr.msk.bf16.vlgmr.msra.gmra.mrb[0].mxu0 %vm2453_vm0, %v11143_v27 }
 0x2f9   : > { %8128 = vmatpush3.bf16.msra.mxu0 %v9537_v35  ;;  %8103 = vmatprep.mubr.msk.bf16.mxu0 %vm2453_vm0, %v11154_v29  ;;  %v3520_v35 = vld [vmem:[#allocation2 + $0x11] sm:$0xff] }
 0x2fa   : > { %8157 = vmatprep.subr.bf16.mxu0 %v9538_v7  ;;  %v3548_v26 = vpack.c.bf16 %v3521_v23, %v3520_v35  ;;  %v3553_v35 = vpack.c.bf16 %v3531_v62, %v3530_v4 }
 0x300   : > { %8104 = vmatmul.mubr.msk.bf16.gmra.mrb[4].mxu0 %vm2453_vm0, %v11157_v32 }
 0x301   : > { %8107 = vmatprep.mubr.msk.bf16.mxu0 %vm2453_vm0, %v11166_v25 }
 0x308   : > { %8108 = vmatmul.mubr.msk.bf16.gmra.mrb[8].mxu0 %vm2453_vm0, %v11168_v42 }
 0x309   : > { %8111 = vmatprep.mubr.msk.bf16.mxu0 %vm2453_vm0, %v11177_v54 }
 0x310   : > { %8112 = vmatmul.mubr.msk.bf16.gmra.mrb[12].mxu0 %vm2453_vm0, %v11179_v6 }
 0x311   : > { %8115 = vmatprep.mubr.msk.bf16.mxu0 %vm2453_vm0, %v11187_v41 }
 0x318   : > { %8116 = vmatmul.mubr.msk.bf16.gmra.mrb[16].mxu0 %vm2453_vm0, %v11190_v51 }
 0x319   : > { %8119 = vmatprep.mubr.msk.bf16.mxu0 %vm2453_vm0, %v11200_v57 }
 0x320   : > { %8120 = vmatmul.mubr.msk.bf16.gmra.mrb[20].mxu0 %vm2453_vm0, %v11204_v58 }
 0x321   : > { %8123 = vmatprep.mubr.msk.bf16.mxu0 %vm2453_vm0, %v11211_v63 }
 0x328   : > { %8124 = vmatmul.mubr.msk.bf16.gmra.mrb[24].mxu0 %vm2453_vm0, %v11301_v28 }
 0x329   : > { %8129 = vmatprep.mubr.msk.bf16.mxu0 %vm2453_vm0, %v3548_v26  ;;  %v3547_v26 = vld [vmem:[#allocation2 + $0xe9] sm:$0xff] }
 0x32a   : > { %v11339_v60 = vpack.c.bf16 %v3547_v26, %v3546_v39 }
 0x330   : > { %8130 = vmatmul.mubr.msk.bf16.vlgmr.msra.gmra.mrb[0].mxu0 %vm2453_vm0, %v11306_v14 }
 0x331   : > { %8158 = vmatpush3.bf16.msra.mxu0 %v9538_v7  ;;  %8133 = vmatprep.mubr.msk.bf16.mxu0 %vm2453_vm0, %v11311_v0  ;;  %v3532_v7 = vld [vmem:[#allocation2 + $0x71] sm:$0xff] }
 0x332   : > { %8187 = vmatprep.subr.bf16.mxu0 %v9539_v2  ;;  %v3554_v23 = vpack.c.bf16 %v3533_v50, %v3532_v7 }
 0x338   : > { %8134 = vmatmul.mubr.msk.bf16.gmra.mrb[4].mxu0 %vm2453_vm0, %v11317_v40 }
 0x339   : > { %8137 = vmatprep.mubr.msk.bf16.mxu0 %vm2453_vm0, %v11319_v30 }
 0x340   : > { %8138 = vmatmul.mubr.msk.bf16.gmra.mrb[8].mxu0 %vm2453_vm0, %v3553_v35 }
 0x341   : > { %8141 = vmatprep.mubr.msk.bf16.mxu0 %vm2453_vm0, %v3554_v23 }
 0x348   : > { %8142 = vmatmul.mubr.msk.bf16.gmra.mrb[12].mxu0 %vm2453_vm0, %v10953_v36  ;;  %v9540_v36 = vld [vmem:[%s12226_s3 + $0x38] sm:$0xff]  }
 0x349   : > { %8145 = vmatprep.mubr.msk.bf16.mxu0 %vm2453_vm0, %v10989_v16  ;;  %v3811_v16 = vld [vmem:[#allocation2 + $0xe2] sm:$0xff] }
 0x350   : > { %8146 = vmatmul.mubr.msk.bf16.gmra.mrb[16].mxu0 %vm2453_vm0, %v11067_v52  ;;  %v3812_v52 = vld [vmem:[#allocation2 + $0xea] sm:$0xff] }
 0x351   : > { %8149 = vmatprep.mubr.msk.bf16.mxu0 %vm2453_vm0, %v11069_v21  ;;  %v11372_v21 = vpack.c.bf16 %v3812_v52, %v3811_v16 }
 0x358   : > { %8150 = vmatmul.mubr.msk.bf16.gmra.mrb[20].mxu0 %vm2453_vm0, %v11124_v59 }
 0x359   : > { %8153 = vmatprep.mubr.msk.bf16.mxu0 %vm2453_vm0, %v11128_v49 }
 0x360   : > { %8154 = vmatmul.mubr.msk.bf16.gmra.mrb[24].mxu0 %vm2453_vm0, %v11339_v60 }
 0x361   : > { %8159 = vmatprep.mubr.msk.bf16.mxu0 %vm2453_vm0, %v11216_v53  ;;  %v9541_v53 = vld [vmem:[%s12226_s3 + $0x40] sm:$0xff]  }
 0x368   : > { %8160 = vmatmul.mubr.msk.bf16.vlgmr.msra.gmra.mrb[0].mxu0 %vm2453_vm0, %v11221_v18 }
 0x369   : > { %8188 = vmatpush3.bf16.msra.mxu0 %v9539_v2  ;;  %8163 = vmatprep.mubr.msk.bf16.mxu0 %vm2453_vm0, %v11228_v55 }
 0x36a   : > { %8217 = vmatprep.subr.bf16.mxu0 %v9540_v36 }
 0x370   : > { %8164 = vmatmul.mubr.msk.bf16.gmra.mrb[4].mxu0 %vm2453_vm0, %v11230_v38 }
 0x371   : > { %8167 = vmatprep.mubr.msk.bf16.mxu0 %vm2453_vm0, %v11236_v5 }
 0x378   : > { %8168 = vmatmul.mubr.msk.bf16.gmra.mrb[8].mxu0 %vm2453_vm0, %v11238_v22 }
 0x379   : > { %8171 = vmatprep.mubr.msk.bf16.mxu0 %vm2453_vm0, %v11244_v34 }
 0x380   : > { %8172 = vmatmul.mubr.msk.bf16.gmra.mrb[12].mxu0 %vm2453_vm0, %v11246_v61 }
 0x381   : > { %8175 = vmatprep.mubr.msk.bf16.mxu0 %vm2453_vm0, %v11252_v45 }
 0x388   : > { %8176 = vmatmul.mubr.msk.bf16.gmra.mrb[16].mxu0 %vm2453_vm0, %v11254_v15 }
 0x389   : > { %8179 = vmatprep.mubr.msk.bf16.mxu0 %vm2453_vm0, %v11260_v44 }
 0x390   : > { %8180 = vmatmul.mubr.msk.bf16.gmra.mrb[20].mxu0 %vm2453_vm0, %v11262_v56 }
 0x391   : > { %8183 = vmatprep.mubr.msk.bf16.mxu0 %vm2453_vm0, %v11268_v46 }
 0x398   : > { %8184 = vmatmul.mubr.msk.bf16.gmra.mrb[24].mxu0 %vm2453_vm0, %v11372_v21 }
 0x399   : > { %8189 = vmatprep.mubr.msk.bf16.mxu0 %vm2453_vm0, %v11143_v27  ;;  %v4076_v27 = vld [vmem:[#allocation2 + $0xf0] sm:$0xff] }
 0x3a0   : > { %8190 = vmatmul.mubr.msk.bf16.vlgmr.msra.gmra.mrb[0].mxu0 %vm2453_vm0, %v11154_v29  ;;  %v4077_v29 = vld [vmem:[#allocation2 + $0xf8] sm:$0xff] }
 0x3a1   : > { %8218 = vmatpush3.bf16.msra.mxu0 %v9540_v36  ;;  %8193 = vmatprep.mubr.msk.bf16.mxu0 %vm2453_vm0, %v11157_v32  ;;  %v4091_v32 = vpack.c.bf16 %v4077_v29, %v4076_v27 }
 0x3a2   : > { %8247 = vmatprep.subr.bf16.mxu0 %v9541_v53 }
 0x3a8   : > { %8194 = vmatmul.mubr.msk.bf16.gmra.mrb[4].mxu0 %vm2453_vm0, %v11166_v25  ;;  %v4327_v25 = vld [vmem:[#allocation2 + $0x81] sm:$0xff] }
 0x3a9   : > { %8197 = vmatprep.mubr.msk.bf16.mxu0 %vm2453_vm0, %v11168_v42  ;;  %v4328_v42 = vld [vmem:[#allocation2 + $0x89] sm:$0xff] }
 0x3b0   : > { %8198 = vmatmul.mubr.msk.bf16.gmra.mrb[8].mxu0 %vm2453_vm0, %v11177_v54  ;;  %v4349_v54 = vpack.c.bf16 %v4328_v42, %v4327_v25 }
 0x3b1   : > { %8201 = vmatprep.mubr.msk.bf16.mxu0 %vm2453_vm0, %v11179_v6  ;;  %v4329_v6 = vld [vmem:[#allocation2 + $0x91] sm:$0xff] }
 0x3b8   : > { %8202 = vmatmul.mubr.msk.bf16.gmra.mrb[12].mxu0 %vm2453_vm0, %v11187_v41  ;;  %v4330_v41 = vld [vmem:[#allocation2 + $0x99] sm:$0xff] }
 0x3b9   : > { %8205 = vmatprep.mubr.msk.bf16.mxu0 %vm2453_vm0, %v11190_v51  ;;  %v4331_v51 = vld [vmem:[#allocation2 + $0xa1] sm:$0xff] }
 0x3c0   : > { %8206 = vmatmul.mubr.msk.bf16.gmra.mrb[16].mxu0 %vm2453_vm0, %v11200_v57  ;;  %v4332_v57 = vld [vmem:[#allocation2 + $0xa9] sm:$0xff] }
 0x3c1   : > { %8209 = vmatprep.mubr.msk.bf16.mxu0 %vm2453_vm0, %v11204_v58  ;;  %v4350_v58 = vpack.c.bf16 %v4330_v41, %v4329_v6 }
 0x3c8   : > { %8210 = vmatmul.mubr.msk.bf16.gmra.mrb[20].mxu0 %vm2453_vm0, %v11211_v63  ;;  %v4351_v63 = vpack.c.bf16 %v4332_v57, %v4331_v51 }
 0x3c9   : > { %8213 = vmatprep.mubr.msk.bf16.mxu0 %vm2453_vm0, %v11301_v28  ;;  %v4333_v28 = vld [vmem:[#allocation2 + $0xb1] sm:$0xff] }
 0x3ca   : > { %v4352_v24 = vpack.c.bf16 %v4334_v19, %v4333_v28 }
 0x3d0   : > { %8214 = vmatmul.mubr.msk.bf16.gmra.mrb[24].mxu0 %vm2453_vm0, %v4091_v32 }
 0x3d1   : > { %8219 = vmatprep.mubr.msk.bf16.mxu0 %vm2453_vm0, %v11306_v14  ;;  %v4342_v14 = vld [vmem:[#allocation2 + $0xf9] sm:$0xff] }
 0x3d2   : > { %v4356_v2 = vpack.c.bf16 %v4342_v14, %v4341_v43 }
 0x3d8   : > { %8220 = vmatmul.mubr.msk.bf16.vlgmr.msra.gmra.mrb[0].mxu0 %vm2453_vm0, %v11311_v0 }
 0x3d9   : > { %8248 = vmatpush3.bf16.msra.mxu0 %v9541_v53  ;;  %8223 = vmatprep.mubr.msk.bf16.mxu0 %vm2453_vm0, %v11317_v40 }
 0x3e0   : > { %8224 = vmatmul.mubr.msk.bf16.gmra.mrb[4].mxu0 %vm2453_vm0, %v11319_v30 }
 0x3e1   : > { %8227 = vmatprep.mubr.msk.bf16.mxu0 %vm2453_vm0, %v3553_v35 }
 0x3e8   : > { %8228 = vmatmul.mubr.msk.bf16.gmra.mrb[8].mxu0 %vm2453_vm0, %v3554_v23 }
 0x3e9   : > { %8231 = vmatprep.mubr.msk.bf16.mxu0 %vm2453_vm0, %v4349_v54 }
 0x3f0   : > { %8232 = vmatmul.mubr.msk.bf16.gmra.mrb[12].mxu0 %vm2453_vm0, %v4350_v58 }
 0x3f1   : > { %8235 = vmatprep.mubr.msk.bf16.mxu0 %vm2453_vm0, %v4351_v63 }
 0x3f8   : > { %8236 = vmatmul.mubr.msk.bf16.gmra.mrb[16].mxu0 %vm2453_vm0, %v4352_v24 }
 0x3f9   : > { %8239 = vmatprep.mubr.msk.bf16.mxu0 %vm2453_vm0, %v11124_v59  ;;  %v4606_v59 = vld [vmem:[#allocation2 + $0xf2] sm:$0xff] }
 0x400   : > { %8240 = vmatmul.mubr.msk.bf16.gmra.mrb[20].mxu0 %vm2453_vm0, %v11128_v49  ;;  %v4607_v49 = vld [vmem:[#allocation2 + $0xfa] sm:$0xff] }
 0x401   : > { %8243 = vmatprep.mubr.msk.bf16.mxu0 %vm2453_vm0, %v11339_v60 }
 0x408   : > { %8244 = vmatmul.mubr.msk.bf16.gmra.mrb[24].mxu0 %vm2453_vm0, %v4356_v2 }
 0x409   : > { %8249 = vmatprep.mubr.msk.bf16.mxu0 %vm2453_vm0, %v11221_v18  ;;  %v4621_v18 = vpack.c.bf16 %v4607_v49, %v4606_v59 }
 0x410   : > { %8250 = vmatmul.mubr.msk.bf16.vlgmr.msra.gmra.mrb[0].mxu0 %vm2453_vm0, %v11228_v55  ;;  %v9542_v55 = vld [vmem:[%s12228_s5 + $0x10] sm:$0xff]  }
 0x411   : > { %8253 = vmatprep.mubr.msk.bf16.mxu0 %vm2453_vm0, %v11230_v38  ;;  %8277 = vmatprep.subr.bf16.mxu1 %v9542_v55  ;;  %v9543_v38 = vld [vmem:[%s12228_s5 + $0x18] sm:$0xff]  }
 0x412   : > { %8278 = vmatpush3.bf16.msra.mxu1 %v9542_v55 }
 0x413   : > { %8279 = vmatprep.subr.bf16.mxu1 %v9543_v38 }
 0x416   : > { %8280 = vmatpush3.bf16.msra.mxu1 %v9543_v38 }
 0x418   : > { %8254 = vmatmul.mubr.msk.bf16.gmra.mrb[4].mxu0 %vm2453_vm0, %v11236_v5  ;;  %v5045_v5 = vld [vmem:[#allocation3 + $0x1] sm:$0xff] }
 0x419   : > { %8257 = vmatprep.mubr.msk.bf16.mxu0 %vm2453_vm0, %v11238_v22  ;;  %v5046_v22 = vld [vmem:[#allocation3 + $0x9] sm:$0xff] }
 0x420   : > { %8258 = vmatmul.mubr.msk.bf16.gmra.mrb[8].mxu0 %vm2453_vm0, %v11244_v34  ;;  %v5073_v34 = vpack.c.bf16 %v5046_v22, %v5045_v5  ;;  %v11509_v5 = vld [vmem:[%s12228_s5 + $0x20] sm:$0xff]  }
 0x421   : > { %8261 = vmatprep.mubr.msk.bf16.mxu0 %vm2453_vm0, %v11246_v61  ;;  %v9544_v61 = vld [vmem:[%s12228_s5] sm:$0xff]  }
 0x422   : > { %8281 = vmatprep.mubr.msk.bf16.mxu1 %vm4936_vm1, %v5073_v34  ;;  %8309 = vmatprep.subr.bf16.mxu1 %v9544_v61 }
 0x428   : > { %8262 = vmatmul.mubr.msk.bf16.gmra.mrb[12].mxu0 %vm2453_vm0, %v11252_v45  ;;  %v11464_v45 = vld [vmem:[#allocation8] ss:$0 sm:$0xff] }
 0x429   : > { %8265 = vmatprep.mubr.msk.bf16.mxu0 %vm2453_vm0, %v11254_v15 }
 0x430   : > { %8266 = vmatmul.mubr.msk.bf16.gmra.mrb[16].mxu0 %vm2453_vm0, %v11260_v44 }
 0x431   : > { %8269 = vmatprep.mubr.msk.bf16.mxu0 %vm2453_vm0, %v11262_v56 }
 0x438   : > { %8270 = vmatmul.mubr.msk.bf16.gmra.mrb[20].mxu0 %vm2453_vm0, %v11268_v46 }
 0x439   : > { %8273 = vmatprep.mubr.msk.bf16.mxu0 %vm2453_vm0, %v11372_v21 }
 0x440   : > { %8274 = vmatmul.mubr.msk.bf16.gmra.mrb[24].mxu0 %vm2453_vm0, %v4621_v18  ;;  %vm7211_vm0 = vcmask 516096  }
 0x4e3   : > { %v8251_v15 = vpop.f32.mrb[0].mxu0 }
 0x4e4   : > { %v4854_v44 = vadd.f32 %v8251_v15, %v11464_v45  ;;  %v4706_v56 = vpop.f32.mrb[1].mxu0 }
 0x4e5   : > { %v4852_v46 = vadd.f32 %v11464_v45, %v4706_v56  ;;  %v8252_v0 = vpop.f32.mrb[2].mxu0 }
 0x4e6   : > { %v4882_v31 = vmax.f32 %v4854_v44, 0.0  ;;  %v4855_v1 = vadd.f32 %v8252_v0, %v11464_v45  ;;  %v4709_v3 = vpop.f32.mrb[3].mxu0 }
 0x4e7   : > { %v4880_v47 = vmax.f32 %v4852_v46, 0.0  ;;  %v4853_v40 = vadd.f32 %v11464_v45, %v4709_v3 }
 0x4e8   : > { %4973 = vst.msk [vmem:[#allocation3 + $0x21] sm:$0xff] %vm4936_vm1, %v4882_v31  ;;  %v4883_v30 = vmax.f32 %v4855_v1, 0.0 }
 0x4e9   : > { %4971 = vst.msk [vmem:[#allocation3 + $0x11] sm:$0xff] %vm4936_vm1, %v4880_v47  ;;  %v4881_v4 = vmax.f32 %v4853_v40, 0.0 }
 0x4ea   : > { %v4911_v7 = vsel %vm10439_vm3, %v4883_v30, 0.0  ;;  %vm7217_vm3 = vcmask 522246  }
 0x4eb   : > { %4974 = vst.msk [vmem:[#allocation3 + $0x29] sm:$0xff] %vm4936_vm1, %v4911_v7  ;;  %v4909_v35 = vsel %vm10371_vm2, %v4881_v4, 0.0  ;;  %v8255_v23 = vpop.f32.mrb[4].mxu0  ;;  %vm7215_vm2 = vcmask 520196  }
 0x4ec   : > { %4972 = vst.msk [vmem:[#allocation3 + $0x19] sm:$0xff] %vm4936_vm1, %v4909_v35  ;;  %v4858_v39 = vadd.f32 %v8255_v23, %v11464_v45  ;;  %v4722_v26 = vpop.f32.mrb[5].mxu0 }
 0x4ed   : > { %v4856_v60 = vadd.f32 %v11464_v45, %v4722_v26  ;;  %v8256_v36 = vpop.f32.mrb[6].mxu0 }
 0x4ee   : > { %v4886_v16 = vmax.f32 %v4858_v39, 0.0  ;;  %v4859_v52 = vadd.f32 %v8256_v36, %v11464_v45  ;;  %v4725_v21 = vpop.f32.mrb[7].mxu0 }
 0x4ef   : > { %v4884_v53 = vmax.f32 %v4856_v60, 0.0  ;;  %v4857_v27 = vadd.f32 %v11464_v45, %v4725_v21  ;;  %v5049_v19 = vld [vmem:[#allocation3 + $0x21] sm:$0xff] }
 0x4f0   : > { %4977 = vst.msk [vmem:[#allocation3 + $0x41] sm:$0xff] %vm4936_vm1, %v4886_v16  ;;  %v4887_v29 = vmax.f32 %v4859_v52, 0.0  ;;  %v5047_v51 = vld [vmem:[#allocation3 + $0x11] sm:$0xff] }
 0x4f1   : > { %4975 = vst.msk [vmem:[#allocation3 + $0x31] sm:$0xff] %vm4936_vm1, %v4884_v53  ;;  %v4885_v32 = vmax.f32 %v4857_v27, 0.0 }
 0x4f2   : > { %v4915_v25 = vsel %vm10695_vm6, %v4887_v29, 0.0  ;;  %v5050_v42 = vld [vmem:[#allocation3 + $0x29] sm:$0xff] }
 0x4f3   : > { %4978 = vst.msk [vmem:[#allocation3 + $0x49] sm:$0xff] %vm4936_vm1, %v4915_v25  ;;  %v4913_v6 = vsel %vm10518_vm4, %v4885_v32, 0.0  ;;  %v8259_v41 = vpop.f32.mrb[8].mxu0  ;;  %v5048_v57 = vld [vmem:[#allocation3 + $0x19] sm:$0xff]  ;;  %v11497_v14 = vpack.c.bf16 %v5050_v42, %v5049_v19 }
 0x4f4   : > { %4976 = vst.msk [vmem:[#allocation3 + $0x39] sm:$0xff] %vm4936_vm1, %v4913_v6  ;;  %v4862_v58 = vadd.f32 %v8259_v41, %v11464_v45  ;;  %v4738_v63 = vpop.f32.mrb[9].mxu0  ;;  %v11491_v28 = vpack.c.bf16 %v5048_v57, %v5047_v51 }
 0x4f5   : > { %v4860_v24 = vadd.f32 %v11464_v45, %v4738_v63  ;;  %v8260_v43 = vpop.f32.mrb[10].mxu0 }
 0x4f6   : > { %v4890_v2 = vmax.f32 %v4862_v58, 0.0  ;;  %v4863_v59 = vadd.f32 %v8260_v43, %v11464_v45  ;;  %v4741_v49 = vpop.f32.mrb[11].mxu0  ;;  %8282 = vmatmul.mubr.msk.bf16.vlgmr.msra.gmra.mrb[0].mxu1 %vm4936_vm1, %v11491_v28 }
 0x4f7   : > { %v4888_v18 = vmax.f32 %v4860_v24, 0.0  ;;  %v4861_v55 = vadd.f32 %v11464_v45, %v4741_v49  ;;  %8310 = vmatpush3.bf16.msra.mxu1 %v9544_v61  ;;  %8285 = vmatprep.mubr.msk.bf16.mxu1 %vm4936_vm1, %v11497_v14  ;;  %v5053_v3 = vld [vmem:[#allocation3 + $0x41] sm:$0xff] }
 0x4f8   : > { %4981 = vst.msk [vmem:[#allocation3 + $0x61] sm:$0xff] %vm4936_vm1, %v4890_v2  ;;  %v4891_v38 = vmax.f32 %v4863_v59, 0.0  ;;  %8311 = vmatprep.subr.bf16.mxu1 %v9545_v33  ;;  %v5051_v56 = vld [vmem:[#allocation3 + $0x31] sm:$0xff] }
 0x4f9   : > { %4979 = vst.msk [vmem:[#allocation3 + $0x51] sm:$0xff] %vm4936_vm1, %v4888_v18  ;;  %v4889_v22 = vmax.f32 %v4861_v55, 0.0 }
 0x4fa   : > { %v4919_v34 = vsel %vm10776_vm7, %v4891_v38, 0.0  ;;  %v5054_v15 = vld [vmem:[#allocation3 + $0x49] sm:$0xff] }
 0x4fb   : > { %4982 = vst.msk [vmem:[#allocation3 + $0x69] sm:$0xff] %vm4936_vm1, %v4919_v34  ;;  %v4917_v61 = vsel %vm10677_vm5, %v4889_v22, 0.0  ;;  %v8263_v44 = vpop.f32.mrb[12].mxu0  ;;  %v5052_v46 = vld [vmem:[#allocation3 + $0x39] sm:$0xff]  ;;  %8312 = vmatpush3.bf16.msra.mxu1 %v9545_v33  ;;  %v11523_v40 = vpack.c.bf16 %v5054_v15, %v5053_v3 }
 0x4fc   : > { %4980 = vst.msk [vmem:[#allocation3 + $0x59] sm:$0xff] %vm4936_vm1, %v4917_v61  ;;  %v4866_v0 = vadd.f32 %v8263_v44, %v11464_v45  ;;  %v4754_v31 = vpop.f32.mrb[13].mxu0  ;;  %v11519_v1 = vpack.c.bf16 %v5052_v46, %v5051_v56  ;;  %8341 = vmatprep.subr.bf16.mxu1 %v11509_v5 }
 0x4fd   : > { %v4864_v48 = vadd.f32 %v11464_v45, %v4754_v31  ;;  %v8264_v47 = vpop.f32.mrb[14].mxu0 }
 0x4fe   : > { %v4894_v12 = vmax.f32 %v4866_v0, 0.0  ;;  %v4867_v30 = vadd.f32 %v8264_v47, %v11464_v45  ;;  %v4757_v4 = vpop.f32.mrb[15].mxu0  ;;  %8286 = vmatmul.mubr.msk.bf16.gmra.mrb[4].mxu1 %vm4936_vm1, %v11519_v1 }
 0x4ff   : > { %v4892_v62 = vmax.f32 %v4864_v48, 0.0  ;;  %v4865_v7 = vadd.f32 %v11464_v45, %v4757_v4  ;;  %8289 = vmatprep.mubr.msk.bf16.mxu1 %vm4936_vm1, %v11523_v40  ;;  %v5057_v27 = vld [vmem:[#allocation3 + $0x61] sm:$0xff] }
 0x500   : > { %4985 = vst.msk [vmem:[#allocation3 + $0x81] sm:$0xff] %vm4936_vm1, %v4894_v12  ;;  %v4895_v50 = vmax.f32 %v4867_v30, 0.0  ;;  %v5055_v36 = vld [vmem:[#allocation3 + $0x51] sm:$0xff] }
 0x501   : > { %4983 = vst.msk [vmem:[#allocation3 + $0x71] sm:$0xff] %vm4936_vm1, %v4892_v62  ;;  %v4893_v35 = vmax.f32 %v4865_v7, 0.0 }
 0x502   : > { %v4923_v23 = vsel %vm10922_vm9, %v4895_v50, 0.0  ;;  %v5058_v39 = vld [vmem:[#allocation3 + $0x69] sm:$0xff] }
 0x503   : > { %4986 = vst.msk [vmem:[#allocation3 + $0x89] sm:$0xff] %vm4936_vm1, %v4923_v23  ;;  %v4921_v26 = vsel %vm10787_vm8, %v4893_v35, 0.0  ;;  %v8267_v60 = vpop.f32.mrb[16].mxu0  ;;  %v5056_v16 = vld [vmem:[#allocation3 + $0x59] sm:$0xff]  ;;  %v11543_v32 = vpack.c.bf16 %v5058_v39, %v5057_v27 }
 0x504   : > { %4984 = vst.msk [vmem:[#allocation3 + $0x79] sm:$0xff] %vm4936_vm1, %v4921_v26  ;;  %v4870_v52 = vadd.f32 %v8267_v60, %v11464_v45  ;;  %v4770_v21 = vpop.f32.mrb[17].mxu0  ;;  %v11540_v53 = vpack.c.bf16 %v5056_v16, %v5055_v36 }
 0x505   : > { %v4868_v13 = vadd.f32 %v11464_v45, %v4770_v21  ;;  %v8268_v29 = vpop.f32.mrb[18].mxu0 }
 0x506   : > { %v4898_v25 = vmax.f32 %v4870_v52, 0.0  ;;  %v4871_v37 = vadd.f32 %v8268_v29, %v11464_v45  ;;  %v4773_v42 = vpop.f32.mrb[19].mxu0  ;;  %8290 = vmatmul.mubr.msk.bf16.gmra.mrb[8].mxu1 %vm4936_vm1, %v11540_v53 }
 0x507   : > { %v4896_v54 = vmax.f32 %v4868_v13, 0.0  ;;  %v4869_v6 = vadd.f32 %v11464_v45, %v4773_v42  ;;  %8293 = vmatprep.mubr.msk.bf16.mxu1 %vm4936_vm1, %v11543_v32  ;;  %v5061_v49 = vld [vmem:[#allocation3 + $0x81] sm:$0xff] }
 0x508   : > { %4989 = vst.msk [vmem:[#allocation3 + $0xa1] sm:$0xff] %vm4936_vm1, %v4898_v25  ;;  %v4899_v41 = vmax.f32 %v4871_v37, 0.0  ;;  %v5059_v33 = vld [vmem:[#allocation3 + $0x71] sm:$0xff]  ;;  %v5000_v25 = vld [vmem:[#allocation3 + $0x8] sm:$0xff] }
 0x509   : > { %4987 = vst.msk [vmem:[#allocation3 + $0x91] sm:$0xff] %vm4936_vm1, %v4896_v54  ;;  %v4897_v51 = vmax.f32 %v4869_v6, 0.0  ;;  %v5027_v42 = vpack.c.bf16 %v5000_v25, %v4999_v17  ;;  %v5002_v6 = vld [vmem:[#allocation3 + $0x18] sm:$0xff]  ;;  %v5466_v17 = vld [vmem:[#allocation3 + $0x2a] sm:$0xff] }
 0x50a   : > { %v4927_v57 = vsel %vm11054_vm12, %v4899_v41, 0.0  ;;  %v5062_v58 = vld [vmem:[#allocation3 + $0x89] sm:$0xff]  ;;  %v5003_v41 = vld [vmem:[#allocation3 + $0x20] sm:$0xff] }
 0x50b   : > { %4990 = vst.msk [vmem:[#allocation3 + $0xa9] sm:$0xff] %vm4936_vm1, %v4927_v57  ;;  %v4925_v63 = vsel %vm10961_vm10, %v4897_v51, 0.0  ;;  %v8271_v19 = vpop.f32.mrb[20].mxu0  ;;  %v5060_v24 = vld [vmem:[#allocation3 + $0x79] sm:$0xff]  ;;  %v11563_v55 = vpack.c.bf16 %v5062_v58, %v5061_v49  ;;  %v5004_v51 = vld [vmem:[#allocation3 + $0x28] sm:$0xff]  ;;  %v5001_v57 = vld [vmem:[#allocation3 + $0x10] sm:$0xff] }
 0x50c   : > { %4988 = vst.msk [vmem:[#allocation3 + $0x99] sm:$0xff] %vm4936_vm1, %v4925_v63  ;;  %v4874_v43 = vadd.f32 %v8271_v19, %v11464_v45  ;;  %v4786_v2 = vpop.f32.mrb[21].mxu0  ;;  %v11560_v59 = vpack.c.bf16 %v5060_v24, %v5059_v33  ;;  %v11612_v58 = vpack.c.bf16 %v5002_v6, %v5001_v57  ;;  %v9547_v63 = vld [vmem:[%s12228_s5 + $0x28] sm:$0xff]   ;;  %v11617_v19 = vpack.c.bf16 %v5004_v51, %v5003_v41  ;;  %v9548_v33 = vld [vmem:[%s12228_s5 + $0x30] sm:$0xff]   ;;  %v5005_v49 = vld [vmem:[#allocation3 + $0x30] sm:$0xff] }
 0x50d   : > { %v4872_v8 = vadd.f32 %v11464_v45, %v4786_v2  ;;  %v8272_v18 = vpop.f32.mrb[22].mxu0  ;;  %v5006_v24 = vld [vmem:[#allocation3 + $0x38] sm:$0xff]  ;;  %v5008_v2 = vld [vmem:[#allocation3 + $0x48] sm:$0xff]  ;;  %v9550_v6 = vld [vmem:[%s12228_s5 + $0x40] sm:$0xff]  }
 0x50e   : > { %v4902_v38 = vmax.f32 %v4874_v43, 0.0  ;;  %v4875_v10 = vadd.f32 %v8272_v18, %v11464_v45  ;;  %v4789_v22 = vpop.f32.mrb[23].mxu0  ;;  %8294 = vmatmul.mubr.msk.bf16.gmra.mrb[12].mxu1 %vm4936_vm1, %v11560_v59  ;;  %v5007_v43 = vld [vmem:[#allocation3 + $0x40] sm:$0xff]  ;;  %v5467_v41 = vld [vmem:[#allocation3 + $0x32] sm:$0xff]  ;;  %v5470_v57 = vld [vmem:[#allocation3 + $0x4a] sm:$0xff] }
 0x50f   : > { %v4900_v34 = vmax.f32 %v4872_v8, 0.0  ;;  %v4873_v15 = vadd.f32 %v11464_v45, %v4789_v22  ;;  %8297 = vmatprep.mubr.msk.bf16.mxu1 %vm4936_vm1, %v11563_v55  ;;  %v5065_v4 = vld [vmem:[#allocation3 + $0xa1] sm:$0xff]  ;;  %v11627_v8 = vpack.c.bf16 %v5006_v24, %v5005_v49  ;;  %v11629_v18 = vpack.c.bf16 %v5008_v2, %v5007_v43  ;;  %v5009_v22 = vld [vmem:[#allocation3 + $0x50] sm:$0xff] }
 0x510   : > { %4993 = vst.msk [vmem:[#allocation3 + $0xc1] sm:$0xff] %vm4936_vm1, %v4902_v38  ;;  %v4903_v61 = vmax.f32 %v4875_v10, 0.0  ;;  %v5063_v3 = vld [vmem:[#allocation3 + $0x91] sm:$0xff]  ;;  %v5011_v38 = vld [vmem:[#allocation3 + $0x60] sm:$0xff]  ;;  %v5012_v10 = vld [vmem:[#allocation3 + $0x68] sm:$0xff] }
 0x511   : > { %4991 = vst.msk [vmem:[#allocation3 + $0xb1] sm:$0xff] %vm4936_vm1, %v4900_v34  ;;  %v4901_v44 = vmax.f32 %v4873_v15, 0.0  ;;  %v11637_v15 = vpack.c.bf16 %v5012_v10, %v5011_v38  ;;  %v5468_v51 = vld [vmem:[#allocation3 + $0x3a] sm:$0xff]  ;;  %v5469_v24 = vld [vmem:[#allocation3 + $0x42] sm:$0xff]  ;;  %v5474_v49 = vld [vmem:[#allocation3 + $0x6a] sm:$0xff] }
 0x512   : > { %v4931_v56 = vsel %vm11101_vm13, %v4903_v61, 0.0  ;;  %v5066_v46 = vld [vmem:[#allocation3 + $0xa9] sm:$0xff]  ;;  %v5014_v61 = vld [vmem:[#allocation3 + $0x78] sm:$0xff]  ;;  %v11688_v43 = vpack.c.bf16 %v5470_v57, %v5469_v24 }
 0x513   : > { %4994 = vst.msk [vmem:[#allocation3 + $0xc9] sm:$0xff] %vm4936_vm1, %v4931_v56  ;;  %v4929_v0 = vsel %vm11045_vm11, %v4901_v44, 0.0  ;;  %v8275_v31 = vpop.f32.mrb[24].mxu0  ;;  %v5064_v48 = vld [vmem:[#allocation3 + $0x99] sm:$0xff]  ;;  %v11583_v7 = vpack.c.bf16 %v5066_v46, %v5065_v4  ;;  %v5016_v56 = vld [vmem:[#allocation3 + $0x88] sm:$0xff]  ;;  %v5013_v46 = vld [vmem:[#allocation3 + $0x70] sm:$0xff] }
 0x514   : > { %4992 = vst.msk [vmem:[#allocation3 + $0xb9] sm:$0xff] %vm4936_vm1, %v4929_v0  ;;  %v4878_v47 = vadd.f32 %v8275_v31, %v11464_v45  ;;  %v4802_v12 = vpop.f32.mrb[25].mxu0  ;;  %v11580_v30 = vpack.c.bf16 %v5064_v48, %v5063_v3  ;;  %v5015_v44 = vld [vmem:[#allocation3 + $0x80] sm:$0xff]  ;;  %v11643_v0 = vpack.c.bf16 %v5014_v61, %v5013_v46  ;;  %v5018_v3 = vld [vmem:[#allocation3 + $0x98] sm:$0xff] }
 0x515   : > { %v4876_v9 = vadd.f32 %v11464_v45, %v4802_v12  ;;  %v8276_v62 = vpop.f32.mrb[26].mxu0  ;;  %v11645_v31 = vpack.c.bf16 %v5016_v56, %v5015_v44  ;;  %v5019_v48 = vld [vmem:[#allocation3 + $0xa0] sm:$0xff]  ;;  %v5017_v12 = vld [vmem:[#allocation3 + $0x90] sm:$0xff] }
 0x516   : > { %v4906_v50 = vmax.f32 %v4878_v47, 0.0  ;;  %v4879_v20 = vadd.f32 %v8276_v62, %v11464_v45  ;;  %v4805_v35 = vpop.f32.mrb[27].mxu0  ;;  %8298 = vmatmul.mubr.msk.bf16.gmra.mrb[16].mxu1 %vm4936_vm1, %v11580_v30  ;;  %v5020_v47 = vld [vmem:[#allocation3 + $0xa8] sm:$0xff]  ;;  %v11651_v4 = vpack.c.bf16 %v5018_v3, %v5017_v12  ;;  %v5472_v2 = vld [vmem:[#allocation3 + $0x5a] sm:$0xff] }
 0x517   : > { %v4904_v23 = vmax.f32 %v4876_v9, 0.0  ;;  %v4877_v39 = vadd.f32 %v11464_v45, %v4805_v35  ;;  %8301 = vmatprep.mubr.msk.bf16.mxu1 %vm4936_vm1, %v11583_v7  ;;  %v5069_v13 = vld [vmem:[#allocation3 + $0xc1] sm:$0xff]  ;;  %v11653_v9 = vpack.c.bf16 %v5020_v47, %v5019_v48  ;;  %v5478_v44 = vld [vmem:[#allocation3 + $0x8a] sm:$0xff]  ;;  %v5479_v48 = vld [vmem:[#allocation3 + $0x92] sm:$0xff] }
 0x518   : > { %4997 = vst.msk [vmem:[#allocation3 + $0xe1] sm:$0xff] %vm4936_vm1, %v4906_v50  ;;  %v4907_v26 = vmax.f32 %v4879_v20, 0.0  ;;  %v5067_v21 = vld [vmem:[#allocation3 + $0xb1] sm:$0xff]  ;;  %v5473_v38 = vld [vmem:[#allocation3 + $0x62] sm:$0xff]  ;;  %v5476_v61 = vld [vmem:[#allocation3 + $0x7a] sm:$0xff] }
 0x519   : > { %4995 = vst.msk [vmem:[#allocation3 + $0xd1] sm:$0xff] %vm4936_vm1, %v4904_v23  ;;  %v4905_v60 = vmax.f32 %v4877_v39, 0.0  ;;  %v5021_v35 = vld [vmem:[#allocation3 + $0xb0] sm:$0xff]  ;;  %v11696_v10 = vpack.c.bf16 %v5474_v49, %v5473_v38  ;;  %v5477_v46 = vld [vmem:[#allocation3 + $0x82] sm:$0xff]  ;;  %v5480_v47 = vld [vmem:[#allocation3 + $0x9a] sm:$0xff] }
 0x51a   : > { %v4935_v36 = vsel %vm11196_vm15, %v4907_v26, 0.0  ;;  %v5070_v16 = vld [vmem:[#allocation3 + $0xc9] sm:$0xff]  ;;  %v11704_v3 = vpack.c.bf16 %v5478_v44, %v5477_v46 }
 0x51b   : > { %4998 = vst.msk [vmem:[#allocation3 + $0xe9] sm:$0xff] %vm4936_vm1, %v4935_v36  ;;  %v4933_v52 = vsel %vm11113_vm14, %v4905_v60, 0.0  ;;  %v5068_v45 = vld [vmem:[#allocation3 + $0xb9] sm:$0xff]  ;;  %v11601_v29 = vpack.c.bf16 %v5070_v16, %v5069_v13  ;;  %v5024_v20 = vld [vmem:[#allocation3 + $0xc8] sm:$0xff] }
 0x51c   : > { %4996 = vst.msk [vmem:[#allocation3 + $0xd9] sm:$0xff] %vm4936_vm1, %v4933_v52  ;;  %v11599_v27 = vpack.c.bf16 %v5068_v45, %v5067_v21  ;;  %v5022_v62 = vld [vmem:[#allocation3 + $0xb8] sm:$0xff]  ;;  %v5023_v50 = vld [vmem:[#allocation3 + $0xc0] sm:$0xff]  ;;  %v5462_v36 = vld [vmem:[#allocation3 + $0xa] sm:$0xff] }
 0x51d   : > { %v11659_v23 = vpack.c.bf16 %v5022_v62, %v5021_v35  ;;  %v11661_v39 = vpack.c.bf16 %v5024_v20, %v5023_v50  ;;  %v5461_v60 = vld [vmem:[#allocation3 + $0x2] sm:$0xff]  ;;  %v5463_v45 = vld [vmem:[#allocation3 + $0x12] sm:$0xff]  ;;  %v5464_v13 = vld [vmem:[#allocation3 + $0x1a] sm:$0xff]  ;;  %v11710_v62 = vpack.c.bf16 %v5480_v47, %v5479_v48 }
 0x51e   : > { %8302 = vmatmul.mubr.msk.bf16.gmra.mrb[20].mxu1 %vm4936_vm1, %v11599_v27  ;;  %v5489_v21 = vpack.c.bf16 %v5462_v36, %v5461_v60  ;;  %v11672_v25 = vpack.c.bf16 %v5464_v13, %v5463_v45  ;;  %v5482_v12 = vld [vmem:[#allocation3 + $0xaa] sm:$0xff]  ;;  %v5481_v50 = vld [vmem:[#allocation3 + $0xa2] sm:$0xff]  ;;  %v5483_v35 = vld [vmem:[#allocation3 + $0xb2] sm:$0xff] }
 0x51f   : > { %8305 = vmatprep.mubr.msk.bf16.mxu1 %vm4936_vm1, %v11601_v29  ;;  %v11712_v20 = vpack.c.bf16 %v5482_v12, %v5481_v50 }
 0x520   : > { %v5071_v37 = vld [vmem:[#allocation3 + $0xd1] sm:$0xff] }
 0x521   : > { %v5025_v16 = vld [vmem:[#allocation3 + $0xd0] sm:$0xff] }
 0x522   : > { %v5486_v60 = vld [vmem:[#allocation3 + $0xca] sm:$0xff] }
 0x523   : > { %v5072_v11 = vld [vmem:[#allocation3 + $0xd9] sm:$0xff] }
 0x524   : > { %v11607_v54 = vpack.c.bf16 %v5072_v11, %v5071_v37  ;;  %v5026_v26 = vld [vmem:[#allocation3 + $0xd8] sm:$0xff]  ;;  %v5465_v37 = vld [vmem:[#allocation3 + $0x22] sm:$0xff] }
 0x525   : > { %v11667_v52 = vpack.c.bf16 %v5026_v26, %v5025_v16  ;;  %v9549_v11 = vld [vmem:[%s12228_s5 + $0x38] sm:$0xff]   ;;  %v5484_v26 = vld [vmem:[#allocation3 + $0xba] sm:$0xff]  ;;  %v5487_v45 = vld [vmem:[#allocation3 + $0xd2] sm:$0xff] }
 0x526   : > { %8306 = vmatmul.mubr.msk.bf16.gmra.mrb[24].mxu1 %vm4936_vm1, %v11607_v54  ;;  %v11718_v36 = vpack.c.bf16 %v5484_v26, %v5483_v35  ;;  %v5485_v16 = vld [vmem:[#allocation3 + $0xc2] sm:$0xff]  ;;  %v5488_v13 = vld [vmem:[#allocation3 + $0xda] sm:$0xff] }
 0x527   : > { %8313 = vmatprep.mubr.msk.bf16.mxu1 %vm4936_vm1, %v5027_v42  ;;  %v11677_v42 = vpack.c.bf16 %v5466_v17, %v5465_v37  ;;  %v11726_v17 = vpack.c.bf16 %v5488_v13, %v5487_v45  ;;  %v9551_v37 = vld [vmem:[%s12228_s5 + $0x48] sm:$0xff]  }
 0x52e   : > { %8314 = vmatmul.mubr.msk.bf16.vlgmr.msra.gmra.mrb[28].mxu1 %vm4936_vm1, %v11612_v58 }
 0x52f   : > { %8342 = vmatpush3.bf16.msra.mxu1 %v11509_v5  ;;  %8317 = vmatprep.mubr.msk.bf16.mxu1 %vm4936_vm1, %v11617_v19  ;;  %v5010_v5 = vld [vmem:[#allocation3 + $0x58] sm:$0xff] }
 0x530   : > { %8343 = vmatprep.subr.bf16.mxu1 %v9547_v63  ;;  %v11635_v34 = vpack.c.bf16 %v5010_v5, %v5009_v22  ;;  %v5475_v22 = vld [vmem:[#allocation3 + $0x72] sm:$0xff] }
 0x531   : > { %v11702_v56 = vpack.c.bf16 %v5476_v61, %v5475_v22  ;;  %v9553_v61 = vld [vmem:[%s12228_s5 + $0x58] sm:$0xff]  }
 0x533   : > { %8344 = vmatpush3.bf16.msra.mxu1 %v9547_v63  ;;  %v11686_v63 = vpack.c.bf16 %v5468_v51, %v5467_v41  ;;  %v5733_v41 = vld [vmem:[#allocation3 + $0xe8] sm:$0xff] }
 0x534   : > { %8373 = vmatprep.subr.bf16.mxu1 %v9548_v33 }
 0x536   : > { %8318 = vmatmul.mubr.msk.bf16.gmra.mrb[32].mxu1 %vm4936_vm1, %v11627_v8 }
 0x537   : > { %8321 = vmatprep.mubr.msk.bf16.mxu1 %vm4936_vm1, %v11629_v18 }
 0x53e   : > { %8322 = vmatmul.mubr.msk.bf16.gmra.mrb[36].mxu1 %vm4936_vm1, %v11635_v34 }
 0x53f   : > { %8325 = vmatprep.mubr.msk.bf16.mxu1 %vm4936_vm1, %v11637_v15 }
 0x546   : > { %8326 = vmatmul.mubr.msk.bf16.gmra.mrb[40].mxu1 %vm4936_vm1, %v11643_v0 }
 0x547   : > { %8329 = vmatprep.mubr.msk.bf16.mxu1 %vm4936_vm1, %v11645_v31 }
 0x54e   : > { %8330 = vmatmul.mubr.msk.bf16.gmra.mrb[44].mxu1 %vm4936_vm1, %v11651_v4 }
 0x54f   : > { %8333 = vmatprep.mubr.msk.bf16.mxu1 %vm4936_vm1, %v11653_v9 }
 0x556   : > { %8334 = vmatmul.mubr.msk.bf16.gmra.mrb[48].mxu1 %vm4936_vm1, %v11659_v23 }
 0x557   : > { %8337 = vmatprep.mubr.msk.bf16.mxu1 %vm4936_vm1, %v11661_v39 }
 0x55e   : > { %8338 = vmatmul.mubr.msk.bf16.gmra.mrb[52].mxu1 %vm4936_vm1, %v11667_v52 }
 0x55f   : > { %8345 = vmatprep.mubr.msk.bf16.mxu1 %vm4936_vm1, %v5489_v21  ;;  %v11720_v21 = vpack.c.bf16 %v5486_v60, %v5485_v16 }
 0x566   : > { %8346 = vmatmul.mubr.msk.bf16.vlgmr.msra.gmra.mrb[56].mxu1 %vm4936_vm1, %v11672_v25 }
 0x567   : > { %8374 = vmatpush3.bf16.msra.mxu1 %v9548_v33  ;;  %8349 = vmatprep.mubr.msk.bf16.mxu1 %vm4936_vm1, %v11677_v42  ;;  %v5471_v33 = vld [vmem:[#allocation3 + $0x52] sm:$0xff] }
 0x568   : > { %8375 = vmatprep.subr.bf16.mxu1 %v9549_v11  ;;  %v11694_v5 = vpack.c.bf16 %v5472_v2, %v5471_v33 }
 0x56b   : > { %8376 = vmatpush3.bf16.msra.mxu1 %v9549_v11  ;;  %v9552_v11 = vld [vmem:[%s12228_s5 + $0x50] sm:$0xff]  }
 0x56c   : > { %8405 = vmatprep.subr.bf16.mxu1 %v9550_v6 }
 0x56e   : > { %8350 = vmatmul.mubr.msk.bf16.gmra.mrb[60].mxu1 %vm4936_vm1, %v11686_v63 }
 0x56f   : > { %8353 = vmatprep.mubr.msk.bf16.mxu1 %vm4936_vm1, %v11688_v43 }
 0x576   : > { %8354 = vmatmul.mubr.msk.bf16.gmra.mrb[64].mxu1 %vm4936_vm1, %v11694_v5 }
 0x577   : > { %8357 = vmatprep.mubr.msk.bf16.mxu1 %vm4936_vm1, %v11696_v10 }
 0x57e   : > { %8358 = vmatmul.mubr.msk.bf16.gmra.mrb[68].mxu1 %vm4936_vm1, %v11702_v56 }
 0x57f   : > { %8361 = vmatprep.mubr.msk.bf16.mxu1 %vm4936_vm1, %v11704_v3 }
 0x586   : > { %8362 = vmatmul.mubr.msk.bf16.gmra.mrb[72].mxu1 %vm4936_vm1, %v11710_v62 }
 0x587   : > { %8365 = vmatprep.mubr.msk.bf16.mxu1 %vm4936_vm1, %v11712_v20 }
 0x58e   : > { %8366 = vmatmul.mubr.msk.bf16.gmra.mrb[76].mxu1 %vm4936_vm1, %v11718_v36 }
 0x58f   : > { %8369 = vmatprep.mubr.msk.bf16.mxu1 %vm4936_vm1, %v11720_v21 }
 0x596   : > { %8370 = vmatmul.mubr.msk.bf16.gmra.mrb[80].mxu1 %vm4936_vm1, %v11726_v17 }
 0x597   : > { %8377 = vmatprep.mubr.msk.bf16.mxu1 %vm4936_vm1, %v11612_v58 }
 0x59e   : > { %8378 = vmatmul.mubr.msk.bf16.vlgmr.msra.gmra.mrb[84].mxu1 %vm4936_vm1, %v11617_v19 }
 0x59f   : > { %8406 = vmatpush3.bf16.msra.mxu1 %v9550_v6  ;;  %8381 = vmatprep.mubr.msk.bf16.mxu1 %vm4936_vm1, %v11627_v8  ;;  %v5732_v6 = vld [vmem:[#allocation3 + $0xe0] sm:$0xff] }
 0x5a0   : > { %8407 = vmatprep.subr.bf16.mxu1 %v9551_v37  ;;  %v11762_v33 = vpack.c.bf16 %v5733_v41, %v5732_v6  ;;  %v5977_v41 = vld [vmem:[#allocation3 + $0xe1] sm:$0xff] }
 0x5a3   : > { %8408 = vmatpush3.bf16.msra.mxu1 %v9551_v37 }
 0x5a4   : > { %8437 = vmatprep.subr.bf16.mxu1 %v9552_v11 }
 0x5a6   : > { %8382 = vmatmul.mubr.msk.bf16.gmra.mrb[88].mxu1 %vm4936_vm1, %v11629_v18 }
 0x5a7   : > { %8385 = vmatprep.mubr.msk.bf16.mxu1 %vm4936_vm1, %v11635_v34 }
 0x5ae   : > { %8386 = vmatmul.mubr.msk.bf16.gmra.mrb[92].mxu1 %vm4936_vm1, %v11637_v15 }
 0x5af   : > { %8389 = vmatprep.mubr.msk.bf16.mxu1 %vm4936_vm1, %v11643_v0 }
 0x5b6   : > { %8390 = vmatmul.mubr.msk.bf16.gmra.mrb[96].mxu1 %vm4936_vm1, %v11645_v31 }
 0x5b7   : > { %8393 = vmatprep.mubr.msk.bf16.mxu1 %vm4936_vm1, %v11651_v4 }
 0x5be   : > { %8394 = vmatmul.mubr.msk.bf16.gmra.mrb[100].mxu1 %vm4936_vm1, %v11653_v9 }
 0x5bf   : > { %8397 = vmatprep.mubr.msk.bf16.mxu1 %vm4936_vm1, %v11659_v23 }
 0x5c6   : > { %8398 = vmatmul.mubr.msk.bf16.gmra.mrb[104].mxu1 %vm4936_vm1, %v11661_v39 }
 0x5c7   : > { %8401 = vmatprep.mubr.msk.bf16.mxu1 %vm4936_vm1, %v11667_v52 }
 0x5c9   : > { %v8283_v58 = vpop.f32.mrb[0].mxu1 }
 0x5ca   : > { %v5179_v51 = vpop.f32.mrb[1].mxu1 }
 0x5cb   : > { %v8284_v57 = vpop.f32.mrb[2].mxu1 }
 0x5cc   : > { %v5182_v24 = vpop.f32.mrb[3].mxu1 }
 0x5ce   : > { %8402 = vmatmul.mubr.msk.bf16.gmra.mrb[108].mxu1 %vm4936_vm1, %v11762_v33 }
 0x5cf   : > { %8409 = vmatprep.mubr.msk.bf16.mxu1 %vm4936_vm1, %v11491_v28  ;;  %v9554_v28 = vld [vmem:[%s12228_s5 + $0x60] sm:$0xff]  }
 0x5d1   : > { %v8287_v2 = vpop.f32.mrb[4].mxu1 }
 0x5d2   : > { %v5193_v49 = vpop.f32.mrb[5].mxu1 }
 0x5d3   : > { %v8288_v38 = vpop.f32.mrb[6].mxu1 }
 0x5d4   : > { %v5196_v22 = vpop.f32.mrb[7].mxu1 }
 0x5d6   : > { %8410 = vmatmul.mubr.msk.bf16.vlgmr.msra.gmra.mrb[112].mxu1 %vm4936_vm1, %v11497_v14 }
 0x5d7   : > { %8438 = vmatpush3.bf16.msra.mxu1 %v9552_v11  ;;  %8413 = vmatprep.mubr.msk.bf16.mxu1 %vm4936_vm1, %v11519_v1 }
 0x5d8   : > { %8439 = vmatprep.subr.bf16.mxu1 %v9553_v61 }
 0x5d9   : > { %v8291_v44 = vpop.f32.mrb[8].mxu1 }
 0x5da   : > { %v5207_v46 = vpop.f32.mrb[9].mxu1  ;;  %v9555_v44 = vld [vmem:[%s12228_s5 + $0x68] sm:$0xff]  }
 0x5db   : > { %v8292_v48 = vpop.f32.mrb[10].mxu1  ;;  %8440 = vmatpush3.bf16.msra.mxu1 %v9553_v61 }
 0x5dc   : > { %v5210_v47 = vpop.f32.mrb[11].mxu1  ;;  %8469 = vmatprep.subr.bf16.mxu1 %v9554_v28 }
 0x5de   : > { %8414 = vmatmul.mubr.msk.bf16.gmra.mrb[116].mxu1 %vm4936_vm1, %v11523_v40 }
 0x5df   : > { %8417 = vmatprep.mubr.msk.bf16.mxu1 %vm4936_vm1, %v11540_v53 }
 0x5e1   : > { %v8295_v14 = vpop.f32.mrb[12].mxu1 }
 0x5e2   : > { %v5221_v12 = vpop.f32.mrb[13].mxu1 }
 0x5e3   : > { %v8296_v1 = vpop.f32.mrb[14].mxu1 }
 0x5e4   : > { %v5224_v50 = vpop.f32.mrb[15].mxu1 }
 0x5e6   : > { %8418 = vmatmul.mubr.msk.bf16.gmra.mrb[120].mxu1 %vm4936_vm1, %v11543_v32 }
 0x5e7   : > { %8421 = vmatprep.mubr.msk.bf16.mxu1 %vm4936_vm1, %v11560_v59 }
 0x5e9   : > { %v8299_v35 = vpop.f32.mrb[16].mxu1 }
 0x5ea   : > { %v5235_v26 = vpop.f32.mrb[17].mxu1 }
 0x5eb   : > { %v8300_v60 = vpop.f32.mrb[18].mxu1 }
 0x5ec   : > { %v5238_v16 = vpop.f32.mrb[19].mxu1 }
 0x5ee   : > { %8422 = vmatmul.mubr.msk.bf16.gmra.mrb[124].mxu1 %vm4936_vm1, %v11563_v55 }
 0x5ef   : > { %8425 = vmatprep.mubr.msk.bf16.mxu1 %vm4936_vm1, %v11580_v30  ;;  %v5978_v30 = vld [vmem:[#allocation3 + $0xe9] sm:$0xff] }
 0x5f0   : > { %v11806_v57 = vpack.c.bf16 %v5978_v30, %v5977_v41 }
 0x5f1   : > { %v8303_v40 = vpop.f32.mrb[20].mxu1 }
 0x5f2   : > { %v5249_v53 = vpop.f32.mrb[21].mxu1 }
 0x5f3   : > { %v8304_v45 = vpop.f32.mrb[22].mxu1 }
 0x5f4   : > { %v11790_v13 = vpop.f32.mrb[23].mxu1 }
 0x5f6   : > { %8426 = vmatmul.mubr.msk.bf16.gmra.mrb[128].mxu1 %vm4936_vm1, %v11583_v7 }
 0x5f7   : > { %8429 = vmatprep.mubr.msk.bf16.mxu1 %vm4936_vm1, %v11599_v27 }
 0x5f9   : > { %v8307_v32 = vpop.f32.mrb[24].mxu1 }
 0x5fa   : > { %v11796_v59 = vpop.f32.mrb[25].mxu1 }
 0x5fb   : > { %v8308_v37 = vpop.f32.mrb[26].mxu1 }
 0x5fc   : > { %v11798_v11 = vpop.f32.mrb[27].mxu1 }
 0x5fe   : > { %8430 = vmatmul.mubr.msk.bf16.gmra.mrb[132].mxu1 %vm4936_vm1, %v11601_v29 }
 0x5ff   : > { %8433 = vmatprep.mubr.msk.bf16.mxu1 %vm4936_vm1, %v11607_v54 }
 0x601   : > { %v8315_v55 = vpop.f32.mrb[28].mxu1 }
 0x602   : > { %v5364_v58 = vpop.f32.mrb[29].mxu1 }
 0x603   : > { %v11804_v6 = vadd.f32 %v5364_v58, %v5179_v51  ;;  %v8316_v7 = vpop.f32.mrb[30].mxu1 }
 0x604   : > { %v5367_v27 = vpop.f32.mrb[31].mxu1  ;;  %v6223_v7 = vld [vmem:[#allocation3 + $0xea] sm:$0xff] }
 0x605   : > { %v11808_v2 = vadd.f32 %v5367_v27, %v5182_v24 }
 0x606   : > { %8434 = vmatmul.mubr.msk.bf16.gmra.mrb[136].mxu1 %vm4936_vm1, %v11806_v57 }
 0x607   : > { %8441 = vmatprep.mubr.msk.bf16.mxu1 %vm4936_vm1, %v11672_v25  ;;  %v9556_v25 = vld [vmem:[%s12228_s5 + $0x70] sm:$0xff]  }
 0x609   : > { %v8319_v29 = vpop.f32.mrb[32].mxu1 }
 0x60a   : > { %v5378_v54 = vpop.f32.mrb[33].mxu1 }
 0x60b   : > { %v11814_v38 = vadd.f32 %v5378_v54, %v5193_v49  ;;  %v8320_v61 = vpop.f32.mrb[34].mxu1 }
 0x60c   : > { %v5381_v51 = vpop.f32.mrb[35].mxu1 }
 0x60d   : > { %v11819_v48 = vadd.f32 %v5381_v51, %v5196_v22  ;;  %v9557_v51 = vld [vmem:[%s12228_s5 + $0x78] sm:$0xff]  }
 0x60e   : > { %8442 = vmatmul.mubr.msk.bf16.vlgmr.msra.gmra.mrb[140].mxu1 %vm4936_vm1, %v11677_v42 }
 0x60f   : > { %8470 = vmatpush3.bf16.msra.mxu1 %v9554_v28  ;;  %8445 = vmatprep.mubr.msk.bf16.mxu1 %vm4936_vm1, %v11686_v63 }
 0x610   : > { %8471 = vmatprep.subr.bf16.mxu1 %v9555_v44 }
 0x611   : > { %v8323_v24 = vpop.f32.mrb[36].mxu1 }
 0x612   : > { %v5392_v49 = vpop.f32.mrb[37].mxu1 }
 0x613   : > { %v11828_v14 = vadd.f32 %v5392_v49, %v5207_v46  ;;  %v8324_v1 = vpop.f32.mrb[38].mxu1  ;;  %8472 = vmatpush3.bf16.msra.mxu1 %v9555_v44 }
 0x614   : > { %v5395_v22 = vpop.f32.mrb[39].mxu1  ;;  %8501 = vmatprep.subr.bf16.mxu1 %v9556_v25 }
 0x615   : > { %v11830_v35 = vadd.f32 %v5395_v22, %v5210_v47 }
 0x616   : > { %8446 = vmatmul.mubr.msk.bf16.gmra.mrb[144].mxu1 %vm4936_vm1, %v11688_v43 }
 0x617   : > { %8449 = vmatprep.mubr.msk.bf16.mxu1 %vm4936_vm1, %v11694_v5 }
 0x619   : > { %v8327_v42 = vpop.f32.mrb[40].mxu1 }
 0x61a   : > { %v5406_v63 = vpop.f32.mrb[41].mxu1 }
 0x61b   : > { %v11836_v28 = vadd.f32 %v5406_v63, %v5221_v12  ;;  %v8328_v60 = vpop.f32.mrb[42].mxu1 }
 0x61c   : > { %v5409_v40 = vpop.f32.mrb[43].mxu1 }
 0x61d   : > { %v11838_v46 = vadd.f32 %v5409_v40, %v5224_v50 }
 0x61e   : > { %8450 = vmatmul.mubr.msk.bf16.gmra.mrb[148].mxu1 %vm4936_vm1, %v11696_v10 }
 0x61f   : > { %8453 = vmatprep.mubr.msk.bf16.mxu1 %vm4936_vm1, %v11702_v56 }
 0x621   : > { %v8331_v47 = vpop.f32.mrb[44].mxu1 }
 0x622   : > { %v5420_v45 = vpop.f32.mrb[45].mxu1 }
 0x623   : > { %v11844_v43 = vadd.f32 %v5420_v45, %v5235_v26  ;;  %v8332_v32 = vpop.f32.mrb[46].mxu1 }
 0x624   : > { %v5423_v5 = vpop.f32.mrb[47].mxu1 }
 0x625   : > { %v11846_v37 = vadd.f32 %v5423_v5, %v5238_v16 }
 0x626   : > { %8454 = vmatmul.mubr.msk.bf16.gmra.mrb[152].mxu1 %vm4936_vm1, %v11704_v3 }
 0x627   : > { %8457 = vmatprep.mubr.msk.bf16.mxu1 %vm4936_vm1, %v11710_v62 }
 0x629   : > { %v8335_v12 = vpop.f32.mrb[48].mxu1 }
 0x62a   : > { %v5434_v50 = vpop.f32.mrb[49].mxu1  ;;  %v6467_v12 = vld [vmem:[#allocation3 + $0xf0] sm:$0xff] }
 0x62b   : > { %v11852_v10 = vadd.f32 %v5434_v50, %v5249_v53  ;;  %v8336_v55 = vpop.f32.mrb[50].mxu1  ;;  %v6468_v50 = vld [vmem:[#allocation3 + $0xf8] sm:$0xff] }
 0x62c   : > { %v5437_v56 = vpop.f32.mrb[51].mxu1 }
 0x62d   : > { %v11855_v30 = vadd.f32 %v5437_v56, %v11790_v13  ;;  %v6222_v13 = vld [vmem:[#allocation3 + $0xe2] sm:$0xff] }
 0x62e   : > { %8458 = vmatmul.mubr.msk.bf16.gmra.mrb[156].mxu1 %vm4936_vm1, %v11712_v20  ;;  %v11874_v29 = vpack.c.bf16 %v6223_v7, %v6222_v13  ;;  %v6688_v7 = vld [vmem:[#allocation3 + $0x31] sm:$0xff] }
 0x62f   : > { %8461 = vmatprep.mubr.msk.bf16.mxu1 %vm4936_vm1, %v11718_v36 }
 0x631   : > { %v8339_v26 = vpop.f32.mrb[52].mxu1 }
 0x632   : > { %v5448_v3 = vpop.f32.mrb[53].mxu1  ;;  %v6482_v26 = vpack.c.bf16 %v6468_v50, %v6467_v12 }
 0x633   : > { %v11862_v16 = vadd.f32 %v5448_v3, %v11796_v59  ;;  %v8340_v62 = vpop.f32.mrb[54].mxu1  ;;  %v6686_v3 = vld [vmem:[#allocation3 + $0x21] sm:$0xff] }
 0x634   : > { %v5451_v58 = vpop.f32.mrb[55].mxu1 }
 0x635   : > { %v11865_v53 = vadd.f32 %v5451_v58, %v11798_v11 }
 0x636   : > { %8462 = vmatmul.mubr.msk.bf16.gmra.mrb[160].mxu1 %vm4936_vm1, %v11720_v21 }
 0x637   : > { %8465 = vmatprep.mubr.msk.bf16.mxu1 %vm4936_vm1, %v11726_v17 }
 0x639   : > { %v8347_v20 = vpop.f32.mrb[56].mxu1 }
 0x63a   : > { %v5595_v36 = vpop.f32.mrb[57].mxu1 }
 0x63b   : > { %v11872_v41 = vadd.f32 %v5595_v36, %v11804_v6  ;;  %v8348_v59 = vpop.f32.mrb[58].mxu1 }
 0x63c   : > { %v5598_v27 = vpop.f32.mrb[59].mxu1  ;;  %v6690_v59 = vld [vmem:[#allocation3 + $0x41] sm:$0xff] }
 0x63d   : > { %v11877_v11 = vadd.f32 %v5598_v27, %v11808_v2  ;;  %v9559_v27 = vld [vmem:[%s12228_s5 + $0x88] sm:$0xff]  }
 0x63e   : > { %8466 = vmatmul.mubr.msk.bf16.gmra.mrb[164].mxu1 %vm4936_vm1, %v11874_v29 }
 0x63f   : > { %8473 = vmatprep.mubr.msk.bf16.mxu1 %vm4936_vm1, %v11617_v19  ;;  %v11899_v19 = vld [vmem:[%s12228_s5 + $0x80] sm:$0xff]  }
 0x641   : > { %v8351_v21 = vpop.f32.mrb[60].mxu1 }
 0x642   : > { %v5609_v17 = vpop.f32.mrb[61].mxu1 }
 0x643   : > { %v11884_v54 = vadd.f32 %v5609_v17, %v11814_v38  ;;  %v8352_v6 = vpop.f32.mrb[62].mxu1 }
 0x644   : > { %v5612_v61 = vpop.f32.mrb[63].mxu1 }
 0x645   : > { %v11890_v2 = vadd.f32 %v5612_v61, %v11819_v48  ;;  %v6695_v61 = vld [vmem:[#allocation3 + $0x69] sm:$0xff] }
 0x646   : > { %8474 = vmatmul.mubr.msk.bf16.vlgmr.msra.gmra.mrb[168].mxu1 %vm4936_vm1, %v11627_v8 }
 0x647   : > { %8502 = vmatpush3.bf16.msra.mxu1 %v9556_v25  ;;  %8477 = vmatprep.mubr.msk.bf16.mxu1 %vm4936_vm1, %v11629_v18 }
 0x648   : > { %8503 = vmatprep.subr.bf16.mxu1 %v9557_v51 }
 0x649   : > { %v8355_v38 = vpop.f32.mrb[64].mxu1 }
 0x64a   : > { %v5623_v44 = vpop.f32.mrb[65].mxu1 }
 0x64b   : > { %v11902_v24 = vadd.f32 %v5623_v44, %v11828_v14  ;;  %v8356_v48 = vpop.f32.mrb[66].mxu1  ;;  %8504 = vmatpush3.bf16.msra.mxu1 %v9557_v51  ;;  %v6692_v44 = vld [vmem:[#allocation3 + $0x51] sm:$0xff] }
 0x64c   : > { %v5626_v49 = vpop.f32.mrb[67].mxu1  ;;  %8533 = vmatprep.subr.bf16.mxu1 %v11899_v19 }
 0x64d   : > { %v11906_v8 = vadd.f32 %v5626_v49, %v11830_v35  ;;  %v6694_v49 = vld [vmem:[#allocation3 + $0x61] sm:$0xff] }
 0x64e   : > { %8478 = vmatmul.mubr.msk.bf16.gmra.mrb[172].mxu1 %vm4936_vm1, %v11635_v34 }
 0x64f   : > { %8481 = vmatprep.mubr.msk.bf16.mxu1 %vm4936_vm1, %v11637_v15 }
 0x651   : > { %v8359_v18 = vpop.f32.mrb[68].mxu1 }
 0x652   : > { %v5637_v25 = vpop.f32.mrb[69].mxu1 }
 0x653   : > { %v11913_v1 = vadd.f32 %v5637_v25, %v11836_v28  ;;  %v8360_v14 = vpop.f32.mrb[70].mxu1 }
 0x654   : > { %v5640_v22 = vpop.f32.mrb[71].mxu1  ;;  %v6697_v14 = vld [vmem:[#allocation3 + $0x79] sm:$0xff] }
 0x655   : > { %v11916_v42 = vadd.f32 %v5640_v22, %v11838_v46 }
 0x656   : > { %8482 = vmatmul.mubr.msk.bf16.gmra.mrb[176].mxu1 %vm4936_vm1, %v11643_v0 }
 0x657   : > { %8485 = vmatprep.mubr.msk.bf16.mxu1 %vm4936_vm1, %v11645_v31 }
 0x659   : > { %v8363_v34 = vpop.f32.mrb[72].mxu1 }
 0x65a   : > { %v5651_v35 = vpop.f32.mrb[73].mxu1  ;;  %v6699_v34 = vld [vmem:[#allocation3 + $0x89] sm:$0xff] }
 0x65b   : > { %v11923_v15 = vadd.f32 %v5651_v35, %v11844_v43  ;;  %v8364_v63 = vpop.f32.mrb[74].mxu1 }
 0x65c   : > { %v5654_v60 = vpop.f32.mrb[75].mxu1  ;;  %v6696_v63 = vld [vmem:[#allocation3 + $0x71] sm:$0xff] }
 0x65d   : > { %v11926_v28 = vadd.f32 %v5654_v60, %v11846_v37 }
 0x65e   : > { %8486 = vmatmul.mubr.msk.bf16.gmra.mrb[180].mxu1 %vm4936_vm1, %v11651_v4 }
 0x65f   : > { %8489 = vmatprep.mubr.msk.bf16.mxu1 %vm4936_vm1, %v11653_v9 }
 0x661   : > { %v8367_v0 = vpop.f32.mrb[76].mxu1 }
 0x662   : > { %v5665_v40 = vpop.f32.mrb[77].mxu1  ;;  %v6719_v0 = vpack.c.bf16 %v6697_v14, %v6696_v63  ;;  %v6933_v14 = vld [vmem:[#allocation3 + $0x32] sm:$0xff] }
 0x663   : > { %v11933_v31 = vadd.f32 %v5665_v40, %v11852_v10  ;;  %v8368_v46 = vpop.f32.mrb[78].mxu1  ;;  %v6687_v10 = vld [vmem:[#allocation3 + $0x29] sm:$0xff]  ;;  %v6698_v40 = vld [vmem:[#allocation3 + $0x81] sm:$0xff] }
 0x664   : > { %v5668_v47 = vpop.f32.mrb[79].mxu1  ;;  %v6714_v62 = vpack.c.bf16 %v6687_v10, %v6686_v3  ;;  %v6720_v46 = vpack.c.bf16 %v6699_v34, %v6698_v40  ;;  %v6707_v3 = vld [vmem:[#allocation3 + $0xc9] sm:$0xff] }
 0x665   : > { %v11936_v45 = vadd.f32 %v5668_v47, %v11855_v30  ;;  %v6935_v40 = vld [vmem:[#allocation3 + $0x42] sm:$0xff] }
 0x666   : > { %8490 = vmatmul.mubr.msk.bf16.gmra.mrb[184].mxu1 %vm4936_vm1, %v11659_v23 }
 0x667   : > { %8493 = vmatprep.mubr.msk.bf16.mxu1 %vm4936_vm1, %v11661_v39 }
 0x669   : > { %v8371_v4 = vpop.f32.mrb[80].mxu1 }
 0x66a   : > { %v5679_v43 = vpop.f32.mrb[81].mxu1  ;;  %v6701_v4 = vld [vmem:[#allocation3 + $0x99] sm:$0xff] }
 0x66b   : > { %v11943_v9 = vadd.f32 %v5679_v43, %v11862_v16  ;;  %v8372_v32 = vpop.f32.mrb[82].mxu1 }
 0x66c   : > { %v5682_v5 = vpop.f32.mrb[83].mxu1  ;;  %v6703_v32 = vld [vmem:[#allocation3 + $0xa9] sm:$0xff] }
 0x66d   : > { %v11946_v37 = vadd.f32 %v5682_v5, %v11865_v53  ;;  %v6691_v53 = vld [vmem:[#allocation3 + $0x49] sm:$0xff] }
 0x66e   : > { %8494 = vmatmul.mubr.msk.bf16.gmra.mrb[188].mxu1 %vm4936_vm1, %v11667_v52  ;;  %v6716_v21 = vpack.c.bf16 %v6691_v53, %v6690_v59  ;;  %v6706_v53 = vld [vmem:[#allocation3 + $0xc1] sm:$0xff] }
 0x66f   : > { %8497 = vmatprep.mubr.msk.bf16.mxu1 %vm4936_vm1, %v11762_v33  ;;  %v6689_v33 = vld [vmem:[#allocation3 + $0x39] sm:$0xff] }
 0x671   : > { %v8379_v23 = vpop.f32.mrb[84].mxu1 }
 0x672   : > { %v5840_v39 = vpop.f32.mrb[85].mxu1  ;;  %v6700_v23 = vld [vmem:[#allocation3 + $0x91] sm:$0xff] }
 0x673   : > { %v11953_v55 = vadd.f32 %v5840_v39, %v11872_v41  ;;  %v8380_v56 = vpop.f32.mrb[86].mxu1  ;;  %v6715_v41 = vpack.c.bf16 %v6689_v33, %v6688_v7  ;;  %v6721_v50 = vpack.c.bf16 %v6701_v4, %v6700_v23  ;;  %v6702_v39 = vld [vmem:[#allocation3 + $0xa1] sm:$0xff]  ;;  %v6937_v4 = vld [vmem:[#allocation3 + $0x52] sm:$0xff] }
 0x674   : > { %v5843_v30 = vpop.f32.mrb[87].mxu1  ;;  %v6722_v10 = vpack.c.bf16 %v6703_v32, %v6702_v39  ;;  %v6939_v39 = vld [vmem:[#allocation3 + $0x62] sm:$0xff] }
 0x675   : > { %v11956_v16 = vadd.f32 %v5843_v30, %v11877_v11  ;;  %v6705_v30 = vld [vmem:[#allocation3 + $0xb9] sm:$0xff] }
 0x676   : > { %8498 = vmatmul.mubr.msk.bf16.gmra.mrb[192].mxu1 %vm4936_vm1, %v6482_v26 }
 0x677   : > { %8505 = vmatprep.mubr.msk.bf16.mxu1 %vm4936_vm1, %v6714_v62 }
 0x679   : > { %v8383_v52 = vpop.f32.mrb[88].mxu1 }
 0x67a   : > { %v5854_v58 = vpop.f32.mrb[89].mxu1  ;;  %v6704_v52 = vld [vmem:[#allocation3 + $0xb1] sm:$0xff] }
 0x67b   : > { %v11961_v20 = vadd.f32 %v5854_v58, %v11884_v54  ;;  %v8384_v13 = vpop.f32.mrb[90].mxu1  ;;  %v6693_v54 = vld [vmem:[#allocation3 + $0x59] sm:$0xff]  ;;  %v6723_v58 = vpack.c.bf16 %v6705_v30, %v6704_v52 }
 0x67c   : > { %v5857_v36 = vpop.f32.mrb[91].mxu1  ;;  %v6717_v48 = vpack.c.bf16 %v6693_v54, %v6692_v44  ;;  %v6724_v13 = vpack.c.bf16 %v6707_v3, %v6706_v53  ;;  %v6941_v30 = vld [vmem:[#allocation3 + $0x72] sm:$0xff]  ;;  %v6943_v53 = vld [vmem:[#allocation3 + $0x82] sm:$0xff] }
 0x67d   : > { %v11967_v11 = vadd.f32 %v5857_v36, %v11890_v2  ;;  %v6709_v36 = vld [vmem:[#allocation3 + $0xd9] sm:$0xff] }
 0x67e   : > { %8506 = vmatmul.mubr.msk.bf16.vlgmr.msra.gmra.mrb[196].mxu1 %vm4936_vm1, %v6715_v41 }
 0x67f   : > { %8534 = vmatpush3.bf16.msra.mxu1 %v11899_v19  ;;  %8509 = vmatprep.mubr.msk.bf16.mxu1 %vm4936_vm1, %v6716_v21  ;;  %v6718_v19 = vpack.c.bf16 %v6695_v61, %v6694_v49 }
 0x680   : > { %8535 = vmatprep.subr.bf16.mxu1 %v9559_v27 }
 0x681   : > { %v8387_v17 = vpop.f32.mrb[92].mxu1 }
 0x682   : > { %v5868_v6 = vpop.f32.mrb[93].mxu1 }
 0x683   : > { %v11973_v51 = vadd.f32 %v5868_v6, %v11902_v24  ;;  %v8388_v38 = vpop.f32.mrb[94].mxu1  ;;  %8536 = vmatpush3.bf16.msra.mxu1 %v9559_v27  ;;  %v6708_v27 = vld [vmem:[#allocation3 + $0xd1] sm:$0xff]  ;;  %v6713_v6 = vld [vmem:[#allocation3 + $0xf9] sm:$0xff] }
 0x684   : > { %v5871_v2 = vpop.f32.mrb[95].mxu1  ;;  %v6725_v17 = vpack.c.bf16 %v6709_v36, %v6708_v27  ;;  %v6945_v36 = vld [vmem:[#allocation3 + $0x92] sm:$0xff]  ;;  %v6948_v27 = vld [vmem:[#allocation3 + $0xaa] sm:$0xff] }
 0x685   : > { %v11976_v18 = vadd.f32 %v5871_v2, %v11906_v8  ;;  %v6932_v2 = vld [vmem:[#allocation3 + $0x2a] sm:$0xff] }
 0x686   : > { %8510 = vmatmul.mubr.msk.bf16.gmra.mrb[200].mxu1 %vm4936_vm1, %v6717_v48 }
 0x687   : > { %8513 = vmatprep.mubr.msk.bf16.mxu1 %vm4936_vm1, %v6718_v19  ;;  %v6931_v19 = vld [vmem:[#allocation3 + $0x22] sm:$0xff] }
 0x689   : > { %v8391_v25 = vpop.f32.mrb[96].mxu1 }
 0x68a   : > { %v5882_v22 = vpop.f32.mrb[97].mxu1  ;;  %v6959_v25 = vpack.c.bf16 %v6932_v2, %v6931_v19  ;;  %v6950_v2 = vld [vmem:[#allocation3 + $0xba] sm:$0xff] }
 0x68b   : > { %v11981_v24 = vadd.f32 %v5882_v22, %v11913_v1  ;;  %v8392_v35 = vpop.f32.mrb[98].mxu1  ;;  %v6934_v22 = vld [vmem:[#allocation3 + $0x3a] sm:$0xff] }
 0x68c   : > { %v5885_v60 = vpop.f32.mrb[99].mxu1  ;;  %v6936_v35 = vld [vmem:[#allocation3 + $0x4a] sm:$0xff] }
 0x68d   : > { %v11984_v8 = vadd.f32 %v5885_v60, %v11916_v42 }
 0x68e   : > { %8514 = vmatmul.mubr.msk.bf16.gmra.mrb[204].mxu1 %vm4936_vm1, %v6719_v0  ;;  %v6960_v0 = vpack.c.bf16 %v6934_v22, %v6933_v14  ;;  %v6951_v14 = vld [vmem:[#allocation3 + $0xc2] sm:$0xff] }
 0x68f   : > { %8517 = vmatprep.mubr.msk.bf16.mxu1 %vm4936_vm1, %v6720_v46  ;;  %v6961_v46 = vpack.c.bf16 %v6936_v35, %v6935_v40  ;;  %v6953_v35 = vld [vmem:[#allocation3 + $0xd2] sm:$0xff] }
 0x691   : > { %v8395_v47 = vpop.f32.mrb[100].mxu1 }
 0x692   : > { %v5896_v43 = vpop.f32.mrb[101].mxu1 }
 0x693   : > { %v11989_v1 = vadd.f32 %v5896_v43, %v11923_v15  ;;  %v8396_v5 = vpop.f32.mrb[102].mxu1  ;;  %v6938_v43 = vld [vmem:[#allocation3 + $0x5a] sm:$0xff] }
 0x694   : > { %v5899_v12 = vpop.f32.mrb[103].mxu1  ;;  %v6940_v5 = vld [vmem:[#allocation3 + $0x6a] sm:$0xff] }
 0x695   : > { %v11992_v42 = vadd.f32 %v5899_v12, %v11926_v28 }
 0x696   : > { %8518 = vmatmul.mubr.msk.bf16.gmra.mrb[208].mxu1 %vm4936_vm1, %v6721_v50  ;;  %v6962_v50 = vpack.c.bf16 %v6938_v43, %v6937_v4  ;;  %v6958_v4 = vld [vmem:[#allocation3 + $0xfa] sm:$0xff] }
 0x697   : > { %8521 = vmatprep.mubr.msk.bf16.mxu1 %vm4936_vm1, %v6722_v10  ;;  %v6963_v10 = vpack.c.bf16 %v6940_v5, %v6939_v39 }
 0x699   : > { %v8399_v56 = vpop.f32.mrb[104].mxu1 }
 0x69a   : > { %v5910_v26 = vpop.f32.mrb[105].mxu1 }
 0x69b   : > { %v11997_v15 = vadd.f32 %v5910_v26, %v11933_v31  ;;  %v8400_v62 = vpop.f32.mrb[106].mxu1  ;;  %v6942_v26 = vld [vmem:[#allocation3 + $0x7a] sm:$0xff] }
 0x69c   : > { %v5913_v33 = vpop.f32.mrb[107].mxu1  ;;  %v6944_v62 = vld [vmem:[#allocation3 + $0x8a] sm:$0xff] }
 0x69d   : > { %v12000_v28 = vadd.f32 %v5913_v33, %v11936_v45  ;;  %v6712_v45 = vld [vmem:[#allocation3 + $0xf1] sm:$0xff] }
 0x69e   : > { %8522 = vmatmul.mubr.msk.bf16.gmra.mrb[212].mxu1 %vm4936_vm1, %v6723_v58  ;;  %v6727_v44 = vpack.c.bf16 %v6713_v6, %v6712_v45  ;;  %v6964_v58 = vpack.c.bf16 %v6942_v26, %v6941_v30  ;;  %v6947_v6 = vld [vmem:[#allocation3 + $0xa2] sm:$0xff] }
 0x69f   : > { %8525 = vmatprep.mubr.msk.bf16.mxu1 %vm4936_vm1, %v6724_v13  ;;  %v6965_v13 = vpack.c.bf16 %v6944_v62, %v6943_v53 }
 0x6a1   : > { %v8403_v7 = vpop.f32.mrb[108].mxu1 }
 0x6a2   : > { %v5924_v41 = vpop.f32.mrb[109].mxu1 }
 0x6a3   : > { %v12005_v59 = vadd.f32 %v5924_v41, %v11943_v9  ;;  %v8404_v31 = vpop.f32.mrb[110].mxu1  ;;  %v6946_v41 = vld [vmem:[#allocation3 + $0x9a] sm:$0xff] }
 0x6a4   : > { %v5927_v21 = vpop.f32.mrb[111].mxu1  ;;  %v6966_v45 = vpack.c.bf16 %v6946_v41, %v6945_v36 }
 0x6a5   : > { %v12008_v54 = vadd.f32 %v5927_v21, %v11946_v37 }
 0x6a6   : > { %8526 = vmatmul.mubr.msk.bf16.gmra.mrb[216].mxu1 %vm4936_vm1, %v6725_v17 }
 0x6a7   : > { %8529 = vmatprep.mubr.msk.bf16.mxu1 %vm4936_vm1, %v11806_v57 }
 0x6a9   : > { %v8411_v61 = vpop.f32.mrb[112].mxu1 }
 0x6aa   : > { %v6085_v38 = vpop.f32.mrb[113].mxu1  ;;  %v6967_v61 = vpack.c.bf16 %v6948_v27, %v6947_v6 }
 0x6ab   : > { %v12014_v9 = vadd.f32 %v6085_v38, %v11953_v55  ;;  %v8412_v48 = vpop.f32.mrb[114].mxu1 }
 0x6ac   : > { %v6088_v49 = vpop.f32.mrb[115].mxu1 }
 0x6ad   : > { %v12017_v37 = vadd.f32 %v6088_v49, %v11956_v16  ;;  %v6952_v49 = vld [vmem:[#allocation3 + $0xca] sm:$0xff] }
 0x6ae   : > { %8530 = vmatmul.mubr.msk.bf16.gmra.mrb[220].mxu1 %vm4936_vm1, %v6727_v44  ;;  %v6949_v44 = vld [vmem:[#allocation3 + $0xb2] sm:$0xff] }
 0x6af   : > { %8537 = vmatprep.mubr.msk.bf16.mxu1 %vm4936_vm1, %v6959_v25 }
 0x6b1   : > { %v8415_v57 = vpop.f32.mrb[116].mxu1 }
 0x6b2   : > { %v6099_v34 = vpop.f32.mrb[117].mxu1  ;;  %v6968_v57 = vpack.c.bf16 %v6950_v2, %v6949_v44 }
 0x6b3   : > { %v12022_v63 = vadd.f32 %v6099_v34, %v11961_v20  ;;  %v8416_v55 = vpop.f32.mrb[118].mxu1  ;;  %v6969_v34 = vpack.c.bf16 %v6952_v49, %v6951_v14 }
 0x6b4   : > { %v6102_v60 = vpop.f32.mrb[119].mxu1  ;;  %v6954_v55 = vld [vmem:[#allocation3 + $0xda] sm:$0xff] }
 0x6b5   : > { %v12025_v16 = vadd.f32 %v6102_v60, %v11967_v11 }
 0x6b6   : > { %8538 = vmatmul.mubr.msk.bf16.vlgmr.msra.gmra.mrb[224].mxu1 %vm4936_vm1, %v6960_v0 }
 0x6b7   : > { %8541 = vmatprep.mubr.msk.bf16.mxu1 %vm4936_vm1, %v6961_v46 }
 0x6b9   : > { %v8419_v47 = vpop.f32.mrb[120].mxu1 }
 0x6ba   : > { %v6113_v32 = vpop.f32.mrb[121].mxu1 }
 0x6bb   : > { %v12030_v20 = vadd.f32 %v6113_v32, %v11973_v51  ;;  %v8420_v23 = vpop.f32.mrb[122].mxu1 }
 0x6bc   : > { %v6116_v12 = vpop.f32.mrb[123].mxu1 }
 0x6bd   : > { %v12033_v11 = vadd.f32 %v6116_v12, %v11976_v18 }
 0x6be   : > { %8542 = vmatmul.mubr.msk.bf16.gmra.mrb[228].mxu1 %vm4936_vm1, %v6962_v50 }
 0x6bf   : > { %8545 = vmatprep.mubr.msk.bf16.mxu1 %vm4936_vm1, %v6963_v10 }
 0x6c1   : > { %v8423_v56 = vpop.f32.mrb[124].mxu1 }
 0x6c2   : > { %v6127_v3 = vpop.f32.mrb[125].mxu1 }
 0x6c3   : > { %v12038_v51 = vadd.f32 %v6127_v3, %v11981_v24  ;;  %v8424_v52 = vpop.f32.mrb[126].mxu1 }
 0x6c4   : > { %v6130_v33 = vpop.f32.mrb[127].mxu1 }
 0x6c5   : > { %v12041_v18 = vadd.f32 %v6130_v33, %v11984_v8 }
 0x6c6   : > { %8546 = vmatmul.mubr.msk.bf16.gmra.mrb[232].mxu1 %vm4936_vm1, %v6964_v58 }
 0x6c7   : > { %8549 = vmatprep.mubr.msk.bf16.mxu1 %vm4936_vm1, %v6965_v13 }
 0x6c9   : > { %v8427_v7 = vpop.f32.mrb[128].mxu1 }
 0x6ca   : > { %v6141_v31 = vpop.f32.mrb[129].mxu1 }
 0x6cb   : > { %v12046_v24 = vadd.f32 %v6141_v31, %v11989_v1  ;;  %v8428_v21 = vpop.f32.mrb[130].mxu1 }
 0x6cc   : > { %v6144_v17 = vpop.f32.mrb[131].mxu1 }
 0x6cd   : > { %v6191_v8 = vadd.f32 %v6144_v17, %v11992_v42 }
 0x6ce   : > { %8550 = vmatmul.mubr.msk.bf16.gmra.mrb[236].mxu1 %vm4936_vm1, %v6966_v45 }
 0x6cf   : > { %8553 = vmatprep.mubr.msk.bf16.mxu1 %vm4936_vm1, %v6967_v61 }
 0x6d1   : > { %v8431_v38 = vpop.f32.mrb[132].mxu1 }
 0x6d2   : > { %v6155_v48 = vpop.f32.mrb[133].mxu1 }
 0x6d3   : > { %v6192_v19 = vadd.f32 %v6155_v48, %v11997_v15  ;;  %v8432_v1 = vpop.f32.mrb[134].mxu1  ;;  %v6970_v15 = vpack.c.bf16 %v6954_v55, %v6953_v35 }
 0x6d4   : > { %v6158_v25 = vpop.f32.mrb[135].mxu1 }
 0x6d5   : > { %v6193_v22 = vadd.f32 %v6158_v25, %v12000_v28  ;;  %v6957_v28 = vld [vmem:[#allocation3 + $0xf2] sm:$0xff] }
 0x6d6   : > { %8554 = vmatmul.mubr.msk.bf16.gmra.mrb[240].mxu1 %vm4936_vm1, %v6968_v57  ;;  %v6972_v5 = vpack.c.bf16 %v6958_v4, %v6957_v28 }
 0x6d7   : > { %8557 = vmatprep.mubr.msk.bf16.mxu1 %vm4936_vm1, %v6969_v34 }
 0x6d9   : > { %v8435_v42 = vpop.f32.mrb[136].mxu1 }
 0x6da   : > { %v6169_v60 = vpop.f32.mrb[137].mxu1 }
 0x6db   : > { %v6194_v0 = vadd.f32 %v6169_v60, %v12005_v59  ;;  %v8436_v40 = vpop.f32.mrb[138].mxu1 }
 0x6dc   : > { %v6172_v46 = vpop.f32.mrb[139].mxu1 }
 0x6dd   : > { %v6195_v47 = vadd.f32 %v6172_v46, %v12008_v54 }
 0x6de   : > { %8558 = vmatmul.mubr.msk.bf16.gmra.mrb[244].mxu1 %vm4936_vm1, %v6970_v15 }
 0x6df   : > { %8561 = vmatprep.mubr.msk.bf16.mxu1 %vm4936_vm1, %v11874_v29 }
 0x6e1   : > { %v8443_v43 = vpop.f32.mrb[140].mxu1 }
 0x6e2   : > { %v6330_v32 = vpop.f32.mrb[141].mxu1 }
 0x6e3   : > { %v6427_v23 = vadd.f32 %v6330_v32, %v12014_v9  ;;  %v8444_v12 = vpop.f32.mrb[142].mxu1 }
 0x6e4   : > { %v6333_v50 = vpop.f32.mrb[143].mxu1 }
 0x6e5   : > { %v6428_v59 = vadd.f32 %v6333_v50, %v12017_v37 }
 0x6e6   : > { %8562 = vmatmul.mubr.msk.bf16.gmra.mrb[248].mxu1 %vm4936_vm1, %v6972_v5  ;;  %vm7213_vm1 = vcmask 518146  }
 0x6e9   : > { %v8447_v39 = vpop.f32.mrb[144].mxu1 }
 0x6ea   : > { %v6344_v54 = vpop.f32.mrb[145].mxu1 }
 0x6eb   : > { %v6429_v10 = vadd.f32 %v6344_v54, %v12022_v63  ;;  %v8448_v56 = vpop.f32.mrb[146].mxu1 }
 0x6ec   : > { %v6347_v30 = vpop.f32.mrb[147].mxu1 }
 0x6ed   : > { %v6430_v29 = vadd.f32 %v6347_v30, %v12025_v16 }
 0x6f1   : > { %v8451_v26 = vpop.f32.mrb[148].mxu1 }
 0x6f2   : > { %v6358_v3 = vpop.f32.mrb[149].mxu1 }
 0x6f3   : > { %v6431_v62 = vadd.f32 %v6358_v3, %v12030_v20  ;;  %v8452_v52 = vpop.f32.mrb[150].mxu1 }
 0x6f4   : > { %v6361_v9 = vpop.f32.mrb[151].mxu1 }
 0x6f5   : > { %v6432_v33 = vadd.f32 %v6361_v9, %v12033_v11 }
 0x6f9   : > { %v8455_v58 = vpop.f32.mrb[152].mxu1 }
 0x6fa   : > { %v6372_v37 = vpop.f32.mrb[153].mxu1 }
 0x6fb   : > { %v6433_v53 = vadd.f32 %v6372_v37, %v12038_v51  ;;  %v8456_v13 = vpop.f32.mrb[154].mxu1 }
 0x6fc   : > { %v6375_v7 = vpop.f32.mrb[155].mxu1 }
 0x6fd   : > { %v6434_v63 = vadd.f32 %v6375_v7, %v12041_v18 }
 0x701   : > { %v8459_v36 = vpop.f32.mrb[156].mxu1 }
 0x702   : > { %v6386_v41 = vpop.f32.mrb[157].mxu1 }
 0x703   : > { %v6435_v16 = vadd.f32 %v6386_v41, %v12046_v24  ;;  %v8460_v31 = vpop.f32.mrb[158].mxu1 }
 0x704   : > { %v6389_v27 = vpop.f32.mrb[159].mxu1 }
 0x705   : > { %v6436_v21 = vadd.f32 %v6389_v27, %v6191_v8 }
 0x709   : > { %v8463_v20 = vpop.f32.mrb[160].mxu1 }
 0x70a   : > { %v6400_v17 = vpop.f32.mrb[161].mxu1 }
 0x70b   : > { %v6437_v45 = vadd.f32 %v6400_v17, %v6192_v19  ;;  %v8464_v6 = vpop.f32.mrb[162].mxu1 }
 0x70c   : > { %v6403_v11 = vpop.f32.mrb[163].mxu1 }
 0x70d   : > { %v6438_v61 = vadd.f32 %v6403_v11, %v6193_v22 }
 0x711   : > { %v8467_v38 = vpop.f32.mrb[164].mxu1 }
 0x712   : > { %v6414_v44 = vpop.f32.mrb[165].mxu1 }
 0x713   : > { %v6439_v51 = vadd.f32 %v6414_v44, %v6194_v0  ;;  %v8468_v2 = vpop.f32.mrb[166].mxu1 }
 0x714   : > { %v6417_v48 = vpop.f32.mrb[167].mxu1 }
 0x715   : > { %v6440_v49 = vadd.f32 %v6417_v48, %v6195_v47 }
 0x719   : > { %v8475_v18 = vpop.f32.mrb[168].mxu1 }
 0x71a   : > { %v6575_v1 = vpop.f32.mrb[169].mxu1 }
 0x71b   : > { %v6672_v25 = vadd.f32 %v6575_v1, %v6427_v23  ;;  %v8476_v57 = vpop.f32.mrb[170].mxu1 }
 0x71c   : > { %v6578_v24 = vpop.f32.mrb[171].mxu1 }
 0x71d   : > { %v6673_v14 = vadd.f32 %v6578_v24, %v6428_v59 }
 0x721   : > { %v8479_v34 = vpop.f32.mrb[172].mxu1 }
 0x722   : > { %v6589_v8 = vpop.f32.mrb[173].mxu1 }
 0x723   : > { %v6674_v42 = vadd.f32 %v6589_v8, %v6429_v10  ;;  %v8480_v35 = vpop.f32.mrb[174].mxu1 }
 0x724   : > { %v6592_v19 = vpop.f32.mrb[175].mxu1 }
 0x725   : > { %v6675_v55 = vadd.f32 %v6592_v19, %v6430_v29 }
 0x729   : > { %v8483_v60 = vpop.f32.mrb[176].mxu1 }
 0x72a   : > { %v6603_v22 = vpop.f32.mrb[177].mxu1 }
 0x72b   : > { %v6676_v40 = vadd.f32 %v6603_v22, %v6431_v62  ;;  %v8484_v46 = vpop.f32.mrb[178].mxu1 }
 0x72c   : > { %v6606_v0 = vpop.f32.mrb[179].mxu1 }
 0x72d   : > { %v6677_v15 = vadd.f32 %v6606_v0, %v6432_v33 }
 0x731   : > { %v8487_v28 = vpop.f32.mrb[180].mxu1 }
 0x732   : > { %v6617_v47 = vpop.f32.mrb[181].mxu1 }
 0x733   : > { %v6678_v4 = vadd.f32 %v6617_v47, %v6433_v53  ;;  %v8488_v43 = vpop.f32.mrb[182].mxu1 }
 0x734   : > { %v6620_v32 = vpop.f32.mrb[183].mxu1 }
 0x735   : > { %v6679_v5 = vadd.f32 %v6620_v32, %v6434_v63  ;;  %v12091_v32 = vld [vmem:[#allocation9] ss:$0 sm:$0xff] }
 0x739   : > { %v8491_v23 = vpop.f32.mrb[184].mxu1 }
 0x73a   : > { %v6631_v12 = vpop.f32.mrb[185].mxu1 }
 0x73b   : > { %v6680_v50 = vadd.f32 %v6631_v12, %v6435_v16  ;;  %v8492_v59 = vpop.f32.mrb[186].mxu1 }
 0x73c   : > { %v6634_v39 = vpop.f32.mrb[187].mxu1 }
 0x73d   : > { %v6681_v54 = vadd.f32 %v6634_v39, %v6436_v21 }
 0x741   : > { %v8495_v10 = vpop.f32.mrb[188].mxu1 }
 0x742   : > { %v6645_v56 = vpop.f32.mrb[189].mxu1 }
 0x743   : > { %v6682_v30 = vadd.f32 %v6645_v56, %v6437_v45  ;;  %v8496_v29 = vpop.f32.mrb[190].mxu1 }
 0x744   : > { %v6648_v26 = vpop.f32.mrb[191].mxu1 }
 0x745   : > { %v6683_v3 = vadd.f32 %v6648_v26, %v6438_v61 }
 0x749   : > { %v8499_v62 = vpop.f32.mrb[192].mxu1 }
 0x74a   : > { %v6659_v52 = vpop.f32.mrb[193].mxu1 }
 0x74b   : > { %v6684_v9 = vadd.f32 %v6659_v52, %v6439_v51  ;;  %v8500_v33 = vpop.f32.mrb[194].mxu1 }
 0x74c   : > { %v6662_v58 = vpop.f32.mrb[195].mxu1 }
 0x74d   : > { %v6685_v37 = vadd.f32 %v6662_v58, %v6440_v49 }
 0x751   : > { %v8507_v53 = vpop.f32.mrb[196].mxu1 }
 0x752   : > { %v6820_v13 = vpop.f32.mrb[197].mxu1 }
 0x753   : > { %v6917_v7 = vadd.f32 %v6820_v13, %v6672_v25  ;;  %v8508_v63 = vpop.f32.mrb[198].mxu1 }
 0x754   : > { %v6823_v36 = vpop.f32.mrb[199].mxu1 }
 0x755   : > { %v6918_v41 = vadd.f32 %v6823_v36, %v6673_v14 }
 0x759   : > { %v8511_v16 = vpop.f32.mrb[200].mxu1 }
 0x75a   : > { %v6834_v31 = vpop.f32.mrb[201].mxu1 }
 0x75b   : > { %v6919_v27 = vadd.f32 %v6834_v31, %v6674_v42  ;;  %v8512_v21 = vpop.f32.mrb[202].mxu1 }
 0x75c   : > { %v6837_v20 = vpop.f32.mrb[203].mxu1 }
 0x75d   : > { %v6920_v17 = vadd.f32 %v6837_v20, %v6675_v55 }
 0x761   : > { %v8515_v45 = vpop.f32.mrb[204].mxu1 }
 0x762   : > { %v6848_v6 = vpop.f32.mrb[205].mxu1 }
 0x763   : > { %v12070_v11 = vadd.f32 %v6848_v6, %v6676_v40  ;;  %v8516_v61 = vpop.f32.mrb[206].mxu1 }
 0x764   : > { %v6851_v38 = vpop.f32.mrb[207].mxu1 }
 0x765   : > { %v12072_v44 = vadd.f32 %v6851_v38, %v6677_v15 }
 0x769   : > { %v8519_v51 = vpop.f32.mrb[208].mxu1 }
 0x76a   : > { %v6862_v2 = vpop.f32.mrb[209].mxu1 }
 0x76b   : > { %v12074_v48 = vadd.f32 %v6862_v2, %v6678_v4  ;;  %v8520_v49 = vpop.f32.mrb[210].mxu1 }
 0x76c   : > { %v6865_v18 = vpop.f32.mrb[211].mxu1 }
 0x76d   : > { %v12076_v1 = vadd.f32 %v6865_v18, %v6679_v5 }
 0x771   : > { %v8523_v25 = vpop.f32.mrb[212].mxu1 }
 0x772   : > { %v6876_v57 = vpop.f32.mrb[213].mxu1 }
 0x773   : > { %v12078_v24 = vadd.f32 %v6876_v57, %v6680_v50  ;;  %v8524_v14 = vpop.f32.mrb[214].mxu1 }
 0x774   : > { %v6879_v34 = vpop.f32.mrb[215].mxu1 }
 0x775   : > { %v12080_v8 = vadd.f32 %v6879_v34, %v6681_v54 }
 0x779   : > { %v8527_v42 = vpop.f32.mrb[216].mxu1 }
 0x77a   : > { %v6890_v35 = vpop.f32.mrb[217].mxu1 }
 0x77b   : > { %v12082_v19 = vadd.f32 %v6890_v35, %v6682_v30  ;;  %v8528_v55 = vpop.f32.mrb[218].mxu1 }
 0x77c   : > { %v6893_v60 = vpop.f32.mrb[219].mxu1 }
 0x77d   : > { %v12084_v22 = vadd.f32 %v6893_v60, %v6683_v3 }
 0x781   : > { %v8531_v40 = vpop.f32.mrb[220].mxu1 }
 0x782   : > { %v6904_v46 = vpop.f32.mrb[221].mxu1 }
 0x783   : > { %v12086_v0 = vadd.f32 %v6904_v46, %v6684_v9  ;;  %v8532_v15 = vpop.f32.mrb[222].mxu1 }
 0x784   : > { %v6907_v28 = vpop.f32.mrb[223].mxu1 }
 0x785   : > { %v12088_v47 = vadd.f32 %v6907_v28, %v6685_v37 }
 0x789   : > { %v8539_v4 = vpop.f32.mrb[224].mxu1 }
 0x78a   : > { %v7065_v43 = vpop.f32.mrb[225].mxu1 }
 0x78b   : > { %v7162_v5 = vadd.f32 %v7065_v43, %v6917_v7  ;;  %v8540_v23 = vpop.f32.mrb[226].mxu1 }
 0x78c   : > { %v7068_v12 = vpop.f32.mrb[227].mxu1 }
 0x78d   : > { %v7183_v50 = vadd.f32 %v12091_v32, %v7162_v5  ;;  %v7163_v59 = vadd.f32 %v7068_v12, %v6918_v41 }
 0x78f   : > { %v7197_v39 = vmax.f32 %v7183_v50, 0.0  ;;  %v7184_v54 = vadd.f32 %v12091_v32, %v7163_v59 }
 0x791   : > { %7212 = vst.msk [vmem:[%s12097_s29] sm:$0x1] %vm7211_vm0, %v7197_v39  ;;  %v7198_v10 = vmax.f32 %v7184_v54, 0.0  ;;  %v8543_v56 = vpop.f32.mrb[228].mxu1 }
 0x792   : > { %7214 = vst.msk [vmem:[%s12097_s29 - $0x1] sm:$0x4] %vm7213_vm1, %v7197_v39  ;;  %v7079_v30 = vpop.f32.mrb[229].mxu1 }
 0x793   : > { %7216 = vst.msk [vmem:[%s12097_s29 - $0x2] sm:$0x10] %vm7215_vm2, %v7197_v39  ;;  %7221 = vst.msk [vmem:[%s12097_s29 + $0x2] sm:$0x10] %vm7215_vm2, %v7198_v10  ;;  %v7164_v29 = vadd.f32 %v7079_v30, %v6919_v27  ;;  %v8544_v26 = vpop.f32.mrb[230].mxu1 }
 0x794   : > { %7218 = vst.msk [vmem:[%s12097_s29 - $0x3] sm:$0x40] %vm7217_vm3, %v7197_v39  ;;  %v7082_v3 = vpop.f32.mrb[231].mxu1 }
 0x795   : > { %7219 = vst.msk [vmem:[%s12097_s29 + $0x4] sm:$0x1] %vm7211_vm0, %v7198_v10  ;;  %v7185_v62 = vadd.f32 %v12091_v32, %v7164_v29  ;;  %v7165_v52 = vadd.f32 %v7082_v3, %v6920_v17 }
 0x796   : > { %7220 = vst.msk [vmem:[%s12097_s29 + $0x3] sm:$0x4] %vm7213_vm1, %v7198_v10 }
 0x797   : > { %v7199_v9 = vmax.f32 %v7185_v62, 0.0  ;;  %v7186_v33 = vadd.f32 %v12091_v32, %v7165_v52 }
 0x799   : > { %7222 = vst.msk [vmem:[%s12097_s29 + $0x7] sm:$0x1] %vm7211_vm0, %v7199_v9  ;;  %v7200_v58 = vmax.f32 %v7186_v33, 0.0  ;;  %v8547_v37 = vpop.f32.mrb[232].mxu1 }
 0x79a   : > { %7223 = vst.msk [vmem:[%s12097_s29 + $0x6] sm:$0x4] %vm7213_vm1, %v7199_v9  ;;  %v7093_v53 = vpop.f32.mrb[233].mxu1 }
 0x79b   : > { %7224 = vst.msk [vmem:[%s12097_s29 + $0x5] sm:$0x10] %vm7215_vm2, %v7199_v9  ;;  %7228 = vst.msk [vmem:[%s12097_s29 + $0x9] sm:$0x10] %vm7215_vm2, %v7200_v58  ;;  %v7166_v13 = vadd.f32 %v7093_v53, %v12070_v11  ;;  %v8548_v7 = vpop.f32.mrb[234].mxu1 }
 0x79c   : > { %7225 = vst.msk [vmem:[%s12097_s29 + $0x4] sm:$0x40] %vm7217_vm3, %v7199_v9  ;;  %v7096_v63 = vpop.f32.mrb[235].mxu1 }
 0x79d   : > { %7226 = vst.msk [vmem:[%s12097_s29 + $0xb] sm:$0x1] %vm7211_vm0, %v7200_v58  ;;  %v7187_v36 = vadd.f32 %v12091_v32, %v7166_v13  ;;  %v7167_v41 = vadd.f32 %v7096_v63, %v12072_v44 }
 0x79e   : > { %7227 = vst.msk [vmem:[%s12097_s29 + $0xa] sm:$0x4] %vm7213_vm1, %v7200_v58 }
 0x79f   : > { %v7201_v16 = vmax.f32 %v7187_v36, 0.0  ;;  %v7188_v31 = vadd.f32 %v12091_v32, %v7167_v41 }
 0x7a1   : > { %7229 = vst.msk [vmem:[%s12097_s29 + $0xe] sm:$0x1] %vm7211_vm0, %v7201_v16  ;;  %v7202_v27 = vmax.f32 %v7188_v31, 0.0  ;;  %v8551_v21 = vpop.f32.mrb[236].mxu1 }
 0x7a2   : > { %7230 = vst.msk [vmem:[%s12097_s29 + $0xd] sm:$0x4] %vm7213_vm1, %v7201_v16  ;;  %v7107_v20 = vpop.f32.mrb[237].mxu1 }
 0x7a3   : > { %7231 = vst.msk [vmem:[%s12097_s29 + $0xc] sm:$0x10] %vm7215_vm2, %v7201_v16  ;;  %7235 = vst.msk [vmem:[%s12097_s29 + $0x10] sm:$0x10] %vm7215_vm2, %v7202_v27  ;;  %v7168_v17 = vadd.f32 %v7107_v20, %v12074_v48  ;;  %v8552_v45 = vpop.f32.mrb[238].mxu1 }
 0x7a4   : > { %7232 = vst.msk [vmem:[%s12097_s29 + $0xb] sm:$0x40] %vm7217_vm3, %v7201_v16  ;;  %v7110_v6 = vpop.f32.mrb[239].mxu1 }
 0x7a5   : > { %7233 = vst.msk [vmem:[%s12097_s29 + $0x12] sm:$0x1] %vm7211_vm0, %v7202_v27  ;;  %v7189_v11 = vadd.f32 %v12091_v32, %v7168_v17  ;;  %v7169_v61 = vadd.f32 %v7110_v6, %v12076_v1 }
 0x7a6   : > { %7234 = vst.msk [vmem:[%s12097_s29 + $0x11] sm:$0x4] %vm7213_vm1, %v7202_v27 }
 0x7a7   : > { %v7203_v38 = vmax.f32 %v7189_v11, 0.0  ;;  %v7190_v44 = vadd.f32 %v12091_v32, %v7169_v61 }
 0x7a9   : > { %7236 = vst.msk [vmem:[%s12097_s29 + $0x15] sm:$0x1] %vm7211_vm0, %v7203_v38  ;;  %v7204_v51 = vmax.f32 %v7190_v44, 0.0  ;;  %v8555_v2 = vpop.f32.mrb[240].mxu1 }
 0x7aa   : > { %7237 = vst.msk [vmem:[%s12097_s29 + $0x14] sm:$0x4] %vm7213_vm1, %v7203_v38  ;;  %v7121_v48 = vpop.f32.mrb[241].mxu1 }
 0x7ab   : > { %7238 = vst.msk [vmem:[%s12097_s29 + $0x13] sm:$0x10] %vm7215_vm2, %v7203_v38  ;;  %7242 = vst.msk [vmem:[%s12097_s29 + $0x17] sm:$0x10] %vm7215_vm2, %v7204_v51  ;;  %v7170_v49 = vadd.f32 %v7121_v48, %v12078_v24  ;;  %v8556_v18 = vpop.f32.mrb[242].mxu1 }
 0x7ac   : > { %7239 = vst.msk [vmem:[%s12097_s29 + $0x12] sm:$0x40] %vm7217_vm3, %v7203_v38  ;;  %v7124_v1 = vpop.f32.mrb[243].mxu1 }
 0x7ad   : > { %7240 = vst.msk [vmem:[%s12097_s29 + $0x19] sm:$0x1] %vm7211_vm0, %v7204_v51  ;;  %v7191_v25 = vadd.f32 %v12091_v32, %v7170_v49  ;;  %v7171_v57 = vadd.f32 %v7124_v1, %v12080_v8 }
 0x7ae   : > { %7241 = vst.msk [vmem:[%s12097_s29 + $0x18] sm:$0x4] %vm7213_vm1, %v7204_v51 }
 0x7af   : > { %v7205_v14 = vmax.f32 %v7191_v25, 0.0  ;;  %v7192_v34 = vadd.f32 %v12091_v32, %v7171_v57 }
 0x7b1   : > { %7243 = vst.msk [vmem:[%s12097_s29 + $0x1c] sm:$0x1] %vm7211_vm0, %v7205_v14  ;;  %v7206_v24 = vmax.f32 %v7192_v34, 0.0  ;;  %v8559_v42 = vpop.f32.mrb[244].mxu1 }
 0x7b2   : > { %7244 = vst.msk [vmem:[%s12097_s29 + $0x1b] sm:$0x4] %vm7213_vm1, %v7205_v14  ;;  %v7135_v35 = vpop.f32.mrb[245].mxu1 }
 0x7b3   : > { %7245 = vst.msk [vmem:[%s12097_s29 + $0x1a] sm:$0x10] %vm7215_vm2, %v7205_v14  ;;  %7249 = vst.msk [vmem:[%s12097_s29 + $0x1e] sm:$0x10] %vm7215_vm2, %v7206_v24  ;;  %v7172_v8 = vadd.f32 %v7135_v35, %v12082_v19  ;;  %v8560_v55 = vpop.f32.mrb[246].mxu1 }
 0x7b4   : > { %7246 = vst.msk [vmem:[%s12097_s29 + $0x19] sm:$0x40] %vm7217_vm3, %v7205_v14  ;;  %v7138_v60 = vpop.f32.mrb[247].mxu1 }
 0x7b5   : > { %7247 = vst.msk [vmem:[%s12097_s29 + $0x20] sm:$0x1] %vm7211_vm0, %v7206_v24  ;;  %v7193_v40 = vadd.f32 %v12091_v32, %v7172_v8  ;;  %v7173_v46 = vadd.f32 %v7138_v60, %v12084_v22 }
 0x7b6   : > { %7248 = vst.msk [vmem:[%s12097_s29 + $0x1f] sm:$0x4] %vm7213_vm1, %v7206_v24 }
 0x7b7   : > { %v7207_v15 = vmax.f32 %v7193_v40, 0.0  ;;  %v7194_v28 = vadd.f32 %v12091_v32, %v7173_v46 }
 0x7b9   : > { %7250 = vst.msk [vmem:[%s12097_s29 + $0x23] sm:$0x1] %vm7211_vm0, %v7207_v15  ;;  %v7208_v19 = vmax.f32 %v7194_v28, 0.0  ;;  %v8563_v4 = vpop.f32.mrb[248].mxu1 }
 0x7ba   : > { %7251 = vst.msk [vmem:[%s12097_s29 + $0x22] sm:$0x4] %vm7213_vm1, %v7207_v15  ;;  %v7149_v43 = vpop.f32.mrb[249].mxu1 }
 0x7bb   : > { %7252 = vst.msk [vmem:[%s12097_s29 + $0x21] sm:$0x10] %vm7215_vm2, %v7207_v15  ;;  %7256 = vst.msk [vmem:[%s12097_s29 + $0x25] sm:$0x10] %vm7215_vm2, %v7208_v19  ;;  %v7174_v22 = vadd.f32 %v7149_v43, %v12086_v0  ;;  %v8564_v5 = vpop.f32.mrb[250].mxu1 }
 0x7bc   : > { %7253 = vst.msk [vmem:[%s12097_s29 + $0x20] sm:$0x40] %vm7217_vm3, %v7207_v15  ;;  %v7152_v23 = vpop.f32.mrb[251].mxu1 }
 0x7bd   : > { %7254 = vst.msk [vmem:[%s12097_s29 + $0x27] sm:$0x1] %vm7211_vm0, %v7208_v19  ;;  %v7195_v12 = vadd.f32 %v12091_v32, %v7174_v22  ;;  %v7175_v50 = vadd.f32 %v7152_v23, %v12088_v47 }
 0x7be   : > { %7255 = vst.msk [vmem:[%s12097_s29 + $0x26] sm:$0x4] %vm7213_vm1, %v7208_v19 }
 0x7bf   : > { %v7209_v59 = vmax.f32 %v7195_v12, 0.0  ;;  %v7196_v39 = vadd.f32 %v12091_v32, %v7175_v50 }
 0x7c1   : > { %7257 = vst.msk [vmem:[%s12097_s29 + $0x2a] sm:$0x1] %vm7211_vm0, %v7209_v59  ;;  %v7210_v54 = vmax.f32 %v7196_v39, 0.0 }
 0x7c2   : > { %7258 = vst.msk [vmem:[%s12097_s29 + $0x29] sm:$0x4] %vm7213_vm1, %v7209_v59 }
 0x7c3   : > { %7259 = vst.msk [vmem:[%s12097_s29 + $0x28] sm:$0x10] %vm7215_vm2, %v7209_v59  ;;  %7263 = vst.msk [vmem:[%s12097_s29 + $0x2c] sm:$0x10] %vm7215_vm2, %v7210_v54 }
 0x7c4   : > { %7260 = vst.msk [vmem:[%s12097_s29 + $0x27] sm:$0x40] %vm7217_vm3, %v7209_v59 }
 0x7c5   : > { %7261 = vst.msk [vmem:[%s12097_s29 + $0x2e] sm:$0x1] %vm7211_vm0, %v7210_v54 }
 0x7c6   : > { %7262 = vst.msk [vmem:[%s12097_s29 + $0x2d] sm:$0x4] %vm7213_vm1, %v7210_v54 }
 0x7c7 PF: > { %s20_s24 = sadd.s32 1, %s9692_s24  }
 0x7c8   : > { %p17_p6 = scmp.ge.s32.totalorder %s20_s24, 4  }
 0x7ca   :  { %19 = sbr.rel (!%p17_p6) target bundleno = 3 (0x3), region = 95 }
 0x7d1   :  { %7285 = vsyncpa [#allocation5], 1 }
 0x7d2   :  { %7287 = vsyncpa [#allocation5 + $0x1], 1 }
 0x7d3   :  { %7288 = vsyncpa [#allocation7], 1 }
 0x7d4   :  { %7289 = vsyncpa [#allocation10], 1 }

</bundles_post_ra>
